<compile_context>
chip_gen: v5e
topology: v5e:2x2
jax: 0.10.0
libtpu: 0.0.40
codegen_flags: <defaults>
</compile_context>

<pallas_src>
import functools

import jax
import jax.numpy as jnp
import numpy as np
from jax.experimental import pallas as pl
from jax.experimental.pallas import tpu as pltpu

# ----- geometry of the per-image flat row space (row r = 32*h + w) ------------------
_W = 32          # image width == pitch of the conv1 row space
_CIN = 8         # input channels padded 3 -> 8
_C1 = 8          # conv1 out-channels padded 6 -> 8
_C2 = 16         # conv2 out-channels
_FP = 128        # lane padding of the fully-connected head
_XFR = 1028      # padded flat input rows per image (1024 valid + 4 for kw widening)
_XWR = 1024      # kw-widened input rows per image (lanes = 8*kw + c, 40 lanes)
_R1 = 896        # conv1 rows computed (valid rows 32h+w, h,w < 28)
_CH1 = 128       # conv1 accumulation chunk (rows)  -> 16-vreg accumulator
_P1R = 232       # compacted pool1 rows (valid rows 16i+j, i,j < 14)
_R2 = 160        # conv2 rows computed (valid rows 16i+j, i,j < 10)

# ----- static invariants: every scratch row that is read has been written -----------
assert _XFR >= _W * _W + 4                    # wrapper widening stays inside padded x
assert _R1 % _CH1 == 0
assert _R1 + 4 * _W <= _XWR                   # conv1 tap reads stay inside widened input
assert 32 * 27 + 27 < _R1                     # every valid conv1 row is computed
assert 64 * 13 + 2 * 15 + 33 < _R1            # pool1 reads stay inside y1
assert 16 * 13 + 13 < 16 * 14                 # every valid pool1 row is written
assert 16 * 14 + 8 == _P1R                    # pool1 writes + zero tail cover p1
assert 16 * 4 + 4 + _R2 <= _P1R               # conv2 tap reads stay inside p1
assert 16 * 9 + 9 < _R2                       # every valid conv2 row is computed
assert 32 * 4 + 2 * 4 + 17 < _R2              # pool2 reads stay inside y2
assert 24 + 32 * 7 < 8 * 32                   # fc1 gather stays inside p2a


def _covnet_kernel(xw_ref, cw1_ref, cb1_ref, cw2_ref, cb2_ref,
                   w1_ref, b1_ref, w2_ref, b2_ref, w3_ref, b3_ref,
                   o_ref, y1_ref, p1_ref, y2_ref, p2a_ref, *, batch):
    f32 = jnp.float32
    cb1 = cb1_ref[...]                                   # (1, 8)
    cb2 = cb2_ref[...]                                   # (1, 16)

    # FC-input rows of images >= batch (and unused tail positions) stay zero.
    p2a_ref[...] = jnp.zeros((8 * 32, _C2), f32)

    for b in range(batch):
        x0 = b * _XWR                                    # this image's rows in xw

        # ---- conv1 (5x5, 3->6): 128-row chunks, 5 aligned K=40 MXU matmuls each ----
        for blk in range(_R1 // _CH1):
            base = blk * _CH1
            acc = jnp.zeros((_CH1, _C1), f32)
            for kh in range(5):
                acc = acc + jnp.dot(
                    xw_ref[pl.ds(x0 + base + 32 * kh, _CH1), :],   # 8-aligned slice
                    cw1_ref[kh], preferred_element_type=f32)
            y1_ref[pl.ds(base, _CH1), :] = jnp.maximum(acc + cb1, 0.0)

        # ---- maxpool1 2x2/2, compacted to a dense pitch-16 row space ----------------
        # p1[16*i + j] = max(y1[64i+2j], y1[64i+2j+1], y1[64i+2j+32], y1[64i+2j+33])
        for i in range(14):
            m = jnp.maximum(
                jnp.maximum(y1_ref[pl.ds(64 * i, 16, stride=2), :],
                            y1_ref[pl.ds(64 * i + 1, 16, stride=2), :]),
                jnp.maximum(y1_ref[pl.ds(64 * i + 32, 16, stride=2), :],
                            y1_ref[pl.ds(64 * i + 33, 16, stride=2), :]))
            p1_ref[pl.ds(16 * i, 16), :] = m
        p1_ref[pl.ds(224, _P1R - 224), :] = jnp.zeros((_P1R - 224, _C1), f32)

        # ---- conv2 (5x5, 6->16): single 160-row chunk, register-resident acc --------
        acc2 = jnp.zeros((_R2, _C2), f32)
        for kh in range(5):
            cw2k = cw2_ref[kh]                           # (5, 8, 16)
            for kw in range(5):
                acc2 = acc2 + jnp.dot(
                    p1_ref[pl.ds(16 * kh + kw, _R2), :],
                    cw2k[kw], preferred_element_type=f32)
        y2_ref[...] = jnp.maximum(acc2 + cb2, 0.0)

        # ---- maxpool2 2x2/2 + gather the 25 valid positions (p = 5a + b') ----------
        for a in range(5):
            m = jnp.maximum(
                jnp.maximum(y2_ref[pl.ds(32 * a, 5, stride=2), :],
                            y2_ref[pl.ds(32 * a + 1, 5, stride=2), :]),
                jnp.maximum(y2_ref[pl.ds(32 * a + 16, 5, stride=2), :],
                            y2_ref[pl.ds(32 * a + 17, 5, stride=2), :]))
            p2a_ref[pl.ds(32 * b + 5 * a, 5), :] = m     # image b -> rows [32b, 32b+25)

    # ---- FC head once per grid step at M = 8 (row k = image k of this step) --------
    h = jnp.zeros((8, _FP), jnp.float32)
    for p in range(25):
        rows = p2a_ref[pl.ds(p, 8, stride=32), :]        # (8, 16): all rows useful
        h = h + jnp.dot(rows, w1_ref[p], preferred_element_type=jnp.float32)
    h = jnp.maximum(h + b1_ref[...], 0.0)
    h = jnp.maximum(jnp.dot(h, w2_ref[...], preferred_element_type=jnp.float32)
                    + b2_ref[...], 0.0)
    o_ref[...] = jnp.dot(h, w3_ref[...], preferred_element_type=jnp.float32) + b3_ref[...]


@jax.jit
def covnet_forward(x_nchw, params):
    n = x_nchw.shape[0]
    # Images per grid step; keep >= 2 grid steps when possible so v7x's two
    # TensorCores both get work under dimension_semantics=("parallel",).
    B = max(d for d in (8, 4, 2, 1) if n % d == 0)
    if n // B == 1 and B > 1:
        B //= 2
    steps = n // B

    # Input -> flat row space (row = 32h + w, channels padded 3->8), then pre-widen the
    # 5 kw taps along lanes (layout plumbing only): xw[img, r, 8*kw + c] = x[img, r+kw, c].
    xr = jnp.transpose(x_nchw, (0, 2, 3, 1)).reshape(n, _W * _W, 3)
    xr = jnp.pad(xr, ((0, 0), (0, _XFR - _W * _W), (0, _CIN - 3)))
    xw = jnp.concatenate([xr[:, kw:kw + _XWR, :] for kw in range(5)], axis=2)
    xw = xw.reshape(steps, B * _XWR, 5 * _CIN)

    # conv1 weights grouped along K = (kw, cin): (5, 40, 8); padded lanes are zero.
    cw1 = jnp.transpose(params["conv1_w"], (2, 3, 1, 0))              # (5,5,3,6)
    cw1 = jnp.pad(cw1, ((0, 0), (0, 0), (0, _CIN - 3), (0, _C1 - 6))).reshape(5, 5 * _CIN, _C1)
    cb1 = jnp.pad(params["conv1_b"], (0, _C1 - 6)).reshape(1, _C1)

    # conv2 weights per tap: (5, 5, 8, 16)
    cw2 = jnp.transpose(params["conv2_w"], (2, 3, 1, 0))              # (5,5,6,16)
    cw2 = jnp.pad(cw2, ((0, 0), (0, 0), (0, _C1 - 6), (0, 0)))
    cb2 = params["conv2_b"].reshape(1, _C2)

    # fc1 weights regrouped per spatial position p = 5a + b (PyTorch flatten = c*25 + p).
    w1 = jnp.transpose(params["fc1_w"].reshape(120, _C2, 25), (2, 1, 0))   # (25, 16, 120)
    w1 = jnp.pad(w1, ((0, 0), (0, 0), (0, _FP - 120)))
    b1 = jnp.pad(params["fc1_b"], (0, _FP - 120)).reshape(1, _FP)
    w2 = jnp.pad(params["fc2_w"].T, ((0, _FP - 120), (0, _FP - 84)))
    b2 = jnp.pad(params["fc2_b"], (0, _FP - 84)).reshape(1, _FP)
    w3 = jnp.pad(params["fc3_w"].T, ((0, _FP - 84), (0, _FP - 10)))
    b3 = jnp.pad(params["fc3_b"], (0, _FP - 10)).reshape(1, _FP)

    def const_spec(a):
        shp = a.shape
        return pl.BlockSpec(shp, lambda s: (0,) * len(shp))

    out = pl.pallas_call(
        functools.partial(_covnet_kernel, batch=B),
        out_shape=jax.ShapeDtypeStruct((steps, 8, _FP), jnp.float32),
        grid=(steps,),
        in_specs=[
            pl.BlockSpec((None, B * _XWR, 5 * _CIN), lambda s: (s, 0, 0)),  # B images/step
            const_spec(cw1), const_spec(cb1), const_spec(cw2), const_spec(cb2),
            const_spec(w1), const_spec(b1), const_spec(w2), const_spec(b2),
            const_spec(w3), const_spec(b3),
        ],
        out_specs=pl.BlockSpec((None, 8, _FP), lambda s: (s, 0, 0)),
        scratch_shapes=[
            pltpu.VMEM((_R1, _C1), jnp.float32),      # y1: conv1 + relu
            pltpu.VMEM((_P1R, _C1), jnp.float32),     # p1: compacted pool1 (pitch 16)
            pltpu.VMEM((_R2, _C2), jnp.float32),      # y2: conv2 + relu (pitch 16)
            pltpu.VMEM((8 * 32, _C2), jnp.float32),   # p2a: FC1 input tile, rows 32b+p
        ],
        compiler_params=pltpu.CompilerParams(dimension_semantics=("parallel",)),
    )(xw, cw1, cb1, cw2, cb2, w1, b1, w2, b2, w3, b3)

    return out[:, :B, :10].reshape(n, 10)   # drop FC lane padding / unused image rows


def init_params(key):
    """Deterministic synthetic params; PyTorch shapes: conv (O,I,KH,KW), fc (out,in)."""
    def u(k, shape, fan_in):
        bound = 1.0 / np.sqrt(fan_in)
        return jax.random.uniform(k, shape, jnp.float32, -bound, bound)

    ks = jax.random.split(key, 10)
    return {
        "conv1_w": u(ks[0], (6, 3, 5, 5), 3 * 5 * 5),
        "conv1_b": u(ks[1], (6,), 3 * 5 * 5),
        "conv2_w": u(ks[2], (16, 6, 5, 5), 6 * 5 * 5),
        "conv2_b": u(ks[3], (16,), 6 * 5 * 5),
        "fc1_w": u(ks[4], (120, 400), 400),
        "fc1_b": u(ks[5], (120,), 400),
        "fc2_w": u(ks[6], (84, 120), 120),
        "fc2_b": u(ks[7], (84,), 120),
        "fc3_w": u(ks[8], (10, 84), 84),
        "fc3_b": u(ks[9], (10,), 84),
    }


def covnet_reference(x_nchw, params):
    """Pure-JAX reference matching the PyTorch module semantics."""
    hi = jax.lax.Precision.HIGHEST

    def conv(x, w, b):
        y = jax.lax.conv_general_dilated(
            x, w, window_strides=(1, 1), padding="VALID",
            dimension_numbers=("NCHW", "OIHW", "NCHW"), precision=hi)
        return y + b.reshape(1, -1, 1, 1)

    def pool(x):
        return jax.lax.reduce_window(
            x, -jnp.inf, jax.lax.max,
            window_dimensions=(1, 1, 2, 2), window_strides=(1, 1, 2, 2),
            padding="VALID")

    x = pool(jax.nn.relu(conv(x_nchw, params["conv1_w"], params["conv1_b"])))
    x = pool(jax.nn.relu(conv(x, params["conv2_w"], params["conv2_b"])))
    x = x.reshape(x.shape[0], -1)
    x = jax.nn.relu(jnp.dot(x, params["fc1_w"].T, precision=hi) + params["fc1_b"])
    x = jax.nn.relu(jnp.dot(x, params["fc2_w"].T, precision=hi) + params["fc2_b"])
    return jnp.dot(x, params["fc3_w"].T, precision=hi) + params["fc3_b"]


if __name__ == "__main__":
    key = jax.random.PRNGKey(0)
    k_x, k_p = jax.random.split(key)
    x = jax.random.normal(k_x, (2, 3, 32, 32), jnp.float32)   # NCHW, as in PyTorch
    params = init_params(k_p)

    out = jax.block_until_ready(covnet_forward(x, params))
    ref = jax.block_until_ready(covnet_reference(x, params))

    assert out.shape == (2, 10), out.shape
    np.testing.assert_allclose(np.asarray(out), np.asarray(ref), rtol=2e-2, atol=2e-2)
    print("KERNEL_OK")
</pallas_src>

<mosaic_0001>
module attributes {stable_mosaic.version = 11 : i64} {
  func.func @_covnet_kernel(%arg0: i32, %arg1: memref<1x1024x40xf32, #tpu.memory_space<vmem>>, %arg2: memref<5x40x8xf32, #tpu.memory_space<vmem>>, %arg3: memref<1x8xf32, #tpu.memory_space<vmem>>, %arg4: memref<5x5x8x16xf32, #tpu.memory_space<vmem>>, %arg5: memref<1x16xf32, #tpu.memory_space<vmem>>, %arg6: memref<25x16x128xf32, #tpu.memory_space<vmem>>, %arg7: memref<1x128xf32, #tpu.memory_space<vmem>>, %arg8: memref<128x128xf32, #tpu.memory_space<vmem>>, %arg9: memref<1x128xf32, #tpu.memory_space<vmem>>, %arg10: memref<128x128xf32, #tpu.memory_space<vmem>>, %arg11: memref<1x128xf32, #tpu.memory_space<vmem>>, %arg12: memref<1x8x128xf32, #tpu.memory_space<vmem>>, %arg13: memref<896x8xf32, #tpu.memory_space<vmem>>, %arg14: memref<232x8xf32, #tpu.memory_space<vmem>>, %arg15: memref<160x16xf32, #tpu.memory_space<vmem>>, %arg16: memref<256x16xf32, #tpu.memory_space<vmem>>) attributes {dimension_semantics = [#tpu.dimension_semantics<parallel>], iteration_bounds = array<i64: 2>, scalar_prefetch = 0 : i64, scratch_operands = 4 : i64, tpu.core_type = #tpu.core_type<tc>, window_params = [{transform_indices = @transform_0, window_bounds = array<i64: 1, 1024, 40>}, {pipeline_mode = #tpu.pipeline_mode<synchronous>, transform_indices = @transform_1, window_bounds = array<i64: 5, 40, 8>}, {pipeline_mode = #tpu.pipeline_mode<synchronous>, transform_indices = @transform_2, window_bounds = array<i64: 1, 8>}, {pipeline_mode = #tpu.pipeline_mode<synchronous>, transform_indices = @transform_3, window_bounds = array<i64: 5, 5, 8, 16>}, {pipeline_mode = #tpu.pipeline_mode<synchronous>, transform_indices = @transform_4, window_bounds = array<i64: 1, 16>}, {pipeline_mode = #tpu.pipeline_mode<synchronous>, transform_indices = @transform_5, window_bounds = array<i64: 25, 16, 128>}, {pipeline_mode = #tpu.pipeline_mode<synchronous>, transform_indices = @transform_6, window_bounds = array<i64: 1, 128>}, {pipeline_mode = #tpu.pipeline_mode<synchronous>, transform_indices = @transform_7, window_bounds = array<i64: 128, 128>}, {pipeline_mode = #tpu.pipeline_mode<synchronous>, transform_indices = @transform_8, window_bounds = array<i64: 1, 128>}, {pipeline_mode = #tpu.pipeline_mode<synchronous>, transform_indices = @transform_9, window_bounds = array<i64: 128, 128>}, {pipeline_mode = #tpu.pipeline_mode<synchronous>, transform_indices = @transform_10, window_bounds = array<i64: 1, 128>}, {transform_indices = @transform_11, window_bounds = array<i64: 1, 8, 128>}]} {
    %c0 = arith.constant 0 : index
    %c0_0 = arith.constant 0 : index
    %0 = vector.load %arg3[%c0, %c0_0] : memref<1x8xf32, #tpu.memory_space<vmem>>, vector<1x8xf32>
    %c0_1 = arith.constant 0 : index
    %c0_2 = arith.constant 0 : index
    %1 = vector.load %arg5[%c0_1, %c0_2] : memref<1x16xf32, #tpu.memory_space<vmem>>, vector<1x16xf32>
    %cst = arith.constant 0.000000e+00 : f32
    %2 = vector.broadcast %cst : f32 to vector<256x16xf32>
    %c0_3 = arith.constant 0 : index
    %c0_4 = arith.constant 0 : index
    %3 = vector.load %arg16[%c0_3, %c0_4] : memref<256x16xf32, #tpu.memory_space<vmem>>, vector<256x16xf32>
    tpu.vector_store %arg16[%c0_3, %c0_4], %2 {strides = array<i32>} : memref<256x16xf32, #tpu.memory_space<vmem>>, vector<256x16xf32>,
    %cst_5 = arith.constant 0.000000e+00 : f32
    %4 = vector.broadcast %cst_5 : f32 to vector<128x8xf32>
    %c0_6 = arith.constant 0 : index
    %c0_7 = arith.constant 0 : index
    %c0_8 = arith.constant 0 : index
    %5 = vector.load %arg1[%c0_6, %c0_7, %c0_8] : memref<1x1024x40xf32, #tpu.memory_space<vmem>>, vector<1x128x40xf32>
    %6 = vector.shape_cast %5 : vector<1x128x40xf32> to vector<128x40xf32>
    %c0_9 = arith.constant 0 : index
    %c0_10 = arith.constant 0 : index
    %c0_11 = arith.constant 0 : index
    %7 = vector.load %arg2[%c0_9, %c0_10, %c0_11] : memref<5x40x8xf32, #tpu.memory_space<vmem>>, vector<1x40x8xf32>
    %8 = vector.shape_cast %7 : vector<1x40x8xf32> to vector<40x8xf32>
    %cst_12 = arith.constant dense<0.000000e+00> : vector<128x8xf32>
    %9 = tpu.matmul %6, %8, %cst_12 {dimension_numbers = #tpu.dot_dimension_numbers<[1], [0], [0], [1], [0, 0, 1, 1], [], []>} : vector<128x40xf32>, vector<40x8xf32>, vector<128x8xf32> -> vector<128x8xf32>
    %10 = arith.addf %4, %9 : vector<128x8xf32>
    %c0_13 = arith.constant 0 : index
    %c32 = arith.constant 32 : index
    %c0_14 = arith.constant 0 : index
    %11 = vector.load %arg1[%c0_13, %c32, %c0_14] : memref<1x1024x40xf32, #tpu.memory_space<vmem>>, vector<1x128x40xf32>
    %12 = vector.shape_cast %11 : vector<1x128x40xf32> to vector<128x40xf32>
    %c1 = arith.constant 1 : index
    %c0_15 = arith.constant 0 : index
    %c0_16 = arith.constant 0 : index
    %13 = vector.load %arg2[%c1, %c0_15, %c0_16] : memref<5x40x8xf32, #tpu.memory_space<vmem>>, vector<1x40x8xf32>
    %14 = vector.shape_cast %13 : vector<1x40x8xf32> to vector<40x8xf32>
    %cst_17 = arith.constant dense<0.000000e+00> : vector<128x8xf32>
    %15 = tpu.matmul %12, %14, %cst_17 {dimension_numbers = #tpu.dot_dimension_numbers<[1], [0], [0], [1], [0, 0, 1, 1], [], []>} : vector<128x40xf32>, vector<40x8xf32>, vector<128x8xf32> -> vector<128x8xf32>
    %16 = arith.addf %10, %15 : vector<128x8xf32>
    %c0_18 = arith.constant 0 : index
    %c64 = arith.constant 64 : index
    %c0_19 = arith.constant 0 : index
    %17 = vector.load %arg1[%c0_18, %c64, %c0_19] : memref<1x1024x40xf32, #tpu.memory_space<vmem>>, vector<1x128x40xf32>
    %18 = vector.shape_cast %17 : vector<1x128x40xf32> to vector<128x40xf32>
    %c2 = arith.constant 2 : index
    %c0_20 = arith.constant 0 : index
    %c0_21 = arith.constant 0 : index
    %19 = vector.load %arg2[%c2, %c0_20, %c0_21] : memref<5x40x8xf32, #tpu.memory_space<vmem>>, vector<1x40x8xf32>
    %20 = vector.shape_cast %19 : vector<1x40x8xf32> to vector<40x8xf32>
    %cst_22 = arith.constant dense<0.000000e+00> : vector<128x8xf32>
    %21 = tpu.matmul %18, %20, %cst_22 {dimension_numbers = #tpu.dot_dimension_numbers<[1], [0], [0], [1], [0, 0, 1, 1], [], []>} : vector<128x40xf32>, vector<40x8xf32>, vector<128x8xf32> -> vector<128x8xf32>
    %22 = arith.addf %16, %21 : vector<128x8xf32>
    %c0_23 = arith.constant 0 : index
    %c96 = arith.constant 96 : index
    %c0_24 = arith.constant 0 : index
    %23 = vector.load %arg1[%c0_23, %c96, %c0_24] : memref<1x1024x40xf32, #tpu.memory_space<vmem>>, vector<1x128x40xf32>
    %24 = vector.shape_cast %23 : vector<1x128x40xf32> to vector<128x40xf32>
    %c3 = arith.constant 3 : index
    %c0_25 = arith.constant 0 : index
    %c0_26 = arith.constant 0 : index
    %25 = vector.load %arg2[%c3, %c0_25, %c0_26] : memref<5x40x8xf32, #tpu.memory_space<vmem>>, vector<1x40x8xf32>
    %26 = vector.shape_cast %25 : vector<1x40x8xf32> to vector<40x8xf32>
    %cst_27 = arith.constant dense<0.000000e+00> : vector<128x8xf32>
    %27 = tpu.matmul %24, %26, %cst_27 {dimension_numbers = #tpu.dot_dimension_numbers<[1], [0], [0], [1], [0, 0, 1, 1], [], []>} : vector<128x40xf32>, vector<40x8xf32>, vector<128x8xf32> -> vector<128x8xf32>
    %28 = arith.addf %22, %27 : vector<128x8xf32>
    %c0_28 = arith.constant 0 : index
    %c128 = arith.constant 128 : index
    %c0_29 = arith.constant 0 : index
    %29 = vector.load %arg1[%c0_28, %c128, %c0_29] : memref<1x1024x40xf32, #tpu.memory_space<vmem>>, vector<1x128x40xf32>
    %30 = vector.shape_cast %29 : vector<1x128x40xf32> to vector<128x40xf32>
    %c4 = arith.constant 4 : index
    %c0_30 = arith.constant 0 : index
    %c0_31 = arith.constant 0 : index
    %31 = vector.load %arg2[%c4, %c0_30, %c0_31] : memref<5x40x8xf32, #tpu.memory_space<vmem>>, vector<1x40x8xf32>
    %32 = vector.shape_cast %31 : vector<1x40x8xf32> to vector<40x8xf32>
    %cst_32 = arith.constant dense<0.000000e+00> : vector<128x8xf32>
    %33 = tpu.matmul %30, %32, %cst_32 {dimension_numbers = #tpu.dot_dimension_numbers<[1], [0], [0], [1], [0, 0, 1, 1], [], []>} : vector<128x40xf32>, vector<40x8xf32>, vector<128x8xf32> -> vector<128x8xf32>
    %34 = arith.addf %28, %33 : vector<128x8xf32>
    %35 = vector.broadcast %0 : vector<1x8xf32> to vector<128x8xf32>
    %36 = arith.addf %34, %35 : vector<128x8xf32>
    %cst_33 = arith.constant 0.000000e+00 : f32
    %37 = vector.broadcast %cst_33 : f32 to vector<128x8xf32>
    %38 = arith.maximumf %36, %37 : vector<128x8xf32>
    %c0_34 = arith.constant 0 : index
    %c0_35 = arith.constant 0 : index
    %39 = vector.load %arg13[%c0_34, %c0_35] : memref<896x8xf32, #tpu.memory_space<vmem>>, vector<128x8xf32>
    tpu.vector_store %arg13[%c0_34, %c0_35], %38 {strides = array<i32>} : memref<896x8xf32, #tpu.memory_space<vmem>>, vector<128x8xf32>,
    %cst_36 = arith.constant 0.000000e+00 : f32
    %40 = vector.broadcast %cst_36 : f32 to vector<128x8xf32>
    %c0_37 = arith.constant 0 : index
    %c128_38 = arith.constant 128 : index
    %c0_39 = arith.constant 0 : index
    %41 = vector.load %arg1[%c0_37, %c128_38, %c0_39] : memref<1x1024x40xf32, #tpu.memory_space<vmem>>, vector<1x128x40xf32>
    %42 = vector.shape_cast %41 : vector<1x128x40xf32> to vector<128x40xf32>
    %c0_40 = arith.constant 0 : index
    %c0_41 = arith.constant 0 : index
    %c0_42 = arith.constant 0 : index
    %43 = vector.load %arg2[%c0_40, %c0_41, %c0_42] : memref<5x40x8xf32, #tpu.memory_space<vmem>>, vector<1x40x8xf32>
    %44 = vector.shape_cast %43 : vector<1x40x8xf32> to vector<40x8xf32>
    %cst_43 = arith.constant dense<0.000000e+00> : vector<128x8xf32>
    %45 = tpu.matmul %42, %44, %cst_43 {dimension_numbers = #tpu.dot_dimension_numbers<[1], [0], [0], [1], [0, 0, 1, 1], [], []>} : vector<128x40xf32>, vector<40x8xf32>, vector<128x8xf32> -> vector<128x8xf32>
    %46 = arith.addf %40, %45 : vector<128x8xf32>
    %c0_44 = arith.constant 0 : index
    %c160 = arith.constant 160 : index
    %c0_45 = arith.constant 0 : index
    %47 = vector.load %arg1[%c0_44, %c160, %c0_45] : memref<1x1024x40xf32, #tpu.memory_space<vmem>>, vector<1x128x40xf32>
    %48 = vector.shape_cast %47 : vector<1x128x40xf32> to vector<128x40xf32>
    %c1_46 = arith.constant 1 : index
    %c0_47 = arith.constant 0 : index
    %c0_48 = arith.constant 0 : index
    %49 = vector.load %arg2[%c1_46, %c0_47, %c0_48] : memref<5x40x8xf32, #tpu.memory_space<vmem>>, vector<1x40x8xf32>
    %50 = vector.shape_cast %49 : vector<1x40x8xf32> to vector<40x8xf32>
    %cst_49 = arith.constant dense<0.000000e+00> : vector<128x8xf32>
    %51 = tpu.matmul %48, %50, %cst_49 {dimension_numbers = #tpu.dot_dimension_numbers<[1], [0], [0], [1], [0, 0, 1, 1], [], []>} : vector<128x40xf32>, vector<40x8xf32>, vector<128x8xf32> -> vector<128x8xf32>
    %52 = arith.addf %46, %51 : vector<128x8xf32>
    %c0_50 = arith.constant 0 : index
    %c192 = arith.constant 192 : index
    %c0_51 = arith.constant 0 : index
    %53 = vector.load %arg1[%c0_50, %c192, %c0_51] : memref<1x1024x40xf32, #tpu.memory_space<vmem>>, vector<1x128x40xf32>
    %54 = vector.shape_cast %53 : vector<1x128x40xf32> to vector<128x40xf32>
    %c2_52 = arith.constant 2 : index
    %c0_53 = arith.constant 0 : index
    %c0_54 = arith.constant 0 : index
    %55 = vector.load %arg2[%c2_52, %c0_53, %c0_54] : memref<5x40x8xf32, #tpu.memory_space<vmem>>, vector<1x40x8xf32>
    %56 = vector.shape_cast %55 : vector<1x40x8xf32> to vector<40x8xf32>
    %cst_55 = arith.constant dense<0.000000e+00> : vector<128x8xf32>
    %57 = tpu.matmul %54, %56, %cst_55 {dimension_numbers = #tpu.dot_dimension_numbers<[1], [0], [0], [1], [0, 0, 1, 1], [], []>} : vector<128x40xf32>, vector<40x8xf32>, vector<128x8xf32> -> vector<128x8xf32>
    %58 = arith.addf %52, %57 : vector<128x8xf32>
    %c0_56 = arith.constant 0 : index
    %c224 = arith.constant 224 : index
    %c0_57 = arith.constant 0 : index
    %59 = vector.load %arg1[%c0_56, %c224, %c0_57] : memref<1x1024x40xf32, #tpu.memory_space<vmem>>, vector<1x128x40xf32>
    %60 = vector.shape_cast %59 : vector<1x128x40xf32> to vector<128x40xf32>
    %c3_58 = arith.constant 3 : index
    %c0_59 = arith.constant 0 : index
    %c0_60 = arith.constant 0 : index
    %61 = vector.load %arg2[%c3_58, %c0_59, %c0_60] : memref<5x40x8xf32, #tpu.memory_space<vmem>>, vector<1x40x8xf32>
    %62 = vector.shape_cast %61 : vector<1x40x8xf32> to vector<40x8xf32>
    %cst_61 = arith.constant dense<0.000000e+00> : vector<128x8xf32>
    %63 = tpu.matmul %60, %62, %cst_61 {dimension_numbers = #tpu.dot_dimension_numbers<[1], [0], [0], [1], [0, 0, 1, 1], [], []>} : vector<128x40xf32>, vector<40x8xf32>, vector<128x8xf32> -> vector<128x8xf32>
    %64 = arith.addf %58, %63 : vector<128x8xf32>
    %c0_62 = arith.constant 0 : index
    %c256 = arith.constant 256 : index
    %c0_63 = arith.constant 0 : index
    %65 = vector.load %arg1[%c0_62, %c256, %c0_63] : memref<1x1024x40xf32, #tpu.memory_space<vmem>>, vector<1x128x40xf32>
    %66 = vector.shape_cast %65 : vector<1x128x40xf32> to vector<128x40xf32>
    %c4_64 = arith.constant 4 : index
    %c0_65 = arith.constant 0 : index
    %c0_66 = arith.constant 0 : index
    %67 = vector.load %arg2[%c4_64, %c0_65, %c0_66] : memref<5x40x8xf32, #tpu.memory_space<vmem>>, vector<1x40x8xf32>
    %68 = vector.shape_cast %67 : vector<1x40x8xf32> to vector<40x8xf32>
    %cst_67 = arith.constant dense<0.000000e+00> : vector<128x8xf32>
    %69 = tpu.matmul %66, %68, %cst_67 {dimension_numbers = #tpu.dot_dimension_numbers<[1], [0], [0], [1], [0, 0, 1, 1], [], []>} : vector<128x40xf32>, vector<40x8xf32>, vector<128x8xf32> -> vector<128x8xf32>
    %70 = arith.addf %64, %69 : vector<128x8xf32>
    %71 = vector.broadcast %0 : vector<1x8xf32> to vector<128x8xf32>
    %72 = arith.addf %70, %71 : vector<128x8xf32>
    %cst_68 = arith.constant 0.000000e+00 : f32
    %73 = vector.broadcast %cst_68 : f32 to vector<128x8xf32>
    %74 = arith.maximumf %72, %73 : vector<128x8xf32>
    %c128_69 = arith.constant 128 : index
    %c0_70 = arith.constant 0 : index
    %75 = vector.load %arg13[%c128_69, %c0_70] : memref<896x8xf32, #tpu.memory_space<vmem>>, vector<128x8xf32>
    tpu.vector_store %arg13[%c128_69, %c0_70], %74 {strides = array<i32>} : memref<896x8xf32, #tpu.memory_space<vmem>>, vector<128x8xf32>,
    %cst_71 = arith.constant 0.000000e+00 : f32
    %76 = vector.broadcast %cst_71 : f32 to vector<128x8xf32>
    %c0_72 = arith.constant 0 : index
    %c256_73 = arith.constant 256 : index
    %c0_74 = arith.constant 0 : index
    %77 = vector.load %arg1[%c0_72, %c256_73, %c0_74] : memref<1x1024x40xf32, #tpu.memory_space<vmem>>, vector<1x128x40xf32>
    %78 = vector.shape_cast %77 : vector<1x128x40xf32> to vector<128x40xf32>
    %c0_75 = arith.constant 0 : index
    %c0_76 = arith.constant 0 : index
    %c0_77 = arith.constant 0 : index
    %79 = vector.load %arg2[%c0_75, %c0_76, %c0_77] : memref<5x40x8xf32, #tpu.memory_space<vmem>>, vector<1x40x8xf32>
    %80 = vector.shape_cast %79 : vector<1x40x8xf32> to vector<40x8xf32>
    %cst_78 = arith.constant dense<0.000000e+00> : vector<128x8xf32>
    %81 = tpu.matmul %78, %80, %cst_78 {dimension_numbers = #tpu.dot_dimension_numbers<[1], [0], [0], [1], [0, 0, 1, 1], [], []>} : vector<128x40xf32>, vector<40x8xf32>, vector<128x8xf32> -> vector<128x8xf32>
    %82 = arith.addf %76, %81 : vector<128x8xf32>
    %c0_79 = arith.constant 0 : index
    %c288 = arith.constant 288 : index
    %c0_80 = arith.constant 0 : index
    %83 = vector.load %arg1[%c0_79, %c288, %c0_80] : memref<1x1024x40xf32, #tpu.memory_space<vmem>>, vector<1x128x40xf32>
    %84 = vector.shape_cast %83 : vector<1x128x40xf32> to vector<128x40xf32>
    %c1_81 = arith.constant 1 : index
    %c0_82 = arith.constant 0 : index
    %c0_83 = arith.constant 0 : index
    %85 = vector.load %arg2[%c1_81, %c0_82, %c0_83] : memref<5x40x8xf32, #tpu.memory_space<vmem>>, vector<1x40x8xf32>
    %86 = vector.shape_cast %85 : vector<1x40x8xf32> to vector<40x8xf32>
    %cst_84 = arith.constant dense<0.000000e+00> : vector<128x8xf32>
    %87 = tpu.matmul %84, %86, %cst_84 {dimension_numbers = #tpu.dot_dimension_numbers<[1], [0], [0], [1], [0, 0, 1, 1], [], []>} : vector<128x40xf32>, vector<40x8xf32>, vector<128x8xf32> -> vector<128x8xf32>
    %88 = arith.addf %82, %87 : vector<128x8xf32>
    %c0_85 = arith.constant 0 : index
    %c320 = arith.constant 320 : index
    %c0_86 = arith.constant 0 : index
    %89 = vector.load %arg1[%c0_85, %c320, %c0_86] : memref<1x1024x40xf32, #tpu.memory_space<vmem>>, vector<1x128x40xf32>
    %90 = vector.shape_cast %89 : vector<1x128x40xf32> to vector<128x40xf32>
    %c2_87 = arith.constant 2 : index
    %c0_88 = arith.constant 0 : index
    %c0_89 = arith.constant 0 : index
    %91 = vector.load %arg2[%c2_87, %c0_88, %c0_89] : memref<5x40x8xf32, #tpu.memory_space<vmem>>, vector<1x40x8xf32>
    %92 = vector.shape_cast %91 : vector<1x40x8xf32> to vector<40x8xf32>
    %cst_90 = arith.constant dense<0.000000e+00> : vector<128x8xf32>
    %93 = tpu.matmul %90, %92, %cst_90 {dimension_numbers = #tpu.dot_dimension_numbers<[1], [0], [0], [1], [0, 0, 1, 1], [], []>} : vector<128x40xf32>, vector<40x8xf32>, vector<128x8xf32> -> vector<128x8xf32>
    %94 = arith.addf %88, %93 : vector<128x8xf32>
    %c0_91 = arith.constant 0 : index
    %c352 = arith.constant 352 : index
    %c0_92 = arith.constant 0 : index
    %95 = vector.load %arg1[%c0_91, %c352, %c0_92] : memref<1x1024x40xf32, #tpu.memory_space<vmem>>, vector<1x128x40xf32>
    %96 = vector.shape_cast %95 : vector<1x128x40xf32> to vector<128x40xf32>
    %c3_93 = arith.constant 3 : index
    %c0_94 = arith.constant 0 : index
    %c0_95 = arith.constant 0 : index
    %97 = vector.load %arg2[%c3_93, %c0_94, %c0_95] : memref<5x40x8xf32, #tpu.memory_space<vmem>>, vector<1x40x8xf32>
    %98 = vector.shape_cast %97 : vector<1x40x8xf32> to vector<40x8xf32>
    %cst_96 = arith.constant dense<0.000000e+00> : vector<128x8xf32>
    %99 = tpu.matmul %96, %98, %cst_96 {dimension_numbers = #tpu.dot_dimension_numbers<[1], [0], [0], [1], [0, 0, 1, 1], [], []>} : vector<128x40xf32>, vector<40x8xf32>, vector<128x8xf32> -> vector<128x8xf32>
    %100 = arith.addf %94, %99 : vector<128x8xf32>
    %c0_97 = arith.constant 0 : index
    %c384 = arith.constant 384 : index
    %c0_98 = arith.constant 0 : index
    %101 = vector.load %arg1[%c0_97, %c384, %c0_98] : memref<1x1024x40xf32, #tpu.memory_space<vmem>>, vector<1x128x40xf32>
    %102 = vector.shape_cast %101 : vector<1x128x40xf32> to vector<128x40xf32>
    %c4_99 = arith.constant 4 : index
    %c0_100 = arith.constant 0 : index
    %c0_101 = arith.constant 0 : index
    %103 = vector.load %arg2[%c4_99, %c0_100, %c0_101] : memref<5x40x8xf32, #tpu.memory_space<vmem>>, vector<1x40x8xf32>
    %104 = vector.shape_cast %103 : vector<1x40x8xf32> to vector<40x8xf32>
    %cst_102 = arith.constant dense<0.000000e+00> : vector<128x8xf32>
    %105 = tpu.matmul %102, %104, %cst_102 {dimension_numbers = #tpu.dot_dimension_numbers<[1], [0], [0], [1], [0, 0, 1, 1], [], []>} : vector<128x40xf32>, vector<40x8xf32>, vector<128x8xf32> -> vector<128x8xf32>
    %106 = arith.addf %100, %105 : vector<128x8xf32>
    %107 = vector.broadcast %0 : vector<1x8xf32> to vector<128x8xf32>
    %108 = arith.addf %106, %107 : vector<128x8xf32>
    %cst_103 = arith.constant 0.000000e+00 : f32
    %109 = vector.broadcast %cst_103 : f32 to vector<128x8xf32>
    %110 = arith.maximumf %108, %109 : vector<128x8xf32>
    %c256_104 = arith.constant 256 : index
    %c0_105 = arith.constant 0 : index
    %111 = vector.load %arg13[%c256_104, %c0_105] : memref<896x8xf32, #tpu.memory_space<vmem>>, vector<128x8xf32>
    tpu.vector_store %arg13[%c256_104, %c0_105], %110 {strides = array<i32>} : memref<896x8xf32, #tpu.memory_space<vmem>>, vector<128x8xf32>,
    %cst_106 = arith.constant 0.000000e+00 : f32
    %112 = vector.broadcast %cst_106 : f32 to vector<128x8xf32>
    %c0_107 = arith.constant 0 : index
    %c384_108 = arith.constant 384 : index
    %c0_109 = arith.constant 0 : index
    %113 = vector.load %arg1[%c0_107, %c384_108, %c0_109] : memref<1x1024x40xf32, #tpu.memory_space<vmem>>, vector<1x128x40xf32>
    %114 = vector.shape_cast %113 : vector<1x128x40xf32> to vector<128x40xf32>
    %c0_110 = arith.constant 0 : index
    %c0_111 = arith.constant 0 : index
    %c0_112 = arith.constant 0 : index
    %115 = vector.load %arg2[%c0_110, %c0_111, %c0_112] : memref<5x40x8xf32, #tpu.memory_space<vmem>>, vector<1x40x8xf32>
    %116 = vector.shape_cast %115 : vector<1x40x8xf32> to vector<40x8xf32>
    %cst_113 = arith.constant dense<0.000000e+00> : vector<128x8xf32>
    %117 = tpu.matmul %114, %116, %cst_113 {dimension_numbers = #tpu.dot_dimension_numbers<[1], [0], [0], [1], [0, 0, 1, 1], [], []>} : vector<128x40xf32>, vector<40x8xf32>, vector<128x8xf32> -> vector<128x8xf32>
    %118 = arith.addf %112, %117 : vector<128x8xf32>
    %c0_114 = arith.constant 0 : index
    %c416 = arith.constant 416 : index
    %c0_115 = arith.constant 0 : index
    %119 = vector.load %arg1[%c0_114, %c416, %c0_115] : memref<1x1024x40xf32, #tpu.memory_space<vmem>>, vector<1x128x40xf32>
    %120 = vector.shape_cast %119 : vector<1x128x40xf32> to vector<128x40xf32>
    %c1_116 = arith.constant 1 : index
    %c0_117 = arith.constant 0 : index
    %c0_118 = arith.constant 0 : index
    %121 = vector.load %arg2[%c1_116, %c0_117, %c0_118] : memref<5x40x8xf32, #tpu.memory_space<vmem>>, vector<1x40x8xf32>
    %122 = vector.shape_cast %121 : vector<1x40x8xf32> to vector<40x8xf32>
    %cst_119 = arith.constant dense<0.000000e+00> : vector<128x8xf32>
    %123 = tpu.matmul %120, %122, %cst_119 {dimension_numbers = #tpu.dot_dimension_numbers<[1], [0], [0], [1], [0, 0, 1, 1], [], []>} : vector<128x40xf32>, vector<40x8xf32>, vector<128x8xf32> -> vector<128x8xf32>
    %124 = arith.addf %118, %123 : vector<128x8xf32>
    %c0_120 = arith.constant 0 : index
    %c448 = arith.constant 448 : index
    %c0_121 = arith.constant 0 : index
    %125 = vector.load %arg1[%c0_120, %c448, %c0_121] : memref<1x1024x40xf32, #tpu.memory_space<vmem>>, vector<1x128x40xf32>
    %126 = vector.shape_cast %125 : vector<1x128x40xf32> to vector<128x40xf32>
    %c2_122 = arith.constant 2 : index
    %c0_123 = arith.constant 0 : index
    %c0_124 = arith.constant 0 : index
    %127 = vector.load %arg2[%c2_122, %c0_123, %c0_124] : memref<5x40x8xf32, #tpu.memory_space<vmem>>, vector<1x40x8xf32>
    %128 = vector.shape_cast %127 : vector<1x40x8xf32> to vector<40x8xf32>
    %cst_125 = arith.constant dense<0.000000e+00> : vector<128x8xf32>
    %129 = tpu.matmul %126, %128, %cst_125 {dimension_numbers = #tpu.dot_dimension_numbers<[1], [0], [0], [1], [0, 0, 1, 1], [], []>} : vector<128x40xf32>, vector<40x8xf32>, vector<128x8xf32> -> vector<128x8xf32>
    %130 = arith.addf %124, %129 : vector<128x8xf32>
    %c0_126 = arith.constant 0 : index
    %c480 = arith.constant 480 : index
    %c0_127 = arith.constant 0 : index
    %131 = vector.load %arg1[%c0_126, %c480, %c0_127] : memref<1x1024x40xf32, #tpu.memory_space<vmem>>, vector<1x128x40xf32>
    %132 = vector.shape_cast %131 : vector<1x128x40xf32> to vector<128x40xf32>
    %c3_128 = arith.constant 3 : index
    %c0_129 = arith.constant 0 : index
    %c0_130 = arith.constant 0 : index
    %133 = vector.load %arg2[%c3_128, %c0_129, %c0_130] : memref<5x40x8xf32, #tpu.memory_space<vmem>>, vector<1x40x8xf32>
    %134 = vector.shape_cast %133 : vector<1x40x8xf32> to vector<40x8xf32>
    %cst_131 = arith.constant dense<0.000000e+00> : vector<128x8xf32>
    %135 = tpu.matmul %132, %134, %cst_131 {dimension_numbers = #tpu.dot_dimension_numbers<[1], [0], [0], [1], [0, 0, 1, 1], [], []>} : vector<128x40xf32>, vector<40x8xf32>, vector<128x8xf32> -> vector<128x8xf32>
    %136 = arith.addf %130, %135 : vector<128x8xf32>
    %c0_132 = arith.constant 0 : index
    %c512 = arith.constant 512 : index
    %c0_133 = arith.constant 0 : index
    %137 = vector.load %arg1[%c0_132, %c512, %c0_133] : memref<1x1024x40xf32, #tpu.memory_space<vmem>>, vector<1x128x40xf32>
    %138 = vector.shape_cast %137 : vector<1x128x40xf32> to vector<128x40xf32>
    %c4_134 = arith.constant 4 : index
    %c0_135 = arith.constant 0 : index
    %c0_136 = arith.constant 0 : index
    %139 = vector.load %arg2[%c4_134, %c0_135, %c0_136] : memref<5x40x8xf32, #tpu.memory_space<vmem>>, vector<1x40x8xf32>
    %140 = vector.shape_cast %139 : vector<1x40x8xf32> to vector<40x8xf32>
    %cst_137 = arith.constant dense<0.000000e+00> : vector<128x8xf32>
    %141 = tpu.matmul %138, %140, %cst_137 {dimension_numbers = #tpu.dot_dimension_numbers<[1], [0], [0], [1], [0, 0, 1, 1], [], []>} : vector<128x40xf32>, vector<40x8xf32>, vector<128x8xf32> -> vector<128x8xf32>
    %142 = arith.addf %136, %141 : vector<128x8xf32>
    %143 = vector.broadcast %0 : vector<1x8xf32> to vector<128x8xf32>
    %144 = arith.addf %142, %143 : vector<128x8xf32>
    %cst_138 = arith.constant 0.000000e+00 : f32
    %145 = vector.broadcast %cst_138 : f32 to vector<128x8xf32>
    %146 = arith.maximumf %144, %145 : vector<128x8xf32>
    %c384_139 = arith.constant 384 : index
    %c0_140 = arith.constant 0 : index
    %147 = vector.load %arg13[%c384_139, %c0_140] : memref<896x8xf32, #tpu.memory_space<vmem>>, vector<128x8xf32>
    tpu.vector_store %arg13[%c384_139, %c0_140], %146 {strides = array<i32>} : memref<896x8xf32, #tpu.memory_space<vmem>>, vector<128x8xf32>,
    %cst_141 = arith.constant 0.000000e+00 : f32
    %148 = vector.broadcast %cst_141 : f32 to vector<128x8xf32>
    %c0_142 = arith.constant 0 : index
    %c512_143 = arith.constant 512 : index
    %c0_144 = arith.constant 0 : index
    %149 = vector.load %arg1[%c0_142, %c512_143, %c0_144] : memref<1x1024x40xf32, #tpu.memory_space<vmem>>, vector<1x128x40xf32>
    %150 = vector.shape_cast %149 : vector<1x128x40xf32> to vector<128x40xf32>
    %c0_145 = arith.constant 0 : index
    %c0_146 = arith.constant 0 : index
    %c0_147 = arith.constant 0 : index
    %151 = vector.load %arg2[%c0_145, %c0_146, %c0_147] : memref<5x40x8xf32, #tpu.memory_space<vmem>>, vector<1x40x8xf32>
    %152 = vector.shape_cast %151 : vector<1x40x8xf32> to vector<40x8xf32>
    %cst_148 = arith.constant dense<0.000000e+00> : vector<128x8xf32>
    %153 = tpu.matmul %150, %152, %cst_148 {dimension_numbers = #tpu.dot_dimension_numbers<[1], [0], [0], [1], [0, 0, 1, 1], [], []>} : vector<128x40xf32>, vector<40x8xf32>, vector<128x8xf32> -> vector<128x8xf32>
    %154 = arith.addf %148, %153 : vector<128x8xf32>
    %c0_149 = arith.constant 0 : index
    %c544 = arith.constant 544 : index
    %c0_150 = arith.constant 0 : index
    %155 = vector.load %arg1[%c0_149, %c544, %c0_150] : memref<1x1024x40xf32, #tpu.memory_space<vmem>>, vector<1x128x40xf32>
    %156 = vector.shape_cast %155 : vector<1x128x40xf32> to vector<128x40xf32>
    %c1_151 = arith.constant 1 : index
    %c0_152 = arith.constant 0 : index
    %c0_153 = arith.constant 0 : index
    %157 = vector.load %arg2[%c1_151, %c0_152, %c0_153] : memref<5x40x8xf32, #tpu.memory_space<vmem>>, vector<1x40x8xf32>
    %158 = vector.shape_cast %157 : vector<1x40x8xf32> to vector<40x8xf32>
    %cst_154 = arith.constant dense<0.000000e+00> : vector<128x8xf32>
    %159 = tpu.matmul %156, %158, %cst_154 {dimension_numbers = #tpu.dot_dimension_numbers<[1], [0], [0], [1], [0, 0, 1, 1], [], []>} : vector<128x40xf32>, vector<40x8xf32>, vector<128x8xf32> -> vector<128x8xf32>
    %160 = arith.addf %154, %159 : vector<128x8xf32>
    %c0_155 = arith.constant 0 : index
    %c576 = arith.constant 576 : index
    %c0_156 = arith.constant 0 : index
    %161 = vector.load %arg1[%c0_155, %c576, %c0_156] : memref<1x1024x40xf32, #tpu.memory_space<vmem>>, vector<1x128x40xf32>
    %162 = vector.shape_cast %161 : vector<1x128x40xf32> to vector<128x40xf32>
    %c2_157 = arith.constant 2 : index
    %c0_158 = arith.constant 0 : index
    %c0_159 = arith.constant 0 : index
    %163 = vector.load %arg2[%c2_157, %c0_158, %c0_159] : memref<5x40x8xf32, #tpu.memory_space<vmem>>, vector<1x40x8xf32>
    %164 = vector.shape_cast %163 : vector<1x40x8xf32> to vector<40x8xf32>
    %cst_160 = arith.constant dense<0.000000e+00> : vector<128x8xf32>
    %165 = tpu.matmul %162, %164, %cst_160 {dimension_numbers = #tpu.dot_dimension_numbers<[1], [0], [0], [1], [0, 0, 1, 1], [], []>} : vector<128x40xf32>, vector<40x8xf32>, vector<128x8xf32> -> vector<128x8xf32>
    %166 = arith.addf %160, %165 : vector<128x8xf32>
    %c0_161 = arith.constant 0 : index
    %c608 = arith.constant 608 : index
    %c0_162 = arith.constant 0 : index
    %167 = vector.load %arg1[%c0_161, %c608, %c0_162] : memref<1x1024x40xf32, #tpu.memory_space<vmem>>, vector<1x128x40xf32>
    %168 = vector.shape_cast %167 : vector<1x128x40xf32> to vector<128x40xf32>
    %c3_163 = arith.constant 3 : index
    %c0_164 = arith.constant 0 : index
    %c0_165 = arith.constant 0 : index
    %169 = vector.load %arg2[%c3_163, %c0_164, %c0_165] : memref<5x40x8xf32, #tpu.memory_space<vmem>>, vector<1x40x8xf32>
    %170 = vector.shape_cast %169 : vector<1x40x8xf32> to vector<40x8xf32>
    %cst_166 = arith.constant dense<0.000000e+00> : vector<128x8xf32>
    %171 = tpu.matmul %168, %170, %cst_166 {dimension_numbers = #tpu.dot_dimension_numbers<[1], [0], [0], [1], [0, 0, 1, 1], [], []>} : vector<128x40xf32>, vector<40x8xf32>, vector<128x8xf32> -> vector<128x8xf32>
    %172 = arith.addf %166, %171 : vector<128x8xf32>
    %c0_167 = arith.constant 0 : index
    %c640 = arith.constant 640 : index
    %c0_168 = arith.constant 0 : index
    %173 = vector.load %arg1[%c0_167, %c640, %c0_168] : memref<1x1024x40xf32, #tpu.memory_space<vmem>>, vector<1x128x40xf32>
    %174 = vector.shape_cast %173 : vector<1x128x40xf32> to vector<128x40xf32>
    %c4_169 = arith.constant 4 : index
    %c0_170 = arith.constant 0 : index
    %c0_171 = arith.constant 0 : index
    %175 = vector.load %arg2[%c4_169, %c0_170, %c0_171] : memref<5x40x8xf32, #tpu.memory_space<vmem>>, vector<1x40x8xf32>
    %176 = vector.shape_cast %175 : vector<1x40x8xf32> to vector<40x8xf32>
    %cst_172 = arith.constant dense<0.000000e+00> : vector<128x8xf32>
    %177 = tpu.matmul %174, %176, %cst_172 {dimension_numbers = #tpu.dot_dimension_numbers<[1], [0], [0], [1], [0, 0, 1, 1], [], []>} : vector<128x40xf32>, vector<40x8xf32>, vector<128x8xf32> -> vector<128x8xf32>
    %178 = arith.addf %172, %177 : vector<128x8xf32>
    %179 = vector.broadcast %0 : vector<1x8xf32> to vector<128x8xf32>
    %180 = arith.addf %178, %179 : vector<128x8xf32>
    %cst_173 = arith.constant 0.000000e+00 : f32
    %181 = vector.broadcast %cst_173 : f32 to vector<128x8xf32>
    %182 = arith.maximumf %180, %181 : vector<128x8xf32>
    %c512_174 = arith.constant 512 : index
    %c0_175 = arith.constant 0 : index
    %183 = vector.load %arg13[%c512_174, %c0_175] : memref<896x8xf32, #tpu.memory_space<vmem>>, vector<128x8xf32>
    tpu.vector_store %arg13[%c512_174, %c0_175], %182 {strides = array<i32>} : memref<896x8xf32, #tpu.memory_space<vmem>>, vector<128x8xf32>,
    %cst_176 = arith.constant 0.000000e+00 : f32
    %184 = vector.broadcast %cst_176 : f32 to vector<128x8xf32>
    %c0_177 = arith.constant 0 : index
    %c640_178 = arith.constant 640 : index
    %c0_179 = arith.constant 0 : index
    %185 = vector.load %arg1[%c0_177, %c640_178, %c0_179] : memref<1x1024x40xf32, #tpu.memory_space<vmem>>, vector<1x128x40xf32>
    %186 = vector.shape_cast %185 : vector<1x128x40xf32> to vector<128x40xf32>
    %c0_180 = arith.constant 0 : index
    %c0_181 = arith.constant 0 : index
    %c0_182 = arith.constant 0 : index
    %187 = vector.load %arg2[%c0_180, %c0_181, %c0_182] : memref<5x40x8xf32, #tpu.memory_space<vmem>>, vector<1x40x8xf32>
    %188 = vector.shape_cast %187 : vector<1x40x8xf32> to vector<40x8xf32>
    %cst_183 = arith.constant dense<0.000000e+00> : vector<128x8xf32>
    %189 = tpu.matmul %186, %188, %cst_183 {dimension_numbers = #tpu.dot_dimension_numbers<[1], [0], [0], [1], [0, 0, 1, 1], [], []>} : vector<128x40xf32>, vector<40x8xf32>, vector<128x8xf32> -> vector<128x8xf32>
    %190 = arith.addf %184, %189 : vector<128x8xf32>
    %c0_184 = arith.constant 0 : index
    %c672 = arith.constant 672 : index
    %c0_185 = arith.constant 0 : index
    %191 = vector.load %arg1[%c0_184, %c672, %c0_185] : memref<1x1024x40xf32, #tpu.memory_space<vmem>>, vector<1x128x40xf32>
    %192 = vector.shape_cast %191 : vector<1x128x40xf32> to vector<128x40xf32>
    %c1_186 = arith.constant 1 : index
    %c0_187 = arith.constant 0 : index
    %c0_188 = arith.constant 0 : index
    %193 = vector.load %arg2[%c1_186, %c0_187, %c0_188] : memref<5x40x8xf32, #tpu.memory_space<vmem>>, vector<1x40x8xf32>
    %194 = vector.shape_cast %193 : vector<1x40x8xf32> to vector<40x8xf32>
    %cst_189 = arith.constant dense<0.000000e+00> : vector<128x8xf32>
    %195 = tpu.matmul %192, %194, %cst_189 {dimension_numbers = #tpu.dot_dimension_numbers<[1], [0], [0], [1], [0, 0, 1, 1], [], []>} : vector<128x40xf32>, vector<40x8xf32>, vector<128x8xf32> -> vector<128x8xf32>
    %196 = arith.addf %190, %195 : vector<128x8xf32>
    %c0_190 = arith.constant 0 : index
    %c704 = arith.constant 704 : index
    %c0_191 = arith.constant 0 : index
    %197 = vector.load %arg1[%c0_190, %c704, %c0_191] : memref<1x1024x40xf32, #tpu.memory_space<vmem>>, vector<1x128x40xf32>
    %198 = vector.shape_cast %197 : vector<1x128x40xf32> to vector<128x40xf32>
    %c2_192 = arith.constant 2 : index
    %c0_193 = arith.constant 0 : index
    %c0_194 = arith.constant 0 : index
    %199 = vector.load %arg2[%c2_192, %c0_193, %c0_194] : memref<5x40x8xf32, #tpu.memory_space<vmem>>, vector<1x40x8xf32>
    %200 = vector.shape_cast %199 : vector<1x40x8xf32> to vector<40x8xf32>
    %cst_195 = arith.constant dense<0.000000e+00> : vector<128x8xf32>
    %201 = tpu.matmul %198, %200, %cst_195 {dimension_numbers = #tpu.dot_dimension_numbers<[1], [0], [0], [1], [0, 0, 1, 1], [], []>} : vector<128x40xf32>, vector<40x8xf32>, vector<128x8xf32> -> vector<128x8xf32>
    %202 = arith.addf %196, %201 : vector<128x8xf32>
    %c0_196 = arith.constant 0 : index
    %c736 = arith.constant 736 : index
    %c0_197 = arith.constant 0 : index
    %203 = vector.load %arg1[%c0_196, %c736, %c0_197] : memref<1x1024x40xf32, #tpu.memory_space<vmem>>, vector<1x128x40xf32>
    %204 = vector.shape_cast %203 : vector<1x128x40xf32> to vector<128x40xf32>
    %c3_198 = arith.constant 3 : index
    %c0_199 = arith.constant 0 : index
    %c0_200 = arith.constant 0 : index
    %205 = vector.load %arg2[%c3_198, %c0_199, %c0_200] : memref<5x40x8xf32, #tpu.memory_space<vmem>>, vector<1x40x8xf32>
    %206 = vector.shape_cast %205 : vector<1x40x8xf32> to vector<40x8xf32>
    %cst_201 = arith.constant dense<0.000000e+00> : vector<128x8xf32>
    %207 = tpu.matmul %204, %206, %cst_201 {dimension_numbers = #tpu.dot_dimension_numbers<[1], [0], [0], [1], [0, 0, 1, 1], [], []>} : vector<128x40xf32>, vector<40x8xf32>, vector<128x8xf32> -> vector<128x8xf32>
    %208 = arith.addf %202, %207 : vector<128x8xf32>
    %c0_202 = arith.constant 0 : index
    %c768 = arith.constant 768 : index
    %c0_203 = arith.constant 0 : index
    %209 = vector.load %arg1[%c0_202, %c768, %c0_203] : memref<1x1024x40xf32, #tpu.memory_space<vmem>>, vector<1x128x40xf32>
    %210 = vector.shape_cast %209 : vector<1x128x40xf32> to vector<128x40xf32>
    %c4_204 = arith.constant 4 : index
    %c0_205 = arith.constant 0 : index
    %c0_206 = arith.constant 0 : index
    %211 = vector.load %arg2[%c4_204, %c0_205, %c0_206] : memref<5x40x8xf32, #tpu.memory_space<vmem>>, vector<1x40x8xf32>
    %212 = vector.shape_cast %211 : vector<1x40x8xf32> to vector<40x8xf32>
    %cst_207 = arith.constant dense<0.000000e+00> : vector<128x8xf32>
    %213 = tpu.matmul %210, %212, %cst_207 {dimension_numbers = #tpu.dot_dimension_numbers<[1], [0], [0], [1], [0, 0, 1, 1], [], []>} : vector<128x40xf32>, vector<40x8xf32>, vector<128x8xf32> -> vector<128x8xf32>
    %214 = arith.addf %208, %213 : vector<128x8xf32>
    %215 = vector.broadcast %0 : vector<1x8xf32> to vector<128x8xf32>
    %216 = arith.addf %214, %215 : vector<128x8xf32>
    %cst_208 = arith.constant 0.000000e+00 : f32
    %217 = vector.broadcast %cst_208 : f32 to vector<128x8xf32>
    %218 = arith.maximumf %216, %217 : vector<128x8xf32>
    %c640_209 = arith.constant 640 : index
    %c0_210 = arith.constant 0 : index
    %219 = vector.load %arg13[%c640_209, %c0_210] : memref<896x8xf32, #tpu.memory_space<vmem>>, vector<128x8xf32>
    tpu.vector_store %arg13[%c640_209, %c0_210], %218 {strides = array<i32>} : memref<896x8xf32, #tpu.memory_space<vmem>>, vector<128x8xf32>,
    %cst_211 = arith.constant 0.000000e+00 : f32
    %220 = vector.broadcast %cst_211 : f32 to vector<128x8xf32>
    %c0_212 = arith.constant 0 : index
    %c768_213 = arith.constant 768 : index
    %c0_214 = arith.constant 0 : index
    %221 = vector.load %arg1[%c0_212, %c768_213, %c0_214] : memref<1x1024x40xf32, #tpu.memory_space<vmem>>, vector<1x128x40xf32>
    %222 = vector.shape_cast %221 : vector<1x128x40xf32> to vector<128x40xf32>
    %c0_215 = arith.constant 0 : index
    %c0_216 = arith.constant 0 : index
    %c0_217 = arith.constant 0 : index
    %223 = vector.load %arg2[%c0_215, %c0_216, %c0_217] : memref<5x40x8xf32, #tpu.memory_space<vmem>>, vector<1x40x8xf32>
    %224 = vector.shape_cast %223 : vector<1x40x8xf32> to vector<40x8xf32>
    %cst_218 = arith.constant dense<0.000000e+00> : vector<128x8xf32>
    %225 = tpu.matmul %222, %224, %cst_218 {dimension_numbers = #tpu.dot_dimension_numbers<[1], [0], [0], [1], [0, 0, 1, 1], [], []>} : vector<128x40xf32>, vector<40x8xf32>, vector<128x8xf32> -> vector<128x8xf32>
    %226 = arith.addf %220, %225 : vector<128x8xf32>
    %c0_219 = arith.constant 0 : index
    %c800 = arith.constant 800 : index
    %c0_220 = arith.constant 0 : index
    %227 = vector.load %arg1[%c0_219, %c800, %c0_220] : memref<1x1024x40xf32, #tpu.memory_space<vmem>>, vector<1x128x40xf32>
    %228 = vector.shape_cast %227 : vector<1x128x40xf32> to vector<128x40xf32>
    %c1_221 = arith.constant 1 : index
    %c0_222 = arith.constant 0 : index
    %c0_223 = arith.constant 0 : index
    %229 = vector.load %arg2[%c1_221, %c0_222, %c0_223] : memref<5x40x8xf32, #tpu.memory_space<vmem>>, vector<1x40x8xf32>
    %230 = vector.shape_cast %229 : vector<1x40x8xf32> to vector<40x8xf32>
    %cst_224 = arith.constant dense<0.000000e+00> : vector<128x8xf32>
    %231 = tpu.matmul %228, %230, %cst_224 {dimension_numbers = #tpu.dot_dimension_numbers<[1], [0], [0], [1], [0, 0, 1, 1], [], []>} : vector<128x40xf32>, vector<40x8xf32>, vector<128x8xf32> -> vector<128x8xf32>
    %232 = arith.addf %226, %231 : vector<128x8xf32>
    %c0_225 = arith.constant 0 : index
    %c832 = arith.constant 832 : index
    %c0_226 = arith.constant 0 : index
    %233 = vector.load %arg1[%c0_225, %c832, %c0_226] : memref<1x1024x40xf32, #tpu.memory_space<vmem>>, vector<1x128x40xf32>
    %234 = vector.shape_cast %233 : vector<1x128x40xf32> to vector<128x40xf32>
    %c2_227 = arith.constant 2 : index
    %c0_228 = arith.constant 0 : index
    %c0_229 = arith.constant 0 : index
    %235 = vector.load %arg2[%c2_227, %c0_228, %c0_229] : memref<5x40x8xf32, #tpu.memory_space<vmem>>, vector<1x40x8xf32>
    %236 = vector.shape_cast %235 : vector<1x40x8xf32> to vector<40x8xf32>
    %cst_230 = arith.constant dense<0.000000e+00> : vector<128x8xf32>
    %237 = tpu.matmul %234, %236, %cst_230 {dimension_numbers = #tpu.dot_dimension_numbers<[1], [0], [0], [1], [0, 0, 1, 1], [], []>} : vector<128x40xf32>, vector<40x8xf32>, vector<128x8xf32> -> vector<128x8xf32>
    %238 = arith.addf %232, %237 : vector<128x8xf32>
    %c0_231 = arith.constant 0 : index
    %c864 = arith.constant 864 : index
    %c0_232 = arith.constant 0 : index
    %239 = vector.load %arg1[%c0_231, %c864, %c0_232] : memref<1x1024x40xf32, #tpu.memory_space<vmem>>, vector<1x128x40xf32>
    %240 = vector.shape_cast %239 : vector<1x128x40xf32> to vector<128x40xf32>
    %c3_233 = arith.constant 3 : index
    %c0_234 = arith.constant 0 : index
    %c0_235 = arith.constant 0 : index
    %241 = vector.load %arg2[%c3_233, %c0_234, %c0_235] : memref<5x40x8xf32, #tpu.memory_space<vmem>>, vector<1x40x8xf32>
    %242 = vector.shape_cast %241 : vector<1x40x8xf32> to vector<40x8xf32>
    %cst_236 = arith.constant dense<0.000000e+00> : vector<128x8xf32>
    %243 = tpu.matmul %240, %242, %cst_236 {dimension_numbers = #tpu.dot_dimension_numbers<[1], [0], [0], [1], [0, 0, 1, 1], [], []>} : vector<128x40xf32>, vector<40x8xf32>, vector<128x8xf32> -> vector<128x8xf32>
    %244 = arith.addf %238, %243 : vector<128x8xf32>
    %c0_237 = arith.constant 0 : index
    %c896 = arith.constant 896 : index
    %c0_238 = arith.constant 0 : index
    %245 = vector.load %arg1[%c0_237, %c896, %c0_238] : memref<1x1024x40xf32, #tpu.memory_space<vmem>>, vector<1x128x40xf32>
    %246 = vector.shape_cast %245 : vector<1x128x40xf32> to vector<128x40xf32>
    %c4_239 = arith.constant 4 : index
    %c0_240 = arith.constant 0 : index
    %c0_241 = arith.constant 0 : index
    %247 = vector.load %arg2[%c4_239, %c0_240, %c0_241] : memref<5x40x8xf32, #tpu.memory_space<vmem>>, vector<1x40x8xf32>
    %248 = vector.shape_cast %247 : vector<1x40x8xf32> to vector<40x8xf32>
    %cst_242 = arith.constant dense<0.000000e+00> : vector<128x8xf32>
    %249 = tpu.matmul %246, %248, %cst_242 {dimension_numbers = #tpu.dot_dimension_numbers<[1], [0], [0], [1], [0, 0, 1, 1], [], []>} : vector<128x40xf32>, vector<40x8xf32>, vector<128x8xf32> -> vector<128x8xf32>
    %250 = arith.addf %244, %249 : vector<128x8xf32>
    %251 = vector.broadcast %0 : vector<1x8xf32> to vector<128x8xf32>
    %252 = arith.addf %250, %251 : vector<128x8xf32>
    %cst_243 = arith.constant 0.000000e+00 : f32
    %253 = vector.broadcast %cst_243 : f32 to vector<128x8xf32>
    %254 = arith.maximumf %252, %253 : vector<128x8xf32>
    %c768_244 = arith.constant 768 : index
    %c0_245 = arith.constant 0 : index
    %255 = vector.load %arg13[%c768_244, %c0_245] : memref<896x8xf32, #tpu.memory_space<vmem>>, vector<128x8xf32>
    tpu.vector_store %arg13[%c768_244, %c0_245], %254 {strides = array<i32>} : memref<896x8xf32, #tpu.memory_space<vmem>>, vector<128x8xf32>,
    %c0_246 = arith.constant 0 : index
    %c0_247 = arith.constant 0 : index
    %256 = tpu.strided_load %arg13[%c0_246, %c0_247] {strides = array<i32: 2, 1>} : memref<896x8xf32, #tpu.memory_space<vmem>>, vector<16x8xf32>
    %c1_248 = arith.constant 1 : index
    %c0_249 = arith.constant 0 : index
    %257 = tpu.strided_load %arg13[%c1_248, %c0_249] {strides = array<i32: 2, 1>} : memref<896x8xf32, #tpu.memory_space<vmem>>, vector<16x8xf32>
    %258 = arith.maximumf %256, %257 : vector<16x8xf32>
    %c32_250 = arith.constant 32 : index
    %c0_251 = arith.constant 0 : index
    %259 = tpu.strided_load %arg13[%c32_250, %c0_251] {strides = array<i32: 2, 1>} : memref<896x8xf32, #tpu.memory_space<vmem>>, vector<16x8xf32>
    %c33 = arith.constant 33 : index
    %c0_252 = arith.constant 0 : index
    %260 = tpu.strided_load %arg13[%c33, %c0_252] {strides = array<i32: 2, 1>} : memref<896x8xf32, #tpu.memory_space<vmem>>, vector<16x8xf32>
    %261 = arith.maximumf %259, %260 : vector<16x8xf32>
    %262 = arith.maximumf %258, %261 : vector<16x8xf32>
    %c0_253 = arith.constant 0 : index
    %c0_254 = arith.constant 0 : index
    %263 = vector.load %arg14[%c0_253, %c0_254] : memref<232x8xf32, #tpu.memory_space<vmem>>, vector<16x8xf32>
    tpu.vector_store %arg14[%c0_253, %c0_254], %262 {strides = array<i32>} : memref<232x8xf32, #tpu.memory_space<vmem>>, vector<16x8xf32>,
    %c64_255 = arith.constant 64 : index
    %c0_256 = arith.constant 0 : index
    %264 = tpu.strided_load %arg13[%c64_255, %c0_256] {strides = array<i32: 2, 1>} : memref<896x8xf32, #tpu.memory_space<vmem>>, vector<16x8xf32>
    %c65 = arith.constant 65 : index
    %c0_257 = arith.constant 0 : index
    %265 = tpu.strided_load %arg13[%c65, %c0_257] {strides = array<i32: 2, 1>} : memref<896x8xf32, #tpu.memory_space<vmem>>, vector<16x8xf32>
    %266 = arith.maximumf %264, %265 : vector<16x8xf32>
    %c96_258 = arith.constant 96 : index
    %c0_259 = arith.constant 0 : index
    %267 = tpu.strided_load %arg13[%c96_258, %c0_259] {strides = array<i32: 2, 1>} : memref<896x8xf32, #tpu.memory_space<vmem>>, vector<16x8xf32>
    %c97 = arith.constant 97 : index
    %c0_260 = arith.constant 0 : index
    %268 = tpu.strided_load %arg13[%c97, %c0_260] {strides = array<i32: 2, 1>} : memref<896x8xf32, #tpu.memory_space<vmem>>, vector<16x8xf32>
    %269 = arith.maximumf %267, %268 : vector<16x8xf32>
    %270 = arith.maximumf %266, %269 : vector<16x8xf32>
    %c16 = arith.constant 16 : index
    %c0_261 = arith.constant 0 : index
    %271 = vector.load %arg14[%c16, %c0_261] : memref<232x8xf32, #tpu.memory_space<vmem>>, vector<16x8xf32>
    tpu.vector_store %arg14[%c16, %c0_261], %270 {strides = array<i32>} : memref<232x8xf32, #tpu.memory_space<vmem>>, vector<16x8xf32>,
    %c128_262 = arith.constant 128 : index
    %c0_263 = arith.constant 0 : index
    %272 = tpu.strided_load %arg13[%c128_262, %c0_263] {strides = array<i32: 2, 1>} : memref<896x8xf32, #tpu.memory_space<vmem>>, vector<16x8xf32>
    %c129 = arith.constant 129 : index
    %c0_264 = arith.constant 0 : index
    %273 = tpu.strided_load %arg13[%c129, %c0_264] {strides = array<i32: 2, 1>} : memref<896x8xf32, #tpu.memory_space<vmem>>, vector<16x8xf32>
    %274 = arith.maximumf %272, %273 : vector<16x8xf32>
    %c160_265 = arith.constant 160 : index
    %c0_266 = arith.constant 0 : index
    %275 = tpu.strided_load %arg13[%c160_265, %c0_266] {strides = array<i32: 2, 1>} : memref<896x8xf32, #tpu.memory_space<vmem>>, vector<16x8xf32>
    %c161 = arith.constant 161 : index
    %c0_267 = arith.constant 0 : index
    %276 = tpu.strided_load %arg13[%c161, %c0_267] {strides = array<i32: 2, 1>} : memref<896x8xf32, #tpu.memory_space<vmem>>, vector<16x8xf32>
    %277 = arith.maximumf %275, %276 : vector<16x8xf32>
    %278 = arith.maximumf %274, %277 : vector<16x8xf32>
    %c32_268 = arith.constant 32 : index
    %c0_269 = arith.constant 0 : index
    %279 = vector.load %arg14[%c32_268, %c0_269] : memref<232x8xf32, #tpu.memory_space<vmem>>, vector<16x8xf32>
    tpu.vector_store %arg14[%c32_268, %c0_269], %278 {strides = array<i32>} : memref<232x8xf32, #tpu.memory_space<vmem>>, vector<16x8xf32>,
    %c192_270 = arith.constant 192 : index
    %c0_271 = arith.constant 0 : index
    %280 = tpu.strided_load %arg13[%c192_270, %c0_271] {strides = array<i32: 2, 1>} : memref<896x8xf32, #tpu.memory_space<vmem>>, vector<16x8xf32>
    %c193 = arith.constant 193 : index
    %c0_272 = arith.constant 0 : index
    %281 = tpu.strided_load %arg13[%c193, %c0_272] {strides = array<i32: 2, 1>} : memref<896x8xf32, #tpu.memory_space<vmem>>, vector<16x8xf32>
    %282 = arith.maximumf %280, %281 : vector<16x8xf32>
    %c224_273 = arith.constant 224 : index
    %c0_274 = arith.constant 0 : index
    %283 = tpu.strided_load %arg13[%c224_273, %c0_274] {strides = array<i32: 2, 1>} : memref<896x8xf32, #tpu.memory_space<vmem>>, vector<16x8xf32>
    %c225 = arith.constant 225 : index
    %c0_275 = arith.constant 0 : index
    %284 = tpu.strided_load %arg13[%c225, %c0_275] {strides = array<i32: 2, 1>} : memref<896x8xf32, #tpu.memory_space<vmem>>, vector<16x8xf32>
    %285 = arith.maximumf %283, %284 : vector<16x8xf32>
    %286 = arith.maximumf %282, %285 : vector<16x8xf32>
    %c48 = arith.constant 48 : index
    %c0_276 = arith.constant 0 : index
    %287 = vector.load %arg14[%c48, %c0_276] : memref<232x8xf32, #tpu.memory_space<vmem>>, vector<16x8xf32>
    tpu.vector_store %arg14[%c48, %c0_276], %286 {strides = array<i32>} : memref<232x8xf32, #tpu.memory_space<vmem>>, vector<16x8xf32>,
    %c256_277 = arith.constant 256 : index
    %c0_278 = arith.constant 0 : index
    %288 = tpu.strided_load %arg13[%c256_277, %c0_278] {strides = array<i32: 2, 1>} : memref<896x8xf32, #tpu.memory_space<vmem>>, vector<16x8xf32>
    %c257 = arith.constant 257 : index
    %c0_279 = arith.constant 0 : index
    %289 = tpu.strided_load %arg13[%c257, %c0_279] {strides = array<i32: 2, 1>} : memref<896x8xf32, #tpu.memory_space<vmem>>, vector<16x8xf32>
    %290 = arith.maximumf %288, %289 : vector<16x8xf32>
    %c288_280 = arith.constant 288 : index
    %c0_281 = arith.constant 0 : index
    %291 = tpu.strided_load %arg13[%c288_280, %c0_281] {strides = array<i32: 2, 1>} : memref<896x8xf32, #tpu.memory_space<vmem>>, vector<16x8xf32>
    %c289 = arith.constant 289 : index
    %c0_282 = arith.constant 0 : index
    %292 = tpu.strided_load %arg13[%c289, %c0_282] {strides = array<i32: 2, 1>} : memref<896x8xf32, #tpu.memory_space<vmem>>, vector<16x8xf32>
    %293 = arith.maximumf %291, %292 : vector<16x8xf32>
    %294 = arith.maximumf %290, %293 : vector<16x8xf32>
    %c64_283 = arith.constant 64 : index
    %c0_284 = arith.constant 0 : index
    %295 = vector.load %arg14[%c64_283, %c0_284] : memref<232x8xf32, #tpu.memory_space<vmem>>, vector<16x8xf32>
    tpu.vector_store %arg14[%c64_283, %c0_284], %294 {strides = array<i32>} : memref<232x8xf32, #tpu.memory_space<vmem>>, vector<16x8xf32>,
    %c320_285 = arith.constant 320 : index
    %c0_286 = arith.constant 0 : index
    %296 = tpu.strided_load %arg13[%c320_285, %c0_286] {strides = array<i32: 2, 1>} : memref<896x8xf32, #tpu.memory_space<vmem>>, vector<16x8xf32>
    %c321 = arith.constant 321 : index
    %c0_287 = arith.constant 0 : index
    %297 = tpu.strided_load %arg13[%c321, %c0_287] {strides = array<i32: 2, 1>} : memref<896x8xf32, #tpu.memory_space<vmem>>, vector<16x8xf32>
    %298 = arith.maximumf %296, %297 : vector<16x8xf32>
    %c352_288 = arith.constant 352 : index
    %c0_289 = arith.constant 0 : index
    %299 = tpu.strided_load %arg13[%c352_288, %c0_289] {strides = array<i32: 2, 1>} : memref<896x8xf32, #tpu.memory_space<vmem>>, vector<16x8xf32>
    %c353 = arith.constant 353 : index
    %c0_290 = arith.constant 0 : index
    %300 = tpu.strided_load %arg13[%c353, %c0_290] {strides = array<i32: 2, 1>} : memref<896x8xf32, #tpu.memory_space<vmem>>, vector<16x8xf32>
    %301 = arith.maximumf %299, %300 : vector<16x8xf32>
    %302 = arith.maximumf %298, %301 : vector<16x8xf32>
    %c80 = arith.constant 80 : index
    %c0_291 = arith.constant 0 : index
    %303 = vector.load %arg14[%c80, %c0_291] : memref<232x8xf32, #tpu.memory_space<vmem>>, vector<16x8xf32>
    tpu.vector_store %arg14[%c80, %c0_291], %302 {strides = array<i32>} : memref<232x8xf32, #tpu.memory_space<vmem>>, vector<16x8xf32>,
    %c384_292 = arith.constant 384 : index
    %c0_293 = arith.constant 0 : index
    %304 = tpu.strided_load %arg13[%c384_292, %c0_293] {strides = array<i32: 2, 1>} : memref<896x8xf32, #tpu.memory_space<vmem>>, vector<16x8xf32>
    %c385 = arith.constant 385 : index
    %c0_294 = arith.constant 0 : index
    %305 = tpu.strided_load %arg13[%c385, %c0_294] {strides = array<i32: 2, 1>} : memref<896x8xf32, #tpu.memory_space<vmem>>, vector<16x8xf32>
    %306 = arith.maximumf %304, %305 : vector<16x8xf32>
    %c416_295 = arith.constant 416 : index
    %c0_296 = arith.constant 0 : index
    %307 = tpu.strided_load %arg13[%c416_295, %c0_296] {strides = array<i32: 2, 1>} : memref<896x8xf32, #tpu.memory_space<vmem>>, vector<16x8xf32>
    %c417 = arith.constant 417 : index
    %c0_297 = arith.constant 0 : index
    %308 = tpu.strided_load %arg13[%c417, %c0_297] {strides = array<i32: 2, 1>} : memref<896x8xf32, #tpu.memory_space<vmem>>, vector<16x8xf32>
    %309 = arith.maximumf %307, %308 : vector<16x8xf32>
    %310 = arith.maximumf %306, %309 : vector<16x8xf32>
    %c96_298 = arith.constant 96 : index
    %c0_299 = arith.constant 0 : index
    %311 = vector.load %arg14[%c96_298, %c0_299] : memref<232x8xf32, #tpu.memory_space<vmem>>, vector<16x8xf32>
    tpu.vector_store %arg14[%c96_298, %c0_299], %310 {strides = array<i32>} : memref<232x8xf32, #tpu.memory_space<vmem>>, vector<16x8xf32>,
    %c448_300 = arith.constant 448 : index
    %c0_301 = arith.constant 0 : index
    %312 = tpu.strided_load %arg13[%c448_300, %c0_301] {strides = array<i32: 2, 1>} : memref<896x8xf32, #tpu.memory_space<vmem>>, vector<16x8xf32>
    %c449 = arith.constant 449 : index
    %c0_302 = arith.constant 0 : index
    %313 = tpu.strided_load %arg13[%c449, %c0_302] {strides = array<i32: 2, 1>} : memref<896x8xf32, #tpu.memory_space<vmem>>, vector<16x8xf32>
    %314 = arith.maximumf %312, %313 : vector<16x8xf32>
    %c480_303 = arith.constant 480 : index
    %c0_304 = arith.constant 0 : index
    %315 = tpu.strided_load %arg13[%c480_303, %c0_304] {strides = array<i32: 2, 1>} : memref<896x8xf32, #tpu.memory_space<vmem>>, vector<16x8xf32>
    %c481 = arith.constant 481 : index
    %c0_305 = arith.constant 0 : index
    %316 = tpu.strided_load %arg13[%c481, %c0_305] {strides = array<i32: 2, 1>} : memref<896x8xf32, #tpu.memory_space<vmem>>, vector<16x8xf32>
    %317 = arith.maximumf %315, %316 : vector<16x8xf32>
    %318 = arith.maximumf %314, %317 : vector<16x8xf32>
    %c112 = arith.constant 112 : index
    %c0_306 = arith.constant 0 : index
    %319 = vector.load %arg14[%c112, %c0_306] : memref<232x8xf32, #tpu.memory_space<vmem>>, vector<16x8xf32>
    tpu.vector_store %arg14[%c112, %c0_306], %318 {strides = array<i32>} : memref<232x8xf32, #tpu.memory_space<vmem>>, vector<16x8xf32>,
    %c512_307 = arith.constant 512 : index
    %c0_308 = arith.constant 0 : index
    %320 = tpu.strided_load %arg13[%c512_307, %c0_308] {strides = array<i32: 2, 1>} : memref<896x8xf32, #tpu.memory_space<vmem>>, vector<16x8xf32>
    %c513 = arith.constant 513 : index
    %c0_309 = arith.constant 0 : index
    %321 = tpu.strided_load %arg13[%c513, %c0_309] {strides = array<i32: 2, 1>} : memref<896x8xf32, #tpu.memory_space<vmem>>, vector<16x8xf32>
    %322 = arith.maximumf %320, %321 : vector<16x8xf32>
    %c544_310 = arith.constant 544 : index
    %c0_311 = arith.constant 0 : index
    %323 = tpu.strided_load %arg13[%c544_310, %c0_311] {strides = array<i32: 2, 1>} : memref<896x8xf32, #tpu.memory_space<vmem>>, vector<16x8xf32>
    %c545 = arith.constant 545 : index
    %c0_312 = arith.constant 0 : index
    %324 = tpu.strided_load %arg13[%c545, %c0_312] {strides = array<i32: 2, 1>} : memref<896x8xf32, #tpu.memory_space<vmem>>, vector<16x8xf32>
    %325 = arith.maximumf %323, %324 : vector<16x8xf32>
    %326 = arith.maximumf %322, %325 : vector<16x8xf32>
    %c128_313 = arith.constant 128 : index
    %c0_314 = arith.constant 0 : index
    %327 = vector.load %arg14[%c128_313, %c0_314] : memref<232x8xf32, #tpu.memory_space<vmem>>, vector<16x8xf32>
    tpu.vector_store %arg14[%c128_313, %c0_314], %326 {strides = array<i32>} : memref<232x8xf32, #tpu.memory_space<vmem>>, vector<16x8xf32>,
    %c576_315 = arith.constant 576 : index
    %c0_316 = arith.constant 0 : index
    %328 = tpu.strided_load %arg13[%c576_315, %c0_316] {strides = array<i32: 2, 1>} : memref<896x8xf32, #tpu.memory_space<vmem>>, vector<16x8xf32>
    %c577 = arith.constant 577 : index
    %c0_317 = arith.constant 0 : index
    %329 = tpu.strided_load %arg13[%c577, %c0_317] {strides = array<i32: 2, 1>} : memref<896x8xf32, #tpu.memory_space<vmem>>, vector<16x8xf32>
    %330 = arith.maximumf %328, %329 : vector<16x8xf32>
    %c608_318 = arith.constant 608 : index
    %c0_319 = arith.constant 0 : index
    %331 = tpu.strided_load %arg13[%c608_318, %c0_319] {strides = array<i32: 2, 1>} : memref<896x8xf32, #tpu.memory_space<vmem>>, vector<16x8xf32>
    %c609 = arith.constant 609 : index
    %c0_320 = arith.constant 0 : index
    %332 = tpu.strided_load %arg13[%c609, %c0_320] {strides = array<i32: 2, 1>} : memref<896x8xf32, #tpu.memory_space<vmem>>, vector<16x8xf32>
    %333 = arith.maximumf %331, %332 : vector<16x8xf32>
    %334 = arith.maximumf %330, %333 : vector<16x8xf32>
    %c144 = arith.constant 144 : index
    %c0_321 = arith.constant 0 : index
    %335 = vector.load %arg14[%c144, %c0_321] : memref<232x8xf32, #tpu.memory_space<vmem>>, vector<16x8xf32>
    tpu.vector_store %arg14[%c144, %c0_321], %334 {strides = array<i32>} : memref<232x8xf32, #tpu.memory_space<vmem>>, vector<16x8xf32>,
    %c640_322 = arith.constant 640 : index
    %c0_323 = arith.constant 0 : index
    %336 = tpu.strided_load %arg13[%c640_322, %c0_323] {strides = array<i32: 2, 1>} : memref<896x8xf32, #tpu.memory_space<vmem>>, vector<16x8xf32>
    %c641 = arith.constant 641 : index
    %c0_324 = arith.constant 0 : index
    %337 = tpu.strided_load %arg13[%c641, %c0_324] {strides = array<i32: 2, 1>} : memref<896x8xf32, #tpu.memory_space<vmem>>, vector<16x8xf32>
    %338 = arith.maximumf %336, %337 : vector<16x8xf32>
    %c672_325 = arith.constant 672 : index
    %c0_326 = arith.constant 0 : index
    %339 = tpu.strided_load %arg13[%c672_325, %c0_326] {strides = array<i32: 2, 1>} : memref<896x8xf32, #tpu.memory_space<vmem>>, vector<16x8xf32>
    %c673 = arith.constant 673 : index
    %c0_327 = arith.constant 0 : index
    %340 = tpu.strided_load %arg13[%c673, %c0_327] {strides = array<i32: 2, 1>} : memref<896x8xf32, #tpu.memory_space<vmem>>, vector<16x8xf32>
    %341 = arith.maximumf %339, %340 : vector<16x8xf32>
    %342 = arith.maximumf %338, %341 : vector<16x8xf32>
    %c160_328 = arith.constant 160 : index
    %c0_329 = arith.constant 0 : index
    %343 = vector.load %arg14[%c160_328, %c0_329] : memref<232x8xf32, #tpu.memory_space<vmem>>, vector<16x8xf32>
    tpu.vector_store %arg14[%c160_328, %c0_329], %342 {strides = array<i32>} : memref<232x8xf32, #tpu.memory_space<vmem>>, vector<16x8xf32>,
    %c704_330 = arith.constant 704 : index
    %c0_331 = arith.constant 0 : index
    %344 = tpu.strided_load %arg13[%c704_330, %c0_331] {strides = array<i32: 2, 1>} : memref<896x8xf32, #tpu.memory_space<vmem>>, vector<16x8xf32>
    %c705 = arith.constant 705 : index
    %c0_332 = arith.constant 0 : index
    %345 = tpu.strided_load %arg13[%c705, %c0_332] {strides = array<i32: 2, 1>} : memref<896x8xf32, #tpu.memory_space<vmem>>, vector<16x8xf32>
    %346 = arith.maximumf %344, %345 : vector<16x8xf32>
    %c736_333 = arith.constant 736 : index
    %c0_334 = arith.constant 0 : index
    %347 = tpu.strided_load %arg13[%c736_333, %c0_334] {strides = array<i32: 2, 1>} : memref<896x8xf32, #tpu.memory_space<vmem>>, vector<16x8xf32>
    %c737 = arith.constant 737 : index
    %c0_335 = arith.constant 0 : index
    %348 = tpu.strided_load %arg13[%c737, %c0_335] {strides = array<i32: 2, 1>} : memref<896x8xf32, #tpu.memory_space<vmem>>, vector<16x8xf32>
    %349 = arith.maximumf %347, %348 : vector<16x8xf32>
    %350 = arith.maximumf %346, %349 : vector<16x8xf32>
    %c176 = arith.constant 176 : index
    %c0_336 = arith.constant 0 : index
    %351 = vector.load %arg14[%c176, %c0_336] : memref<232x8xf32, #tpu.memory_space<vmem>>, vector<16x8xf32>
    tpu.vector_store %arg14[%c176, %c0_336], %350 {strides = array<i32>} : memref<232x8xf32, #tpu.memory_space<vmem>>, vector<16x8xf32>,
    %c768_337 = arith.constant 768 : index
    %c0_338 = arith.constant 0 : index
    %352 = tpu.strided_load %arg13[%c768_337, %c0_338] {strides = array<i32: 2, 1>} : memref<896x8xf32, #tpu.memory_space<vmem>>, vector<16x8xf32>
    %c769 = arith.constant 769 : index
    %c0_339 = arith.constant 0 : index
    %353 = tpu.strided_load %arg13[%c769, %c0_339] {strides = array<i32: 2, 1>} : memref<896x8xf32, #tpu.memory_space<vmem>>, vector<16x8xf32>
    %354 = arith.maximumf %352, %353 : vector<16x8xf32>
    %c800_340 = arith.constant 800 : index
    %c0_341 = arith.constant 0 : index
    %355 = tpu.strided_load %arg13[%c800_340, %c0_341] {strides = array<i32: 2, 1>} : memref<896x8xf32, #tpu.memory_space<vmem>>, vector<16x8xf32>
    %c801 = arith.constant 801 : index
    %c0_342 = arith.constant 0 : index
    %356 = tpu.strided_load %arg13[%c801, %c0_342] {strides = array<i32: 2, 1>} : memref<896x8xf32, #tpu.memory_space<vmem>>, vector<16x8xf32>
    %357 = arith.maximumf %355, %356 : vector<16x8xf32>
    %358 = arith.maximumf %354, %357 : vector<16x8xf32>
    %c192_343 = arith.constant 192 : index
    %c0_344 = arith.constant 0 : index
    %359 = vector.load %arg14[%c192_343, %c0_344] : memref<232x8xf32, #tpu.memory_space<vmem>>, vector<16x8xf32>
    tpu.vector_store %arg14[%c192_343, %c0_344], %358 {strides = array<i32>} : memref<232x8xf32, #tpu.memory_space<vmem>>, vector<16x8xf32>,
    %c832_345 = arith.constant 832 : index
    %c0_346 = arith.constant 0 : index
    %360 = tpu.strided_load %arg13[%c832_345, %c0_346] {strides = array<i32: 2, 1>} : memref<896x8xf32, #tpu.memory_space<vmem>>, vector<16x8xf32>
    %c833 = arith.constant 833 : index
    %c0_347 = arith.constant 0 : index
    %361 = tpu.strided_load %arg13[%c833, %c0_347] {strides = array<i32: 2, 1>} : memref<896x8xf32, #tpu.memory_space<vmem>>, vector<16x8xf32>
    %362 = arith.maximumf %360, %361 : vector<16x8xf32>
    %c864_348 = arith.constant 864 : index
    %c0_349 = arith.constant 0 : index
    %363 = tpu.strided_load %arg13[%c864_348, %c0_349] {strides = array<i32: 2, 1>} : memref<896x8xf32, #tpu.memory_space<vmem>>, vector<16x8xf32>
    %c865 = arith.constant 865 : index
    %c0_350 = arith.constant 0 : index
    %364 = tpu.strided_load %arg13[%c865, %c0_350] {strides = array<i32: 2, 1>} : memref<896x8xf32, #tpu.memory_space<vmem>>, vector<16x8xf32>
    %365 = arith.maximumf %363, %364 : vector<16x8xf32>
    %366 = arith.maximumf %362, %365 : vector<16x8xf32>
    %c208 = arith.constant 208 : index
    %c0_351 = arith.constant 0 : index
    %367 = vector.load %arg14[%c208, %c0_351] : memref<232x8xf32, #tpu.memory_space<vmem>>, vector<16x8xf32>
    tpu.vector_store %arg14[%c208, %c0_351], %366 {strides = array<i32>} : memref<232x8xf32, #tpu.memory_space<vmem>>, vector<16x8xf32>,
    %cst_352 = arith.constant 0.000000e+00 : f32
    %368 = vector.broadcast %cst_352 : f32 to vector<8x8xf32>
    %c224_353 = arith.constant 224 : index
    %c0_354 = arith.constant 0 : index
    %369 = vector.load %arg14[%c224_353, %c0_354] : memref<232x8xf32, #tpu.memory_space<vmem>>, vector<8x8xf32>
    tpu.vector_store %arg14[%c224_353, %c0_354], %368 {strides = array<i32>} : memref<232x8xf32, #tpu.memory_space<vmem>>, vector<8x8xf32>,
    %cst_355 = arith.constant 0.000000e+00 : f32
    %370 = vector.broadcast %cst_355 : f32 to vector<160x16xf32>
    %c0_356 = arith.constant 0 : index
    %c0_357 = arith.constant 0 : index
    %c0_358 = arith.constant 0 : index
    %c0_359 = arith.constant 0 : index
    %371 = vector.load %arg4[%c0_356, %c0_357, %c0_358, %c0_359] : memref<5x5x8x16xf32, #tpu.memory_space<vmem>>, vector<1x5x8x16xf32>
    %372 = vector.shape_cast %371 : vector<1x5x8x16xf32> to vector<5x8x16xf32>
    %c0_360 = arith.constant 0 : index
    %c0_361 = arith.constant 0 : index
    %373 = vector.load %arg14[%c0_360, %c0_361] : memref<232x8xf32, #tpu.memory_space<vmem>>, vector<160x8xf32>
    %374 = vector.extract_strided_slice %372 {offsets = [0, 0, 0], sizes = [1, 8, 16], strides = [1, 1, 1]} : vector<5x8x16xf32> to vector<1x8x16xf32>
    %375 = vector.shape_cast %374 : vector<1x8x16xf32> to vector<8x16xf32>
    %cst_362 = arith.constant dense<0.000000e+00> : vector<160x16xf32>
    %376 = tpu.matmul %373, %375, %cst_362 {dimension_numbers = #tpu.dot_dimension_numbers<[1], [0], [0], [1], [0, 0, 1, 1], [], []>} : vector<160x8xf32>, vector<8x16xf32>, vector<160x16xf32> -> vector<160x16xf32>
    %377 = arith.addf %370, %376 : vector<160x16xf32>
    %c1_363 = arith.constant 1 : index
    %c0_364 = arith.constant 0 : index
    %378 = vector.load %arg14[%c1_363, %c0_364] : memref<232x8xf32, #tpu.memory_space<vmem>>, vector<160x8xf32>
    %379 = vector.extract_strided_slice %372 {offsets = [1, 0, 0], sizes = [1, 8, 16], strides = [1, 1, 1]} : vector<5x8x16xf32> to vector<1x8x16xf32>
    %380 = vector.shape_cast %379 : vector<1x8x16xf32> to vector<8x16xf32>
    %cst_365 = arith.constant dense<0.000000e+00> : vector<160x16xf32>
    %381 = tpu.matmul %378, %380, %cst_365 {dimension_numbers = #tpu.dot_dimension_numbers<[1], [0], [0], [1], [0, 0, 1, 1], [], []>} : vector<160x8xf32>, vector<8x16xf32>, vector<160x16xf32> -> vector<160x16xf32>
    %382 = arith.addf %377, %381 : vector<160x16xf32>
    %c2_366 = arith.constant 2 : index
    %c0_367 = arith.constant 0 : index
    %383 = vector.load %arg14[%c2_366, %c0_367] : memref<232x8xf32, #tpu.memory_space<vmem>>, vector<160x8xf32>
    %384 = vector.extract_strided_slice %372 {offsets = [2, 0, 0], sizes = [1, 8, 16], strides = [1, 1, 1]} : vector<5x8x16xf32> to vector<1x8x16xf32>
    %385 = vector.shape_cast %384 : vector<1x8x16xf32> to vector<8x16xf32>
    %cst_368 = arith.constant dense<0.000000e+00> : vector<160x16xf32>
    %386 = tpu.matmul %383, %385, %cst_368 {dimension_numbers = #tpu.dot_dimension_numbers<[1], [0], [0], [1], [0, 0, 1, 1], [], []>} : vector<160x8xf32>, vector<8x16xf32>, vector<160x16xf32> -> vector<160x16xf32>
    %387 = arith.addf %382, %386 : vector<160x16xf32>
    %c3_369 = arith.constant 3 : index
    %c0_370 = arith.constant 0 : index
    %388 = vector.load %arg14[%c3_369, %c0_370] : memref<232x8xf32, #tpu.memory_space<vmem>>, vector<160x8xf32>
    %389 = vector.extract_strided_slice %372 {offsets = [3, 0, 0], sizes = [1, 8, 16], strides = [1, 1, 1]} : vector<5x8x16xf32> to vector<1x8x16xf32>
    %390 = vector.shape_cast %389 : vector<1x8x16xf32> to vector<8x16xf32>
    %cst_371 = arith.constant dense<0.000000e+00> : vector<160x16xf32>
    %391 = tpu.matmul %388, %390, %cst_371 {dimension_numbers = #tpu.dot_dimension_numbers<[1], [0], [0], [1], [0, 0, 1, 1], [], []>} : vector<160x8xf32>, vector<8x16xf32>, vector<160x16xf32> -> vector<160x16xf32>
    %392 = arith.addf %387, %391 : vector<160x16xf32>
    %c4_372 = arith.constant 4 : index
    %c0_373 = arith.constant 0 : index
    %393 = vector.load %arg14[%c4_372, %c0_373] : memref<232x8xf32, #tpu.memory_space<vmem>>, vector<160x8xf32>
    %394 = vector.extract_strided_slice %372 {offsets = [4, 0, 0], sizes = [1, 8, 16], strides = [1, 1, 1]} : vector<5x8x16xf32> to vector<1x8x16xf32>
    %395 = vector.shape_cast %394 : vector<1x8x16xf32> to vector<8x16xf32>
    %cst_374 = arith.constant dense<0.000000e+00> : vector<160x16xf32>
    %396 = tpu.matmul %393, %395, %cst_374 {dimension_numbers = #tpu.dot_dimension_numbers<[1], [0], [0], [1], [0, 0, 1, 1], [], []>} : vector<160x8xf32>, vector<8x16xf32>, vector<160x16xf32> -> vector<160x16xf32>
    %397 = arith.addf %392, %396 : vector<160x16xf32>
    %c1_375 = arith.constant 1 : index
    %c0_376 = arith.constant 0 : index
    %c0_377 = arith.constant 0 : index
    %c0_378 = arith.constant 0 : index
    %398 = vector.load %arg4[%c1_375, %c0_376, %c0_377, %c0_378] : memref<5x5x8x16xf32, #tpu.memory_space<vmem>>, vector<1x5x8x16xf32>
    %399 = vector.shape_cast %398 : vector<1x5x8x16xf32> to vector<5x8x16xf32>
    %c16_379 = arith.constant 16 : index
    %c0_380 = arith.constant 0 : index
    %400 = vector.load %arg14[%c16_379, %c0_380] : memref<232x8xf32, #tpu.memory_space<vmem>>, vector<160x8xf32>
    %401 = vector.extract_strided_slice %399 {offsets = [0, 0, 0], sizes = [1, 8, 16], strides = [1, 1, 1]} : vector<5x8x16xf32> to vector<1x8x16xf32>
    %402 = vector.shape_cast %401 : vector<1x8x16xf32> to vector<8x16xf32>
    %cst_381 = arith.constant dense<0.000000e+00> : vector<160x16xf32>
    %403 = tpu.matmul %400, %402, %cst_381 {dimension_numbers = #tpu.dot_dimension_numbers<[1], [0], [0], [1], [0, 0, 1, 1], [], []>} : vector<160x8xf32>, vector<8x16xf32>, vector<160x16xf32> -> vector<160x16xf32>
    %404 = arith.addf %397, %403 : vector<160x16xf32>
    %c17 = arith.constant 17 : index
    %c0_382 = arith.constant 0 : index
    %405 = vector.load %arg14[%c17, %c0_382] : memref<232x8xf32, #tpu.memory_space<vmem>>, vector<160x8xf32>
    %406 = vector.extract_strided_slice %399 {offsets = [1, 0, 0], sizes = [1, 8, 16], strides = [1, 1, 1]} : vector<5x8x16xf32> to vector<1x8x16xf32>
    %407 = vector.shape_cast %406 : vector<1x8x16xf32> to vector<8x16xf32>
    %cst_383 = arith.constant dense<0.000000e+00> : vector<160x16xf32>
    %408 = tpu.matmul %405, %407, %cst_383 {dimension_numbers = #tpu.dot_dimension_numbers<[1], [0], [0], [1], [0, 0, 1, 1], [], []>} : vector<160x8xf32>, vector<8x16xf32>, vector<160x16xf32> -> vector<160x16xf32>
    %409 = arith.addf %404, %408 : vector<160x16xf32>
    %c18 = arith.constant 18 : index
    %c0_384 = arith.constant 0 : index
    %410 = vector.load %arg14[%c18, %c0_384] : memref<232x8xf32, #tpu.memory_space<vmem>>, vector<160x8xf32>
    %411 = vector.extract_strided_slice %399 {offsets = [2, 0, 0], sizes = [1, 8, 16], strides = [1, 1, 1]} : vector<5x8x16xf32> to vector<1x8x16xf32>
    %412 = vector.shape_cast %411 : vector<1x8x16xf32> to vector<8x16xf32>
    %cst_385 = arith.constant dense<0.000000e+00> : vector<160x16xf32>
    %413 = tpu.matmul %410, %412, %cst_385 {dimension_numbers = #tpu.dot_dimension_numbers<[1], [0], [0], [1], [0, 0, 1, 1], [], []>} : vector<160x8xf32>, vector<8x16xf32>, vector<160x16xf32> -> vector<160x16xf32>
    %414 = arith.addf %409, %413 : vector<160x16xf32>
    %c19 = arith.constant 19 : index
    %c0_386 = arith.constant 0 : index
    %415 = vector.load %arg14[%c19, %c0_386] : memref<232x8xf32, #tpu.memory_space<vmem>>, vector<160x8xf32>
    %416 = vector.extract_strided_slice %399 {offsets = [3, 0, 0], sizes = [1, 8, 16], strides = [1, 1, 1]} : vector<5x8x16xf32> to vector<1x8x16xf32>
    %417 = vector.shape_cast %416 : vector<1x8x16xf32> to vector<8x16xf32>
    %cst_387 = arith.constant dense<0.000000e+00> : vector<160x16xf32>
    %418 = tpu.matmul %415, %417, %cst_387 {dimension_numbers = #tpu.dot_dimension_numbers<[1], [0], [0], [1], [0, 0, 1, 1], [], []>} : vector<160x8xf32>, vector<8x16xf32>, vector<160x16xf32> -> vector<160x16xf32>
    %419 = arith.addf %414, %418 : vector<160x16xf32>
    %c20 = arith.constant 20 : index
    %c0_388 = arith.constant 0 : index
    %420 = vector.load %arg14[%c20, %c0_388] : memref<232x8xf32, #tpu.memory_space<vmem>>, vector<160x8xf32>
    %421 = vector.extract_strided_slice %399 {offsets = [4, 0, 0], sizes = [1, 8, 16], strides = [1, 1, 1]} : vector<5x8x16xf32> to vector<1x8x16xf32>
    %422 = vector.shape_cast %421 : vector<1x8x16xf32> to vector<8x16xf32>
    %cst_389 = arith.constant dense<0.000000e+00> : vector<160x16xf32>
    %423 = tpu.matmul %420, %422, %cst_389 {dimension_numbers = #tpu.dot_dimension_numbers<[1], [0], [0], [1], [0, 0, 1, 1], [], []>} : vector<160x8xf32>, vector<8x16xf32>, vector<160x16xf32> -> vector<160x16xf32>
    %424 = arith.addf %419, %423 : vector<160x16xf32>
    %c2_390 = arith.constant 2 : index
    %c0_391 = arith.constant 0 : index
    %c0_392 = arith.constant 0 : index
    %c0_393 = arith.constant 0 : index
    %425 = vector.load %arg4[%c2_390, %c0_391, %c0_392, %c0_393] : memref<5x5x8x16xf32, #tpu.memory_space<vmem>>, vector<1x5x8x16xf32>
    %426 = vector.shape_cast %425 : vector<1x5x8x16xf32> to vector<5x8x16xf32>
    %c32_394 = arith.constant 32 : index
    %c0_395 = arith.constant 0 : index
    %427 = vector.load %arg14[%c32_394, %c0_395] : memref<232x8xf32, #tpu.memory_space<vmem>>, vector<160x8xf32>
    %428 = vector.extract_strided_slice %426 {offsets = [0, 0, 0], sizes = [1, 8, 16], strides = [1, 1, 1]} : vector<5x8x16xf32> to vector<1x8x16xf32>
    %429 = vector.shape_cast %428 : vector<1x8x16xf32> to vector<8x16xf32>
    %cst_396 = arith.constant dense<0.000000e+00> : vector<160x16xf32>
    %430 = tpu.matmul %427, %429, %cst_396 {dimension_numbers = #tpu.dot_dimension_numbers<[1], [0], [0], [1], [0, 0, 1, 1], [], []>} : vector<160x8xf32>, vector<8x16xf32>, vector<160x16xf32> -> vector<160x16xf32>
    %431 = arith.addf %424, %430 : vector<160x16xf32>
    %c33_397 = arith.constant 33 : index
    %c0_398 = arith.constant 0 : index
    %432 = vector.load %arg14[%c33_397, %c0_398] : memref<232x8xf32, #tpu.memory_space<vmem>>, vector<160x8xf32>
    %433 = vector.extract_strided_slice %426 {offsets = [1, 0, 0], sizes = [1, 8, 16], strides = [1, 1, 1]} : vector<5x8x16xf32> to vector<1x8x16xf32>
    %434 = vector.shape_cast %433 : vector<1x8x16xf32> to vector<8x16xf32>
    %cst_399 = arith.constant dense<0.000000e+00> : vector<160x16xf32>
    %435 = tpu.matmul %432, %434, %cst_399 {dimension_numbers = #tpu.dot_dimension_numbers<[1], [0], [0], [1], [0, 0, 1, 1], [], []>} : vector<160x8xf32>, vector<8x16xf32>, vector<160x16xf32> -> vector<160x16xf32>
    %436 = arith.addf %431, %435 : vector<160x16xf32>
    %c34 = arith.constant 34 : index
    %c0_400 = arith.constant 0 : index
    %437 = vector.load %arg14[%c34, %c0_400] : memref<232x8xf32, #tpu.memory_space<vmem>>, vector<160x8xf32>
    %438 = vector.extract_strided_slice %426 {offsets = [2, 0, 0], sizes = [1, 8, 16], strides = [1, 1, 1]} : vector<5x8x16xf32> to vector<1x8x16xf32>
    %439 = vector.shape_cast %438 : vector<1x8x16xf32> to vector<8x16xf32>
    %cst_401 = arith.constant dense<0.000000e+00> : vector<160x16xf32>
    %440 = tpu.matmul %437, %439, %cst_401 {dimension_numbers = #tpu.dot_dimension_numbers<[1], [0], [0], [1], [0, 0, 1, 1], [], []>} : vector<160x8xf32>, vector<8x16xf32>, vector<160x16xf32> -> vector<160x16xf32>
    %441 = arith.addf %436, %440 : vector<160x16xf32>
    %c35 = arith.constant 35 : index
    %c0_402 = arith.constant 0 : index
    %442 = vector.load %arg14[%c35, %c0_402] : memref<232x8xf32, #tpu.memory_space<vmem>>, vector<160x8xf32>
    %443 = vector.extract_strided_slice %426 {offsets = [3, 0, 0], sizes = [1, 8, 16], strides = [1, 1, 1]} : vector<5x8x16xf32> to vector<1x8x16xf32>
    %444 = vector.shape_cast %443 : vector<1x8x16xf32> to vector<8x16xf32>
    %cst_403 = arith.constant dense<0.000000e+00> : vector<160x16xf32>
    %445 = tpu.matmul %442, %444, %cst_403 {dimension_numbers = #tpu.dot_dimension_numbers<[1], [0], [0], [1], [0, 0, 1, 1], [], []>} : vector<160x8xf32>, vector<8x16xf32>, vector<160x16xf32> -> vector<160x16xf32>
    %446 = arith.addf %441, %445 : vector<160x16xf32>
    %c36 = arith.constant 36 : index
    %c0_404 = arith.constant 0 : index
    %447 = vector.load %arg14[%c36, %c0_404] : memref<232x8xf32, #tpu.memory_space<vmem>>, vector<160x8xf32>
    %448 = vector.extract_strided_slice %426 {offsets = [4, 0, 0], sizes = [1, 8, 16], strides = [1, 1, 1]} : vector<5x8x16xf32> to vector<1x8x16xf32>
    %449 = vector.shape_cast %448 : vector<1x8x16xf32> to vector<8x16xf32>
    %cst_405 = arith.constant dense<0.000000e+00> : vector<160x16xf32>
    %450 = tpu.matmul %447, %449, %cst_405 {dimension_numbers = #tpu.dot_dimension_numbers<[1], [0], [0], [1], [0, 0, 1, 1], [], []>} : vector<160x8xf32>, vector<8x16xf32>, vector<160x16xf32> -> vector<160x16xf32>
    %451 = arith.addf %446, %450 : vector<160x16xf32>
    %c3_406 = arith.constant 3 : index
    %c0_407 = arith.constant 0 : index
    %c0_408 = arith.constant 0 : index
    %c0_409 = arith.constant 0 : index
    %452 = vector.load %arg4[%c3_406, %c0_407, %c0_408, %c0_409] : memref<5x5x8x16xf32, #tpu.memory_space<vmem>>, vector<1x5x8x16xf32>
    %453 = vector.shape_cast %452 : vector<1x5x8x16xf32> to vector<5x8x16xf32>
    %c48_410 = arith.constant 48 : index
    %c0_411 = arith.constant 0 : index
    %454 = vector.load %arg14[%c48_410, %c0_411] : memref<232x8xf32, #tpu.memory_space<vmem>>, vector<160x8xf32>
    %455 = vector.extract_strided_slice %453 {offsets = [0, 0, 0], sizes = [1, 8, 16], strides = [1, 1, 1]} : vector<5x8x16xf32> to vector<1x8x16xf32>
    %456 = vector.shape_cast %455 : vector<1x8x16xf32> to vector<8x16xf32>
    %cst_412 = arith.constant dense<0.000000e+00> : vector<160x16xf32>
    %457 = tpu.matmul %454, %456, %cst_412 {dimension_numbers = #tpu.dot_dimension_numbers<[1], [0], [0], [1], [0, 0, 1, 1], [], []>} : vector<160x8xf32>, vector<8x16xf32>, vector<160x16xf32> -> vector<160x16xf32>
    %458 = arith.addf %451, %457 : vector<160x16xf32>
    %c49 = arith.constant 49 : index
    %c0_413 = arith.constant 0 : index
    %459 = vector.load %arg14[%c49, %c0_413] : memref<232x8xf32, #tpu.memory_space<vmem>>, vector<160x8xf32>
    %460 = vector.extract_strided_slice %453 {offsets = [1, 0, 0], sizes = [1, 8, 16], strides = [1, 1, 1]} : vector<5x8x16xf32> to vector<1x8x16xf32>
    %461 = vector.shape_cast %460 : vector<1x8x16xf32> to vector<8x16xf32>
    %cst_414 = arith.constant dense<0.000000e+00> : vector<160x16xf32>
    %462 = tpu.matmul %459, %461, %cst_414 {dimension_numbers = #tpu.dot_dimension_numbers<[1], [0], [0], [1], [0, 0, 1, 1], [], []>} : vector<160x8xf32>, vector<8x16xf32>, vector<160x16xf32> -> vector<160x16xf32>
    %463 = arith.addf %458, %462 : vector<160x16xf32>
    %c50 = arith.constant 50 : index
    %c0_415 = arith.constant 0 : index
    %464 = vector.load %arg14[%c50, %c0_415] : memref<232x8xf32, #tpu.memory_space<vmem>>, vector<160x8xf32>
    %465 = vector.extract_strided_slice %453 {offsets = [2, 0, 0], sizes = [1, 8, 16], strides = [1, 1, 1]} : vector<5x8x16xf32> to vector<1x8x16xf32>
    %466 = vector.shape_cast %465 : vector<1x8x16xf32> to vector<8x16xf32>
    %cst_416 = arith.constant dense<0.000000e+00> : vector<160x16xf32>
    %467 = tpu.matmul %464, %466, %cst_416 {dimension_numbers = #tpu.dot_dimension_numbers<[1], [0], [0], [1], [0, 0, 1, 1], [], []>} : vector<160x8xf32>, vector<8x16xf32>, vector<160x16xf32> -> vector<160x16xf32>
    %468 = arith.addf %463, %467 : vector<160x16xf32>
    %c51 = arith.constant 51 : index
    %c0_417 = arith.constant 0 : index
    %469 = vector.load %arg14[%c51, %c0_417] : memref<232x8xf32, #tpu.memory_space<vmem>>, vector<160x8xf32>
    %470 = vector.extract_strided_slice %453 {offsets = [3, 0, 0], sizes = [1, 8, 16], strides = [1, 1, 1]} : vector<5x8x16xf32> to vector<1x8x16xf32>
    %471 = vector.shape_cast %470 : vector<1x8x16xf32> to vector<8x16xf32>
    %cst_418 = arith.constant dense<0.000000e+00> : vector<160x16xf32>
    %472 = tpu.matmul %469, %471, %cst_418 {dimension_numbers = #tpu.dot_dimension_numbers<[1], [0], [0], [1], [0, 0, 1, 1], [], []>} : vector<160x8xf32>, vector<8x16xf32>, vector<160x16xf32> -> vector<160x16xf32>
    %473 = arith.addf %468, %472 : vector<160x16xf32>
    %c52 = arith.constant 52 : index
    %c0_419 = arith.constant 0 : index
    %474 = vector.load %arg14[%c52, %c0_419] : memref<232x8xf32, #tpu.memory_space<vmem>>, vector<160x8xf32>
    %475 = vector.extract_strided_slice %453 {offsets = [4, 0, 0], sizes = [1, 8, 16], strides = [1, 1, 1]} : vector<5x8x16xf32> to vector<1x8x16xf32>
    %476 = vector.shape_cast %475 : vector<1x8x16xf32> to vector<8x16xf32>
    %cst_420 = arith.constant dense<0.000000e+00> : vector<160x16xf32>
    %477 = tpu.matmul %474, %476, %cst_420 {dimension_numbers = #tpu.dot_dimension_numbers<[1], [0], [0], [1], [0, 0, 1, 1], [], []>} : vector<160x8xf32>, vector<8x16xf32>, vector<160x16xf32> -> vector<160x16xf32>
    %478 = arith.addf %473, %477 : vector<160x16xf32>
    %c4_421 = arith.constant 4 : index
    %c0_422 = arith.constant 0 : index
    %c0_423 = arith.constant 0 : index
    %c0_424 = arith.constant 0 : index
    %479 = vector.load %arg4[%c4_421, %c0_422, %c0_423, %c0_424] : memref<5x5x8x16xf32, #tpu.memory_space<vmem>>, vector<1x5x8x16xf32>
    %480 = vector.shape_cast %479 : vector<1x5x8x16xf32> to vector<5x8x16xf32>
    %c64_425 = arith.constant 64 : index
    %c0_426 = arith.constant 0 : index
    %481 = vector.load %arg14[%c64_425, %c0_426] : memref<232x8xf32, #tpu.memory_space<vmem>>, vector<160x8xf32>
    %482 = vector.extract_strided_slice %480 {offsets = [0, 0, 0], sizes = [1, 8, 16], strides = [1, 1, 1]} : vector<5x8x16xf32> to vector<1x8x16xf32>
    %483 = vector.shape_cast %482 : vector<1x8x16xf32> to vector<8x16xf32>
    %cst_427 = arith.constant dense<0.000000e+00> : vector<160x16xf32>
    %484 = tpu.matmul %481, %483, %cst_427 {dimension_numbers = #tpu.dot_dimension_numbers<[1], [0], [0], [1], [0, 0, 1, 1], [], []>} : vector<160x8xf32>, vector<8x16xf32>, vector<160x16xf32> -> vector<160x16xf32>
    %485 = arith.addf %478, %484 : vector<160x16xf32>
    %c65_428 = arith.constant 65 : index
    %c0_429 = arith.constant 0 : index
    %486 = vector.load %arg14[%c65_428, %c0_429] : memref<232x8xf32, #tpu.memory_space<vmem>>, vector<160x8xf32>
    %487 = vector.extract_strided_slice %480 {offsets = [1, 0, 0], sizes = [1, 8, 16], strides = [1, 1, 1]} : vector<5x8x16xf32> to vector<1x8x16xf32>
    %488 = vector.shape_cast %487 : vector<1x8x16xf32> to vector<8x16xf32>
    %cst_430 = arith.constant dense<0.000000e+00> : vector<160x16xf32>
    %489 = tpu.matmul %486, %488, %cst_430 {dimension_numbers = #tpu.dot_dimension_numbers<[1], [0], [0], [1], [0, 0, 1, 1], [], []>} : vector<160x8xf32>, vector<8x16xf32>, vector<160x16xf32> -> vector<160x16xf32>
    %490 = arith.addf %485, %489 : vector<160x16xf32>
    %c66 = arith.constant 66 : index
    %c0_431 = arith.constant 0 : index
    %491 = vector.load %arg14[%c66, %c0_431] : memref<232x8xf32, #tpu.memory_space<vmem>>, vector<160x8xf32>
    %492 = vector.extract_strided_slice %480 {offsets = [2, 0, 0], sizes = [1, 8, 16], strides = [1, 1, 1]} : vector<5x8x16xf32> to vector<1x8x16xf32>
    %493 = vector.shape_cast %492 : vector<1x8x16xf32> to vector<8x16xf32>
    %cst_432 = arith.constant dense<0.000000e+00> : vector<160x16xf32>
    %494 = tpu.matmul %491, %493, %cst_432 {dimension_numbers = #tpu.dot_dimension_numbers<[1], [0], [0], [1], [0, 0, 1, 1], [], []>} : vector<160x8xf32>, vector<8x16xf32>, vector<160x16xf32> -> vector<160x16xf32>
    %495 = arith.addf %490, %494 : vector<160x16xf32>
    %c67 = arith.constant 67 : index
    %c0_433 = arith.constant 0 : index
    %496 = vector.load %arg14[%c67, %c0_433] : memref<232x8xf32, #tpu.memory_space<vmem>>, vector<160x8xf32>
    %497 = vector.extract_strided_slice %480 {offsets = [3, 0, 0], sizes = [1, 8, 16], strides = [1, 1, 1]} : vector<5x8x16xf32> to vector<1x8x16xf32>
    %498 = vector.shape_cast %497 : vector<1x8x16xf32> to vector<8x16xf32>
    %cst_434 = arith.constant dense<0.000000e+00> : vector<160x16xf32>
    %499 = tpu.matmul %496, %498, %cst_434 {dimension_numbers = #tpu.dot_dimension_numbers<[1], [0], [0], [1], [0, 0, 1, 1], [], []>} : vector<160x8xf32>, vector<8x16xf32>, vector<160x16xf32> -> vector<160x16xf32>
    %500 = arith.addf %495, %499 : vector<160x16xf32>
    %c68 = arith.constant 68 : index
    %c0_435 = arith.constant 0 : index
    %501 = vector.load %arg14[%c68, %c0_435] : memref<232x8xf32, #tpu.memory_space<vmem>>, vector<160x8xf32>
    %502 = vector.extract_strided_slice %480 {offsets = [4, 0, 0], sizes = [1, 8, 16], strides = [1, 1, 1]} : vector<5x8x16xf32> to vector<1x8x16xf32>
    %503 = vector.shape_cast %502 : vector<1x8x16xf32> to vector<8x16xf32>
    %cst_436 = arith.constant dense<0.000000e+00> : vector<160x16xf32>
    %504 = tpu.matmul %501, %503, %cst_436 {dimension_numbers = #tpu.dot_dimension_numbers<[1], [0], [0], [1], [0, 0, 1, 1], [], []>} : vector<160x8xf32>, vector<8x16xf32>, vector<160x16xf32> -> vector<160x16xf32>
    %505 = arith.addf %500, %504 : vector<160x16xf32>
    %506 = vector.broadcast %1 : vector<1x16xf32> to vector<160x16xf32>
    %507 = arith.addf %505, %506 : vector<160x16xf32>
    %cst_437 = arith.constant 0.000000e+00 : f32
    %508 = vector.broadcast %cst_437 : f32 to vector<160x16xf32>
    %509 = arith.maximumf %507, %508 : vector<160x16xf32>
    %c0_438 = arith.constant 0 : index
    %c0_439 = arith.constant 0 : index
    %510 = vector.load %arg15[%c0_438, %c0_439] : memref<160x16xf32, #tpu.memory_space<vmem>>, vector<160x16xf32>
    tpu.vector_store %arg15[%c0_438, %c0_439], %509 {strides = array<i32>} : memref<160x16xf32, #tpu.memory_space<vmem>>, vector<160x16xf32>,
    %c0_440 = arith.constant 0 : index
    %c0_441 = arith.constant 0 : index
    %511 = tpu.strided_load %arg15[%c0_440, %c0_441] {strides = array<i32: 2, 1>} : memref<160x16xf32, #tpu.memory_space<vmem>>, vector<5x16xf32>
    %c1_442 = arith.constant 1 : index
    %c0_443 = arith.constant 0 : index
    %512 = tpu.strided_load %arg15[%c1_442, %c0_443] {strides = array<i32: 2, 1>} : memref<160x16xf32, #tpu.memory_space<vmem>>, vector<5x16xf32>
    %513 = arith.maximumf %511, %512 : vector<5x16xf32>
    %c16_444 = arith.constant 16 : index
    %c0_445 = arith.constant 0 : index
    %514 = tpu.strided_load %arg15[%c16_444, %c0_445] {strides = array<i32: 2, 1>} : memref<160x16xf32, #tpu.memory_space<vmem>>, vector<5x16xf32>
    %c17_446 = arith.constant 17 : index
    %c0_447 = arith.constant 0 : index
    %515 = tpu.strided_load %arg15[%c17_446, %c0_447] {strides = array<i32: 2, 1>} : memref<160x16xf32, #tpu.memory_space<vmem>>, vector<5x16xf32>
    %516 = arith.maximumf %514, %515 : vector<5x16xf32>
    %517 = arith.maximumf %513, %516 : vector<5x16xf32>
    %c0_448 = arith.constant 0 : index
    %c0_449 = arith.constant 0 : index
    %518 = vector.load %arg16[%c0_448, %c0_449] : memref<256x16xf32, #tpu.memory_space<vmem>>, vector<5x16xf32>
    tpu.vector_store %arg16[%c0_448, %c0_449], %517 {strides = array<i32>} : memref<256x16xf32, #tpu.memory_space<vmem>>, vector<5x16xf32>,
    %c32_450 = arith.constant 32 : index
    %c0_451 = arith.constant 0 : index
    %519 = tpu.strided_load %arg15[%c32_450, %c0_451] {strides = array<i32: 2, 1>} : memref<160x16xf32, #tpu.memory_space<vmem>>, vector<5x16xf32>
    %c33_452 = arith.constant 33 : index
    %c0_453 = arith.constant 0 : index
    %520 = tpu.strided_load %arg15[%c33_452, %c0_453] {strides = array<i32: 2, 1>} : memref<160x16xf32, #tpu.memory_space<vmem>>, vector<5x16xf32>
    %521 = arith.maximumf %519, %520 : vector<5x16xf32>
    %c48_454 = arith.constant 48 : index
    %c0_455 = arith.constant 0 : index
    %522 = tpu.strided_load %arg15[%c48_454, %c0_455] {strides = array<i32: 2, 1>} : memref<160x16xf32, #tpu.memory_space<vmem>>, vector<5x16xf32>
    %c49_456 = arith.constant 49 : index
    %c0_457 = arith.constant 0 : index
    %523 = tpu.strided_load %arg15[%c49_456, %c0_457] {strides = array<i32: 2, 1>} : memref<160x16xf32, #tpu.memory_space<vmem>>, vector<5x16xf32>
    %524 = arith.maximumf %522, %523 : vector<5x16xf32>
    %525 = arith.maximumf %521, %524 : vector<5x16xf32>
    %c5 = arith.constant 5 : index
    %c0_458 = arith.constant 0 : index
    %526 = vector.load %arg16[%c5, %c0_458] : memref<256x16xf32, #tpu.memory_space<vmem>>, vector<5x16xf32>
    tpu.vector_store %arg16[%c5, %c0_458], %525 {strides = array<i32>} : memref<256x16xf32, #tpu.memory_space<vmem>>, vector<5x16xf32>,
    %c64_459 = arith.constant 64 : index
    %c0_460 = arith.constant 0 : index
    %527 = tpu.strided_load %arg15[%c64_459, %c0_460] {strides = array<i32: 2, 1>} : memref<160x16xf32, #tpu.memory_space<vmem>>, vector<5x16xf32>
    %c65_461 = arith.constant 65 : index
    %c0_462 = arith.constant 0 : index
    %528 = tpu.strided_load %arg15[%c65_461, %c0_462] {strides = array<i32: 2, 1>} : memref<160x16xf32, #tpu.memory_space<vmem>>, vector<5x16xf32>
    %529 = arith.maximumf %527, %528 : vector<5x16xf32>
    %c80_463 = arith.constant 80 : index
    %c0_464 = arith.constant 0 : index
    %530 = tpu.strided_load %arg15[%c80_463, %c0_464] {strides = array<i32: 2, 1>} : memref<160x16xf32, #tpu.memory_space<vmem>>, vector<5x16xf32>
    %c81 = arith.constant 81 : index
    %c0_465 = arith.constant 0 : index
    %531 = tpu.strided_load %arg15[%c81, %c0_465] {strides = array<i32: 2, 1>} : memref<160x16xf32, #tpu.memory_space<vmem>>, vector<5x16xf32>
    %532 = arith.maximumf %530, %531 : vector<5x16xf32>
    %533 = arith.maximumf %529, %532 : vector<5x16xf32>
    %c10 = arith.constant 10 : index
    %c0_466 = arith.constant 0 : index
    %534 = vector.load %arg16[%c10, %c0_466] : memref<256x16xf32, #tpu.memory_space<vmem>>, vector<5x16xf32>
    tpu.vector_store %arg16[%c10, %c0_466], %533 {strides = array<i32>} : memref<256x16xf32, #tpu.memory_space<vmem>>, vector<5x16xf32>,
    %c96_467 = arith.constant 96 : index
    %c0_468 = arith.constant 0 : index
    %535 = tpu.strided_load %arg15[%c96_467, %c0_468] {strides = array<i32: 2, 1>} : memref<160x16xf32, #tpu.memory_space<vmem>>, vector<5x16xf32>
    %c97_469 = arith.constant 97 : index
    %c0_470 = arith.constant 0 : index
    %536 = tpu.strided_load %arg15[%c97_469, %c0_470] {strides = array<i32: 2, 1>} : memref<160x16xf32, #tpu.memory_space<vmem>>, vector<5x16xf32>
    %537 = arith.maximumf %535, %536 : vector<5x16xf32>
    %c112_471 = arith.constant 112 : index
    %c0_472 = arith.constant 0 : index
    %538 = tpu.strided_load %arg15[%c112_471, %c0_472] {strides = array<i32: 2, 1>} : memref<160x16xf32, #tpu.memory_space<vmem>>, vector<5x16xf32>
    %c113 = arith.constant 113 : index
    %c0_473 = arith.constant 0 : index
    %539 = tpu.strided_load %arg15[%c113, %c0_473] {strides = array<i32: 2, 1>} : memref<160x16xf32, #tpu.memory_space<vmem>>, vector<5x16xf32>
    %540 = arith.maximumf %538, %539 : vector<5x16xf32>
    %541 = arith.maximumf %537, %540 : vector<5x16xf32>
    %c15 = arith.constant 15 : index
    %c0_474 = arith.constant 0 : index
    %542 = vector.load %arg16[%c15, %c0_474] : memref<256x16xf32, #tpu.memory_space<vmem>>, vector<5x16xf32>
    tpu.vector_store %arg16[%c15, %c0_474], %541 {strides = array<i32>} : memref<256x16xf32, #tpu.memory_space<vmem>>, vector<5x16xf32>,
    %c128_475 = arith.constant 128 : index
    %c0_476 = arith.constant 0 : index
    %543 = tpu.strided_load %arg15[%c128_475, %c0_476] {strides = array<i32: 2, 1>} : memref<160x16xf32, #tpu.memory_space<vmem>>, vector<5x16xf32>
    %c129_477 = arith.constant 129 : index
    %c0_478 = arith.constant 0 : index
    %544 = tpu.strided_load %arg15[%c129_477, %c0_478] {strides = array<i32: 2, 1>} : memref<160x16xf32, #tpu.memory_space<vmem>>, vector<5x16xf32>
    %545 = arith.maximumf %543, %544 : vector<5x16xf32>
    %c144_479 = arith.constant 144 : index
    %c0_480 = arith.constant 0 : index
    %546 = tpu.strided_load %arg15[%c144_479, %c0_480] {strides = array<i32: 2, 1>} : memref<160x16xf32, #tpu.memory_space<vmem>>, vector<5x16xf32>
    %c145 = arith.constant 145 : index
    %c0_481 = arith.constant 0 : index
    %547 = tpu.strided_load %arg15[%c145, %c0_481] {strides = array<i32: 2, 1>} : memref<160x16xf32, #tpu.memory_space<vmem>>, vector<5x16xf32>
    %548 = arith.maximumf %546, %547 : vector<5x16xf32>
    %549 = arith.maximumf %545, %548 : vector<5x16xf32>
    %c20_482 = arith.constant 20 : index
    %c0_483 = arith.constant 0 : index
    %550 = vector.load %arg16[%c20_482, %c0_483] : memref<256x16xf32, #tpu.memory_space<vmem>>, vector<5x16xf32>
    tpu.vector_store %arg16[%c20_482, %c0_483], %549 {strides = array<i32>} : memref<256x16xf32, #tpu.memory_space<vmem>>, vector<5x16xf32>,
    %cst_484 = arith.constant 0.000000e+00 : f32
    %551 = vector.broadcast %cst_484 : f32 to vector<8x128xf32>
    %c0_485 = arith.constant 0 : index
    %c0_486 = arith.constant 0 : index
    %552 = tpu.strided_load %arg16[%c0_485, %c0_486] {strides = array<i32: 32, 1>} : memref<256x16xf32, #tpu.memory_space<vmem>>, vector<8x16xf32>
    %c0_487 = arith.constant 0 : index
    %c0_488 = arith.constant 0 : index
    %c0_489 = arith.constant 0 : index
    %553 = vector.load %arg6[%c0_487, %c0_488, %c0_489] : memref<25x16x128xf32, #tpu.memory_space<vmem>>, vector<1x16x128xf32>
    %554 = vector.shape_cast %553 : vector<1x16x128xf32> to vector<16x128xf32>
    %cst_490 = arith.constant dense<0.000000e+00> : vector<8x128xf32>
    %555 = tpu.matmul %552, %554, %cst_490 {dimension_numbers = #tpu.dot_dimension_numbers<[1], [0], [0], [1], [0, 0, 1, 1], [], []>} : vector<8x16xf32>, vector<16x128xf32>, vector<8x128xf32> -> vector<8x128xf32>
    %556 = arith.addf %551, %555 : vector<8x128xf32>
    %c1_491 = arith.constant 1 : index
    %c0_492 = arith.constant 0 : index
    %557 = tpu.strided_load %arg16[%c1_491, %c0_492] {strides = array<i32: 32, 1>} : memref<256x16xf32, #tpu.memory_space<vmem>>, vector<8x16xf32>
    %c1_493 = arith.constant 1 : index
    %c0_494 = arith.constant 0 : index
    %c0_495 = arith.constant 0 : index
    %558 = vector.load %arg6[%c1_493, %c0_494, %c0_495] : memref<25x16x128xf32, #tpu.memory_space<vmem>>, vector<1x16x128xf32>
    %559 = vector.shape_cast %558 : vector<1x16x128xf32> to vector<16x128xf32>
    %cst_496 = arith.constant dense<0.000000e+00> : vector<8x128xf32>
    %560 = tpu.matmul %557, %559, %cst_496 {dimension_numbers = #tpu.dot_dimension_numbers<[1], [0], [0], [1], [0, 0, 1, 1], [], []>} : vector<8x16xf32>, vector<16x128xf32>, vector<8x128xf32> -> vector<8x128xf32>
    %561 = arith.addf %556, %560 : vector<8x128xf32>
    %c2_497 = arith.constant 2 : index
    %c0_498 = arith.constant 0 : index
    %562 = tpu.strided_load %arg16[%c2_497, %c0_498] {strides = array<i32: 32, 1>} : memref<256x16xf32, #tpu.memory_space<vmem>>, vector<8x16xf32>
    %c2_499 = arith.constant 2 : index
    %c0_500 = arith.constant 0 : index
    %c0_501 = arith.constant 0 : index
    %563 = vector.load %arg6[%c2_499, %c0_500, %c0_501] : memref<25x16x128xf32, #tpu.memory_space<vmem>>, vector<1x16x128xf32>
    %564 = vector.shape_cast %563 : vector<1x16x128xf32> to vector<16x128xf32>
    %cst_502 = arith.constant dense<0.000000e+00> : vector<8x128xf32>
    %565 = tpu.matmul %562, %564, %cst_502 {dimension_numbers = #tpu.dot_dimension_numbers<[1], [0], [0], [1], [0, 0, 1, 1], [], []>} : vector<8x16xf32>, vector<16x128xf32>, vector<8x128xf32> -> vector<8x128xf32>
    %566 = arith.addf %561, %565 : vector<8x128xf32>
    %c3_503 = arith.constant 3 : index
    %c0_504 = arith.constant 0 : index
    %567 = tpu.strided_load %arg16[%c3_503, %c0_504] {strides = array<i32: 32, 1>} : memref<256x16xf32, #tpu.memory_space<vmem>>, vector<8x16xf32>
    %c3_505 = arith.constant 3 : index
    %c0_506 = arith.constant 0 : index
    %c0_507 = arith.constant 0 : index
    %568 = vector.load %arg6[%c3_505, %c0_506, %c0_507] : memref<25x16x128xf32, #tpu.memory_space<vmem>>, vector<1x16x128xf32>
    %569 = vector.shape_cast %568 : vector<1x16x128xf32> to vector<16x128xf32>
    %cst_508 = arith.constant dense<0.000000e+00> : vector<8x128xf32>
    %570 = tpu.matmul %567, %569, %cst_508 {dimension_numbers = #tpu.dot_dimension_numbers<[1], [0], [0], [1], [0, 0, 1, 1], [], []>} : vector<8x16xf32>, vector<16x128xf32>, vector<8x128xf32> -> vector<8x128xf32>
    %571 = arith.addf %566, %570 : vector<8x128xf32>
    %c4_509 = arith.constant 4 : index
    %c0_510 = arith.constant 0 : index
    %572 = tpu.strided_load %arg16[%c4_509, %c0_510] {strides = array<i32: 32, 1>} : memref<256x16xf32, #tpu.memory_space<vmem>>, vector<8x16xf32>
    %c4_511 = arith.constant 4 : index
    %c0_512 = arith.constant 0 : index
    %c0_513 = arith.constant 0 : index
    %573 = vector.load %arg6[%c4_511, %c0_512, %c0_513] : memref<25x16x128xf32, #tpu.memory_space<vmem>>, vector<1x16x128xf32>
    %574 = vector.shape_cast %573 : vector<1x16x128xf32> to vector<16x128xf32>
    %cst_514 = arith.constant dense<0.000000e+00> : vector<8x128xf32>
    %575 = tpu.matmul %572, %574, %cst_514 {dimension_numbers = #tpu.dot_dimension_numbers<[1], [0], [0], [1], [0, 0, 1, 1], [], []>} : vector<8x16xf32>, vector<16x128xf32>, vector<8x128xf32> -> vector<8x128xf32>
    %576 = arith.addf %571, %575 : vector<8x128xf32>
    %c5_515 = arith.constant 5 : index
    %c0_516 = arith.constant 0 : index
    %577 = tpu.strided_load %arg16[%c5_515, %c0_516] {strides = array<i32: 32, 1>} : memref<256x16xf32, #tpu.memory_space<vmem>>, vector<8x16xf32>
    %c5_517 = arith.constant 5 : index
    %c0_518 = arith.constant 0 : index
    %c0_519 = arith.constant 0 : index
    %578 = vector.load %arg6[%c5_517, %c0_518, %c0_519] : memref<25x16x128xf32, #tpu.memory_space<vmem>>, vector<1x16x128xf32>
    %579 = vector.shape_cast %578 : vector<1x16x128xf32> to vector<16x128xf32>
    %cst_520 = arith.constant dense<0.000000e+00> : vector<8x128xf32>
    %580 = tpu.matmul %577, %579, %cst_520 {dimension_numbers = #tpu.dot_dimension_numbers<[1], [0], [0], [1], [0, 0, 1, 1], [], []>} : vector<8x16xf32>, vector<16x128xf32>, vector<8x128xf32> -> vector<8x128xf32>
    %581 = arith.addf %576, %580 : vector<8x128xf32>
    %c6 = arith.constant 6 : index
    %c0_521 = arith.constant 0 : index
    %582 = tpu.strided_load %arg16[%c6, %c0_521] {strides = array<i32: 32, 1>} : memref<256x16xf32, #tpu.memory_space<vmem>>, vector<8x16xf32>
    %c6_522 = arith.constant 6 : index
    %c0_523 = arith.constant 0 : index
    %c0_524 = arith.constant 0 : index
    %583 = vector.load %arg6[%c6_522, %c0_523, %c0_524] : memref<25x16x128xf32, #tpu.memory_space<vmem>>, vector<1x16x128xf32>
    %584 = vector.shape_cast %583 : vector<1x16x128xf32> to vector<16x128xf32>
    %cst_525 = arith.constant dense<0.000000e+00> : vector<8x128xf32>
    %585 = tpu.matmul %582, %584, %cst_525 {dimension_numbers = #tpu.dot_dimension_numbers<[1], [0], [0], [1], [0, 0, 1, 1], [], []>} : vector<8x16xf32>, vector<16x128xf32>, vector<8x128xf32> -> vector<8x128xf32>
    %586 = arith.addf %581, %585 : vector<8x128xf32>
    %c7 = arith.constant 7 : index
    %c0_526 = arith.constant 0 : index
    %587 = tpu.strided_load %arg16[%c7, %c0_526] {strides = array<i32: 32, 1>} : memref<256x16xf32, #tpu.memory_space<vmem>>, vector<8x16xf32>
    %c7_527 = arith.constant 7 : index
    %c0_528 = arith.constant 0 : index
    %c0_529 = arith.constant 0 : index
    %588 = vector.load %arg6[%c7_527, %c0_528, %c0_529] : memref<25x16x128xf32, #tpu.memory_space<vmem>>, vector<1x16x128xf32>
    %589 = vector.shape_cast %588 : vector<1x16x128xf32> to vector<16x128xf32>
    %cst_530 = arith.constant dense<0.000000e+00> : vector<8x128xf32>
    %590 = tpu.matmul %587, %589, %cst_530 {dimension_numbers = #tpu.dot_dimension_numbers<[1], [0], [0], [1], [0, 0, 1, 1], [], []>} : vector<8x16xf32>, vector<16x128xf32>, vector<8x128xf32> -> vector<8x128xf32>
    %591 = arith.addf %586, %590 : vector<8x128xf32>
    %c8 = arith.constant 8 : index
    %c0_531 = arith.constant 0 : index
    %592 = tpu.strided_load %arg16[%c8, %c0_531] {strides = array<i32: 32, 1>} : memref<256x16xf32, #tpu.memory_space<vmem>>, vector<8x16xf32>
    %c8_532 = arith.constant 8 : index
    %c0_533 = arith.constant 0 : index
    %c0_534 = arith.constant 0 : index
    %593 = vector.load %arg6[%c8_532, %c0_533, %c0_534] : memref<25x16x128xf32, #tpu.memory_space<vmem>>, vector<1x16x128xf32>
    %594 = vector.shape_cast %593 : vector<1x16x128xf32> to vector<16x128xf32>
    %cst_535 = arith.constant dense<0.000000e+00> : vector<8x128xf32>
    %595 = tpu.matmul %592, %594, %cst_535 {dimension_numbers = #tpu.dot_dimension_numbers<[1], [0], [0], [1], [0, 0, 1, 1], [], []>} : vector<8x16xf32>, vector<16x128xf32>, vector<8x128xf32> -> vector<8x128xf32>
    %596 = arith.addf %591, %595 : vector<8x128xf32>
    %c9 = arith.constant 9 : index
    %c0_536 = arith.constant 0 : index
    %597 = tpu.strided_load %arg16[%c9, %c0_536] {strides = array<i32: 32, 1>} : memref<256x16xf32, #tpu.memory_space<vmem>>, vector<8x16xf32>
    %c9_537 = arith.constant 9 : index
    %c0_538 = arith.constant 0 : index
    %c0_539 = arith.constant 0 : index
    %598 = vector.load %arg6[%c9_537, %c0_538, %c0_539] : memref<25x16x128xf32, #tpu.memory_space<vmem>>, vector<1x16x128xf32>
    %599 = vector.shape_cast %598 : vector<1x16x128xf32> to vector<16x128xf32>
    %cst_540 = arith.constant dense<0.000000e+00> : vector<8x128xf32>
    %600 = tpu.matmul %597, %599, %cst_540 {dimension_numbers = #tpu.dot_dimension_numbers<[1], [0], [0], [1], [0, 0, 1, 1], [], []>} : vector<8x16xf32>, vector<16x128xf32>, vector<8x128xf32> -> vector<8x128xf32>
    %601 = arith.addf %596, %600 : vector<8x128xf32>
    %c10_541 = arith.constant 10 : index
    %c0_542 = arith.constant 0 : index
    %602 = tpu.strided_load %arg16[%c10_541, %c0_542] {strides = array<i32: 32, 1>} : memref<256x16xf32, #tpu.memory_space<vmem>>, vector<8x16xf32>
    %c10_543 = arith.constant 10 : index
    %c0_544 = arith.constant 0 : index
    %c0_545 = arith.constant 0 : index
    %603 = vector.load %arg6[%c10_543, %c0_544, %c0_545] : memref<25x16x128xf32, #tpu.memory_space<vmem>>, vector<1x16x128xf32>
    %604 = vector.shape_cast %603 : vector<1x16x128xf32> to vector<16x128xf32>
    %cst_546 = arith.constant dense<0.000000e+00> : vector<8x128xf32>
    %605 = tpu.matmul %602, %604, %cst_546 {dimension_numbers = #tpu.dot_dimension_numbers<[1], [0], [0], [1], [0, 0, 1, 1], [], []>} : vector<8x16xf32>, vector<16x128xf32>, vector<8x128xf32> -> vector<8x128xf32>
    %606 = arith.addf %601, %605 : vector<8x128xf32>
    %c11 = arith.constant 11 : index
    %c0_547 = arith.constant 0 : index
    %607 = tpu.strided_load %arg16[%c11, %c0_547] {strides = array<i32: 32, 1>} : memref<256x16xf32, #tpu.memory_space<vmem>>, vector<8x16xf32>
    %c11_548 = arith.constant 11 : index
    %c0_549 = arith.constant 0 : index
    %c0_550 = arith.constant 0 : index
    %608 = vector.load %arg6[%c11_548, %c0_549, %c0_550] : memref<25x16x128xf32, #tpu.memory_space<vmem>>, vector<1x16x128xf32>
    %609 = vector.shape_cast %608 : vector<1x16x128xf32> to vector<16x128xf32>
    %cst_551 = arith.constant dense<0.000000e+00> : vector<8x128xf32>
    %610 = tpu.matmul %607, %609, %cst_551 {dimension_numbers = #tpu.dot_dimension_numbers<[1], [0], [0], [1], [0, 0, 1, 1], [], []>} : vector<8x16xf32>, vector<16x128xf32>, vector<8x128xf32> -> vector<8x128xf32>
    %611 = arith.addf %606, %610 : vector<8x128xf32>
    %c12 = arith.constant 12 : index
    %c0_552 = arith.constant 0 : index
    %612 = tpu.strided_load %arg16[%c12, %c0_552] {strides = array<i32: 32, 1>} : memref<256x16xf32, #tpu.memory_space<vmem>>, vector<8x16xf32>
    %c12_553 = arith.constant 12 : index
    %c0_554 = arith.constant 0 : index
    %c0_555 = arith.constant 0 : index
    %613 = vector.load %arg6[%c12_553, %c0_554, %c0_555] : memref<25x16x128xf32, #tpu.memory_space<vmem>>, vector<1x16x128xf32>
    %614 = vector.shape_cast %613 : vector<1x16x128xf32> to vector<16x128xf32>
    %cst_556 = arith.constant dense<0.000000e+00> : vector<8x128xf32>
    %615 = tpu.matmul %612, %614, %cst_556 {dimension_numbers = #tpu.dot_dimension_numbers<[1], [0], [0], [1], [0, 0, 1, 1], [], []>} : vector<8x16xf32>, vector<16x128xf32>, vector<8x128xf32> -> vector<8x128xf32>
    %616 = arith.addf %611, %615 : vector<8x128xf32>
    %c13 = arith.constant 13 : index
    %c0_557 = arith.constant 0 : index
    %617 = tpu.strided_load %arg16[%c13, %c0_557] {strides = array<i32: 32, 1>} : memref<256x16xf32, #tpu.memory_space<vmem>>, vector<8x16xf32>
    %c13_558 = arith.constant 13 : index
    %c0_559 = arith.constant 0 : index
    %c0_560 = arith.constant 0 : index
    %618 = vector.load %arg6[%c13_558, %c0_559, %c0_560] : memref<25x16x128xf32, #tpu.memory_space<vmem>>, vector<1x16x128xf32>
    %619 = vector.shape_cast %618 : vector<1x16x128xf32> to vector<16x128xf32>
    %cst_561 = arith.constant dense<0.000000e+00> : vector<8x128xf32>
    %620 = tpu.matmul %617, %619, %cst_561 {dimension_numbers = #tpu.dot_dimension_numbers<[1], [0], [0], [1], [0, 0, 1, 1], [], []>} : vector<8x16xf32>, vector<16x128xf32>, vector<8x128xf32> -> vector<8x128xf32>
    %621 = arith.addf %616, %620 : vector<8x128xf32>
    %c14 = arith.constant 14 : index
    %c0_562 = arith.constant 0 : index
    %622 = tpu.strided_load %arg16[%c14, %c0_562] {strides = array<i32: 32, 1>} : memref<256x16xf32, #tpu.memory_space<vmem>>, vector<8x16xf32>
    %c14_563 = arith.constant 14 : index
    %c0_564 = arith.constant 0 : index
    %c0_565 = arith.constant 0 : index
    %623 = vector.load %arg6[%c14_563, %c0_564, %c0_565] : memref<25x16x128xf32, #tpu.memory_space<vmem>>, vector<1x16x128xf32>
    %624 = vector.shape_cast %623 : vector<1x16x128xf32> to vector<16x128xf32>
    %cst_566 = arith.constant dense<0.000000e+00> : vector<8x128xf32>
    %625 = tpu.matmul %622, %624, %cst_566 {dimension_numbers = #tpu.dot_dimension_numbers<[1], [0], [0], [1], [0, 0, 1, 1], [], []>} : vector<8x16xf32>, vector<16x128xf32>, vector<8x128xf32> -> vector<8x128xf32>
    %626 = arith.addf %621, %625 : vector<8x128xf32>
    %c15_567 = arith.constant 15 : index
    %c0_568 = arith.constant 0 : index
    %627 = tpu.strided_load %arg16[%c15_567, %c0_568] {strides = array<i32: 32, 1>} : memref<256x16xf32, #tpu.memory_space<vmem>>, vector<8x16xf32>
    %c15_569 = arith.constant 15 : index
    %c0_570 = arith.constant 0 : index
    %c0_571 = arith.constant 0 : index
    %628 = vector.load %arg6[%c15_569, %c0_570, %c0_571] : memref<25x16x128xf32, #tpu.memory_space<vmem>>, vector<1x16x128xf32>
    %629 = vector.shape_cast %628 : vector<1x16x128xf32> to vector<16x128xf32>
    %cst_572 = arith.constant dense<0.000000e+00> : vector<8x128xf32>
    %630 = tpu.matmul %627, %629, %cst_572 {dimension_numbers = #tpu.dot_dimension_numbers<[1], [0], [0], [1], [0, 0, 1, 1], [], []>} : vector<8x16xf32>, vector<16x128xf32>, vector<8x128xf32> -> vector<8x128xf32>
    %631 = arith.addf %626, %630 : vector<8x128xf32>
    %c16_573 = arith.constant 16 : index
    %c0_574 = arith.constant 0 : index
    %632 = tpu.strided_load %arg16[%c16_573, %c0_574] {strides = array<i32: 32, 1>} : memref<256x16xf32, #tpu.memory_space<vmem>>, vector<8x16xf32>
    %c16_575 = arith.constant 16 : index
    %c0_576 = arith.constant 0 : index
    %c0_577 = arith.constant 0 : index
    %633 = vector.load %arg6[%c16_575, %c0_576, %c0_577] : memref<25x16x128xf32, #tpu.memory_space<vmem>>, vector<1x16x128xf32>
    %634 = vector.shape_cast %633 : vector<1x16x128xf32> to vector<16x128xf32>
    %cst_578 = arith.constant dense<0.000000e+00> : vector<8x128xf32>
    %635 = tpu.matmul %632, %634, %cst_578 {dimension_numbers = #tpu.dot_dimension_numbers<[1], [0], [0], [1], [0, 0, 1, 1], [], []>} : vector<8x16xf32>, vector<16x128xf32>, vector<8x128xf32> -> vector<8x128xf32>
    %636 = arith.addf %631, %635 : vector<8x128xf32>
    %c17_579 = arith.constant 17 : index
    %c0_580 = arith.constant 0 : index
    %637 = tpu.strided_load %arg16[%c17_579, %c0_580] {strides = array<i32: 32, 1>} : memref<256x16xf32, #tpu.memory_space<vmem>>, vector<8x16xf32>
    %c17_581 = arith.constant 17 : index
    %c0_582 = arith.constant 0 : index
    %c0_583 = arith.constant 0 : index
    %638 = vector.load %arg6[%c17_581, %c0_582, %c0_583] : memref<25x16x128xf32, #tpu.memory_space<vmem>>, vector<1x16x128xf32>
    %639 = vector.shape_cast %638 : vector<1x16x128xf32> to vector<16x128xf32>
    %cst_584 = arith.constant dense<0.000000e+00> : vector<8x128xf32>
    %640 = tpu.matmul %637, %639, %cst_584 {dimension_numbers = #tpu.dot_dimension_numbers<[1], [0], [0], [1], [0, 0, 1, 1], [], []>} : vector<8x16xf32>, vector<16x128xf32>, vector<8x128xf32> -> vector<8x128xf32>
    %641 = arith.addf %636, %640 : vector<8x128xf32>
    %c18_585 = arith.constant 18 : index
    %c0_586 = arith.constant 0 : index
    %642 = tpu.strided_load %arg16[%c18_585, %c0_586] {strides = array<i32: 32, 1>} : memref<256x16xf32, #tpu.memory_space<vmem>>, vector<8x16xf32>
    %c18_587 = arith.constant 18 : index
    %c0_588 = arith.constant 0 : index
    %c0_589 = arith.constant 0 : index
    %643 = vector.load %arg6[%c18_587, %c0_588, %c0_589] : memref<25x16x128xf32, #tpu.memory_space<vmem>>, vector<1x16x128xf32>
    %644 = vector.shape_cast %643 : vector<1x16x128xf32> to vector<16x128xf32>
    %cst_590 = arith.constant dense<0.000000e+00> : vector<8x128xf32>
    %645 = tpu.matmul %642, %644, %cst_590 {dimension_numbers = #tpu.dot_dimension_numbers<[1], [0], [0], [1], [0, 0, 1, 1], [], []>} : vector<8x16xf32>, vector<16x128xf32>, vector<8x128xf32> -> vector<8x128xf32>
    %646 = arith.addf %641, %645 : vector<8x128xf32>
    %c19_591 = arith.constant 19 : index
    %c0_592 = arith.constant 0 : index
    %647 = tpu.strided_load %arg16[%c19_591, %c0_592] {strides = array<i32: 32, 1>} : memref<256x16xf32, #tpu.memory_space<vmem>>, vector<8x16xf32>
    %c19_593 = arith.constant 19 : index
    %c0_594 = arith.constant 0 : index
    %c0_595 = arith.constant 0 : index
    %648 = vector.load %arg6[%c19_593, %c0_594, %c0_595] : memref<25x16x128xf32, #tpu.memory_space<vmem>>, vector<1x16x128xf32>
    %649 = vector.shape_cast %648 : vector<1x16x128xf32> to vector<16x128xf32>
    %cst_596 = arith.constant dense<0.000000e+00> : vector<8x128xf32>
    %650 = tpu.matmul %647, %649, %cst_596 {dimension_numbers = #tpu.dot_dimension_numbers<[1], [0], [0], [1], [0, 0, 1, 1], [], []>} : vector<8x16xf32>, vector<16x128xf32>, vector<8x128xf32> -> vector<8x128xf32>
    %651 = arith.addf %646, %650 : vector<8x128xf32>
    %c20_597 = arith.constant 20 : index
    %c0_598 = arith.constant 0 : index
    %652 = tpu.strided_load %arg16[%c20_597, %c0_598] {strides = array<i32: 32, 1>} : memref<256x16xf32, #tpu.memory_space<vmem>>, vector<8x16xf32>
    %c20_599 = arith.constant 20 : index
    %c0_600 = arith.constant 0 : index
    %c0_601 = arith.constant 0 : index
    %653 = vector.load %arg6[%c20_599, %c0_600, %c0_601] : memref<25x16x128xf32, #tpu.memory_space<vmem>>, vector<1x16x128xf32>
    %654 = vector.shape_cast %653 : vector<1x16x128xf32> to vector<16x128xf32>
    %cst_602 = arith.constant dense<0.000000e+00> : vector<8x128xf32>
    %655 = tpu.matmul %652, %654, %cst_602 {dimension_numbers = #tpu.dot_dimension_numbers<[1], [0], [0], [1], [0, 0, 1, 1], [], []>} : vector<8x16xf32>, vector<16x128xf32>, vector<8x128xf32> -> vector<8x128xf32>
    %656 = arith.addf %651, %655 : vector<8x128xf32>
    %c21 = arith.constant 21 : index
    %c0_603 = arith.constant 0 : index
    %657 = tpu.strided_load %arg16[%c21, %c0_603] {strides = array<i32: 32, 1>} : memref<256x16xf32, #tpu.memory_space<vmem>>, vector<8x16xf32>
    %c21_604 = arith.constant 21 : index
    %c0_605 = arith.constant 0 : index
    %c0_606 = arith.constant 0 : index
    %658 = vector.load %arg6[%c21_604, %c0_605, %c0_606] : memref<25x16x128xf32, #tpu.memory_space<vmem>>, vector<1x16x128xf32>
    %659 = vector.shape_cast %658 : vector<1x16x128xf32> to vector<16x128xf32>
    %cst_607 = arith.constant dense<0.000000e+00> : vector<8x128xf32>
    %660 = tpu.matmul %657, %659, %cst_607 {dimension_numbers = #tpu.dot_dimension_numbers<[1], [0], [0], [1], [0, 0, 1, 1], [], []>} : vector<8x16xf32>, vector<16x128xf32>, vector<8x128xf32> -> vector<8x128xf32>
    %661 = arith.addf %656, %660 : vector<8x128xf32>
    %c22 = arith.constant 22 : index
    %c0_608 = arith.constant 0 : index
    %662 = tpu.strided_load %arg16[%c22, %c0_608] {strides = array<i32: 32, 1>} : memref<256x16xf32, #tpu.memory_space<vmem>>, vector<8x16xf32>
    %c22_609 = arith.constant 22 : index
    %c0_610 = arith.constant 0 : index
    %c0_611 = arith.constant 0 : index
    %663 = vector.load %arg6[%c22_609, %c0_610, %c0_611] : memref<25x16x128xf32, #tpu.memory_space<vmem>>, vector<1x16x128xf32>
    %664 = vector.shape_cast %663 : vector<1x16x128xf32> to vector<16x128xf32>
    %cst_612 = arith.constant dense<0.000000e+00> : vector<8x128xf32>
    %665 = tpu.matmul %662, %664, %cst_612 {dimension_numbers = #tpu.dot_dimension_numbers<[1], [0], [0], [1], [0, 0, 1, 1], [], []>} : vector<8x16xf32>, vector<16x128xf32>, vector<8x128xf32> -> vector<8x128xf32>
    %666 = arith.addf %661, %665 : vector<8x128xf32>
    %c23 = arith.constant 23 : index
    %c0_613 = arith.constant 0 : index
    %667 = tpu.strided_load %arg16[%c23, %c0_613] {strides = array<i32: 32, 1>} : memref<256x16xf32, #tpu.memory_space<vmem>>, vector<8x16xf32>
    %c23_614 = arith.constant 23 : index
    %c0_615 = arith.constant 0 : index
    %c0_616 = arith.constant 0 : index
    %668 = vector.load %arg6[%c23_614, %c0_615, %c0_616] : memref<25x16x128xf32, #tpu.memory_space<vmem>>, vector<1x16x128xf32>
    %669 = vector.shape_cast %668 : vector<1x16x128xf32> to vector<16x128xf32>
    %cst_617 = arith.constant dense<0.000000e+00> : vector<8x128xf32>
    %670 = tpu.matmul %667, %669, %cst_617 {dimension_numbers = #tpu.dot_dimension_numbers<[1], [0], [0], [1], [0, 0, 1, 1], [], []>} : vector<8x16xf32>, vector<16x128xf32>, vector<8x128xf32> -> vector<8x128xf32>
    %671 = arith.addf %666, %670 : vector<8x128xf32>
    %c24 = arith.constant 24 : index
    %c0_618 = arith.constant 0 : index
    %672 = tpu.strided_load %arg16[%c24, %c0_618] {strides = array<i32: 32, 1>} : memref<256x16xf32, #tpu.memory_space<vmem>>, vector<8x16xf32>
    %c24_619 = arith.constant 24 : index
    %c0_620 = arith.constant 0 : index
    %c0_621 = arith.constant 0 : index
    %673 = vector.load %arg6[%c24_619, %c0_620, %c0_621] : memref<25x16x128xf32, #tpu.memory_space<vmem>>, vector<1x16x128xf32>
    %674 = vector.shape_cast %673 : vector<1x16x128xf32> to vector<16x128xf32>
    %cst_622 = arith.constant dense<0.000000e+00> : vector<8x128xf32>
    %675 = tpu.matmul %672, %674, %cst_622 {dimension_numbers = #tpu.dot_dimension_numbers<[1], [0], [0], [1], [0, 0, 1, 1], [], []>} : vector<8x16xf32>, vector<16x128xf32>, vector<8x128xf32> -> vector<8x128xf32>
    %676 = arith.addf %671, %675 : vector<8x128xf32>
    %c0_623 = arith.constant 0 : index
    %c0_624 = arith.constant 0 : index
    %677 = vector.load %arg7[%c0_623, %c0_624] : memref<1x128xf32, #tpu.memory_space<vmem>>, vector<1x128xf32>
    %678 = vector.broadcast %677 : vector<1x128xf32> to vector<8x128xf32>
    %679 = arith.addf %676, %678 : vector<8x128xf32>
    %cst_625 = arith.constant 0.000000e+00 : f32
    %680 = vector.broadcast %cst_625 : f32 to vector<8x128xf32>
    %681 = arith.maximumf %679, %680 : vector<8x128xf32>
    %c0_626 = arith.constant 0 : index
    %c0_627 = arith.constant 0 : index
    %682 = vector.load %arg8[%c0_626, %c0_627] : memref<128x128xf32, #tpu.memory_space<vmem>>, vector<128x128xf32>
    %cst_628 = arith.constant dense<0.000000e+00> : vector<8x128xf32>
    %683 = tpu.matmul %681, %682, %cst_628 {dimension_numbers = #tpu.dot_dimension_numbers<[1], [0], [0], [1], [0, 0, 1, 1], [], []>} : vector<8x128xf32>, vector<128x128xf32>, vector<8x128xf32> -> vector<8x128xf32>
    %c0_629 = arith.constant 0 : index
    %c0_630 = arith.constant 0 : index
    %684 = vector.load %arg9[%c0_629, %c0_630] : memref<1x128xf32, #tpu.memory_space<vmem>>, vector<1x128xf32>
    %685 = vector.broadcast %684 : vector<1x128xf32> to vector<8x128xf32>
    %686 = arith.addf %683, %685 : vector<8x128xf32>
    %cst_631 = arith.constant 0.000000e+00 : f32
    %687 = vector.broadcast %cst_631 : f32 to vector<8x128xf32>
    %688 = arith.maximumf %686, %687 : vector<8x128xf32>
    %c0_632 = arith.constant 0 : index
    %c0_633 = arith.constant 0 : index
    %689 = vector.load %arg10[%c0_632, %c0_633] : memref<128x128xf32, #tpu.memory_space<vmem>>, vector<128x128xf32>
    %cst_634 = arith.constant dense<0.000000e+00> : vector<8x128xf32>
    %690 = tpu.matmul %688, %689, %cst_634 {dimension_numbers = #tpu.dot_dimension_numbers<[1], [0], [0], [1], [0, 0, 1, 1], [], []>} : vector<8x128xf32>, vector<128x128xf32>, vector<8x128xf32> -> vector<8x128xf32>
    %c0_635 = arith.constant 0 : index
    %c0_636 = arith.constant 0 : index
    %691 = vector.load %arg11[%c0_635, %c0_636] : memref<1x128xf32, #tpu.memory_space<vmem>>, vector<1x128xf32>
    %692 = vector.broadcast %691 : vector<1x128xf32> to vector<8x128xf32>
    %693 = arith.addf %690, %692 : vector<8x128xf32>
    %c0_637 = arith.constant 0 : index
    %c0_638 = arith.constant 0 : index
    %c0_639 = arith.constant 0 : index
    %694 = vector.load %arg12[%c0_637, %c0_638, %c0_639] : memref<1x8x128xf32, #tpu.memory_space<vmem>>, vector<1x8x128xf32>
    %695 = vector.shape_cast %694 : vector<1x8x128xf32> to vector<8x128xf32>
    %696 = vector.shape_cast %693 : vector<8x128xf32> to vector<1x8x128xf32>
    tpu.vector_store %arg12[%c0_637, %c0_638, %c0_639], %696 {strides = array<i32>} : memref<1x8x128xf32, #tpu.memory_space<vmem>>, vector<1x8x128xf32>,
    return
  }
  func.func @transform_0(%arg0: i32) -> (i32, i32, i32) {
    %c0_i32 = arith.constant 0 : i32
    %c0_i32_0 = arith.constant 0 : i32
    %c0_i32_1 = arith.constant 0 : i32
    return %arg0, %c0_i32, %c0_i32_0 : i32, i32, i32
  }
  func.func @transform_1(%arg0: i32) -> (i32, i32, i32) {
    %c0_i32 = arith.constant 0 : i32
    %c0_i32_0 = arith.constant 0 : i32
    %c0_i32_1 = arith.constant 0 : i32
    %c0_i32_2 = arith.constant 0 : i32
    return %c0_i32, %c0_i32_0, %c0_i32_1 : i32, i32, i32
  }
  func.func @transform_2(%arg0: i32) -> (i32, i32) {
    %c0_i32 = arith.constant 0 : i32
    %c0_i32_0 = arith.constant 0 : i32
    %c0_i32_1 = arith.constant 0 : i32
    return %c0_i32, %c0_i32_0 : i32, i32
  }
  func.func @transform_3(%arg0: i32) -> (i32, i32, i32, i32) {
    %c0_i32 = arith.constant 0 : i32
    %c0_i32_0 = arith.constant 0 : i32
    %c0_i32_1 = arith.constant 0 : i32
    %c0_i32_2 = arith.constant 0 : i32
    %c0_i32_3 = arith.constant 0 : i32
    return %c0_i32, %c0_i32_0, %c0_i32_1, %c0_i32_2 : i32, i32, i32, i32
  }
  func.func @transform_4(%arg0: i32) -> (i32, i32) {
    %c0_i32 = arith.constant 0 : i32
    %c0_i32_0 = arith.constant 0 : i32
    %c0_i32_1 = arith.constant 0 : i32
    return %c0_i32, %c0_i32_0 : i32, i32
  }
  func.func @transform_5(%arg0: i32) -> (i32, i32, i32) {
    %c0_i32 = arith.constant 0 : i32
    %c0_i32_0 = arith.constant 0 : i32
    %c0_i32_1 = arith.constant 0 : i32
    %c0_i32_2 = arith.constant 0 : i32
    return %c0_i32, %c0_i32_0, %c0_i32_1 : i32, i32, i32
  }
  func.func @transform_6(%arg0: i32) -> (i32, i32) {
    %c0_i32 = arith.constant 0 : i32
    %c0_i32_0 = arith.constant 0 : i32
    %c0_i32_1 = arith.constant 0 : i32
    return %c0_i32, %c0_i32_0 : i32, i32
  }
  func.func @transform_7(%arg0: i32) -> (i32, i32) {
    %c0_i32 = arith.constant 0 : i32
    %c0_i32_0 = arith.constant 0 : i32
    %c0_i32_1 = arith.constant 0 : i32
    return %c0_i32, %c0_i32_0 : i32, i32
  }
  func.func @transform_8(%arg0: i32) -> (i32, i32) {
    %c0_i32 = arith.constant 0 : i32
    %c0_i32_0 = arith.constant 0 : i32
    %c0_i32_1 = arith.constant 0 : i32
    return %c0_i32, %c0_i32_0 : i32, i32
  }
  func.func @transform_9(%arg0: i32) -> (i32, i32) {
    %c0_i32 = arith.constant 0 : i32
    %c0_i32_0 = arith.constant 0 : i32
    %c0_i32_1 = arith.constant 0 : i32
    return %c0_i32, %c0_i32_0 : i32, i32
  }
  func.func @transform_10(%arg0: i32) -> (i32, i32) {
    %c0_i32 = arith.constant 0 : i32
    %c0_i32_0 = arith.constant 0 : i32
    %c0_i32_1 = arith.constant 0 : i32
    return %c0_i32, %c0_i32_0 : i32, i32
  }
  func.func @transform_11(%arg0: i32) -> (i32, i32, i32) {
    %c0_i32 = arith.constant 0 : i32
    %c0_i32_0 = arith.constant 0 : i32
    %c0_i32_1 = arith.constant 0 : i32
    return %arg0, %c0_i32, %c0_i32_0 : i32, i32, i32
  }
}

</mosaic_0001>

<bundles_post_ra>
// kernel: covnet_forward.1
= control target key start
LH: loop header
LB: loop body
LE: loop exit
PB: predicated region body
PF: predicated region fallthrough
CT: control target
= control target key end

     0   :  { %s12942_s17 = smov 0   ;;  %s17765_s0 = inlined_call_operand.vmem [shape: f32[2,1024,40], index: 0, kind: input, shape index: {}]   ;;  %s17766_s1 = inlined_call_operand.vmem [shape: f32[5,40,8], index: 1, kind: input, shape index: {}]   ;;  %s17767_s2 = inlined_call_operand.vmem [shape: f32[1,8], index: 2, kind: input, shape index: {}]   ;;  %s17768_s3 = inlined_call_operand.vmem [shape: f32[5,5,8,16], index: 3, kind: input, shape index: {}]   ;;  %s17769_s4 = inlined_call_operand.vmem [shape: f32[1,16], index: 4, kind: input, shape index: {}]   ;;  %s17770_s5 = inlined_call_operand.vmem [shape: f32[25,16,128], index: 5, kind: input, shape index: {}]   ;;  %s17771_s6 = inlined_call_operand.vmem [shape: f32[1,128], index: 6, kind: input, shape index: {}]   ;;  %s17772_s7 = inlined_call_operand.vmem [shape: f32[128,128], index: 7, kind: input, shape index: {}]   ;;  %s17773_s8 = inlined_call_operand.vmem [shape: f32[1,128], index: 8, kind: input, shape index: {}]   ;;  %s17774_s9 = inlined_call_operand.vmem [shape: f32[128,128], index: 9, kind: input, shape index: {}]   ;;  %s17775_s10 = inlined_call_operand.vmem [shape: f32[1,128], index: 10, kind: input, shape index: {}]   ;;  %s17776_s11 = inlined_call_operand.vmem [shape: f32[2,8,128], index: 11, kind: output, shape index: {}]  }
   0x1 LB: > { %s11540_s18 = sadd.s32 4294967295, %s12879_s17   ;;  %p11544_p0 = scmp.ge.s32.totalorder %s12879_s17, 1  ;;  %s12879_s17 = sphi %s12942_s17, %s21_s17  }
   0x2   : > { %p337_p1 = scmp.lt.s32.totalorder %s12879_s17, 3 }
   0x4   : > { %p338_p2 = pnand %p11544_p0, %p337_p1 }
   0x6   : > { %341 = sbr.rel (%p338_p2) target bundleno = 2749 (0xabd), region = 64 }
   0xb   : > { %v12953_v0 = vld [vmem:[%s17766_s1 + $0x48] sm:$0xff]  ;;  %v12958_v1 = vld [vmem:[%s17766_s1 + $0x20] sm:$0xff]  ;;  %v12963_v2 = vld [vmem:[%s17766_s1 + $0x70] sm:$0xff]  ;;  %p376_p3 = scmp.lt.s32.totalorder %s11540_s18, 1  ;;  %vm451_vm0 = vcmask 326656   ;;  %vm1130_vm1 = vcmask 64512  }
   0xc   : > { %511 = vmatpush.msra.mxu0 %v12953_v0  ;;  %588 = vmatpush.msra.mxu1 %v12958_v1  ;;  %v12970_v3 = vld [vmem:[%s17766_s1 + $0x40] sm:$0xff]  ;;  %v12975_v4 = vld [vmem:[%s17766_s1 + $0x18] sm:$0xff]  ;;  %v12980_v5 = vld [vmem:[%s17766_s1 + $0x68] sm:$0xff]  ;;  %vm387_vm2 = vcmask 130048   ;;  %vm10278_vm3 = vcmask 126976  }
   0xd   : > { %12844 = vmatpush.msra.mxu3 %v12958_v1  ;;  %12849 = vmatpush.msra.mxu2 %v12963_v2  ;;  %v12987_v6 = vld [vmem:[%s17766_s1 + $0x38] sm:$0xff]  ;;  %v12992_v7 = vld [vmem:[%s17766_s1 + $0x10] sm:$0xff]  ;;  %s17902_s18 = smov (!%p376_p3, %s11540_s18), 1  ;;  %v13001_v8 = vld [vmem:[%s17766_s1 + $0x60] sm:$0xff] }
   0xe   : > { %512 = vmatpush.msra.mxu0 %v12970_v3  ;;  %589 = vmatpush.msra.mxu1 %v12975_v4  ;;  %v13008_v9 = vld [vmem:[%s17766_s1 + $0x30] sm:$0xff]  ;;  %v13013_v10 = vld [vmem:[%s17766_s1 + $0x8] sm:$0xff]  ;;  %s12843_s24 = sshll.u32 %s17902_s18, 10  ;;  %v13021_v11 = vld [vmem:[%s17766_s1 + $0x58] sm:$0xff]  ;;  %s11547_s28 = sshll.u32 %s17902_s18, 3 }
   0xf   : > { %12845 = vmatpush.msra.mxu3 %v12975_v4  ;;  %12850 = vmatpush.msra.mxu2 %v12980_v5  ;;  %s13026_s29 = scalar_lea.vmem %s17765_s0, %s12843_s24  ;;  %v13033_v12 = vld [vmem:[%s17766_s1 + $0x28] sm:$0xff]  ;;  %v13038_v13 = vld [vmem:[%s17766_s1] sm:$0xff]  ;;  %v11585_v14 = vld [vmem:[%s17766_s1 + $0x50] sm:$0xff]  ;;  %s384_s15 = scalar_lea.vmem %s17776_s11, %s11547_s28 }
  0x10   : > { %513 = vmatpush.msra.mxu0 %v12987_v6  ;;  %590 = vmatpush.msra.mxu1 %v12992_v7  ;;  %v13048_v15 = vld [vmem:[%s13026_s29 + $0x20] sm:$0xff]  ;;  %v13054_v17 = vld [vmem:[%s13026_s29 + $0x48] sm:$0xff]  ;;  %v13059_v18 = vld [vmem:[%s17766_s1 + $0x98] sm:$0xff] }
  0x11   : > { %12846 = vmatpush.msra.mxu3 %v12992_v7  ;;  %12851 = vmatpush.msra.mxu2 %v13001_v8  ;;  %v420_v16 = vld [vmem:[%s13026_s29] sm:$0xff]  ;;  %v13063_v19 = vld [vmem:[%s13026_s29 + $0x78] sm:$0xff]  ;;  %v13071_v20 = vld [vmem:[%s17766_s1 + $0x90] sm:$0xff] }
  0x12   : > { %514 = vmatpush.msra.mxu0 %v13008_v9  ;;  %591 = vmatpush.msra.mxu1 %v13013_v10  ;;  %v13081_v21 = vld [vmem:[%s17766_s1 + $0x88] sm:$0xff]  ;;  %v13089_v22 = vld [vmem:[%s17766_s1 + $0x80] sm:$0xff]  ;;  %v13098_v25 = vld [vmem:[%s13026_s29 + $0x50] sm:$0xff] }
  0x13   : > { %12847 = vmatpush.msra.mxu3 %v13013_v10  ;;  %12852 = vmatpush.msra.mxu2 %v13021_v11  ;;  %v425_v23 = vld [vmem:[%s13026_s29 + $0x28] sm:$0xff]  ;;  %v13103_v26 = vld [vmem:[%s17766_s1 + $0x78] sm:$0xff]  ;;  %v13109_v27 = vld [vmem:[%s13026_s29 + $0x60] sm:$0xff] }
  0x14   : > { %515 = vmatpush.msra.mxu0 %v13033_v12  ;;  %592 = vmatpush.msra.mxu1 %v13038_v13  ;;  %v421_v24 = vld [vmem:[%s13026_s29 + $0x8] sm:$0xff]  ;;  %v426_v28 = vld [vmem:[%s13026_s29 + $0x30] sm:$0xff]  ;;  %v13128_v30 = vld [vmem:[%s13026_s29 + $0x58] sm:$0xff] }
  0x15   : > { %12848 = vmatpush.msra.mxu3 %v13038_v13  ;;  %12853 = vmatpush.msra.mxu2 %v11585_v14  ;;  %v422_v29 = vld [vmem:[%s13026_s29 + $0x10] sm:$0xff]  ;;  %v13133_v31 = vld [vmem:[%s13026_s29 + $0x68] sm:$0xff]  ;;  %v427_v32 = vld [vmem:[%s13026_s29 + $0x38] sm:$0xff] }
  0x16   : > { %11553 = vmatmul.msk.f32.vlgmr.msra.gmra.mxu0 %vm451_vm0, %v13048_v15  ;;  %11569 = vmatmul.msk.f32.vlgmr.msra.gmra.mxu1 %vm451_vm0, %v420_v16  ;;  %v423_v33 = vld [vmem:[%s13026_s29 + $0x18] sm:$0xff]  ;;  %v13152_v34 = vld [vmem:[%s13026_s29 + $0x70] sm:$0xff]  ;;  %v13164_v35 = vld [vmem:[%s13026_s29 + $0x40] sm:$0xff] }
  0x17   : > { %11591 = vmatmul.msk.f32.vlgmr.msra.gmra.mxu2 %vm451_vm0, %v13054_v17  ;;  %874 = vmatpush.msrb.mxu3 %v13059_v18  ;;  %v13176_v36 = vld [vmem:[%s13026_s29 + $0x80] sm:$0xff]  ;;  %v13186_v37 = vld [vmem:[%s13026_s29 + $0x88] sm:$0xff]  ;;  %v13196_v38 = vld [vmem:[%s13026_s29 + $0x90] sm:$0xff] }
  0x18   : > { %11584 = vmatmul.msk.f32.vlgmr.msra.gmra.mxu3 %vm451_vm0, %v13063_v19  ;;  %723 = vmatpush.msrb.mxu0 %v12963_v2  ;;  %v13206_v39 = vld [vmem:[%s13026_s29 + $0x98] sm:$0xff]  ;;  %v13217_v40 = vld [vmem:[%s13026_s29 + $0xa0] sm:$0xff]  ;;  %v13228_v41 = vld [vmem:[%s13026_s29 + $0xa8] sm:$0xff] }
  0x19   : > { %875 = vmatpush.msrb.mxu3 %v13071_v20  ;;  %1313 = vmatpush.msrb.mxu2 %v12958_v1  ;;  %v13239_v42 = vld [vmem:[%s13026_s29 + $0xb0] sm:$0xff]  ;;  %v11631_v43 = vld [vmem:[%s17766_s1 + $0xc0] sm:$0xff]  ;;  %v13253_v44 = vld [vmem:[%s13026_s29 + $0xb8] sm:$0xff] }
  0x1a   : > { %1236 = vmatpush.msrb.mxu1 %v12953_v0  ;;  %724 = vmatpush.msrb.mxu0 %v12980_v5  ;;  %v11630_v45 = vld [vmem:[%s17766_s1 + $0xb8] sm:$0xff]  ;;  %v11629_v46 = vld [vmem:[%s17766_s1 + $0xb0] sm:$0xff]  ;;  %v11628_v47 = vld [vmem:[%s17766_s1 + $0xa8] sm:$0xff] }
  0x1b   : > { %876 = vmatpush.msrb.mxu3 %v13081_v21  ;;  %1314 = vmatpush.msrb.mxu2 %v12975_v4  ;;  %v13273_v48 = vld [vmem:[%s13026_s29 + $0xc0] sm:$0xff]  ;;  %v13287_v50 = vld [vmem:[%s13026_s29 + $0xc8] sm:$0xff]  ;;  %v13298_v51 = vld [vmem:[%s13026_s29 + $0xd0] sm:$0xff] }
  0x1c   : > { %1237 = vmatpush.msrb.mxu1 %v12970_v3  ;;  %725 = vmatpush.msrb.mxu0 %v13001_v8  ;;  %v11627_v49 = vld [vmem:[%s17766_s1 + $0xa0] sm:$0xff]  ;;  %v13313_v54 = vld [vmem:[%s13026_s29 + $0xd8] sm:$0xff] }
  0x1d   : > { %877 = vmatpush.msrb.mxu3 %v13089_v22  ;;  %1315 = vmatpush.msrb.mxu2 %v12992_v7 }
  0x1e   : > { %11554 = vmatmul.msk.f32.gmra.mxu0 %vm451_vm0, %v425_v23  ;;  %11570 = vmatmul.msk.f32.gmra.mxu1 %vm451_vm0, %v421_v24 }
  0x1f   : > { %11592 = vmatmul.msk.f32.gmra.mxu2 %vm451_vm0, %v13098_v25  ;;  %878 = vmatpush.msrb.mxu3 %v13103_v26 }
  0x20   : > { %11611 = vmatmul.msk.f32.vlgmr.msrb.gmra.mxu3 %vm451_vm0, %v13109_v27  ;;  %1238 = vmatpush.msrb.mxu1 %v12987_v6 }
  0x21   : > { %1447 = vmatpush.msra.mxu3 %v12963_v2  ;;  %726 = vmatpush.msrb.mxu0 %v13021_v11 }
  0x22   : > { %1239 = vmatpush.msrb.mxu1 %v13008_v9  ;;  %1316 = vmatpush.msrb.mxu2 %v13013_v10 }
  0x23   : > { %1448 = vmatpush.msra.mxu3 %v12980_v5  ;;  %727 = vmatpush.msrb.mxu0 %v11585_v14 }
  0x24   : > { %1240 = vmatpush.msrb.mxu1 %v13033_v12  ;;  %1317 = vmatpush.msrb.mxu2 %v13038_v13 }
  0x25   : > { %1449 = vmatpush.msra.mxu3 %v13001_v8  ;;  %1025 = vmatpush.msra.mxu0 %v11631_v43 }
  0x26   : > { %1954 = vmatpush.msra.mxu2 %v12953_v0  ;;  %11555 = vmatmul.msk.f32.gmra.mxu0 %vm451_vm0, %v426_v28 }
  0x27   : > { %11571 = vmatmul.msk.f32.gmra.mxu1 %vm451_vm0, %v422_v29  ;;  %11593 = vmatmul.msk.f32.gmra.mxu2 %vm451_vm0, %v13128_v30  ;;  %v13385_v29 = vld [vmem:[%s13026_s29 + $0xe8] sm:$0xff] }
  0x28   : > { %1450 = vmatpush.msra.mxu3 %v13021_v11  ;;  %1955 = vmatpush.msra.mxu2 %v12970_v3 }
  0x29   : > { %11612 = vmatmul.msk.f32.gmra.mxu3 %vm451_vm0, %v13133_v31  ;;  %1747 = vmatpush.msra.mxu1 %v11631_v43 }
  0x2a   : > { %1451 = vmatpush.msra.mxu3 %v11585_v14  ;;  %1956 = vmatpush.msra.mxu2 %v12987_v6 }
  0x2b   : > { %1026 = vmatpush.msra.mxu0 %v11630_v45  ;;  %1748 = vmatpush.msra.mxu1 %v11630_v45 }
  0x2c   : > { %2031 = vmatpush.msrb.mxu3 %v12958_v1  ;;  %1957 = vmatpush.msra.mxu2 %v13008_v9 }
  0x2d   : > { %1027 = vmatpush.msra.mxu0 %v11629_v46  ;;  %1749 = vmatpush.msra.mxu1 %v11629_v46 }
  0x2e   : > { %2032 = vmatpush.msrb.mxu3 %v12975_v4  ;;  %11556 = vmatmul.msk.f32.gmra.mxu0 %vm451_vm0, %v427_v32 }
  0x2f   : > { %11572 = vmatmul.msk.f32.gmra.mxu1 %vm451_vm0, %v423_v33  ;;  %11594 = vmatmul.msk.f32.gmra.mxu2 %vm451_vm0, %v13109_v27 }
  0x30   : > { %2033 = vmatpush.msrb.mxu3 %v12992_v7  ;;  %1958 = vmatpush.msra.mxu2 %v13033_v12 }
  0x31   : > { %11613 = vmatmul.msk.f32.gmra.mxu3 %vm451_vm0, %v13152_v34  ;;  %1028 = vmatpush.msra.mxu0 %v11628_v47 }
  0x32   : > { %2034 = vmatpush.msrb.mxu3 %v13013_v10  ;;  %1750 = vmatpush.msra.mxu1 %v11628_v47  ;;  %v13411_v47 = vld [vmem:[%s13026_s29 + $0xf8] sm:$0xff] }
  0x33   : > { %1029 = vmatpush.msra.mxu0 %v11627_v49 }
  0x34   : > { %2035 = vmatpush.msrb.mxu3 %v13038_v13  ;;  %1751 = vmatpush.msra.mxu1 %v11627_v49 }
  0x36   : > { %11557 = vmatmul.msk.f32.gmra.mxu0 %vm451_vm0, %v13164_v35 }
  0x37   : > { %11573 = vmatmul.msk.f32.gmra.mxu1 %vm451_vm0, %v13048_v15  ;;  %11595 = vmatmul.msk.f32.gmra.mxu2 %vm451_vm0, %v13133_v31 }
  0x39   : > { %11614 = vmatmul.msk.f32.gmra.mxu3 %vm451_vm0, %v13063_v19 }
  0x3e   : > { %11558 = vmatmul.msk.f32.gmra.mxu0 %vm451_vm0, %v13054_v17 }
  0x3f   : > { %11574 = vmatmul.msk.f32.gmra.mxu1 %vm451_vm0, %v425_v23  ;;  %11596 = vmatmul.msk.f32.gmra.mxu2 %vm451_vm0, %v13152_v34 }
  0x41   : > { %11615 = vmatmul.msk.f32.gmra.mxu3 %vm451_vm0, %v13176_v36 }
  0x46   : > { %11559 = vmatmul.msk.f32.gmra.mxu0 %vm451_vm0, %v13098_v25 }
  0x47   : > { %11575 = vmatmul.msk.f32.gmra.mxu1 %vm451_vm0, %v426_v28  ;;  %11597 = vmatmul.msk.f32.gmra.mxu2 %vm451_vm0, %v13063_v19 }
  0x49   : > { %11616 = vmatmul.msk.f32.gmra.mxu3 %vm451_vm0, %v13186_v37 }
  0x4e   : > { %11560 = vmatmul.msk.f32.gmra.mxu0 %vm451_vm0, %v13128_v30 }
  0x4f   : > { %11576 = vmatmul.msk.f32.gmra.mxu1 %vm451_vm0, %v427_v32  ;;  %11598 = vmatmul.msk.f32.gmra.mxu2 %vm451_vm0, %v13176_v36 }
  0x51   : > { %11617 = vmatmul.msk.f32.gmra.mxu3 %vm451_vm0, %v13196_v38 }
  0x56   : > { %11561 = vmatmul.msk.f32.gmra.mxu0 %vm451_vm0, %v13109_v27 }
  0x57   : > { %11577 = vmatmul.msk.f32.gmra.mxu1 %vm451_vm0, %v13164_v35  ;;  %11599 = vmatmul.msk.f32.gmra.mxu2 %vm451_vm0, %v13186_v37 }
  0x59   : > { %11618 = vmatmul.msk.f32.gmra.mxu3 %vm451_vm0, %v13206_v39 }
  0x5e   : > { %11562 = vmatmul.msk.f32.gmra.mxu0 %vm451_vm0, %v13133_v31 }
  0x5f   : > { %11578 = vmatmul.msk.f32.gmra.mxu1 %vm451_vm0, %v13054_v17  ;;  %11600 = vmatmul.msk.f32.gmra.mxu2 %vm451_vm0, %v13196_v38 }
  0x61   : > { %11619 = vmatmul.msk.f32.gmra.mxu3 %vm451_vm0, %v13217_v40 }
  0x66   : > { %11563 = vmatmul.msk.f32.gmra.mxu0 %vm451_vm0, %v13152_v34 }
  0x67   : > { %11579 = vmatmul.msk.f32.gmra.mxu1 %vm451_vm0, %v13098_v25  ;;  %11601 = vmatmul.msk.f32.gmra.mxu2 %vm451_vm0, %v13206_v39 }
  0x69   : > { %11620 = vmatmul.msk.f32.gmra.mxu3 %vm451_vm0, %v13228_v41 }
  0x6e   : > { %11564 = vmatmul.msk.f32.gmra.mxu0 %vm451_vm0, %v13063_v19 }
  0x6f   : > { %11580 = vmatmul.msk.f32.gmra.mxu1 %vm451_vm0, %v13128_v30  ;;  %11602 = vmatmul.msk.f32.gmra.mxu2 %vm451_vm0, %v13217_v40 }
  0x71   : > { %11621 = vmatmul.msk.f32.gmra.mxu3 %vm451_vm0, %v13239_v42 }
  0x76   : > { %11565 = vmatmul.msk.f32.gmra.mxu0 %vm451_vm0, %v13176_v36 }
  0x77   : > { %11581 = vmatmul.msk.f32.gmra.mxu1 %vm451_vm0, %v13109_v27  ;;  %11603 = vmatmul.msk.f32.gmra.mxu2 %vm451_vm0, %v13228_v41 }
  0x79   : > { %11622 = vmatmul.msk.f32.gmra.mxu3 %vm451_vm0, %v13253_v44 }
  0x7e   : > { %11566 = vmatmul.msk.f32.gmra.mxu0 %vm451_vm0, %v13186_v37 }
  0x7f   : > { %11582 = vmatmul.msk.f32.gmra.mxu1 %vm451_vm0, %v13133_v31  ;;  %11604 = vmatmul.msk.f32.gmra.mxu2 %vm451_vm0, %v13239_v42 }
  0x81   : > { %11623 = vmatmul.msk.f32.gmra.mxu3 %vm451_vm0, %v13273_v48 }
  0x86   : > { %11567 = vmatmul.msk.f32.gmra.mxu0 %vm451_vm0, %v13196_v38 }
  0x87   : > { %11583 = vmatmul.msk.f32.gmra.mxu1 %vm451_vm0, %v13152_v34  ;;  %11605 = vmatmul.msk.f32.gmra.mxu2 %vm451_vm0, %v13253_v44 }
  0x89   : > { %11624 = vmatmul.msk.f32.gmra.mxu3 %vm451_vm0, %v13287_v50 }
  0x8e   : > { %11568 = vmatmul.msk.f32.gmra.mxu0 %vm451_vm0, %v13206_v39 }
  0x8f   : > { %11653 = vmatmul.msk.f32.vlgmr.msrb.gmra.mxu1 %vm451_vm0, %v13217_v40  ;;  %11669 = vmatmul.msk.f32.vlgmr.msrb.gmra.mxu2 %vm451_vm0, %v13176_v36 }
  0x90   : > { %2465 = vmatpush.msrb.mxu2 %v11631_v43 }
  0x91   : > { %11625 = vmatmul.msk.f32.gmra.mxu3 %vm451_vm0, %v13298_v51 }
  0x92   : > { %2466 = vmatpush.msrb.mxu2 %v11630_v45 }
  0x93   : > { %v13308_v52 = vpop.f32.mrf.mxu0  ;;  %v13310_v53 = vpop.f32.mrf.mxu1 }
  0x94   : > { %2467 = vmatpush.msrb.mxu2 %v11629_v46 }
  0x96   : > { %11590 = vmatmul.msk.f32.vlgmr.msrb.gmra.mxu0 %vm451_vm0, %v13164_v35 }
  0x97   : > { %11654 = vmatmul.msk.f32.gmra.mxu1 %vm451_vm0, %v13228_v41  ;;  %11670 = vmatmul.msk.f32.gmra.mxu2 %vm451_vm0, %v13186_v37 }
  0x98   : > { %1597 = vmatpush.msrb.mxu0 %v13059_v18 }
  0x99   : > { %11626 = vmatmul.msk.f32.gmra.mxu3 %vm451_vm0, %v13313_v54 }
  0x9a   : > { %1598 = vmatpush.msrb.mxu0 %v13071_v20  ;;  %v732_v55 = vpop.f32.mrf.mxu2 }
  0x9b   : > { %v13325_v56 = vpop.f32.mrf.mxu3  ;;  %v520_v57 = vpop.f32.mrf.mxu0 }
  0x9c   : > { %1599 = vmatpush.msrb.mxu0 %v13081_v21  ;;  %v597_v58 = vpop.f32.mrf.mxu1  ;;  %v13372_v21 = vld [vmem:[%s13026_s29 + $0xe0] sm:$0xff] }
  0x9d   : > { %v598_v62 = vadd.f32 %v597_v58, %v520_v57 }
  0x9e   : > { %1600 = vmatpush.msrb.mxu0 %v13089_v22 }
  0x9f   : > { %11632 = vmatmul.msk.f32.vlgmr.msra.gmra.mxu0 %vm451_vm0, %v13176_v36  ;;  %11655 = vmatmul.msk.f32.gmra.mxu1 %vm451_vm0, %v13239_v42  ;;  %v778_v1 = vadd.f32 %v732_v55, %v598_v62  ;;  %v13424_v62 = vld [vmem:[%s13026_s29 + $0x100] sm:$0xff] }
  0xa0   : > { %11671 = vmatmul.msk.f32.gmra.mxu2 %vm451_vm0, %v13196_v38  ;;  %1601 = vmatpush.msrb.mxu0 %v13103_v26 }
  0xa1   : > { %11690 = vmatmul.msk.f32.vlgmr.msra.gmra.mxu3 %vm451_vm0, %v13273_v48 }
  0xa2   : > { %2672 = vmatpush.msra.mxu3 %v12953_v0  ;;  %v735_v59 = vpop.f32.mrf.mxu2 }
  0xa3   : > { %v13339_v60 = vpop.f32.mrf.mxu3  ;;  %v523_v61 = vpop.f32.mrf.mxu0 }
  0xa4   : > { %v600_v63 = vpop.f32.mrf.mxu1 }
  0xa5   : > { %v601_v4 = vadd.f32 %v600_v63, %v523_v61 }
  0xa7   : > { %11633 = vmatmul.msk.f32.gmra.mxu0 %vm451_vm0, %v13186_v37  ;;  %11656 = vmatmul.msk.f32.gmra.mxu1 %vm451_vm0, %v13253_v44  ;;  %v779_v7 = vadd.f32 %v735_v59, %v601_v4  ;;  %v13398_v37 = vld [vmem:[%s13026_s29 + $0xf0] sm:$0xff] }
  0xa8   : > { %11672 = vmatmul.msk.f32.gmra.mxu2 %vm451_vm0, %v13206_v39 }
  0xa9   : > { %11691 = vmatmul.msk.f32.gmra.mxu3 %vm451_vm0, %v13287_v50 }
  0xaa   : > { %v738_v0 = vpop.f32.mrf.mxu2 }
  0xab   : > { %v526_v3 = vpop.f32.mrf.mxu0 }
  0xac   : > { %v883_v2 = vpop.f32.mrf.mxu3  ;;  %v603_v6 = vpop.f32.mrf.mxu1 }
  0xad   : > { %v13349_v5 = vadd.f32 %v883_v2, %v778_v1  ;;  %v604_v11 = vadd.f32 %v603_v6, %v526_v3  ;;  %v13437_v6 = vld [vmem:[%s13026_s29 + $0x108] sm:$0xff] }
  0xaf   : > { %11634 = vmatmul.msk.f32.gmra.mxu0 %vm451_vm0, %v13196_v38  ;;  %11657 = vmatmul.msk.f32.gmra.mxu1 %vm451_vm0, %v13273_v48  ;;  %v780_v14 = vadd.f32 %v738_v0, %v604_v11 }
  0xb0   : > { %11673 = vmatmul.msk.f32.gmra.mxu2 %vm451_vm0, %v13217_v40 }
  0xb1   : > { %11692 = vmatmul.msk.f32.gmra.mxu3 %vm451_vm0, %v13298_v51 }
  0xb2   : > { %v741_v8 = vpop.f32.mrf.mxu2 }
  0xb3   : > { %v529_v10 = vpop.f32.mrf.mxu0 }
  0xb4   : > { %v886_v9 = vpop.f32.mrf.mxu3  ;;  %v606_v13 = vpop.f32.mrf.mxu1 }
  0xb5   : > { %v13359_v12 = vadd.f32 %v886_v9, %v779_v7  ;;  %v607_v18 = vadd.f32 %v606_v13, %v529_v10 }
  0xb7   : > { %11635 = vmatmul.msk.f32.gmra.mxu0 %vm451_vm0, %v13206_v39  ;;  %11658 = vmatmul.msk.f32.gmra.mxu1 %vm451_vm0, %v13287_v50  ;;  %v781_v22 = vadd.f32 %v741_v8, %v607_v18 }
  0xb8   : > { %11674 = vmatmul.msk.f32.gmra.mxu2 %vm451_vm0, %v13228_v41 }
  0xb9   : > { %11693 = vmatmul.msk.f32.gmra.mxu3 %vm451_vm0, %v13313_v54 }
  0xba   : > { %v744_v15 = vpop.f32.mrf.mxu2 }
  0xbb   : > { %v532_v17 = vpop.f32.mrf.mxu0 }
  0xbc   : > { %v889_v16 = vpop.f32.mrf.mxu3  ;;  %v609_v20 = vpop.f32.mrf.mxu1 }
  0xbd   : > { %v13369_v19 = vadd.f32 %v889_v16, %v780_v14  ;;  %v610_v26 = vadd.f32 %v609_v20, %v532_v17  ;;  %v13450_v14 = vld [vmem:[%s13026_s29 + $0x110] sm:$0xff] }
  0xbf   : > { %11636 = vmatmul.msk.f32.gmra.mxu0 %vm451_vm0, %v13217_v40  ;;  %11659 = vmatmul.msk.f32.gmra.mxu1 %vm451_vm0, %v13298_v51  ;;  %v782_v30 = vadd.f32 %v744_v15, %v610_v26 }
  0xc0   : > { %11675 = vmatmul.msk.f32.gmra.mxu2 %vm451_vm0, %v13239_v42 }
  0xc1   : > { %11694 = vmatmul.msk.f32.gmra.mxu3 %vm451_vm0, %v13372_v21 }
  0xc2   : > { %v747_v23 = vpop.f32.mrf.mxu2 }
  0xc3   : > { %v535_v25 = vpop.f32.mrf.mxu0 }
  0xc4   : > { %v892_v24 = vpop.f32.mrf.mxu3  ;;  %v612_v28 = vpop.f32.mrf.mxu1 }
  0xc5   : > { %v13382_v27 = vadd.f32 %v892_v24, %v781_v22  ;;  %v613_v34 = vadd.f32 %v612_v28, %v535_v25 }
  0xc7   : > { %11637 = vmatmul.msk.f32.gmra.mxu0 %vm451_vm0, %v13228_v41  ;;  %11660 = vmatmul.msk.f32.gmra.mxu1 %vm451_vm0, %v13313_v54  ;;  %v783_v38 = vadd.f32 %v747_v23, %v613_v34  ;;  %v13463_v23 = vld [vmem:[%s13026_s29 + $0x118] sm:$0xff] }
  0xc8   : > { %11676 = vmatmul.msk.f32.gmra.mxu2 %vm451_vm0, %v13253_v44 }
  0xc9   : > { %11695 = vmatmul.msk.f32.gmra.mxu3 %vm451_vm0, %v13385_v29 }
  0xca   : > { %v750_v31 = vpop.f32.mrf.mxu2 }
  0xcb   : > { %v538_v33 = vpop.f32.mrf.mxu0 }
  0xcc   : > { %v895_v32 = vpop.f32.mrf.mxu3  ;;  %v615_v36 = vpop.f32.mrf.mxu1 }
  0xcd   : > { %v13395_v35 = vadd.f32 %v895_v32, %v782_v30  ;;  %v616_v43 = vadd.f32 %v615_v36, %v538_v33  ;;  %v13476_v32 = vld [vmem:[%s13026_s29 + $0x120] sm:$0xff] }
  0xcf   : > { %11638 = vmatmul.msk.f32.gmra.mxu0 %vm451_vm0, %v13239_v42  ;;  %11661 = vmatmul.msk.f32.gmra.mxu1 %vm451_vm0, %v13372_v21  ;;  %v784_v42 = vadd.f32 %v750_v31, %v616_v43 }
  0xd0   : > { %11677 = vmatmul.msk.f32.gmra.mxu2 %vm451_vm0, %v13273_v48 }
  0xd1   : > { %11696 = vmatmul.msk.f32.gmra.mxu3 %vm451_vm0, %v13398_v37 }
  0xd2   : > { %v753_v39 = vpop.f32.mrf.mxu2 }
  0xd3   : > { %v541_v41 = vpop.f32.mrf.mxu0 }
  0xd4   : > { %v898_v40 = vpop.f32.mrf.mxu3  ;;  %v618_v46 = vpop.f32.mrf.mxu1 }
  0xd5   : > { %v13408_v45 = vadd.f32 %v898_v40, %v783_v38  ;;  %v619_v58 = vadd.f32 %v618_v46, %v541_v41  ;;  %v13489_v41 = vld [vmem:[%s13026_s29 + $0x128] sm:$0xff] }
  0xd7   : > { %11639 = vmatmul.msk.f32.gmra.mxu0 %vm451_vm0, %v13253_v44  ;;  %11662 = vmatmul.msk.f32.gmra.mxu1 %vm451_vm0, %v13385_v29  ;;  %v785_v44 = vadd.f32 %v753_v39, %v619_v58 }
  0xd8   : > { %11678 = vmatmul.msk.f32.gmra.mxu2 %vm451_vm0, %v13287_v50 }
  0xd9   : > { %11697 = vmatmul.msk.f32.gmra.mxu3 %vm451_vm0, %v13411_v47 }
  0xda   : > { %v756_v49 = vpop.f32.mrf.mxu2 }
  0xdb   : > { %v544_v57 = vpop.f32.mrf.mxu0 }
  0xdc   : > { %v901_v55 = vpop.f32.mrf.mxu3  ;;  %v621_v61 = vpop.f32.mrf.mxu1 }
  0xdd   : > { %v13421_v59 = vadd.f32 %v901_v55, %v784_v42  ;;  %v622_v2 = vadd.f32 %v621_v61, %v544_v57  ;;  %v13502_v61 = vld [vmem:[%s13026_s29 + $0x130] sm:$0xff] }
  0xdf   : > { %11640 = vmatmul.msk.f32.gmra.mxu0 %vm451_vm0, %v13273_v48  ;;  %11663 = vmatmul.msk.f32.gmra.mxu1 %vm451_vm0, %v13398_v37  ;;  %v786_v48 = vadd.f32 %v756_v49, %v622_v2 }
  0xe0   : > { %11679 = vmatmul.msk.f32.gmra.mxu2 %vm451_vm0, %v13298_v51 }
  0xe1   : > { %11698 = vmatmul.msk.f32.gmra.mxu3 %vm451_vm0, %v13424_v62 }
  0xe2   : > { %v759_v63 = vpop.f32.mrf.mxu2 }
  0xe3   : > { %v547_v0 = vpop.f32.mrf.mxu0 }
  0xe4   : > { %v904_v1 = vpop.f32.mrf.mxu3  ;;  %v624_v4 = vpop.f32.mrf.mxu1 }
  0xe5   : > { %v13434_v3 = vadd.f32 %v904_v1, %v785_v44  ;;  %v625_v10 = vadd.f32 %v624_v4, %v547_v0  ;;  %v595_v4 = vadd.f32 %v13310_v53, %v13308_v52 }
  0xe7   : > { %11641 = vmatmul.msk.f32.gmra.mxu0 %vm451_vm0, %v13287_v50  ;;  %11664 = vmatmul.msk.f32.gmra.mxu1 %vm451_vm0, %v13411_v47  ;;  %v787_v50 = vadd.f32 %v759_v63, %v625_v10 }
  0xe8   : > { %11680 = vmatmul.msk.f32.gmra.mxu2 %vm451_vm0, %v13313_v54 }
  0xe9   : > { %11699 = vmatmul.msk.f32.gmra.mxu3 %vm451_vm0, %v13437_v6 }
  0xea   : > { %v762_v7 = vpop.f32.mrf.mxu2 }
  0xeb   : > { %v550_v9 = vpop.f32.mrf.mxu0 }
  0xec   : > { %v907_v8 = vpop.f32.mrf.mxu3  ;;  %v627_v13 = vpop.f32.mrf.mxu1 }
  0xed   : > { %v13447_v11 = vadd.f32 %v907_v8, %v786_v48  ;;  %v628_v18 = vadd.f32 %v627_v13, %v550_v9  ;;  %v13517_v8 = vld [vmem:[%s13026_s29 + $0x138] sm:$0xff] }
  0xef   : > { %11642 = vmatmul.msk.f32.gmra.mxu0 %vm451_vm0, %v13298_v51  ;;  %11665 = vmatmul.msk.f32.gmra.mxu1 %vm451_vm0, %v13424_v62  ;;  %v788_v51 = vadd.f32 %v762_v7, %v628_v18 }
  0xf0   : > { %11681 = vmatmul.msk.f32.gmra.mxu2 %vm451_vm0, %v13372_v21 }
  0xf1   : > { %11700 = vmatmul.msk.f32.gmra.mxu3 %vm451_vm0, %v13450_v14 }
  0xf2   : > { %v765_v15 = vpop.f32.mrf.mxu2 }
  0xf3   : > { %v553_v17 = vpop.f32.mrf.mxu0 }
  0xf4   : > { %v910_v16 = vpop.f32.mrf.mxu3  ;;  %v630_v22 = vpop.f32.mrf.mxu1 }
  0xf5   : > { %v13460_v20 = vadd.f32 %v910_v16, %v787_v50  ;;  %v631_v28 = vadd.f32 %v630_v22, %v553_v17 }
  0xf7   : > { %11643 = vmatmul.msk.f32.gmra.mxu0 %vm451_vm0, %v13313_v54  ;;  %11666 = vmatmul.msk.f32.gmra.mxu1 %vm451_vm0, %v13437_v6  ;;  %v789_v54 = vadd.f32 %v765_v15, %v631_v28 }
  0xf8   : > { %11682 = vmatmul.msk.f32.gmra.mxu2 %vm451_vm0, %v13385_v29 }
  0xf9   : > { %11701 = vmatmul.msk.f32.gmra.mxu3 %vm451_vm0, %v13463_v23 }
  0xfa   : > { %v768_v24 = vpop.f32.mrf.mxu2 }
  0xfb   : > { %v556_v26 = vpop.f32.mrf.mxu0 }
  0xfc   : > { %v913_v25 = vpop.f32.mrf.mxu3  ;;  %v633_v31 = vpop.f32.mrf.mxu1 }
  0xfd   : > { %v13473_v30 = vadd.f32 %v913_v25, %v788_v51  ;;  %v634_v38 = vadd.f32 %v633_v31, %v556_v26  ;;  %v11851_v25 = vld [vmem:[%s17766_s1 + $0x40] sm:$0xff] }
  0xfe   : > { %2673 = vmatpush.msra.mxu3 %v11851_v25 }
  0xff   : > { %11644 = vmatmul.msk.f32.gmra.mxu0 %vm451_vm0, %v13372_v21  ;;  %11667 = vmatmul.msk.f32.gmra.mxu1 %vm451_vm0, %v13450_v14  ;;  %v790_v43 = vadd.f32 %v768_v24, %v634_v38 }
 0x100   : > { %11683 = vmatmul.msk.f32.gmra.mxu2 %vm451_vm0, %v13398_v37 }
 0x101   : > { %11702 = vmatmul.msk.f32.gmra.mxu3 %vm451_vm0, %v13476_v32 }
 0x102   : > { %v771_v33 = vpop.f32.mrf.mxu2 }
 0x103   : > { %v559_v36 = vpop.f32.mrf.mxu0 }
 0x104   : > { %v916_v34 = vpop.f32.mrf.mxu3  ;;  %v636_v40 = vpop.f32.mrf.mxu1 }
 0x105   : > { %v13486_v39 = vadd.f32 %v916_v34, %v789_v54  ;;  %v637_v55 = vadd.f32 %v636_v40, %v559_v36  ;;  %v13558_v54 = vld [vmem:[%s17766_s1 + $0x98] sm:$0xff] }
 0x106   : > { %2315 = vmatpush.msrb.mxu1 %v13558_v54 }
 0x107   : > { %11645 = vmatmul.msk.f32.gmra.mxu0 %vm451_vm0, %v13385_v29  ;;  %11668 = vmatmul.msk.f32.gmra.mxu1 %vm451_vm0, %v13463_v23  ;;  %v791_v44 = vadd.f32 %v771_v33, %v637_v55 }
 0x108   : > { %11684 = vmatmul.msk.f32.gmra.mxu2 %vm451_vm0, %v13411_v47 }
 0x109   : > { %11703 = vmatmul.msk.f32.gmra.mxu3 %vm451_vm0, %v13489_v41 }
 0x10a   : > { %v774_v46 = vpop.f32.mrf.mxu2 }
 0x10b   : > { %v562_v49 = vpop.f32.mrf.mxu0 }
 0x10c   : > { %v919_v42 = vpop.f32.mrf.mxu3  ;;  %v1242_v58 = vpop.f32.mrf.mxu1  ;;  %v640_v9 = vadd.f32 %v13325_v56, %v562_v49  ;;  %v13532_v56 = vld [vmem:[%s17767_s2] ss:$0 sm:$0xff] }
 0x10d   : > { %v13499_v57 = vadd.f32 %v919_v42, %v790_v43 }
 0x10e   : > { %v792_v53 = vadd.f32 %v774_v46, %v640_v9  ;;  %v13594_v9 = vld [vmem:[%s13026_s29 + $0x148] sm:$0xff] }
 0x10f   : > { %11646 = vmatmul.msk.f32.gmra.mxu0 %vm451_vm0, %v13398_v37  ;;  %11732 = vmatmul.msk.f32.vlgmr.msra.gmra.mxu1 %vm451_vm0, %v13424_v62 }
 0x110   : > { %11753 = vmatmul.msk.f32.vlgmr.msra.gmra.mxu2 %vm451_vm0, %v13476_v32 }
 0x111   : > { %11704 = vmatmul.msk.f32.gmra.mxu3 %vm451_vm0, %v13502_v61 }
 0x112   : > { %v1319_v63 = vpop.f32.mrf.mxu2 }
 0x113   : > { %v1320_v1 = vadd.f32 %v1319_v63, %v1242_v58  ;;  %v729_v2 = vpop.f32.mrf.mxu0  ;;  %v13578_v58 = vld [vmem:[%s13026_s29 + $0x140] sm:$0xff] }
 0x114   : > { %v922_v0 = vpop.f32.mrf.mxu3  ;;  %v1245_v7 = vpop.f32.mrf.mxu1  ;;  %v777_v10 = vadd.f32 %v729_v2, %v595_v4 }
 0x115   : > { %v13514_v48 = vadd.f32 %v922_v0, %v791_v44 }
 0x116   : > { %v928_v13 = vadd.f32 %v13339_v60, %v777_v10 }
 0x117   : > { %11647 = vmatmul.msk.f32.gmra.mxu0 %vm451_vm0, %v13411_v47  ;;  %11733 = vmatmul.msk.f32.gmra.mxu1 %vm451_vm0, %v13437_v6 }
 0x118   : > { %11754 = vmatmul.msk.f32.gmra.mxu2 %vm451_vm0, %v13489_v41 }
 0x119   : > { %11705 = vmatmul.msk.f32.gmra.mxu3 %vm451_vm0, %v13517_v8 }
 0x11a   : > { %v1322_v52 = vpop.f32.mrf.mxu2 }
 0x11b   : > { %v1323_v50 = vadd.f32 %v1322_v52, %v1245_v7 }
 0x11c   : > { %v925_v15 = vpop.f32.mrf.mxu3  ;;  %v1031_v16 = vpop.f32.mrf.mxu0 }
 0x11d   : > { %v13534_v17 = vadd.f32 %v925_v15, %v792_v53  ;;  %v1079_v18 = vadd.f32 %v1031_v16, %v928_v13  ;;  %v1248_v22 = vpop.f32.mrf.mxu1 }
 0x11f   : > { %v1098_v51 = vadd.f32 %v13532_v56, %v1079_v18  ;;  %11711 = vmatmul.msk.f32.vlgmr.msrb.gmra.mxu0 %vm451_vm0, %v13372_v21  ;;  %11734 = vmatmul.msk.f32.gmra.mxu1 %vm451_vm0, %v13450_v14  ;;  %v13552_v21 = vld [vmem:[%s17766_s1 + $0x70] sm:$0xff] }
 0x120   : > { %11755 = vmatmul.msk.f32.gmra.mxu2 %vm451_vm0, %v13502_v61  ;;  %2165 = vmatpush.msra.mxu0 %v13552_v21  ;;  %v13610_v18 = vld [vmem:[%s13026_s29 + $0x150] sm:$0xff] }
 0x121   : > { %v1114_v60 = vmax.f32 %v1098_v51, 0.0  ;;  %11769 = vmatmul.msk.f32.vlgmr.msrb.gmra.mxu3 %vm451_vm0, %v13424_v62 }
 0x123   : > { %1131 = vst.msk [vmem:[#allocation2] sm:$0xff] %vm1130_vm1, %v1114_v60  ;;  %v1325_v24 = vpop.f32.mrf.mxu2 }
 0x124   : > { %v1326_v26 = vadd.f32 %v1325_v24, %v1248_v22  ;;  %v1453_v28 = vpop.f32.mrf.mxu3  ;;  %v1034_v31 = vpop.f32.mrf.mxu0 }
 0x125   : > { %v13560_v33 = vadd.f32 %v1453_v28, %v1320_v1  ;;  %v1080_v34 = vadd.f32 %v1034_v31, %v13349_v5  ;;  %v1251_v36 = vpop.f32.mrf.mxu1  ;;  %v13626_v31 = vld [vmem:[%s13026_s29 + $0x158] sm:$0xff] }
 0x127   : > { %v1099_v38 = vadd.f32 %v13532_v56, %v1080_v34  ;;  %11712 = vmatmul.msk.f32.gmra.mxu0 %vm451_vm0, %v13385_v29  ;;  %11735 = vmatmul.msk.f32.gmra.mxu1 %vm451_vm0, %v13463_v23 }
 0x128   : > { %11756 = vmatmul.msk.f32.gmra.mxu2 %vm451_vm0, %v13517_v8 }
 0x129   : > { %v1115_v40 = vmax.f32 %v1099_v38, 0.0  ;;  %11770 = vmatmul.msk.f32.gmra.mxu3 %vm451_vm0, %v13437_v6  ;;  %v13639_v38 = vld [vmem:[%s17766_s1 + $0x68] sm:$0xff] }
 0x12a   : > { %2166 = vmatpush.msra.mxu0 %v13639_v38 }
 0x12b   : > { %1132 = vst.msk [vmem:[#allocation2 + $0x8] sm:$0xff] %vm1130_vm1, %v1115_v40  ;;  %v1328_v5 = vpop.f32.mrf.mxu2 }
 0x12c   : > { %v1329_v43 = vadd.f32 %v1328_v5, %v1251_v36  ;;  %v1456_v46 = vpop.f32.mrf.mxu3  ;;  %v1037_v42 = vpop.f32.mrf.mxu0  ;;  %v11850_v36 = vld [vmem:[%s17766_s1 + $0x38] sm:$0xff] }
 0x12d   : > { %v13574_v49 = vadd.f32 %v1456_v46, %v1323_v50  ;;  %v1081_v29 = vadd.f32 %v1037_v42, %v13359_v12  ;;  %v1254_v55 = vpop.f32.mrf.mxu1  ;;  %2674 = vmatpush.msra.mxu3 %v11850_v36 }
 0x12f   : > { %v1100_v44 = vadd.f32 %v13532_v56, %v1081_v29  ;;  %11713 = vmatmul.msk.f32.gmra.mxu0 %vm451_vm0, %v13398_v37  ;;  %11736 = vmatmul.msk.f32.gmra.mxu1 %vm451_vm0, %v13476_v32 }
 0x130   : > { %11757 = vmatmul.msk.f32.gmra.mxu2 %vm451_vm0, %v13578_v58 }
 0x131   : > { %v1116_v63 = vmax.f32 %v1100_v44, 0.0  ;;  %11771 = vmatmul.msk.f32.gmra.mxu3 %vm451_vm0, %v13450_v14  ;;  %v13657_v44 = vld [vmem:[%s13026_s29 + $0x160] sm:$0xff] }
 0x133   : > { %1133 = vst.msk [vmem:[#allocation2 + $0x10] sm:$0xff] %vm1130_vm1, %v1116_v63  ;;  %v1331_v12 = vpop.f32.mrf.mxu2 }
 0x134   : > { %v1332_v1 = vadd.f32 %v1331_v12, %v1254_v55  ;;  %v1459_v0 = vpop.f32.mrf.mxu3  ;;  %v1040_v2 = vpop.f32.mrf.mxu0  ;;  %v5455_v12 = vld [vmem:[#allocation2] ss:$2 sm:$0xff] }
 0x135   : > { %v13590_v4 = vadd.f32 %v1459_v0, %v1326_v26  ;;  %v1082_v37 = vadd.f32 %v1040_v2, %v13369_v19  ;;  %v1257_v7 = vpop.f32.mrf.mxu1 }
 0x137   : > { %v1101_v10 = vadd.f32 %v13532_v56, %v1082_v37  ;;  %11714 = vmatmul.msk.f32.gmra.mxu0 %vm451_vm0, %v13411_v47  ;;  %11737 = vmatmul.msk.f32.gmra.mxu1 %vm451_vm0, %v13489_v41 }
 0x138   : > { %11758 = vmatmul.msk.f32.gmra.mxu2 %vm451_vm0, %v13594_v9 }
 0x139   : > { %v1117_v52 = vmax.f32 %v1101_v10, 0.0  ;;  %11772 = vmatmul.msk.f32.gmra.mxu3 %vm451_vm0, %v13463_v23  ;;  %v11849_v10 = vld [vmem:[%s17766_s1 + $0x30] sm:$0xff] }
 0x13a   : > { %2675 = vmatpush.msra.mxu3 %v11849_v10 }
 0x13b   : > { %1134 = vst.msk [vmem:[#allocation2 + $0x18] sm:$0xff] %vm1130_vm1, %v1117_v52  ;;  %v1334_v19 = vpop.f32.mrf.mxu2 }
 0x13c   : > { %v1335_v53 = vadd.f32 %v1334_v19, %v1257_v7  ;;  %v1462_v13 = vpop.f32.mrf.mxu3  ;;  %v1043_v50 = vpop.f32.mrf.mxu0 }
 0x13d   : > { %v13606_v15 = vadd.f32 %v1462_v13, %v1329_v43  ;;  %v1083_v47 = vadd.f32 %v1043_v50, %v13382_v27  ;;  %v1260_v16 = vpop.f32.mrf.mxu1 }
 0x13f   : > { %v1102_v22 = vadd.f32 %v13532_v56, %v1083_v47  ;;  %11715 = vmatmul.msk.f32.gmra.mxu0 %vm451_vm0, %v13424_v62  ;;  %11738 = vmatmul.msk.f32.gmra.mxu1 %vm451_vm0, %v13502_v61 }
 0x140   : > { %11759 = vmatmul.msk.f32.gmra.mxu2 %vm451_vm0, %v13610_v18 }
 0x141   : > { %v1118_v51 = vmax.f32 %v1102_v22, 0.0  ;;  %11773 = vmatmul.msk.f32.gmra.mxu3 %vm451_vm0, %v13476_v32  ;;  %v13676_v22 = vld [vmem:[%s13026_s29 + $0x168] sm:$0xff] }
 0x143   : > { %1135 = vst.msk [vmem:[#allocation2 + $0x20] sm:$0xff] %vm1130_vm1, %v1118_v51  ;;  %v1337_v27 = vpop.f32.mrf.mxu2 }
 0x144   : > { %v1338_v60 = vadd.f32 %v1337_v27, %v1260_v16  ;;  %v1465_v24 = vpop.f32.mrf.mxu3  ;;  %v1046_v25 = vpop.f32.mrf.mxu0 }
 0x145   : > { %v13622_v26 = vadd.f32 %v1465_v24, %v1332_v1  ;;  %v1084_v62 = vadd.f32 %v1046_v25, %v13395_v35  ;;  %v1263_v28 = vpop.f32.mrf.mxu1  ;;  %v13644_v35 = vld [vmem:[%s17766_s1 + $0x90] sm:$0xff]  ;;  %v5459_v1 = vld [vmem:[#allocation2 + $0x1] ss:$2 sm:$0xff] }
 0x146   : > { %2316 = vmatpush.msrb.mxu1 %v13644_v35  ;;  %v5462_v37 = vmax.f32 %v5455_v12, %v5459_v1 }
 0x147   : > { %v1103_v34 = vadd.f32 %v13532_v56, %v1084_v62  ;;  %11716 = vmatmul.msk.f32.gmra.mxu0 %vm451_vm0, %v13437_v6  ;;  %11739 = vmatmul.msk.f32.gmra.mxu1 %vm451_vm0, %v13517_v8 }
 0x148   : > { %11760 = vmatmul.msk.f32.gmra.mxu2 %vm451_vm0, %v13626_v31 }
 0x149   : > { %v1119_v6 = vmax.f32 %v1103_v34, 0.0  ;;  %11774 = vmatmul.msk.f32.gmra.mxu3 %vm451_vm0, %v13489_v41  ;;  %v13693_v34 = vld [vmem:[%s13026_s29 + $0x170] sm:$0xff] }
 0x14b   : > { %1136 = vst.msk [vmem:[#allocation2 + $0x28] sm:$0xff] %vm1130_vm1, %v1119_v6  ;;  %v1340_v40 = vpop.f32.mrf.mxu2  ;;  %v5457_v6 = vld [vmem:[#allocation2 + $0x10] ss:$2 sm:$0xff] }
 0x14c   : > { %v1341_v5 = vadd.f32 %v1340_v40, %v1263_v28  ;;  %v1468_v43 = vpop.f32.mrf.mxu3  ;;  %v1049_v46 = vpop.f32.mrf.mxu0  ;;  %v5461_v40 = vld [vmem:[#allocation2 + $0x11] ss:$2 sm:$0xff] }
 0x14d   : > { %v13653_v42 = vadd.f32 %v1468_v43, %v1335_v53  ;;  %v1085_v29 = vadd.f32 %v1049_v46, %v13408_v45  ;;  %v1266_v55 = vpop.f32.mrf.mxu1  ;;  %v5463_v46 = vmax.f32 %v5457_v6, %v5461_v40 }
 0x14f   : > { %v1104_v63 = vadd.f32 %v13532_v56, %v1085_v29  ;;  %11717 = vmatmul.msk.f32.gmra.mxu0 %vm451_vm0, %v13450_v14  ;;  %11740 = vmatmul.msk.f32.gmra.mxu1 %vm451_vm0, %v13578_v58 }
 0x150   : > { %11761 = vmatmul.msk.f32.gmra.mxu2 %vm451_vm0, %v13657_v44 }
 0x151   : > { %v1120_v0 = vmax.f32 %v1104_v63, 0.0  ;;  %11775 = vmatmul.msk.f32.gmra.mxu3 %vm451_vm0, %v13502_v61  ;;  %v13713_v63 = vld [vmem:[%s17766_s1 + $0x88] sm:$0xff] }
 0x152   : > { %v5465_v45 = vld [vmem:[#allocation2 + $0x20] ss:$2 sm:$0xff]  ;;  %v5469_v2 = vld [vmem:[#allocation2 + $0x21] ss:$2 sm:$0xff]  ;;  %2317 = vmatpush.msrb.mxu1 %v13713_v63 }
 0x153   : > { %v5472_v7 = vmax.f32 %v5465_v45, %v5469_v2  ;;  %1137 = vst.msk [vmem:[#allocation2 + $0x30] sm:$0xff] %vm1130_vm1, %v1120_v0  ;;  %v1343_v14 = vpop.f32.mrf.mxu2 }
 0x154   : > { %v1344_v52 = vadd.f32 %v1343_v14, %v1266_v55  ;;  %v1471_v19 = vpop.f32.mrf.mxu3  ;;  %v1052_v53 = vpop.f32.mrf.mxu0  ;;  %v13708_v55 = vld [vmem:[%s17766_s1 + $0x60] sm:$0xff]  ;;  %v13721_v14 = vld [vmem:[%s13026_s29 + $0x178] sm:$0xff] }
 0x155   : > { %v5474_v13 = vmax.f32 %v5462_v37, %v5472_v7  ;;  %v13672_v50 = vadd.f32 %v1471_v19, %v1338_v60  ;;  %v1086_v47 = vadd.f32 %v1052_v53, %v13421_v59  ;;  %v1269_v16 = vpop.f32.mrf.mxu1  ;;  %2167 = vmatpush.msra.mxu0 %v13708_v55 }
 0x157   : > { %5476 = vst.msk [vmem:[#allocation3] sm:$0xff] %vm1130_vm1, %v5474_v13  ;;  %v1105_v51 = vadd.f32 %v13532_v56, %v1086_v47  ;;  %11718 = vmatmul.msk.f32.gmra.mxu0 %vm451_vm0, %v13463_v23  ;;  %11741 = vmatmul.msk.f32.gmra.mxu1 %vm451_vm0, %v13594_v9  ;;  %v11807_v47 = vld [vmem:[%s17766_s1 + $0x80] sm:$0xff] }
 0x158   : > { %11762 = vmatmul.msk.f32.gmra.mxu2 %vm451_vm0, %v13676_v22  ;;  %2318 = vmatpush.msrb.mxu1 %v11807_v47 }
 0x159   : > { %v1121_v27 = vmax.f32 %v1105_v51, 0.0  ;;  %11776 = vmatmul.msk.f32.gmra.mxu3 %vm451_vm0, %v13517_v8 }
 0x15b   : > { %1138 = vst.msk [vmem:[#allocation2 + $0x38] sm:$0xff] %vm1130_vm1, %v1121_v27  ;;  %v1346_v59 = vpop.f32.mrf.mxu2 }
 0x15c   : > { %v1347_v60 = vadd.f32 %v1346_v59, %v1269_v16  ;;  %v1474_v24 = vpop.f32.mrf.mxu3  ;;  %v1055_v25 = vpop.f32.mrf.mxu0  ;;  %v13746_v59 = vld [vmem:[%s13026_s29 + $0x180] sm:$0xff] }
 0x15d   : > { %v13689_v62 = vadd.f32 %v1474_v24, %v1341_v5  ;;  %v1087_v23 = vadd.f32 %v1055_v25, %v13434_v3  ;;  %v1272_v28 = vpop.f32.mrf.mxu1  ;;  %v11806_v24 = vld [vmem:[%s17766_s1 + $0x78] sm:$0xff]  ;;  %v13755_v25 = vld [vmem:[%s17766_s1 + $0xa0] sm:$0xff] }
 0x15e   : > { %2319 = vmatpush.msrb.mxu1 %v11806_v24 }
 0x15f   : > { %v1106_v36 = vadd.f32 %v13532_v56, %v1087_v23  ;;  %11719 = vmatmul.msk.f32.gmra.mxu0 %vm451_vm0, %v13476_v32  ;;  %11742 = vmatmul.msk.f32.gmra.mxu1 %vm451_vm0, %v13610_v18  ;;  %v11848_v23 = vld [vmem:[%s17766_s1 + $0x28] sm:$0xff] }
 0x160   : > { %11763 = vmatmul.msk.f32.gmra.mxu2 %vm451_vm0, %v13693_v34  ;;  %2883 = vmatpush.msra.mxu1 %v13552_v21 }
 0x161   : > { %v1122_v5 = vmax.f32 %v1106_v36, 0.0  ;;  %11777 = vmatmul.msk.f32.gmra.mxu3 %vm451_vm0, %v13578_v58 }
 0x162   : > { %v5467_v3 = vld [vmem:[#allocation2 + $0x30] ss:$2 sm:$0xff]  ;;  %v5471_v43 = vld [vmem:[#allocation2 + $0x31] ss:$2 sm:$0xff]  ;;  %2676 = vmatpush.msra.mxu3 %v11848_v23  ;;  %2884 = vmatpush.msra.mxu1 %v13639_v38 }
 0x163   : > { %v5473_v29 = vmax.f32 %v5467_v3, %v5471_v43  ;;  %1139 = vst.msk [vmem:[#allocation2 + $0x40] sm:$0xff] %vm1130_vm1, %v1122_v5  ;;  %v1349_v32 = vpop.f32.mrf.mxu2  ;;  %v13780_v3 = vld [vmem:[%s13026_s29 + $0x188] sm:$0xff] }
 0x164   : > { %v1350_v12 = vadd.f32 %v1349_v32, %v1272_v28  ;;  %v1477_v1 = vpop.f32.mrf.mxu3  ;;  %v1058_v0 = vpop.f32.mrf.mxu0  ;;  %v11786_v28 = vld [vmem:[%s17766_s1 + $0x58] sm:$0xff]  ;;  %2885 = vmatpush.msra.mxu1 %v13708_v55  ;;  %v13800_v55 = vld [vmem:[%s13026_s29 + $0x190] sm:$0xff] }
 0x165   : > { %v5475_v45 = vmax.f32 %v5463_v46, %v5473_v29  ;;  %v13717_v2 = vadd.f32 %v1477_v1, %v1344_v52  ;;  %v1088_v37 = vadd.f32 %v1058_v0, %v13447_v11  ;;  %v1275_v7 = vpop.f32.mrf.mxu1  ;;  %2168 = vmatpush.msra.mxu0 %v11786_v28 }
 0x166   : > { %2886 = vmatpush.msra.mxu1 %v11786_v28 }
 0x167   : > { %5477 = vst.msk [vmem:[#allocation3 + $0x8] sm:$0xff] %vm1130_vm1, %v5475_v45  ;;  %v1107_v10 = vadd.f32 %v13532_v56, %v1088_v37  ;;  %11720 = vmatmul.msk.f32.gmra.mxu0 %vm451_vm0, %v13489_v41  ;;  %11743 = vmatmul.msk.f32.gmra.mxu1 %vm451_vm0, %v13626_v31  ;;  %v13737_v41 = vld [vmem:[%s17766_s1 + $0xa8] sm:$0xff] }
 0x168   : > { %11764 = vmatmul.msk.f32.gmra.mxu2 %vm451_vm0, %v13721_v14 }
 0x169   : > { %v1123_v52 = vmax.f32 %v1107_v10, 0.0  ;;  %11778 = vmatmul.msk.f32.gmra.mxu3 %vm451_vm0, %v13594_v9  ;;  %2468 = vmatpush.msrb.mxu2 %v13737_v41 }
 0x16b   : > { %1140 = vst.msk [vmem:[#allocation2 + $0x48] sm:$0xff] %vm1130_vm1, %v1123_v52  ;;  %v1352_v11 = vpop.f32.mrf.mxu2  ;;  %2469 = vmatpush.msrb.mxu2 %v13755_v25 }
 0x16c   : > { %v1353_v19 = vadd.f32 %v1352_v11, %v1275_v7  ;;  %v1480_v53 = vpop.f32.mrf.mxu3  ;;  %v1061_v13 = vpop.f32.mrf.mxu0 }
 0x16d   : > { %v13742_v16 = vadd.f32 %v1480_v53, %v1347_v60  ;;  %v1089_v51 = vadd.f32 %v1061_v13, %v13460_v20  ;;  %v1278_v27 = vpop.f32.mrf.mxu1  ;;  %3033 = vmatpush.msra.mxu2 %v13558_v54  ;;  %v11931_v53 = vld [vmem:[%s17766_s1 + $0xc0] sm:$0xff] }
 0x16e   : > { %3183 = vmatpush.msrb.mxu3 %v11931_v53 }
 0x16f   : > { %v1108_v60 = vadd.f32 %v13532_v56, %v1089_v51  ;;  %11721 = vmatmul.msk.f32.gmra.mxu0 %vm451_vm0, %v13502_v61  ;;  %11744 = vmatmul.msk.f32.gmra.mxu1 %vm451_vm0, %v13657_v44 }
 0x170   : > { %11765 = vmatmul.msk.f32.gmra.mxu2 %vm451_vm0, %v13746_v59 }
 0x171   : > { %v1124_v20 = vmax.f32 %v1108_v60, 0.0  ;;  %11779 = vmatmul.msk.f32.gmra.mxu3 %vm451_vm0, %v13610_v18  ;;  %3034 = vmatpush.msra.mxu2 %v13644_v35 }
 0x172   : > { %v5479_v28 = vld [vmem:[#allocation2 + $0x40] ss:$2 sm:$0xff] }
 0x173   : > { %1141 = vst.msk [vmem:[#allocation2 + $0x50] sm:$0xff] %vm1130_vm1, %v1124_v20  ;;  %v1355_v61 = vpop.f32.mrf.mxu2  ;;  %3035 = vmatpush.msra.mxu2 %v13713_v63  ;;  %v11785_v63 = vld [vmem:[%s17766_s1 + $0x50] sm:$0xff] }
 0x174   : > { %v1356_v36 = vadd.f32 %v1355_v61, %v1278_v27  ;;  %v1483_v6 = vpop.f32.mrf.mxu3  ;;  %v1064_v40 = vpop.f32.mrf.mxu0  ;;  %2169 = vmatpush.msra.mxu0 %v11785_v63  ;;  %2887 = vmatpush.msra.mxu1 %v11785_v63 }
 0x175   : > { %v13776_v5 = vadd.f32 %v1483_v6, %v1350_v12  ;;  %v1090_v21 = vadd.f32 %v1064_v40, %v13473_v30  ;;  %v1281_v54 = vpop.f32.mrf.mxu1  ;;  %3036 = vmatpush.msra.mxu2 %v11807_v47 }
 0x177   : > { %v1109_v43 = vadd.f32 %v13532_v56, %v1090_v21  ;;  %11722 = vmatmul.msk.f32.gmra.mxu0 %vm451_vm0, %v13517_v8  ;;  %11745 = vmatmul.msk.f32.gmra.mxu1 %vm451_vm0, %v13676_v22 }
 0x178   : > { %11766 = vmatmul.msk.f32.gmra.mxu2 %vm451_vm0, %v13780_v3 }
 0x179   : > { %v1125_v30 = vmax.f32 %v1109_v43, 0.0  ;;  %11780 = vmatmul.msk.f32.gmra.mxu3 %vm451_vm0, %v13626_v31  ;;  %3037 = vmatpush.msra.mxu2 %v11806_v24 }
 0x17b   : > { %1142 = vst.msk [vmem:[#allocation2 + $0x58] sm:$0xff] %vm1130_vm1, %v1125_v30  ;;  %v1358_v38 = vpop.f32.mrf.mxu2 }
 0x17c   : > { %v1359_v8 = vadd.f32 %v1358_v38, %v1281_v54  ;;  %v1486_v35 = vpop.f32.mrf.mxu3  ;;  %v1067_v46 = vpop.f32.mrf.mxu0 }
 0x17d   : > { %v13796_v29 = vadd.f32 %v1486_v35, %v1353_v19  ;;  %v1091_v32 = vadd.f32 %v1067_v46, %v13486_v39  ;;  %v1284_v12 = vpop.f32.mrf.mxu1  ;;  %v13819_v19 = vld [vmem:[%s13026_s29 + $0x198] sm:$0xff] }
 0x17f   : > { %v1110_v1 = vadd.f32 %v13532_v56, %v1091_v32  ;;  %11723 = vmatmul.msk.f32.gmra.mxu0 %vm451_vm0, %v13578_v58  ;;  %11746 = vmatmul.msk.f32.gmra.mxu1 %vm451_vm0, %v13693_v34 }
 0x180   : > { %11767 = vmatmul.msk.f32.gmra.mxu2 %vm451_vm0, %v13800_v55 }
 0x181   : > { %v1126_v39 = vmax.f32 %v1110_v1, 0.0  ;;  %11781 = vmatmul.msk.f32.gmra.mxu3 %vm451_vm0, %v13657_v44 }
 0x182   : > { %v5485_v53 = vld [vmem:[#allocation2 + $0x51] ss:$2 sm:$0xff] }
 0x183   : > { %1143 = vst.msk [vmem:[#allocation2 + $0x60] sm:$0xff] %vm1130_vm1, %v1126_v39  ;;  %v1361_v0 = vpop.f32.mrf.mxu2 }
 0x184   : > { %v1362_v45 = vadd.f32 %v1361_v0, %v1284_v12  ;;  %v1489_v37 = vpop.f32.mrf.mxu3  ;;  %v1070_v7 = vpop.f32.mrf.mxu0 }
 0x185   : > { %v13815_v10 = vadd.f32 %v1489_v37, %v1356_v36  ;;  %v1092_v52 = vadd.f32 %v1070_v7, %v13499_v57  ;;  %v1287_v11 = vpop.f32.mrf.mxu1  ;;  %v5483_v36 = vld [vmem:[#allocation2 + $0x41] ss:$2 sm:$0xff] }
 0x186   : > { %v5486_v21 = vmax.f32 %v5479_v28, %v5483_v36  ;;  %v13865_v7 = vld [vmem:[%s13026_s29 + $0x1a0] sm:$0xff] }
 0x187   : > { %v1111_v13 = vadd.f32 %v13532_v56, %v1092_v52  ;;  %11724 = vmatmul.msk.f32.gmra.mxu0 %vm451_vm0, %v13594_v9  ;;  %11747 = vmatmul.msk.f32.gmra.mxu1 %vm451_vm0, %v13721_v14 }
 0x188   : > { %11768 = vmatmul.msk.f32.gmra.mxu2 %vm451_vm0, %v13819_v19 }
 0x189   : > { %v1127_v57 = vmax.f32 %v1111_v13, 0.0  ;;  %11782 = vmatmul.msk.f32.gmra.mxu3 %vm451_vm0, %v13676_v22 }
 0x18b   : > { %1144 = vst.msk [vmem:[#allocation2 + $0x68] sm:$0xff] %vm1130_vm1, %v1127_v57  ;;  %v1364_v47 = vpop.f32.mrf.mxu2 }
 0x18c   : > { %v1365_v51 = vadd.f32 %v1364_v47, %v1287_v11  ;;  %v1492_v27 = vpop.f32.mrf.mxu3  ;;  %v1073_v24 = vpop.f32.mrf.mxu0  ;;  %v5481_v11 = vld [vmem:[#allocation2 + $0x50] ss:$2 sm:$0xff] }
 0x18d   : > { %v13834_v60 = vadd.f32 %v1492_v27, %v1359_v8  ;;  %v1093_v20 = vadd.f32 %v1073_v24, %v13514_v48  ;;  %v1753_v61 = vpop.f32.mrf.mxu1  ;;  %v5487_v47 = vmax.f32 %v5481_v11, %v5485_v53 }
 0x18f   : > { %v1112_v23 = vadd.f32 %v13532_v56, %v1093_v20  ;;  %11725 = vmatmul.msk.f32.gmra.mxu0 %vm451_vm0, %v13610_v18  ;;  %11811 = vmatmul.msk.f32.vlgmr.msrb.gmra.mxu1 %vm451_vm0, %v13657_v44 }
 0x190   : > { %11832 = vmatmul.msk.f32.vlgmr.msrb.gmra.mxu2 %vm451_vm0, %v13746_v59 }
 0x191   : > { %v1128_v6 = vmax.f32 %v1112_v23, 0.0  ;;  %11783 = vmatmul.msk.f32.gmra.mxu3 %vm451_vm0, %v13693_v34 }
 0x192   : > { %v5489_v40 = vld [vmem:[#allocation2 + $0x60] ss:$2 sm:$0xff]  ;;  %v5493_v48 = vld [vmem:[#allocation2 + $0x61] ss:$2 sm:$0xff] }
 0x193   : > { %v5496_v54 = vmax.f32 %v5489_v40, %v5493_v48  ;;  %1145 = vst.msk [vmem:[#allocation2 + $0x70] sm:$0xff] %vm1130_vm1, %v1128_v6  ;;  %v1960_v43 = vpop.f32.mrf.mxu2  ;;  %v2603_v6 = vld [vmem:[%s17766_s1 + $0x20] sm:$0xff]  ;;  %v13887_v48 = vld [vmem:[%s13026_s29 + $0x1a8] sm:$0xff] }
 0x194   : > { %v1495_v30 = vpop.f32.mrf.mxu3  ;;  %v1076_v38 = vpop.f32.mrf.mxu0  ;;  %2749 = vmatpush.msrb.mxu0 %v2603_v6  ;;  %3467 = vmatpush.msrb.mxu1 %v2603_v6 }
 0x195   : > { %v13847_v8 = vadd.f32 %v1495_v30, %v1362_v45  ;;  %v1094_v35 = vadd.f32 %v1076_v38, %v13534_v17  ;;  %v1756_v46 = vpop.f32.mrf.mxu1  ;;  %v5498_v32 = vmax.f32 %v5486_v21, %v5496_v54 }
 0x197   : > { %v1113_v12 = vadd.f32 %v13532_v56, %v1094_v35  ;;  %11726 = vmatmul.msk.f32.gmra.mxu0 %vm451_vm0, %v13626_v31  ;;  %11812 = vmatmul.msk.f32.gmra.mxu1 %vm451_vm0, %v13676_v22  ;;  %5500 = vst.msk [vmem:[#allocation3 + $0x10] sm:$0xff] %vm1130_vm1, %v5498_v32  ;;  %v13904_v32 = vld [vmem:[%s13026_s29 + $0x1b0] sm:$0xff] }
 0x198   : > { %11833 = vmatmul.msk.f32.gmra.mxu2 %vm451_vm0, %v13780_v3 }
 0x199   : > { %v1129_v63 = vmax.f32 %v1113_v12, 0.0  ;;  %11784 = vmatmul.msk.f32.gmra.mxu3 %vm451_vm0, %v13721_v14 }
 0x19b   : > { %1146 = vst.msk [vmem:[#allocation2 + $0x78] sm:$0xff] %vm1130_vm1, %v1129_v63  ;;  %v1963_v17 = vpop.f32.mrf.mxu2 }
 0x19c   : > { %v1498_v1 = vpop.f32.mrf.mxu3  ;;  %v1603_v39 = vpop.f32.mrf.mxu0 }
 0x19d   : > { %v13861_v0 = vadd.f32 %v1498_v1, %v1365_v51  ;;  %v1651_v45 = vadd.f32 %v1603_v39, %v13560_v33  ;;  %v1759_v37 = vpop.f32.mrf.mxu1 }
 0x19f   : > { %v1801_v52 = vadd.f32 %v1753_v61, %v1651_v45  ;;  %11790 = vmatmul.msk.f32.vlgmr.msra.gmra.mxu0 %vm451_vm0, %v13578_v58  ;;  %11813 = vmatmul.msk.f32.gmra.mxu1 %vm451_vm0, %v13693_v34  ;;  %v11930_v61 = vld [vmem:[%s17766_s1 + $0xb8] sm:$0xff] }
 0x1a0   : > { %11834 = vmatmul.msk.f32.gmra.mxu2 %vm451_vm0, %v13800_v55  ;;  %3184 = vmatpush.msrb.mxu3 %v11930_v61 }
 0x1a1   : > { %v1817_v13 = vadd.f32 %v13532_v56, %v1801_v52  ;;  %11853 = vmatmul.msk.f32.vlgmr.msra.gmra.mxu3 %vm451_vm0, %v13865_v7  ;;  %v13920_v52 = vld [vmem:[%s13026_s29 + $0x1b8] sm:$0xff] }
 0x1a2   : > { %v5491_v33 = vld [vmem:[#allocation2 + $0x70] ss:$2 sm:$0xff]  ;;  %v5495_v57 = vld [vmem:[#allocation2 + $0x71] ss:$2 sm:$0xff] }
 0x1a3   : > { %v5497_v51 = vmax.f32 %v5491_v33, %v5495_v57  ;;  %v1833_v27 = vmax.f32 %v1817_v13, 0.0  ;;  %v1966_v58 = vpop.f32.mrf.mxu2 }
 0x1a4   : > { %v2037_v24 = vpop.f32.mrf.mxu3  ;;  %v1606_v20 = vpop.f32.mrf.mxu0 }
 0x1a5   : > { %1849 = vst.msk [vmem:[#allocation2 + $0x80] sm:$0xff] %vm1130_vm1, %v1833_v27  ;;  %v13880_v23 = vadd.f32 %v2037_v24, %v1960_v43  ;;  %v1652_v28 = vadd.f32 %v1606_v20, %v13574_v49  ;;  %v1762_v36 = vpop.f32.mrf.mxu1  ;;  %v5499_v40 = vmax.f32 %v5487_v47, %v5497_v51  ;;  %v13936_v27 = vld [vmem:[%s13026_s29 + $0x1c0] sm:$0xff] }
 0x1a7   : > { %v1802_v21 = vadd.f32 %v1756_v46, %v1652_v28  ;;  %11791 = vmatmul.msk.f32.gmra.mxu0 %vm451_vm0, %v13594_v9  ;;  %11814 = vmatmul.msk.f32.gmra.mxu1 %vm451_vm0, %v13721_v14  ;;  %5501 = vst.msk [vmem:[#allocation3 + $0x18] sm:$0xff] %vm1130_vm1, %v5499_v40 }
 0x1a8   : > { %11835 = vmatmul.msk.f32.gmra.mxu2 %vm451_vm0, %v13819_v19 }
 0x1a9   : > { %v1818_v49 = vadd.f32 %v13532_v56, %v1802_v21  ;;  %11854 = vmatmul.msk.f32.gmra.mxu3 %vm451_vm0, %v13887_v48  ;;  %v2602_v21 = vld [vmem:[%s17766_s1 + $0x18] sm:$0xff] }
 0x1aa   : > { %2750 = vmatpush.msrb.mxu0 %v2602_v21  ;;  %3468 = vmatpush.msrb.mxu1 %v2602_v21 }
 0x1ab   : > { %v1834_v54 = vmax.f32 %v1818_v49, 0.0  ;;  %v1969_v43 = vpop.f32.mrf.mxu2  ;;  %v13958_v49 = vld [vmem:[%s13026_s29 + $0x1c8] sm:$0xff] }
 0x1ac   : > { %v2040_v30 = vpop.f32.mrf.mxu3  ;;  %v1609_v38 = vpop.f32.mrf.mxu0 }
 0x1ad   : > { %1850 = vst.msk [vmem:[#allocation2 + $0x88] sm:$0xff] %vm1130_vm1, %v1834_v54  ;;  %v13900_v9 = vadd.f32 %v2040_v30, %v1963_v17  ;;  %v1653_v35 = vadd.f32 %v1609_v38, %v13590_v4  ;;  %v1765_v46 = vpop.f32.mrf.mxu1 }
 0x1af   : > { %v1803_v12 = vadd.f32 %v1759_v37, %v1653_v35  ;;  %11792 = vmatmul.msk.f32.gmra.mxu0 %vm451_vm0, %v13610_v18  ;;  %11815 = vmatmul.msk.f32.gmra.mxu1 %vm451_vm0, %v13746_v59 }
 0x1b0   : > { %11836 = vmatmul.msk.f32.gmra.mxu2 %vm451_vm0, %v13865_v7 }
 0x1b1   : > { %v1819_v63 = vadd.f32 %v13532_v56, %v1803_v12  ;;  %11855 = vmatmul.msk.f32.gmra.mxu3 %vm451_vm0, %v13904_v32 }
 0x1b3   : > { %v1835_v4 = vmax.f32 %v1819_v63, 0.0  ;;  %v1972_v17 = vpop.f32.mrf.mxu2  ;;  %v13976_v63 = vld [vmem:[%s13026_s29 + $0x1d0] sm:$0xff] }
 0x1b4   : > { %v2043_v1 = vpop.f32.mrf.mxu3  ;;  %v1612_v39 = vpop.f32.mrf.mxu0 }
 0x1b5   : > { %1851 = vst.msk [vmem:[#allocation2 + $0x90] sm:$0xff] %vm1130_vm1, %v1835_v4  ;;  %v13916_v45 = vadd.f32 %v2043_v1, %v1966_v58  ;;  %v1654_v18 = vadd.f32 %v1612_v39, %v13606_v15  ;;  %v1768_v37 = vpop.f32.mrf.mxu1  ;;  %v5507_v4 = vld [vmem:[#allocation2 + $0x81] ss:$2 sm:$0xff] }
 0x1b7   : > { %v1804_v11 = vadd.f32 %v1762_v36, %v1654_v18  ;;  %11793 = vmatmul.msk.f32.gmra.mxu0 %vm451_vm0, %v13626_v31  ;;  %11816 = vmatmul.msk.f32.gmra.mxu1 %vm451_vm0, %v13780_v3 }
 0x1b8   : > { %11837 = vmatmul.msk.f32.gmra.mxu2 %vm451_vm0, %v13887_v48 }
 0x1b9   : > { %v1820_v53 = vadd.f32 %v13532_v56, %v1804_v11  ;;  %11856 = vmatmul.msk.f32.gmra.mxu3 %vm451_vm0, %v13920_v52 }
 0x1bb   : > { %v1836_v15 = vmax.f32 %v1820_v53, 0.0  ;;  %v1975_v13 = vpop.f32.mrf.mxu2 }
 0x1bc   : > { %v2046_v33 = vpop.f32.mrf.mxu3  ;;  %v1615_v57 = vpop.f32.mrf.mxu0 }
 0x1bd   : > { %1852 = vst.msk [vmem:[#allocation2 + $0x98] sm:$0xff] %vm1130_vm1, %v1836_v15  ;;  %v13932_v47 = vadd.f32 %v2046_v33, %v1969_v43  ;;  %v1655_v31 = vadd.f32 %v1615_v57, %v13622_v26  ;;  %v1771_v51 = vpop.f32.mrf.mxu1  ;;  %v13992_v57 = vld [vmem:[%s13026_s29 + $0x1d8] sm:$0xff] }
 0x1bf   : > { %v1805_v58 = vadd.f32 %v1765_v46, %v1655_v31  ;;  %11794 = vmatmul.msk.f32.gmra.mxu0 %vm451_vm0, %v13657_v44  ;;  %11817 = vmatmul.msk.f32.gmra.mxu1 %vm451_vm0, %v13800_v55  ;;  %v11929_v44 = vld [vmem:[%s17766_s1 + $0xb0] sm:$0xff] }
 0x1c0   : > { %11838 = vmatmul.msk.f32.gmra.mxu2 %vm451_vm0, %v13904_v32  ;;  %3185 = vmatpush.msrb.mxu3 %v11929_v44  ;;  %v14009_v44 = vld [vmem:[%s13026_s29 + $0x1e0] sm:$0xff] }
 0x1c1   : > { %v1821_v24 = vadd.f32 %v13532_v56, %v1805_v58  ;;  %11857 = vmatmul.msk.f32.gmra.mxu3 %vm451_vm0, %v13936_v27 }
 0x1c2   : > { %3186 = vmatpush.msrb.mxu3 %v13737_v41 }
 0x1c3   : > { %v1837_v26 = vmax.f32 %v1821_v24, 0.0  ;;  %v1978_v20 = vpop.f32.mrf.mxu2 }
 0x1c4   : > { %v2049_v61 = vpop.f32.mrf.mxu3  ;;  %v1618_v28 = vpop.f32.mrf.mxu0  ;;  %3187 = vmatpush.msrb.mxu3 %v13755_v25  ;;  %v5509_v21 = vld [vmem:[#allocation2 + $0x91] ss:$2 sm:$0xff] }
 0x1c5   : > { %1853 = vst.msk [vmem:[#allocation2 + $0xa0] sm:$0xff] %vm1130_vm1, %v1837_v26  ;;  %v13951_v36 = vadd.f32 %v2049_v61, %v1972_v17  ;;  %v1656_v6 = vadd.f32 %v1618_v28, %v13653_v42  ;;  %v1774_v40 = vpop.f32.mrf.mxu1 }
 0x1c7   : > { %v1806_v54 = vadd.f32 %v1768_v37, %v1656_v6  ;;  %11795 = vmatmul.msk.f32.gmra.mxu0 %vm451_vm0, %v13676_v22  ;;  %11818 = vmatmul.msk.f32.gmra.mxu1 %vm451_vm0, %v13819_v19 }
 0x1c8   : > { %11839 = vmatmul.msk.f32.gmra.mxu2 %vm451_vm0, %v13920_v52 }
 0x1c9   : > { %v1822_v42 = vadd.f32 %v13532_v56, %v1806_v54  ;;  %11858 = vmatmul.msk.f32.gmra.mxu3 %vm451_vm0, %v13958_v49 }
 0x1cb   : > { %v1838_v43 = vmax.f32 %v1822_v42, 0.0  ;;  %v1981_v30 = vpop.f32.mrf.mxu2 }
 0x1cc   : > { %v2052_v38 = vpop.f32.mrf.mxu3  ;;  %v1621_v35 = vpop.f32.mrf.mxu0 }
 0x1cd   : > { %1854 = vst.msk [vmem:[#allocation2 + $0xa8] sm:$0xff] %vm1130_vm1, %v1838_v43  ;;  %v13972_v22 = vadd.f32 %v2052_v38, %v1975_v13  ;;  %v1657_v46 = vadd.f32 %v1621_v35, %v13672_v50  ;;  %v1777_v12 = vpop.f32.mrf.mxu1  ;;  %v5503_v50 = vld [vmem:[#allocation2 + $0x80] ss:$2 sm:$0xff] }
 0x1ce   : > { %v5510_v13 = vmax.f32 %v5503_v50, %v5507_v4 }
 0x1cf   : > { %v1807_v41 = vadd.f32 %v1771_v51, %v1657_v46  ;;  %11796 = vmatmul.msk.f32.gmra.mxu0 %vm451_vm0, %v13693_v34  ;;  %11819 = vmatmul.msk.f32.gmra.mxu1 %vm451_vm0, %v13865_v7  ;;  %v2601_v46 = vld [vmem:[%s17766_s1 + $0x10] sm:$0xff] }
 0x1d0   : > { %11840 = vmatmul.msk.f32.gmra.mxu2 %vm451_vm0, %v13936_v27  ;;  %2751 = vmatpush.msrb.mxu0 %v2601_v46 }
 0x1d1   : > { %v1823_v25 = vadd.f32 %v13532_v56, %v1807_v41  ;;  %11859 = vmatmul.msk.f32.gmra.mxu3 %vm451_vm0, %v13976_v63  ;;  %3469 = vmatpush.msrb.mxu1 %v2601_v46  ;;  %v14085_v46 = vld [vmem:[%s13026_s29 + $0x200] sm:$0xff] }
 0x1d3   : > { %v1839_v17 = vmax.f32 %v1823_v25, 0.0  ;;  %v1984_v1 = vpop.f32.mrf.mxu2 }
 0x1d4   : > { %v5513_v39 = vld [vmem:[#allocation2 + $0xa0] ss:$2 sm:$0xff]  ;;  %v5517_v18 = vld [vmem:[#allocation2 + $0xa1] ss:$2 sm:$0xff]  ;;  %v2055_v37 = vpop.f32.mrf.mxu3  ;;  %v1624_v34 = vpop.f32.mrf.mxu0 }
 0x1d5   : > { %1855 = vst.msk [vmem:[#allocation2 + $0xb0] sm:$0xff] %vm1130_vm1, %v1839_v17  ;;  %v13988_v11 = vadd.f32 %v2055_v37, %v1978_v20  ;;  %v1658_v53 = vadd.f32 %v1624_v34, %v13689_v62  ;;  %v1780_v15 = vpop.f32.mrf.mxu1  ;;  %v5520_v33 = vmax.f32 %v5513_v39, %v5517_v18  ;;  %v14028_v17 = vld [vmem:[%s13026_s29 + $0x1e8] sm:$0xff] }
 0x1d7   : > { %v1808_v31 = vadd.f32 %v1774_v40, %v1658_v53  ;;  %11797 = vmatmul.msk.f32.gmra.mxu0 %vm451_vm0, %v13721_v14  ;;  %11820 = vmatmul.msk.f32.gmra.mxu1 %vm451_vm0, %v13887_v48  ;;  %v5522_v51 = vmax.f32 %v5510_v13, %v5520_v33  ;;  %v5505_v40 = vld [vmem:[#allocation2 + $0x90] ss:$2 sm:$0xff] }
 0x1d8   : > { %11841 = vmatmul.msk.f32.gmra.mxu2 %vm451_vm0, %v13958_v49 }
 0x1d9   : > { %v1824_v58 = vadd.f32 %v13532_v56, %v1808_v31  ;;  %11860 = vmatmul.msk.f32.gmra.mxu3 %vm451_vm0, %v13992_v57  ;;  %5524 = vst.msk [vmem:[#allocation3 + $0x20] sm:$0xff] %vm1130_vm1, %v5522_v51  ;;  %v14045_v31 = vld [vmem:[%s13026_s29 + $0x1f0] sm:$0xff] }
 0x1db   : > { %v1840_v62 = vmax.f32 %v1824_v58, 0.0  ;;  %v1987_v24 = vpop.f32.mrf.mxu2 }
 0x1dc   : > { %v2058_v26 = vpop.f32.mrf.mxu3  ;;  %v1627_v20 = vpop.f32.mrf.mxu0 }
 0x1dd   : > { %1856 = vst.msk [vmem:[#allocation2 + $0xb8] sm:$0xff] %vm1130_vm1, %v1840_v62  ;;  %v14005_v14 = vadd.f32 %v2058_v26, %v1981_v30  ;;  %v1659_v61 = vadd.f32 %v1627_v20, %v13717_v2  ;;  %v1783_v28 = vpop.f32.mrf.mxu1 }
 0x1df   : > { %v1809_v6 = vadd.f32 %v1777_v12, %v1659_v61  ;;  %11798 = vmatmul.msk.f32.gmra.mxu0 %vm451_vm0, %v13746_v59  ;;  %11821 = vmatmul.msk.f32.gmra.mxu1 %vm451_vm0, %v13904_v32  ;;  %v5511_v12 = vmax.f32 %v5505_v40, %v5509_v21  ;;  %v14064_v40 = vld [vmem:[%s13026_s29 + $0x1f8] sm:$0xff] }
 0x1e0   : > { %11842 = vmatmul.msk.f32.gmra.mxu2 %vm451_vm0, %v13976_v63 }
 0x1e1   : > { %v1825_v54 = vadd.f32 %v13532_v56, %v1809_v6  ;;  %11861 = vmatmul.msk.f32.gmra.mxu3 %vm451_vm0, %v14009_v44  ;;  %v2600_v6 = vld [vmem:[%s17766_s1 + $0x8] sm:$0xff] }
 0x1e2   : > { %2752 = vmatpush.msrb.mxu0 %v2600_v6  ;;  %3470 = vmatpush.msrb.mxu1 %v2600_v6 }
 0x1e3   : > { %v1841_v2 = vmax.f32 %v1825_v54, 0.0  ;;  %v1990_v42 = vpop.f32.mrf.mxu2 }
 0x1e4   : > { %v5515_v43 = vld [vmem:[#allocation2 + $0xb0] ss:$2 sm:$0xff]  ;;  %v5519_v30 = vld [vmem:[#allocation2 + $0xb1] ss:$2 sm:$0xff]  ;;  %v2061_v38 = vpop.f32.mrf.mxu3  ;;  %v1630_v35 = vpop.f32.mrf.mxu0 }
 0x1e5   : > { %1857 = vst.msk [vmem:[#allocation2 + $0xc0] sm:$0xff] %vm1130_vm1, %v1841_v2  ;;  %v14024_v41 = vadd.f32 %v2061_v38, %v1984_v1  ;;  %v1660_v25 = vadd.f32 %v1630_v35, %v13742_v16  ;;  %v1786_v50 = vpop.f32.mrf.mxu1  ;;  %v5521_v4 = vmax.f32 %v5515_v43, %v5519_v30 }
 0x1e7   : > { %v1810_v39 = vadd.f32 %v1780_v15, %v1660_v25  ;;  %11799 = vmatmul.msk.f32.gmra.mxu0 %vm451_vm0, %v13780_v3  ;;  %11822 = vmatmul.msk.f32.gmra.mxu1 %vm451_vm0, %v13920_v52  ;;  %v5523_v18 = vmax.f32 %v5511_v12, %v5521_v4  ;;  %v2599_v12 = vld [vmem:[%s17766_s1] sm:$0xff] }
 0x1e8   : > { %11843 = vmatmul.msk.f32.gmra.mxu2 %vm451_vm0, %v13992_v57  ;;  %2753 = vmatpush.msrb.mxu0 %v2599_v12 }
 0x1e9   : > { %v1826_v16 = vadd.f32 %v13532_v56, %v1810_v39  ;;  %11862 = vmatmul.msk.f32.gmra.mxu3 %vm451_vm0, %v14028_v17  ;;  %5525 = vst.msk [vmem:[#allocation3 + $0x28] sm:$0xff] %vm1130_vm1, %v5523_v18  ;;  %3471 = vmatpush.msrb.mxu1 %v2599_v12 }
 0x1eb   : > { %v1842_v1 = vmax.f32 %v1826_v16, 0.0  ;;  %v1993_v37 = vpop.f32.mrf.mxu2 }
 0x1ec   : > { %v2064_v34 = vpop.f32.mrf.mxu3  ;;  %v1633_v53 = vpop.f32.mrf.mxu0 }
 0x1ed   : > { %1858 = vst.msk [vmem:[#allocation2 + $0xc8] sm:$0xff] %vm1130_vm1, %v1842_v1  ;;  %v14041_v15 = vadd.f32 %v2064_v34, %v1987_v24  ;;  %v1661_v13 = vadd.f32 %v1633_v53, %v13776_v5  ;;  %v1789_v33 = vpop.f32.mrf.mxu1  ;;  %v14104_v34 = vld [vmem:[%s13026_s29 + $0x208] sm:$0xff] }
 0x1ef   : > { %v1811_v51 = vadd.f32 %v1783_v28, %v1661_v13  ;;  %11800 = vmatmul.msk.f32.gmra.mxu0 %vm451_vm0, %v13800_v55  ;;  %11823 = vmatmul.msk.f32.gmra.mxu1 %vm451_vm0, %v13936_v27  ;;  %v12010_v13 = vld [vmem:[%s17766_s1 + $0x98] sm:$0xff] }
 0x1f0   : > { %11844 = vmatmul.msk.f32.gmra.mxu2 %vm451_vm0, %v14009_v44  ;;  %3751 = vmatpush.msra.mxu3 %v12010_v13 }
 0x1f1   : > { %v1827_v58 = vadd.f32 %v13532_v56, %v1811_v51  ;;  %11863 = vmatmul.msk.f32.gmra.mxu3 %vm451_vm0, %v14045_v31 }
 0x1f3   : > { %v1843_v5 = vmax.f32 %v1827_v58, 0.0  ;;  %v1996_v62 = vpop.f32.mrf.mxu2 }
 0x1f4   : > { %v2067_v24 = vpop.f32.mrf.mxu3  ;;  %v1636_v26 = vpop.f32.mrf.mxu0 }
 0x1f5   : > { %1859 = vst.msk [vmem:[#allocation2 + $0xd0] sm:$0xff] %vm1130_vm1, %v1843_v5  ;;  %v14057_v20 = vadd.f32 %v2067_v24, %v1990_v42  ;;  %v1662_v61 = vadd.f32 %v1636_v26, %v13796_v29  ;;  %v1792_v28 = vpop.f32.mrf.mxu1  ;;  %v14075_v29 = vld [vmem:[%s17767_s2] ss:$0 sm:$0xff] }
 0x1f7   : > { %v1812_v56 = vadd.f32 %v1786_v50, %v1662_v61  ;;  %11801 = vmatmul.msk.f32.gmra.mxu0 %vm451_vm0, %v13819_v19  ;;  %11824 = vmatmul.msk.f32.gmra.mxu1 %vm451_vm0, %v13958_v49  ;;  %v14123_v61 = vld [vmem:[%s13026_s29 + $0x210] sm:$0xff] }
 0x1f8   : > { %11845 = vmatmul.msk.f32.gmra.mxu2 %vm451_vm0, %v14028_v17 }
 0x1f9   : > { %v1828_v21 = vadd.f32 %v14075_v29, %v1812_v56  ;;  %11864 = vmatmul.msk.f32.gmra.mxu3 %vm451_vm0, %v14064_v40  ;;  %v5531_v56 = vld [vmem:[#allocation2 + $0xc1] ss:$2 sm:$0xff] }
 0x1fb   : > { %v1844_v54 = vmax.f32 %v1828_v21, 0.0  ;;  %v1999_v2 = vpop.f32.mrf.mxu2 }
 0x1fc   : > { %v2070_v42 = vpop.f32.mrf.mxu3  ;;  %v1639_v43 = vpop.f32.mrf.mxu0 }
 0x1fd   : > { %1860 = vst.msk [vmem:[#allocation2 + $0xd8] sm:$0xff] %vm1130_vm1, %v1844_v54  ;;  %v14081_v30 = vadd.f32 %v2070_v42, %v1993_v37  ;;  %v1663_v38 = vadd.f32 %v1639_v43, %v13815_v10  ;;  %v1795_v35 = vpop.f32.mrf.mxu1 }
 0x1ff   : > { %v1813_v25 = vadd.f32 %v1789_v33, %v1663_v38  ;;  %11802 = vmatmul.msk.f32.gmra.mxu0 %vm451_vm0, %v13865_v7  ;;  %11825 = vmatmul.msk.f32.gmra.mxu1 %vm451_vm0, %v13976_v63 }
 0x200   : > { %11846 = vmatmul.msk.f32.gmra.mxu2 %vm451_vm0, %v14045_v31 }
 0x201   : > { %v1829_v10 = vadd.f32 %v14075_v29, %v1813_v25  ;;  %11865 = vmatmul.msk.f32.gmra.mxu3 %vm451_vm0, %v14085_v46 }
 0x203   : > { %v1845_v50 = vmax.f32 %v1829_v10, 0.0  ;;  %v2002_v4 = vpop.f32.mrf.mxu2 }
 0x204   : > { %v2073_v39 = vpop.f32.mrf.mxu3  ;;  %v1642_v18 = vpop.f32.mrf.mxu0 }
 0x205   : > { %1861 = vst.msk [vmem:[#allocation2 + $0xe0] sm:$0xff] %vm1130_vm1, %v1845_v50  ;;  %v14100_v16 = vadd.f32 %v2073_v39, %v1996_v62  ;;  %v1664_v1 = vadd.f32 %v1642_v18, %v13834_v60  ;;  %v1798_v37 = vpop.f32.mrf.mxu1  ;;  %v14139_v39 = vld [vmem:[%s13026_s29 + $0x218] sm:$0xff] }
 0x207   : > { %v1814_v53 = vadd.f32 %v1792_v28, %v1664_v1  ;;  %11803 = vmatmul.msk.f32.gmra.mxu0 %vm451_vm0, %v13887_v48  ;;  %11826 = vmatmul.msk.f32.gmra.mxu1 %vm451_vm0, %v13992_v57 }
 0x208   : > { %11847 = vmatmul.msk.f32.gmra.mxu2 %vm451_vm0, %v14064_v40 }
 0x209   : > { %v1830_v60 = vadd.f32 %v14075_v29, %v1814_v53  ;;  %11866 = vmatmul.msk.f32.gmra.mxu3 %vm451_vm0, %v14104_v34 }
 0x20b   : > { %v1846_v33 = vmax.f32 %v1830_v60, 0.0  ;;  %v2005_v51 = vpop.f32.mrf.mxu2 }
 0x20c   : > { %v2076_v58 = vpop.f32.mrf.mxu3  ;;  %v1645_v5 = vpop.f32.mrf.mxu0 }
 0x20d   : > { %1862 = vst.msk [vmem:[#allocation2 + $0xe8] sm:$0xff] %vm1130_vm1, %v1846_v33  ;;  %v14119_v62 = vadd.f32 %v2076_v58, %v1999_v2  ;;  %v1665_v24 = vadd.f32 %v1645_v5, %v13847_v8  ;;  %v2321_v26 = vpop.f32.mrf.mxu1  ;;  %v5527_v8 = vld [vmem:[#allocation2 + $0xc0] ss:$2 sm:$0xff] }
 0x20e   : > { %v5534_v10 = vmax.f32 %v5527_v8, %v5531_v56 }
 0x20f   : > { %v1815_v28 = vadd.f32 %v1795_v35, %v1665_v24  ;;  %11804 = vmatmul.msk.f32.gmra.mxu0 %vm451_vm0, %v13904_v32  ;;  %11890 = vmatmul.msk.f32.vlgmr.msra.gmra.mxu1 %vm451_vm0, %v13936_v27  ;;  %v12009_v24 = vld [vmem:[%s17766_s1 + $0x90] sm:$0xff] }
 0x210   : > { %11911 = vmatmul.msk.f32.vlgmr.msra.gmra.mxu2 %vm451_vm0, %v14009_v44  ;;  %3752 = vmatpush.msra.mxu3 %v12009_v24 }
 0x211   : > { %v1831_v6 = vadd.f32 %v14075_v29, %v1815_v28  ;;  %11867 = vmatmul.msk.f32.gmra.mxu3 %vm451_vm0, %v14123_v61 }
 0x213   : > { %v1847_v21 = vmax.f32 %v1831_v6, 0.0  ;;  %v2471_v54 = vpop.f32.mrf.mxu2 }
 0x214   : > { %v5537_v2 = vld [vmem:[#allocation2 + $0xe0] ss:$2 sm:$0xff]  ;;  %v5541_v42 = vld [vmem:[#allocation2 + $0xe1] ss:$2 sm:$0xff]  ;;  %v2079_v43 = vpop.f32.mrf.mxu3  ;;  %v1648_v38 = vpop.f32.mrf.mxu0 }
 0x215   : > { %1863 = vst.msk [vmem:[#allocation2 + $0xf0] sm:$0xff] %vm1130_vm1, %v1847_v21  ;;  %v14135_v35 = vadd.f32 %v2079_v43, %v2002_v4  ;;  %v1666_v12 = vadd.f32 %v1648_v38, %v13861_v0  ;;  %v2324_v25 = vpop.f32.mrf.mxu1  ;;  %v5544_v50 = vmax.f32 %v5537_v2, %v5541_v42 }
 0x217   : > { %v1816_v18 = vadd.f32 %v1798_v37, %v1666_v12  ;;  %11805 = vmatmul.msk.f32.gmra.mxu0 %vm451_vm0, %v13920_v52  ;;  %11891 = vmatmul.msk.f32.gmra.mxu1 %vm451_vm0, %v13958_v49  ;;  %v5546_v1 = vmax.f32 %v5534_v10, %v5544_v50  ;;  %v14178_v10 = vld [vmem:[%s17766_s1 + $0x70] sm:$0xff] }
 0x218   : > { %11912 = vmatmul.msk.f32.gmra.mxu2 %vm451_vm0, %v14028_v17 }
 0x219   : > { %v1832_v4 = vadd.f32 %v14075_v29, %v1816_v18  ;;  %11868 = vmatmul.msk.f32.gmra.mxu3 %vm451_vm0, %v14139_v39  ;;  %5548 = vst.msk [vmem:[#allocation3 + $0x30] sm:$0xff] %vm1130_vm1, %v5546_v1  ;;  %3601 = vmatpush.msrb.mxu2 %v14178_v10 }
 0x21b   : > { %v1848_v0 = vmax.f32 %v1832_v4, 0.0  ;;  %v2474_v53 = vpop.f32.mrf.mxu2 }
 0x21c   : > { %v2082_v37 = vpop.f32.mrf.mxu3  ;;  %v2171_v13 = vpop.f32.mrf.mxu0 }
 0x21d   : > { %1864 = vst.msk [vmem:[#allocation2 + $0xf8] sm:$0xff] %vm1130_vm1, %v1848_v0  ;;  %v14152_v60 = vadd.f32 %v2082_v37, %v2005_v51  ;;  %v2219_v33 = vadd.f32 %v2171_v13, %v13880_v23  ;;  %v2327_v58 = vpop.f32.mrf.mxu1  ;;  %v5529_v23 = vld [vmem:[#allocation2 + $0xd0] ss:$2 sm:$0xff] }
 0x21f   : > { %v2369_v5 = vadd.f32 %v2321_v26, %v2219_v33  ;;  %11869 = vmatmul.msk.f32.vlgmr.msrb.gmra.mxu0 %vm451_vm0, %v13746_v59  ;;  %11892 = vmatmul.msk.f32.gmra.mxu1 %vm451_vm0, %v13976_v63  ;;  %v5533_v26 = vld [vmem:[#allocation2 + $0xd1] ss:$2 sm:$0xff] }
 0x220   : > { %11913 = vmatmul.msk.f32.gmra.mxu2 %vm451_vm0, %v14045_v31  ;;  %v5535_v38 = vmax.f32 %v5529_v23, %v5533_v26 }
 0x221   : > { %v2519_v51 = vadd.f32 %v2471_v54, %v2369_v5  ;;  %11932 = vmatmul.msk.f32.vlgmr.msrb.gmra.mxu3 %vm451_vm0, %v14085_v46 }
 0x223   : > { %v2535_v28 = vadd.f32 %v14075_v29, %v2519_v51  ;;  %v2477_v59 = vpop.f32.mrf.mxu2 }
 0x224   : > { %v5539_v6 = vld [vmem:[#allocation2 + $0xf0] ss:$2 sm:$0xff]  ;;  %v5543_v8 = vld [vmem:[#allocation2 + $0xf1] ss:$2 sm:$0xff]  ;;  %v14167_v56 = vpop.f32.mrf.mxu3  ;;  %v2174_v21 = vpop.f32.mrf.mxu0 }
 0x225   : > { %v2551_v2 = vmax.f32 %v2535_v28, 0.0  ;;  %v2220_v42 = vadd.f32 %v2174_v21, %v13900_v9  ;;  %v2330_v43 = vpop.f32.mrf.mxu1  ;;  %v5545_v12 = vmax.f32 %v5539_v6, %v5543_v8  ;;  %v11952_v9 = vld [vmem:[%s17766_s1 + $0x48] sm:$0xff] }
 0x226   : > { %3390 = vmatpush.msra.mxu0 %v11952_v9  ;;  %4108 = vmatpush.msra.mxu1 %v11952_v9 }
 0x227   : > { %2567 = vst.msk [vmem:[#allocation2 + $0x100] sm:$0xff] %vm1130_vm1, %v2551_v2  ;;  %v2370_v54 = vadd.f32 %v2324_v25, %v2220_v42  ;;  %11870 = vmatmul.msk.f32.gmra.mxu0 %vm451_vm0, %v13780_v3  ;;  %11893 = vmatmul.msk.f32.gmra.mxu1 %vm451_vm0, %v13992_v57  ;;  %v5547_v50 = vmax.f32 %v5535_v38, %v5545_v12  ;;  %v14220_v42 = vld [vmem:[%s13026_s29 + $0x220] sm:$0xff]  ;;  %v12008_v38 = vld [vmem:[%s17766_s1 + $0x88] sm:$0xff] }
 0x228   : > { %11914 = vmatmul.msk.f32.gmra.mxu2 %vm451_vm0, %v14064_v40  ;;  %v11951_v12 = vld [vmem:[%s17766_s1 + $0x40] sm:$0xff]  ;;  %3753 = vmatpush.msra.mxu3 %v12008_v38 }
 0x229   : > { %v2520_v25 = vadd.f32 %v2474_v53, %v2370_v54  ;;  %11933 = vmatmul.msk.f32.gmra.mxu3 %vm451_vm0, %v14104_v34  ;;  %5549 = vst.msk [vmem:[#allocation3 + $0x38] sm:$0xff] %vm1130_vm1, %v5547_v50  ;;  %3391 = vmatpush.msra.mxu0 %v11951_v12 }
 0x22a   : > { %4109 = vmatpush.msra.mxu1 %v11951_v12 }
 0x22b   : > { %v2536_v3 = vadd.f32 %v14075_v29, %v2520_v25  ;;  %v2480_v18 = vpop.f32.mrf.mxu2 }
 0x22c   : > { %v14190_v1 = vpop.f32.mrf.mxu3  ;;  %v2177_v4 = vpop.f32.mrf.mxu0 }
 0x22d   : > { %v2552_v0 = vmax.f32 %v2536_v3, 0.0  ;;  %v2221_v37 = vadd.f32 %v2177_v4, %v13916_v45  ;;  %v2333_v13 = vpop.f32.mrf.mxu1 }
 0x22f   : > { %2568 = vst.msk [vmem:[#allocation2 + $0x108] sm:$0xff] %vm1130_vm1, %v2552_v0  ;;  %v2371_v53 = vadd.f32 %v2327_v58, %v2221_v37  ;;  %11871 = vmatmul.msk.f32.gmra.mxu0 %vm451_vm0, %v13800_v55  ;;  %11894 = vmatmul.msk.f32.gmra.mxu1 %vm451_vm0, %v14009_v44  ;;  %v14248_v0 = vld [vmem:[%s13026_s29 + $0x228] sm:$0xff] }
 0x230   : > { %11915 = vmatmul.msk.f32.gmra.mxu2 %vm451_vm0, %v14085_v46 }
 0x231   : > { %v2521_v33 = vadd.f32 %v2477_v59, %v2371_v53  ;;  %11934 = vmatmul.msk.f32.gmra.mxu3 %vm451_vm0, %v14123_v61 }
 0x233   : > { %v2537_v5 = vadd.f32 %v14075_v29, %v2521_v33  ;;  %v2483_v45 = vpop.f32.mrf.mxu2 }
 0x234   : > { %v14203_v24 = vpop.f32.mrf.mxu3  ;;  %v2180_v51 = vpop.f32.mrf.mxu0 }
 0x235   : > { %v2553_v58 = vmax.f32 %v2537_v5, 0.0  ;;  %v2222_v23 = vadd.f32 %v2180_v51, %v13932_v47  ;;  %v2336_v55 = vpop.f32.mrf.mxu1 }
 0x237   : > { %2569 = vst.msk [vmem:[#allocation2 + $0x110] sm:$0xff] %vm1130_vm1, %v2553_v58  ;;  %v2372_v26 = vadd.f32 %v2330_v43, %v2222_v23  ;;  %11872 = vmatmul.msk.f32.gmra.mxu0 %vm451_vm0, %v13819_v19  ;;  %11895 = vmatmul.msk.f32.gmra.mxu1 %vm451_vm0, %v14028_v17  ;;  %v14264_v58 = vld [vmem:[%s13026_s29 + $0x230] sm:$0xff] }
 0x238   : > { %11916 = vmatmul.msk.f32.gmra.mxu2 %vm451_vm0, %v14104_v34 }
 0x239   : > { %v2522_v28 = vadd.f32 %v2480_v18, %v2372_v26  ;;  %11935 = vmatmul.msk.f32.gmra.mxu3 %vm451_vm0, %v14139_v39 }
 0x23b   : > { %v2538_v47 = vadd.f32 %v14075_v29, %v2522_v28  ;;  %v2486_v59 = vpop.f32.mrf.mxu2 }
 0x23c   : > { %v14216_v6 = vpop.f32.mrf.mxu3  ;;  %v2183_v8 = vpop.f32.mrf.mxu0 }
 0x23d   : > { %v2554_v21 = vmax.f32 %v2538_v47, 0.0  ;;  %v2223_v2 = vadd.f32 %v2183_v8, %v13951_v36  ;;  %v2339_v19 = vpop.f32.mrf.mxu1  ;;  %v14233_v36 = vld [vmem:[%s17766_s1 + $0x68] sm:$0xff] }
 0x23e   : > { %3602 = vmatpush.msrb.mxu2 %v14233_v36  ;;  %v5555_v8 = vld [vmem:[#allocation2 + $0x101] ss:$2 sm:$0xff] }
 0x23f   : > { %2570 = vst.msk [vmem:[#allocation2 + $0x118] sm:$0xff] %vm1130_vm1, %v2554_v21  ;;  %v2373_v43 = vadd.f32 %v2333_v13, %v2223_v2  ;;  %11873 = vmatmul.msk.f32.gmra.mxu0 %vm451_vm0, %v13865_v7  ;;  %11896 = vmatmul.msk.f32.gmra.mxu1 %vm451_vm0, %v14045_v31 }
 0x240   : > { %11917 = vmatmul.msk.f32.gmra.mxu2 %vm451_vm0, %v14123_v61 }
 0x241   : > { %v2523_v7 = vadd.f32 %v2483_v45, %v2373_v43  ;;  %11936 = vmatmul.msk.f32.gmra.mxu3 %vm451_vm0, %v14220_v42 }
 0x243   : > { %v2539_v54 = vadd.f32 %v14075_v29, %v2523_v7  ;;  %v2489_v9 = vpop.f32.mrf.mxu2  ;;  %v12007_v7 = vld [vmem:[%s17766_s1 + $0x80] sm:$0xff] }
 0x244   : > { %v14244_v50 = vpop.f32.mrf.mxu3  ;;  %v2186_v25 = vpop.f32.mrf.mxu0  ;;  %3754 = vmatpush.msra.mxu3 %v12007_v7 }
 0x245   : > { %v2555_v3 = vmax.f32 %v2539_v54, 0.0  ;;  %v2224_v18 = vadd.f32 %v2186_v25, %v13972_v22  ;;  %v2342_v4 = vpop.f32.mrf.mxu1 }
 0x247   : > { %2571 = vst.msk [vmem:[#allocation2 + $0x120] sm:$0xff] %vm1130_vm1, %v2555_v3  ;;  %v2374_v37 = vadd.f32 %v2336_v55, %v2224_v18  ;;  %11874 = vmatmul.msk.f32.gmra.mxu0 %vm451_vm0, %v13887_v48  ;;  %11897 = vmatmul.msk.f32.gmra.mxu1 %vm451_vm0, %v14064_v40 }
 0x248   : > { %11918 = vmatmul.msk.f32.gmra.mxu2 %vm451_vm0, %v14139_v39 }
 0x249   : > { %v2524_v13 = vadd.f32 %v2486_v59, %v2374_v37  ;;  %11937 = vmatmul.msk.f32.gmra.mxu3 %vm451_vm0, %v14248_v0  ;;  %v5551_v59 = vld [vmem:[#allocation2 + $0x100] ss:$2 sm:$0xff] }
 0x24a   : > { %v5558_v54 = vmax.f32 %v5551_v59, %v5555_v8 }
 0x24b   : > { %v2540_v22 = vadd.f32 %v14075_v29, %v2524_v13  ;;  %v2492_v53 = vpop.f32.mrf.mxu2 }
 0x24c   : > { %v14260_v33 = vpop.f32.mrf.mxu3  ;;  %v2189_v5 = vpop.f32.mrf.mxu0 }
 0x24d   : > { %v2556_v45 = vmax.f32 %v2540_v22, 0.0  ;;  %v2225_v51 = vadd.f32 %v2189_v5, %v13988_v11  ;;  %v2345_v48 = vpop.f32.mrf.mxu1 }
 0x24f   : > { %2572 = vst.msk [vmem:[#allocation2 + $0x128] sm:$0xff] %vm1130_vm1, %v2556_v45  ;;  %v2375_v23 = vadd.f32 %v2339_v19, %v2225_v51  ;;  %11875 = vmatmul.msk.f32.gmra.mxu0 %vm451_vm0, %v13904_v32  ;;  %11898 = vmatmul.msk.f32.gmra.mxu1 %vm451_vm0, %v14085_v46  ;;  %v14280_v19 = vld [vmem:[%s13026_s29 + $0x238] sm:$0xff]  ;;  %v14306_v45 = vld [vmem:[%s13026_s29 + $0x240] sm:$0xff] }
 0x250   : > { %11919 = vmatmul.msk.f32.gmra.mxu2 %vm451_vm0, %v14220_v42  ;;  %v11950_v51 = vld [vmem:[%s17766_s1 + $0x38] sm:$0xff] }
 0x251   : > { %v2525_v55 = vadd.f32 %v2489_v9, %v2375_v23  ;;  %11938 = vmatmul.msk.f32.gmra.mxu3 %vm451_vm0, %v14264_v58  ;;  %3392 = vmatpush.msra.mxu0 %v11950_v51 }
 0x252   : > { %4110 = vmatpush.msra.mxu1 %v11950_v51 }
 0x253   : > { %v2541_v11 = vadd.f32 %v14075_v29, %v2525_v55  ;;  %v2495_v26 = vpop.f32.mrf.mxu2 }
 0x254   : > { %v14276_v28 = vpop.f32.mrf.mxu3  ;;  %v2192_v47 = vpop.f32.mrf.mxu0 }
 0x255   : > { %v2557_v21 = vmax.f32 %v2541_v11, 0.0  ;;  %v2226_v32 = vadd.f32 %v2192_v47, %v14005_v14  ;;  %v2348_v2 = vpop.f32.mrf.mxu1  ;;  %v14293_v14 = vld [vmem:[%s17766_s1 + $0x60] sm:$0xff]  ;;  %v5553_v11 = vld [vmem:[#allocation2 + $0x110] ss:$2 sm:$0xff]  ;;  %v5557_v47 = vld [vmem:[#allocation2 + $0x111] ss:$2 sm:$0xff] }
 0x256   : > { %v5561_v43 = vld [vmem:[#allocation2 + $0x120] ss:$2 sm:$0xff]  ;;  %v5565_v38 = vld [vmem:[#allocation2 + $0x121] ss:$2 sm:$0xff]  ;;  %3603 = vmatpush.msrb.mxu2 %v14293_v14 }
 0x257   : > { %2573 = vst.msk [vmem:[#allocation2 + $0x130] sm:$0xff] %vm1130_vm1, %v2557_v21  ;;  %v2376_v12 = vadd.f32 %v2342_v4, %v2226_v32  ;;  %11876 = vmatmul.msk.f32.gmra.mxu0 %vm451_vm0, %v13920_v52  ;;  %11899 = vmatmul.msk.f32.gmra.mxu1 %vm451_vm0, %v14104_v34  ;;  %v5568_v9 = vmax.f32 %v5561_v43, %v5565_v38  ;;  %v14325_v32 = vld [vmem:[%s13026_s29 + $0x248] sm:$0xff] }
 0x258   : > { %11920 = vmatmul.msk.f32.gmra.mxu2 %vm451_vm0, %v14248_v0 }
 0x259   : > { %v2526_v52 = vadd.f32 %v2492_v53, %v2376_v12  ;;  %11939 = vmatmul.msk.f32.gmra.mxu3 %vm451_vm0, %v14280_v19  ;;  %v5570_v25 = vmax.f32 %v5558_v54, %v5568_v9  ;;  %v5559_v12 = vmax.f32 %v5553_v11, %v5557_v47 }
 0x25b   : > { %v2542_v3 = vadd.f32 %v14075_v29, %v2526_v52  ;;  %v2498_v18 = vpop.f32.mrf.mxu2  ;;  %5572 = vst.msk [vmem:[#allocation3 + $0x40] sm:$0xff] %vm1130_vm1, %v5570_v25  ;;  %v11986_v25 = vld [vmem:[%s17766_s1 + $0x58] sm:$0xff] }
 0x25c   : > { %v14302_v4 = vpop.f32.mrf.mxu3  ;;  %v2195_v37 = vpop.f32.mrf.mxu0  ;;  %3604 = vmatpush.msrb.mxu2 %v11986_v25 }
 0x25d   : > { %v2558_v13 = vmax.f32 %v2542_v3, 0.0  ;;  %v2227_v22 = vadd.f32 %v2195_v37, %v14024_v41  ;;  %v2351_v5 = vpop.f32.mrf.mxu1 }
 0x25f   : > { %2574 = vst.msk [vmem:[#allocation2 + $0x138] sm:$0xff] %vm1130_vm1, %v2558_v13  ;;  %v2377_v53 = vadd.f32 %v2345_v48, %v2227_v22  ;;  %11877 = vmatmul.msk.f32.gmra.mxu0 %vm451_vm0, %v13936_v27  ;;  %11900 = vmatmul.msk.f32.gmra.mxu1 %vm451_vm0, %v14123_v61  ;;  %v14345_v13 = vld [vmem:[%s13026_s29 + $0x250] sm:$0xff] }
 0x260   : > { %11921 = vmatmul.msk.f32.gmra.mxu2 %vm451_vm0, %v14264_v58  ;;  %v11985_v22 = vld [vmem:[%s17766_s1 + $0x50] sm:$0xff] }
 0x261   : > { %v2527_v41 = vadd.f32 %v2495_v26, %v2377_v53  ;;  %11940 = vmatmul.msk.f32.gmra.mxu3 %vm451_vm0, %v14306_v45  ;;  %3605 = vmatpush.msrb.mxu2 %v11985_v22 }
 0x263   : > { %v2543_v48 = vadd.f32 %v14075_v29, %v2527_v41  ;;  %v2501_v27 = vpop.f32.mrf.mxu2 }
 0x264   : > { %v14321_v23 = vpop.f32.mrf.mxu3  ;;  %v2198_v55 = vpop.f32.mrf.mxu0 }
 0x265   : > { %v2559_v59 = vmax.f32 %v2543_v48, 0.0  ;;  %v2228_v8 = vadd.f32 %v2198_v55, %v14041_v15  ;;  %v2354_v21 = vpop.f32.mrf.mxu1 }
 0x266   : > { %v5563_v43 = vld [vmem:[#allocation2 + $0x130] ss:$2 sm:$0xff]  ;;  %v5567_v26 = vld [vmem:[#allocation2 + $0x131] ss:$2 sm:$0xff] }
 0x267   : > { %2575 = vst.msk [vmem:[#allocation2 + $0x140] sm:$0xff] %vm1130_vm1, %v2559_v59  ;;  %v2378_v38 = vadd.f32 %v2348_v2, %v2228_v8  ;;  %11878 = vmatmul.msk.f32.gmra.mxu0 %vm451_vm0, %v13958_v49  ;;  %11901 = vmatmul.msk.f32.gmra.mxu1 %vm451_vm0, %v14139_v39  ;;  %v5569_v7 = vmax.f32 %v5563_v43, %v5567_v26  ;;  %v14369_v59 = vld [vmem:[%s13026_s29 + $0x258] sm:$0xff] }
 0x268   : > { %11922 = vmatmul.msk.f32.gmra.mxu2 %vm451_vm0, %v14280_v19 }
 0x269   : > { %v2528_v15 = vadd.f32 %v2498_v18, %v2378_v38  ;;  %11941 = vmatmul.msk.f32.gmra.mxu3 %vm451_vm0, %v14325_v32  ;;  %v5571_v54 = vmax.f32 %v5559_v12, %v5569_v7  ;;  %v14389_v38 = vld [vmem:[%s13026_s29 + $0x260] sm:$0xff]  ;;  %v11948_v12 = vld [vmem:[%s17766_s1 + $0x28] sm:$0xff] }
 0x26b   : > { %v2544_v9 = vadd.f32 %v14075_v29, %v2528_v15  ;;  %v2504_v2 = vpop.f32.mrf.mxu2  ;;  %5573 = vst.msk [vmem:[#allocation3 + $0x48] sm:$0xff] %vm1130_vm1, %v5571_v54 }
 0x26c   : > { %v14338_v49 = vpop.f32.mrf.mxu3  ;;  %v2201_v52 = vpop.f32.mrf.mxu0 }
 0x26d   : > { %v2560_v3 = vmax.f32 %v2544_v9, 0.0  ;;  %v2229_v37 = vadd.f32 %v2201_v52, %v14057_v20  ;;  %v2357_v18 = vpop.f32.mrf.mxu1  ;;  %v12006_v20 = vld [vmem:[%s17766_s1 + $0x78] sm:$0xff] }
 0x26e   : > { %3755 = vmatpush.msra.mxu3 %v12006_v20 }
 0x26f   : > { %2576 = vst.msk [vmem:[#allocation2 + $0x148] sm:$0xff] %vm1130_vm1, %v2560_v3  ;;  %v2379_v53 = vadd.f32 %v2351_v5, %v2229_v37  ;;  %11879 = vmatmul.msk.f32.gmra.mxu0 %vm451_vm0, %v13976_v63  ;;  %11902 = vmatmul.msk.f32.gmra.mxu1 %vm451_vm0, %v14220_v42  ;;  %v14408_v3 = vld [vmem:[%s13026_s29 + $0x268] sm:$0xff] }
 0x270   : > { %11923 = vmatmul.msk.f32.gmra.mxu2 %vm451_vm0, %v14306_v45  ;;  %4319 = vmatpush.msrb.mxu3 %v14178_v10  ;;  %v11949_v10 = vld [vmem:[%s17766_s1 + $0x30] sm:$0xff] }
 0x271   : > { %v2529_v51 = vadd.f32 %v2501_v27, %v2379_v53  ;;  %11942 = vmatmul.msk.f32.gmra.mxu3 %vm451_vm0, %v14345_v13  ;;  %3393 = vmatpush.msra.mxu0 %v11949_v10 }
 0x272   : > { %4320 = vmatpush.msrb.mxu3 %v14233_v36  ;;  %4111 = vmatpush.msra.mxu1 %v11949_v10 }
 0x273   : > { %v2545_v63 = vadd.f32 %v14075_v29, %v2529_v51  ;;  %v2507_v5 = vpop.f32.mrf.mxu2  ;;  %3394 = vmatpush.msra.mxu0 %v11948_v12 }
 0x274   : > { %v14364_v41 = vpop.f32.mrf.mxu3  ;;  %v2204_v48 = vpop.f32.mrf.mxu0  ;;  %4321 = vmatpush.msrb.mxu3 %v14293_v14  ;;  %4112 = vmatpush.msra.mxu1 %v11948_v12 }
 0x275   : > { %v2561_v55 = vmax.f32 %v2545_v63, 0.0  ;;  %v2230_v11 = vadd.f32 %v2204_v48, %v14081_v30  ;;  %v2360_v47 = vpop.f32.mrf.mxu1 }
 0x276   : > { %4322 = vmatpush.msrb.mxu3 %v11986_v25  ;;  %v5575_v10 = vld [vmem:[#allocation2 + $0x140] ss:$2 sm:$0xff] }
 0x277   : > { %2577 = vst.msk [vmem:[#allocation2 + $0x150] sm:$0xff] %vm1130_vm1, %v2561_v55  ;;  %v2380_v27 = vadd.f32 %v2354_v21, %v2230_v11  ;;  %11880 = vmatmul.msk.f32.gmra.mxu0 %vm451_vm0, %v13992_v57  ;;  %11903 = vmatmul.msk.f32.gmra.mxu1 %vm451_vm0, %v14248_v0 }
 0x278   : > { %11924 = vmatmul.msk.f32.gmra.mxu2 %vm451_vm0, %v14325_v32  ;;  %4323 = vmatpush.msrb.mxu3 %v11985_v22 }
 0x279   : > { %v2530_v30 = vadd.f32 %v2504_v2, %v2380_v27  ;;  %11943 = vmatmul.msk.f32.gmra.mxu3 %vm451_vm0, %v14369_v59 }
 0x27b   : > { %v2546_v57 = vadd.f32 %v14075_v29, %v2530_v30  ;;  %v2510_v36 = vpop.f32.mrf.mxu2  ;;  %v5579_v30 = vld [vmem:[#allocation2 + $0x141] ss:$2 sm:$0xff] }
 0x27c   : > { %v14385_v14 = vpop.f32.mrf.mxu3  ;;  %v2207_v8 = vpop.f32.mrf.mxu0 }
 0x27d   : > { %v2562_v21 = vmax.f32 %v2546_v57, 0.0  ;;  %v2231_v43 = vadd.f32 %v2207_v8, %v14100_v16  ;;  %v2363_v26 = vpop.f32.mrf.mxu1 }
 0x27f   : > { %2578 = vst.msk [vmem:[#allocation2 + $0x158] sm:$0xff] %vm1130_vm1, %v2562_v21  ;;  %v2381_v7 = vadd.f32 %v2357_v18, %v2231_v43  ;;  %11881 = vmatmul.msk.f32.gmra.mxu0 %vm451_vm0, %v14009_v44  ;;  %11904 = vmatmul.msk.f32.gmra.mxu1 %vm451_vm0, %v14264_v58 }
 0x280   : > { %11925 = vmatmul.msk.f32.gmra.mxu2 %vm451_vm0, %v14345_v13 }
 0x281   : > { %v2531_v16 = vadd.f32 %v2507_v5, %v2381_v7  ;;  %11944 = vmatmul.msk.f32.gmra.mxu3 %vm451_vm0, %v14389_v38  ;;  %v14424_v5 = vld [vmem:[%s13026_s29 + $0x270] sm:$0xff] }
 0x283   : > { %v2547_v15 = vadd.f32 %v14075_v29, %v2531_v16  ;;  %v2513_v54 = vpop.f32.mrf.mxu2 }
 0x284   : > { %v14404_v9 = vpop.f32.mrf.mxu3  ;;  %v2210_v2 = vpop.f32.mrf.mxu0 }
 0x285   : > { %v2563_v52 = vmax.f32 %v2547_v15, 0.0  ;;  %v2232_v44 = vadd.f32 %v2210_v2, %v14119_v62  ;;  %v2366_v25 = vpop.f32.mrf.mxu1 }
 0x287   : > { %2579 = vst.msk [vmem:[#allocation2 + $0x160] sm:$0xff] %vm1130_vm1, %v2563_v52  ;;  %v2382_v37 = vadd.f32 %v2360_v47, %v2232_v44  ;;  %11882 = vmatmul.msk.f32.gmra.mxu0 %vm451_vm0, %v14028_v17  ;;  %11905 = vmatmul.msk.f32.gmra.mxu1 %vm451_vm0, %v14280_v19 }
 0x288   : > { %11926 = vmatmul.msk.f32.gmra.mxu2 %vm451_vm0, %v14369_v59 }
 0x289   : > { %v2532_v18 = vadd.f32 %v2510_v36, %v2382_v37  ;;  %11945 = vmatmul.msk.f32.gmra.mxu3 %vm451_vm0, %v14408_v3 }
 0x28b   : > { %v2548_v62 = vadd.f32 %v14075_v29, %v2532_v18  ;;  %v2516_v22 = vpop.f32.mrf.mxu2  ;;  %v5577_v18 = vld [vmem:[#allocation2 + $0x150] ss:$2 sm:$0xff] }
 0x28c   : > { %v14420_v53 = vpop.f32.mrf.mxu3  ;;  %v2213_v20 = vpop.f32.mrf.mxu0 }
 0x28d   : > { %v2564_v51 = vmax.f32 %v2548_v62, 0.0  ;;  %v2233_v63 = vadd.f32 %v2213_v20, %v14135_v35  ;;  %v2889_v17 = vpop.f32.mrf.mxu1 }
 0x28f   : > { %2580 = vst.msk [vmem:[#allocation2 + $0x168] sm:$0xff] %vm1130_vm1, %v2564_v51  ;;  %v2383_v48 = vadd.f32 %v2363_v26, %v2233_v63  ;;  %11883 = vmatmul.msk.f32.gmra.mxu0 %vm451_vm0, %v14045_v31  ;;  %11969 = vmatmul.msk.f32.vlgmr.msrb.gmra.mxu1 %vm451_vm0, %v14085_v46  ;;  %v14440_v46 = vld [vmem:[%s13026_s29 + $0x278] sm:$0xff]  ;;  %v5582_v26 = vmax.f32 %v5575_v10, %v5579_v30 }
 0x290   : > { %11990 = vmatmul.msk.f32.vlgmr.msrb.gmra.mxu2 %vm451_vm0, %v14306_v45 }
 0x291   : > { %v2533_v55 = vadd.f32 %v2513_v54, %v2383_v48  ;;  %11946 = vmatmul.msk.f32.gmra.mxu3 %vm451_vm0, %v14424_v5 }
 0x293   : > { %v2549_v35 = vadd.f32 %v14075_v29, %v2533_v55  ;;  %v3039_v11 = vpop.f32.mrf.mxu2 }
 0x294   : > { %v14436_v47 = vpop.f32.mrf.mxu3  ;;  %v2216_v27 = vpop.f32.mrf.mxu0 }
 0x295   : > { %v2565_v57 = vmax.f32 %v2549_v35, 0.0  ;;  %v2234_v31 = vadd.f32 %v2216_v27, %v14152_v60  ;;  %v2892_v36 = vpop.f32.mrf.mxu1 }
 0x296   : > { %v5585_v8 = vld [vmem:[#allocation2 + $0x160] ss:$2 sm:$0xff]  ;;  %v5589_v21 = vld [vmem:[#allocation2 + $0x161] ss:$2 sm:$0xff] }
 0x297   : > { %2581 = vst.msk [vmem:[#allocation2 + $0x170] sm:$0xff] %vm1130_vm1, %v2565_v57  ;;  %v2384_v43 = vadd.f32 %v2366_v25, %v2234_v31  ;;  %11884 = vmatmul.msk.f32.gmra.mxu0 %vm451_vm0, %v14064_v40  ;;  %11970 = vmatmul.msk.f32.gmra.mxu1 %vm451_vm0, %v14104_v34  ;;  %v5592_v12 = vmax.f32 %v5585_v8, %v5589_v21  ;;  %v4039_v57 = vld [vmem:[%s17766_s1 + $0x20] sm:$0xff] }
 0x298   : > { %11991 = vmatmul.msk.f32.gmra.mxu2 %vm451_vm0, %v14325_v32 }
 0x299   : > { %v2534_v60 = vadd.f32 %v2516_v22, %v2384_v43  ;;  %11947 = vmatmul.msk.f32.gmra.mxu3 %vm451_vm0, %v14440_v46  ;;  %v5594_v7 = vmax.f32 %v5582_v26, %v5592_v12  ;;  %4185 = vmatpush.msra.mxu2 %v4039_v57 }
 0x29b   : > { %v2550_v16 = vadd.f32 %v14075_v29, %v2534_v60  ;;  %v3042_v15 = vpop.f32.mrf.mxu2  ;;  %5596 = vst.msk [vmem:[#allocation3 + $0x50] sm:$0xff] %vm1130_vm1, %v5594_v7 }
 0x29c   : > { %v14453_v54 = vpop.f32.mrf.mxu3  ;;  %v2755_v40 = vpop.f32.mrf.mxu0 }
 0x29d   : > { %v2566_v2 = vmax.f32 %v2550_v16, 0.0  ;;  %v2756_v34 = vadd.f32 %v2755_v40, %v14167_v56  ;;  %v2895_v52 = vpop.f32.mrf.mxu1  ;;  %v5581_v56 = vld [vmem:[#allocation2 + $0x151] ss:$2 sm:$0xff] }
 0x29f   : > { %2582 = vst.msk [vmem:[#allocation2 + $0x178] sm:$0xff] %vm1130_vm1, %v2566_v2  ;;  %v2937_v44 = vadd.f32 %v2889_v17, %v2756_v34  ;;  %11953 = vmatmul.msk.f32.vlgmr.msra.gmra.mxu0 %vm451_vm0, %v14220_v42  ;;  %11971 = vmatmul.msk.f32.gmra.mxu1 %vm451_vm0, %v14123_v61  ;;  %v5583_v17 = vmax.f32 %v5577_v18, %v5581_v56 }
 0x2a0   : > { %11992 = vmatmul.msk.f32.gmra.mxu2 %vm451_vm0, %v14345_v13 }
 0x2a1   : > { %12011 = vmatmul.msk.f32.vlgmr.msra.gmra.mxu3 %vm451_vm0, %v14389_v38  ;;  %v3087_v25 = vadd.f32 %v3039_v11, %v2937_v44 }
 0x2a2   : > { %4903 = vmatpush.msra.mxu3 %v4039_v57 }
 0x2a3   : > { %v3045_v37 = vpop.f32.mrf.mxu2 }
 0x2a4   : > { %v3189_v62 = vpop.f32.mrf.mxu3  ;;  %v2758_v22 = vpop.f32.mrf.mxu0 }
 0x2a5   : > { %v3237_v20 = vadd.f32 %v3189_v62, %v3087_v25  ;;  %v2759_v51 = vadd.f32 %v2758_v22, %v14190_v1  ;;  %v2898_v63 = vpop.f32.mrf.mxu1 }
 0x2a6   : > { %v5587_v48 = vld [vmem:[#allocation2 + $0x170] ss:$2 sm:$0xff]  ;;  %v5591_v55 = vld [vmem:[#allocation2 + $0x171] ss:$2 sm:$0xff] }
 0x2a7   : > { %v3253_v61 = vadd.f32 %v14075_v29, %v3237_v20  ;;  %v2938_v35 = vadd.f32 %v2892_v36, %v2759_v51  ;;  %11954 = vmatmul.msk.f32.gmra.mxu0 %vm451_vm0, %v14248_v0  ;;  %11972 = vmatmul.msk.f32.gmra.mxu1 %vm451_vm0, %v14139_v39  ;;  %v5593_v11 = vmax.f32 %v5587_v48, %v5591_v55  ;;  %v12031_v39 = vld [vmem:[%s17766_s1 + $0xc0] sm:$0xff] }
 0x2a8   : > { %11993 = vmatmul.msk.f32.gmra.mxu2 %vm451_vm0, %v14369_v59  ;;  %3901 = vmatpush.msrb.mxu0 %v12031_v39  ;;  %v14513_v51 = vld [vmem:[%s13026_s29 + $0x280] sm:$0xff] }
 0x2a9   : > { %v3269_v27 = vmax.f32 %v3253_v61, 0.0  ;;  %12012 = vmatmul.msk.f32.gmra.mxu3 %vm451_vm0, %v14408_v3  ;;  %v3088_v1 = vadd.f32 %v3042_v15, %v2938_v35  ;;  %v5595_v10 = vmax.f32 %v5583_v17, %v5593_v11  ;;  %4619 = vmatpush.msrb.mxu1 %v12031_v39 }
 0x2ab   : > { %3285 = vst.msk [vmem:[#allocation2 + $0x180] sm:$0xff] %vm1130_vm1, %v3269_v27  ;;  %v3048_v30 = vpop.f32.mrf.mxu2 }
 0x2ac   : > { %v3192_v31 = vpop.f32.mrf.mxu3  ;;  %v2761_v36 = vpop.f32.mrf.mxu0  ;;  %5597 = vst.msk [vmem:[#allocation3 + $0x58] sm:$0xff] %vm1130_vm1, %v5595_v10  ;;  %v14527_v10 = vld [vmem:[%s13026_s29 + $0x288] sm:$0xff] }
 0x2ad   : > { %v3238_v8 = vadd.f32 %v3192_v31, %v3088_v1  ;;  %v2762_v21 = vadd.f32 %v2761_v36, %v14203_v24  ;;  %v2901_v43 = vpop.f32.mrf.mxu1 }
 0x2af   : > { %v3254_v26 = vadd.f32 %v14075_v29, %v3238_v8  ;;  %v2939_v12 = vadd.f32 %v2895_v52, %v2762_v21  ;;  %11955 = vmatmul.msk.f32.gmra.mxu0 %vm451_vm0, %v14264_v58  ;;  %11973 = vmatmul.msk.f32.gmra.mxu1 %vm451_vm0, %v14220_v42 }
 0x2b0   : > { %11994 = vmatmul.msk.f32.gmra.mxu2 %vm451_vm0, %v14389_v38 }
 0x2b1   : > { %v3270_v60 = vmax.f32 %v3254_v26, 0.0  ;;  %12013 = vmatmul.msk.f32.gmra.mxu3 %vm451_vm0, %v14424_v5  ;;  %v3089_v24 = vadd.f32 %v3045_v37, %v2939_v12  ;;  %v4038_v37 = vld [vmem:[%s17766_s1 + $0x18] sm:$0xff]  ;;  %v14541_v26 = vld [vmem:[%s13026_s29 + $0x290] sm:$0xff] }
 0x2b2   : > { %4186 = vmatpush.msra.mxu2 %v4038_v37  ;;  %4904 = vmatpush.msra.mxu3 %v4038_v37 }
 0x2b3   : > { %3286 = vst.msk [vmem:[#allocation2 + $0x188] sm:$0xff] %vm1130_vm1, %v3270_v60  ;;  %v3051_v7 = vpop.f32.mrf.mxu2 }
 0x2b4   : > { %v3195_v16 = vpop.f32.mrf.mxu3  ;;  %v2764_v15 = vpop.f32.mrf.mxu0 }
 0x2b5   : > { %v3239_v40 = vadd.f32 %v3195_v16, %v3089_v24  ;;  %v2765_v2 = vadd.f32 %v2764_v15, %v14216_v6  ;;  %v2904_v34 = vpop.f32.mrf.mxu1 }
 0x2b7   : > { %v3255_v52 = vadd.f32 %v14075_v29, %v3239_v40  ;;  %v2940_v42 = vadd.f32 %v2898_v63, %v2765_v2  ;;  %11956 = vmatmul.msk.f32.gmra.mxu0 %vm451_vm0, %v14280_v19  ;;  %11974 = vmatmul.msk.f32.gmra.mxu1 %vm451_vm0, %v14248_v0  ;;  %v12030_v0 = vld [vmem:[%s17766_s1 + $0xb8] sm:$0xff] }
 0x2b8   : > { %11995 = vmatmul.msk.f32.gmra.mxu2 %vm451_vm0, %v14408_v3  ;;  %3902 = vmatpush.msrb.mxu0 %v12030_v0  ;;  %v14555_v2 = vld [vmem:[%s13026_s29 + $0x298] sm:$0xff] }
 0x2b9   : > { %v3271_v44 = vmax.f32 %v3255_v52, 0.0  ;;  %12014 = vmatmul.msk.f32.gmra.mxu3 %vm451_vm0, %v14440_v46  ;;  %v3090_v25 = vadd.f32 %v3048_v30, %v2940_v42  ;;  %4620 = vmatpush.msrb.mxu1 %v12030_v0 }
 0x2ba   : > { %v5599_v42 = vld [vmem:[#allocation2 + $0x180] ss:$2 sm:$0xff] }
 0x2bb   : > { %3287 = vst.msk [vmem:[#allocation2 + $0x190] sm:$0xff] %vm1130_vm1, %v3271_v44  ;;  %v3054_v6 = vpop.f32.mrf.mxu2  ;;  %v5603_v44 = vld [vmem:[#allocation2 + $0x181] ss:$2 sm:$0xff] }
 0x2bc   : > { %v3198_v18 = vpop.f32.mrf.mxu3  ;;  %v2767_v56 = vpop.f32.mrf.mxu0  ;;  %v5606_v0 = vmax.f32 %v5599_v42, %v5603_v44 }
 0x2bd   : > { %v3240_v62 = vadd.f32 %v3198_v18, %v3090_v25  ;;  %v2768_v22 = vadd.f32 %v2767_v56, %v14244_v50  ;;  %v2907_v20 = vpop.f32.mrf.mxu1 }
 0x2bf   : > { %v3256_v63 = vadd.f32 %v14075_v29, %v3240_v62  ;;  %v2941_v17 = vadd.f32 %v2901_v43, %v2768_v22  ;;  %11957 = vmatmul.msk.f32.gmra.mxu0 %vm451_vm0, %v14306_v45  ;;  %11975 = vmatmul.msk.f32.gmra.mxu1 %vm451_vm0, %v14264_v58  ;;  %v12029_v62 = vld [vmem:[%s17766_s1 + $0xb0] sm:$0xff] }
 0x2c0   : > { %11996 = vmatmul.msk.f32.gmra.mxu2 %vm451_vm0, %v14424_v5  ;;  %3903 = vmatpush.msrb.mxu0 %v12029_v62 }
 0x2c1   : > { %v3272_v48 = vmax.f32 %v3256_v63, 0.0  ;;  %12015 = vmatmul.msk.f32.gmra.mxu3 %vm451_vm0, %v14513_v51  ;;  %v3091_v50 = vadd.f32 %v3051_v7, %v2941_v17  ;;  %4621 = vmatpush.msrb.mxu1 %v12029_v62 }
 0x2c3   : > { %3288 = vst.msk [vmem:[#allocation2 + $0x198] sm:$0xff] %vm1130_vm1, %v3272_v48  ;;  %v3057_v55 = vpop.f32.mrf.mxu2 }
 0x2c4   : > { %v3201_v61 = vpop.f32.mrf.mxu3  ;;  %v2770_v35 = vpop.f32.mrf.mxu0 }
 0x2c5   : > { %v3241_v11 = vadd.f32 %v3201_v61, %v3091_v50  ;;  %v2771_v27 = vadd.f32 %v2770_v35, %v14260_v33  ;;  %v2910_v1 = vpop.f32.mrf.mxu1 }
 0x2c7   : > { %v3257_v58 = vadd.f32 %v14075_v29, %v3241_v11  ;;  %v2942_v30 = vadd.f32 %v2904_v34, %v2771_v27  ;;  %11958 = vmatmul.msk.f32.gmra.mxu0 %vm451_vm0, %v14325_v32  ;;  %11976 = vmatmul.msk.f32.gmra.mxu1 %vm451_vm0, %v14280_v19 }
 0x2c8   : > { %11997 = vmatmul.msk.f32.gmra.mxu2 %vm451_vm0, %v14440_v46 }
 0x2c9   : > { %v3273_v57 = vmax.f32 %v3257_v58, 0.0  ;;  %12016 = vmatmul.msk.f32.gmra.mxu3 %vm451_vm0, %v14527_v10  ;;  %v3092_v33 = vadd.f32 %v3054_v6, %v2942_v30 }
 0x2cb   : > { %3289 = vst.msk [vmem:[#allocation2 + $0x1a0] sm:$0xff] %vm1130_vm1, %v3273_v57  ;;  %v3060_v39 = vpop.f32.mrf.mxu2 }
 0x2cc   : > { %v3204_v31 = vpop.f32.mrf.mxu3  ;;  %v2773_v36 = vpop.f32.mrf.mxu0 }
 0x2cd   : > { %v3242_v8 = vadd.f32 %v3204_v31, %v3092_v33  ;;  %v2774_v21 = vadd.f32 %v2773_v36, %v14276_v28  ;;  %v2913_v43 = vpop.f32.mrf.mxu1  ;;  %v5601_v36 = vld [vmem:[#allocation2 + $0x190] ss:$2 sm:$0xff] }
 0x2cf   : > { %v3258_v19 = vadd.f32 %v14075_v29, %v3242_v8  ;;  %v2943_v12 = vadd.f32 %v2907_v20, %v2774_v21  ;;  %11959 = vmatmul.msk.f32.gmra.mxu0 %vm451_vm0, %v14345_v13  ;;  %11977 = vmatmul.msk.f32.gmra.mxu1 %vm451_vm0, %v14306_v45  ;;  %v14560_v45 = vld [vmem:[%s17767_s2] ss:$0 sm:$0xff]  ;;  %v5605_v8 = vld [vmem:[#allocation2 + $0x191] ss:$2 sm:$0xff] }
 0x2d0   : > { %11998 = vmatmul.msk.f32.gmra.mxu2 %vm451_vm0, %v14513_v51 }
 0x2d1   : > { %v3274_v60 = vmax.f32 %v3258_v19, 0.0  ;;  %12017 = vmatmul.msk.f32.gmra.mxu3 %vm451_vm0, %v14541_v26  ;;  %v3093_v28 = vadd.f32 %v3057_v55, %v2943_v12  ;;  %v14580_v55 = vld [vmem:[%s13026_s29 + $0x2a0] sm:$0xff]  ;;  %v5607_v12 = vmax.f32 %v5601_v36, %v5605_v8 }
 0x2d3   : > { %3290 = vst.msk [vmem:[#allocation2 + $0x1a8] sm:$0xff] %vm1130_vm1, %v3274_v60  ;;  %v3063_v24 = vpop.f32.mrf.mxu2 }
 0x2d4   : > { %v3207_v7 = vpop.f32.mrf.mxu3  ;;  %v2776_v29 = vpop.f32.mrf.mxu0 }
 0x2d5   : > { %v3243_v16 = vadd.f32 %v3207_v7, %v3093_v28  ;;  %v2777_v15 = vadd.f32 %v2776_v29, %v14302_v4  ;;  %v2916_v40 = vpop.f32.mrf.mxu1  ;;  %v4036_v7 = vld [vmem:[%s17766_s1 + $0x8] sm:$0xff] }
 0x2d7   : > { %v3259_v34 = vadd.f32 %v14560_v45, %v3243_v16  ;;  %v2944_v52 = vadd.f32 %v2910_v1, %v2777_v15  ;;  %11960 = vmatmul.msk.f32.gmra.mxu0 %vm451_vm0, %v14369_v59  ;;  %11978 = vmatmul.msk.f32.gmra.mxu1 %vm451_vm0, %v14325_v32  ;;  %v4037_v32 = vld [vmem:[%s17766_s1 + $0x10] sm:$0xff] }
 0x2d8   : > { %11999 = vmatmul.msk.f32.gmra.mxu2 %vm451_vm0, %v14527_v10  ;;  %4905 = vmatpush.msra.mxu3 %v4037_v32 }
 0x2d9   : > { %v3275_v4 = vmax.f32 %v3259_v34, 0.0  ;;  %12018 = vmatmul.msk.f32.gmra.mxu3 %vm451_vm0, %v14555_v2  ;;  %v3094_v25 = vadd.f32 %v3060_v39, %v2944_v52  ;;  %4187 = vmatpush.msra.mxu2 %v4037_v32  ;;  %v14612_v34 = vld [vmem:[%s13026_s29 + $0x2b0] sm:$0xff]  ;;  %v4035_v52 = vld [vmem:[%s17766_s1] sm:$0xff] }
 0x2da   : > { %v5609_v6 = vld [vmem:[#allocation2 + $0x1a0] ss:$2 sm:$0xff]  ;;  %v5613_v37 = vld [vmem:[#allocation2 + $0x1a1] ss:$2 sm:$0xff]  ;;  %4906 = vmatpush.msra.mxu3 %v4036_v7 }
 0x2db   : > { %v5616_v18 = vmax.f32 %v5609_v6, %v5613_v37  ;;  %3291 = vst.msk [vmem:[#allocation2 + $0x1b0] sm:$0xff] %vm1130_vm1, %v3275_v4  ;;  %v3066_v56 = vpop.f32.mrf.mxu2  ;;  %4188 = vmatpush.msra.mxu2 %v4036_v7 }
 0x2dc   : > { %v3210_v22 = vpop.f32.mrf.mxu3  ;;  %v2779_v20 = vpop.f32.mrf.mxu0  ;;  %4907 = vmatpush.msra.mxu3 %v4035_v52 }
 0x2dd   : > { %v3244_v63 = vadd.f32 %v3210_v22, %v3094_v25  ;;  %v2780_v17 = vadd.f32 %v2779_v20, %v14321_v23  ;;  %v2919_v48 = vpop.f32.mrf.mxu1  ;;  %v5618_v50 = vmax.f32 %v5606_v0, %v5616_v18  ;;  %4189 = vmatpush.msra.mxu2 %v4035_v52 }
 0x2df   : > { %v3260_v61 = vadd.f32 %v14560_v45, %v3244_v63  ;;  %v2945_v35 = vadd.f32 %v2913_v43, %v2780_v17  ;;  %11961 = vmatmul.msk.f32.gmra.mxu0 %vm451_vm0, %v14389_v38  ;;  %11979 = vmatmul.msk.f32.gmra.mxu1 %vm451_vm0, %v14345_v13  ;;  %5620 = vst.msk [vmem:[#allocation3 + $0x60] sm:$0xff] %vm1130_vm1, %v5618_v50  ;;  %v14595_v13 = vld [vmem:[%s13026_s29 + $0x2a8] sm:$0xff] }
 0x2e0   : > { %12000 = vmatmul.msk.f32.gmra.mxu2 %vm451_vm0, %v14541_v26  ;;  %v12028_v63 = vld [vmem:[%s17766_s1 + $0xa8] sm:$0xff] }
 0x2e1   : > { %v3276_v23 = vmax.f32 %v3260_v61, 0.0  ;;  %12019 = vmatmul.msk.f32.gmra.mxu3 %vm451_vm0, %v14580_v55  ;;  %v3095_v11 = vadd.f32 %v3063_v24, %v2945_v35  ;;  %3904 = vmatpush.msrb.mxu0 %v12028_v63  ;;  %v14647_v35 = vld [vmem:[%s13026_s29 + $0x2c0] sm:$0xff] }
 0x2e2   : > { %4622 = vmatpush.msrb.mxu1 %v12028_v63 }
 0x2e3   : > { %3292 = vst.msk [vmem:[#allocation2 + $0x1b8] sm:$0xff] %vm1130_vm1, %v3276_v23  ;;  %v3069_v27 = vpop.f32.mrf.mxu2  ;;  %v12027_v23 = vld [vmem:[%s17766_s1 + $0xa0] sm:$0xff] }
 0x2e4   : > { %v3213_v1 = vpop.f32.mrf.mxu3  ;;  %v2782_v58 = vpop.f32.mrf.mxu0  ;;  %3905 = vmatpush.msrb.mxu0 %v12027_v23  ;;  %4623 = vmatpush.msrb.mxu1 %v12027_v23 }
 0x2e5   : > { %v3245_v30 = vadd.f32 %v3213_v1, %v3095_v11  ;;  %v2783_v57 = vadd.f32 %v2782_v58, %v14338_v49  ;;  %v2922_v33 = vpop.f32.mrf.mxu1 }
 0x2e7   : > { %v3261_v39 = vadd.f32 %v14560_v45, %v3245_v30  ;;  %v2946_v31 = vadd.f32 %v2916_v40, %v2783_v57  ;;  %11962 = vmatmul.msk.f32.gmra.mxu0 %vm451_vm0, %v14408_v3  ;;  %11980 = vmatmul.msk.f32.gmra.mxu1 %vm451_vm0, %v14369_v59 }
 0x2e8   : > { %12001 = vmatmul.msk.f32.gmra.mxu2 %vm451_vm0, %v14555_v2 }
 0x2e9   : > { %v3277_v21 = vmax.f32 %v3261_v39, 0.0  ;;  %12020 = vmatmul.msk.f32.gmra.mxu3 %vm451_vm0, %v14595_v13  ;;  %v3096_v49 = vadd.f32 %v3066_v56, %v2946_v31  ;;  %v14630_v56 = vld [vmem:[%s13026_s29 + $0x2b8] sm:$0xff] }
 0x2ea   : > { %v5611_v43 = vld [vmem:[#allocation2 + $0x1b0] ss:$2 sm:$0xff]  ;;  %v5615_v19 = vld [vmem:[#allocation2 + $0x1b1] ss:$2 sm:$0xff] }
 0x2eb   : > { %v5617_v60 = vmax.f32 %v5611_v43, %v5615_v19  ;;  %3293 = vst.msk [vmem:[#allocation2 + $0x1c0] sm:$0xff] %vm1130_vm1, %v3277_v21  ;;  %v3072_v28 = vpop.f32.mrf.mxu2 }
 0x2ec   : > { %v3216_v24 = vpop.f32.mrf.mxu3  ;;  %v2785_v59 = vpop.f32.mrf.mxu0 }
 0x2ed   : > { %v3246_v29 = vadd.f32 %v3216_v24, %v3096_v49  ;;  %v2786_v16 = vadd.f32 %v2785_v59, %v14364_v41  ;;  %v2925_v15 = vpop.f32.mrf.mxu1  ;;  %v5619_v40 = vmax.f32 %v5607_v12, %v5617_v60  ;;  %v14678_v24 = vld [vmem:[%s13026_s29 + $0x2d0] sm:$0xff] }
 0x2ef   : > { %v3262_v42 = vadd.f32 %v14560_v45, %v3246_v29  ;;  %v2947_v44 = vadd.f32 %v2919_v48, %v2786_v16  ;;  %11963 = vmatmul.msk.f32.gmra.mxu0 %vm451_vm0, %v14424_v5  ;;  %11981 = vmatmul.msk.f32.gmra.mxu1 %vm451_vm0, %v14389_v38  ;;  %5621 = vst.msk [vmem:[#allocation3 + $0x68] sm:$0xff] %vm1130_vm1, %v5619_v40 }
 0x2f0   : > { %12002 = vmatmul.msk.f32.gmra.mxu2 %vm451_vm0, %v14580_v55 }
 0x2f1   : > { %v3278_v41 = vmax.f32 %v3262_v42, 0.0  ;;  %12021 = vmatmul.msk.f32.gmra.mxu3 %vm451_vm0, %v14612_v34  ;;  %v3097_v4 = vadd.f32 %v3069_v27, %v2947_v44  ;;  %v14692_v44 = vld [vmem:[%s13026_s29 + $0x2d8] sm:$0xff] }
 0x2f3   : > { %3294 = vst.msk [vmem:[#allocation2 + $0x1c8] sm:$0xff] %vm1130_vm1, %v3278_v41  ;;  %v3075_v25 = vpop.f32.mrf.mxu2 }
 0x2f4   : > { %v3219_v6 = vpop.f32.mrf.mxu3  ;;  %v2788_v37 = vpop.f32.mrf.mxu0 }
 0x2f5   : > { %v3247_v0 = vadd.f32 %v3219_v6, %v3097_v4  ;;  %v2789_v38 = vadd.f32 %v2788_v37, %v14385_v14  ;;  %v2928_v18 = vpop.f32.mrf.mxu1 }
 0x2f7   : > { %v3263_v32 = vadd.f32 %v14560_v45, %v3247_v0  ;;  %v2948_v62 = vadd.f32 %v2922_v33, %v2789_v38  ;;  %11964 = vmatmul.msk.f32.gmra.mxu0 %vm451_vm0, %v14440_v46  ;;  %11982 = vmatmul.msk.f32.gmra.mxu1 %vm451_vm0, %v14408_v3 }
 0x2f8   : > { %12003 = vmatmul.msk.f32.gmra.mxu2 %vm451_vm0, %v14595_v13 }
 0x2f9   : > { %v3279_v22 = vmax.f32 %v3263_v32, 0.0  ;;  %12022 = vmatmul.msk.f32.gmra.mxu3 %vm451_vm0, %v14630_v56  ;;  %v3098_v14 = vadd.f32 %v3072_v28, %v2948_v62 }
 0x2fa   : > { %v5627_v6 = vld [vmem:[#allocation2 + $0x1c1] ss:$2 sm:$0xff] }
 0x2fb   : > { %3295 = vst.msk [vmem:[#allocation2 + $0x1d0] sm:$0xff] %vm1130_vm1, %v3279_v22  ;;  %v3078_v20 = vpop.f32.mrf.mxu2 }
 0x2fc   : > { %v3222_v17 = vpop.f32.mrf.mxu3  ;;  %v2791_v48 = vpop.f32.mrf.mxu0 }
 0x2fd   : > { %v3248_v3 = vadd.f32 %v3222_v17, %v3098_v14  ;;  %v2792_v50 = vadd.f32 %v2791_v48, %v14404_v9  ;;  %v2931_v61 = vpop.f32.mrf.mxu1  ;;  %v12152_v48 = vld [vmem:[%s17766_s1 + $0x48] sm:$0xff] }
 0x2fe   : > { %4826 = vmatpush.msrb.mxu2 %v12152_v48 }
 0x2ff   : > { %v3264_v11 = vadd.f32 %v14560_v45, %v3248_v3  ;;  %v2949_v27 = vadd.f32 %v2925_v15, %v2792_v50  ;;  %11965 = vmatmul.msk.f32.gmra.mxu0 %vm451_vm0, %v14513_v51  ;;  %11983 = vmatmul.msk.f32.gmra.mxu1 %vm451_vm0, %v14424_v5  ;;  %v14664_v5 = vld [vmem:[%s13026_s29 + $0x2c8] sm:$0xff] }
 0x300   : > { %12004 = vmatmul.msk.f32.gmra.mxu2 %vm451_vm0, %v14612_v34 }
 0x301   : > { %v3280_v9 = vmax.f32 %v3264_v11, 0.0  ;;  %12023 = vmatmul.msk.f32.gmra.mxu3 %vm451_vm0, %v14647_v35  ;;  %v3099_v1 = vadd.f32 %v3075_v25, %v2949_v27  ;;  %v5623_v25 = vld [vmem:[#allocation2 + $0x1c0] ss:$2 sm:$0xff]  ;;  %v12110_v11 = vld [vmem:[%s17766_s1 + $0x98] sm:$0xff] }
 0x302   : > { %4469 = vmatpush.msra.mxu0 %v12110_v11 }
 0x303   : > { %3296 = vst.msk [vmem:[#allocation2 + $0x1d8] sm:$0xff] %vm1130_vm1, %v3280_v9  ;;  %v3081_v58 = vpop.f32.mrf.mxu2 }
 0x304   : > { %v3225_v30 = vpop.f32.mrf.mxu3  ;;  %v2794_v57 = vpop.f32.mrf.mxu0 }
 0x305   : > { %v3249_v33 = vadd.f32 %v3225_v30, %v3099_v1  ;;  %v2795_v39 = vadd.f32 %v2794_v57, %v14420_v53  ;;  %v2934_v31 = vpop.f32.mrf.mxu1 }
 0x307   : > { %v3265_v36 = vadd.f32 %v14560_v45, %v3249_v33  ;;  %v2950_v8 = vadd.f32 %v2928_v18, %v2795_v39  ;;  %11966 = vmatmul.msk.f32.gmra.mxu0 %vm451_vm0, %v14527_v10  ;;  %11984 = vmatmul.msk.f32.gmra.mxu1 %vm451_vm0, %v14440_v46  ;;  %v5630_v18 = vmax.f32 %v5623_v25, %v5627_v6  ;;  %v14761_v6 = vld [vmem:[%s13026_s29 + $0x2e0] sm:$0xff] }
 0x308   : > { %12005 = vmatmul.msk.f32.gmra.mxu2 %vm451_vm0, %v14630_v56 }
 0x309   : > { %v3281_v21 = vmax.f32 %v3265_v36, 0.0  ;;  %12024 = vmatmul.msk.f32.gmra.mxu3 %vm451_vm0, %v14664_v5  ;;  %v3100_v53 = vadd.f32 %v3078_v20, %v2950_v8 }
 0x30a   : > { %v5625_v33 = vld [vmem:[#allocation2 + $0x1d0] ss:$2 sm:$0xff]  ;;  %v5629_v39 = vld [vmem:[#allocation2 + $0x1d1] ss:$2 sm:$0xff] }
 0x30b   : > { %3297 = vst.msk [vmem:[#allocation2 + $0x1e0] sm:$0xff] %vm1130_vm1, %v3281_v21  ;;  %v3084_v49 = vpop.f32.mrf.mxu2  ;;  %v5631_v8 = vmax.f32 %v5625_v33, %v5629_v39 }
 0x30c   : > { %v3228_v43 = vpop.f32.mrf.mxu3  ;;  %v2797_v19 = vpop.f32.mrf.mxu0 }
 0x30d   : > { %v3250_v12 = vadd.f32 %v3228_v43, %v3100_v53  ;;  %v2798_v60 = vadd.f32 %v2797_v19, %v14436_v47  ;;  %v3473_v28 = vpop.f32.mrf.mxu1 }
 0x30f   : > { %v3266_v46 = vadd.f32 %v14560_v45, %v3250_v12  ;;  %v2951_v59 = vadd.f32 %v2931_v61, %v2798_v60  ;;  %11967 = vmatmul.msk.f32.gmra.mxu0 %vm451_vm0, %v14541_v26  ;;  %12053 = vmatmul.msk.f32.vlgmr.msra.gmra.mxu1 %vm451_vm0, %v14580_v55 }
 0x310   : > { %12069 = vmatmul.msk.f32.vlgmr.msra.gmra.mxu2 %vm451_vm0, %v14513_v51  ;;  %5187 = vmatpush.msra.mxu1 %v12110_v11 }
 0x311   : > { %v3282_v7 = vmax.f32 %v3266_v46, 0.0  ;;  %12025 = vmatmul.msk.f32.gmra.mxu3 %vm451_vm0, %v14678_v24  ;;  %v3101_v47 = vadd.f32 %v3081_v58, %v2951_v59 }
 0x313   : > { %3298 = vst.msk [vmem:[#allocation2 + $0x1e8] sm:$0xff] %vm1130_vm1, %v3282_v7  ;;  %v3607_v29 = vpop.f32.mrf.mxu2 }
 0x314   : > { %v3231_v16 = vpop.f32.mrf.mxu3  ;;  %v2800_v15 = vpop.f32.mrf.mxu0 }
 0x315   : > { %v3251_v40 = vadd.f32 %v3231_v16, %v3101_v47  ;;  %v2801_v52 = vadd.f32 %v2800_v15, %v14453_v54  ;;  %v3476_v42 = vpop.f32.mrf.mxu1  ;;  %v12151_v15 = vld [vmem:[%s17766_s1 + $0x40] sm:$0xff] }
 0x316   : > { %4827 = vmatpush.msrb.mxu2 %v12151_v15 }
 0x317   : > { %v3267_v41 = vadd.f32 %v14560_v45, %v3251_v40  ;;  %v2952_v4 = vadd.f32 %v2934_v31, %v2801_v52  ;;  %11968 = vmatmul.msk.f32.gmra.mxu0 %vm451_vm0, %v14555_v2  ;;  %12054 = vmatmul.msk.f32.gmra.mxu1 %vm451_vm0, %v14595_v13 }
 0x318   : > { %12070 = vmatmul.msk.f32.gmra.mxu2 %vm451_vm0, %v14527_v10 }
 0x319   : > { %v3283_v37 = vmax.f32 %v3267_v41, 0.0  ;;  %12026 = vmatmul.msk.f32.gmra.mxu3 %vm451_vm0, %v14692_v44  ;;  %v3102_v54 = vadd.f32 %v3084_v49, %v2952_v4 }
 0x31a   : > { %v5633_v0 = vld [vmem:[#allocation2 + $0x1e0] ss:$2 sm:$0xff]  ;;  %v5637_v38 = vld [vmem:[#allocation2 + $0x1e1] ss:$2 sm:$0xff] }
 0x31b   : > { %v5640_v32 = vmax.f32 %v5633_v0, %v5637_v38  ;;  %3299 = vst.msk [vmem:[#allocation2 + $0x1f0] sm:$0xff] %vm1130_vm1, %v3283_v37  ;;  %v3610_v62 = vpop.f32.mrf.mxu2 }
 0x31c   : > { %v3234_v22 = vpop.f32.mrf.mxu3  ;;  %v3396_v14 = vpop.f32.mrf.mxu0 }
 0x31d   : > { %v3252_v20 = vadd.f32 %v3234_v22, %v3102_v54  ;;  %v3474_v63 = vadd.f32 %v3473_v28, %v3396_v14  ;;  %v3479_v17 = vpop.f32.mrf.mxu1  ;;  %v5642_v3 = vmax.f32 %v5630_v18, %v5640_v32  ;;  %v14774_v22 = vld [vmem:[%s13026_s29 + $0x2e8] sm:$0xff] }
 0x31f   : > { %v3268_v50 = vadd.f32 %v14560_v45, %v3252_v20  ;;  %12032 = vmatmul.msk.f32.vlgmr.msrb.gmra.mxu0 %vm451_vm0, %v14513_v51  ;;  %12055 = vmatmul.msk.f32.gmra.mxu1 %vm451_vm0, %v14612_v34  ;;  %v3655_v61 = vadd.f32 %v3607_v29, %v3474_v63  ;;  %5644 = vst.msk [vmem:[#allocation3 + $0x70] sm:$0xff] %vm1130_vm1, %v5642_v3 }
 0x320   : > { %12071 = vmatmul.msk.f32.gmra.mxu2 %vm451_vm0, %v14541_v26 }
 0x321   : > { %v3284_v23 = vmax.f32 %v3268_v50, 0.0  ;;  %12090 = vmatmul.msk.f32.vlgmr.msrb.gmra.mxu3 %vm451_vm0, %v14647_v35  ;;  %v14787_v50 = vld [vmem:[%s13026_s29 + $0x2f0] sm:$0xff] }
 0x323   : > { %3300 = vst.msk [vmem:[#allocation2 + $0x1f8] sm:$0xff] %vm1130_vm1, %v3284_v23  ;;  %v3613_v51 = vpop.f32.mrf.mxu2  ;;  %v12150_v23 = vld [vmem:[%s17766_s1 + $0x38] sm:$0xff] }
 0x324   : > { %v3757_v27 = vpop.f32.mrf.mxu3  ;;  %v3399_v9 = vpop.f32.mrf.mxu0  ;;  %4828 = vmatpush.msrb.mxu2 %v12150_v23  ;;  %v5792_v23 = vld [vmem:[%s17768_s3 + $0x8] sm:$0xff] }
 0x325   : > { %v14721_v1 = vadd.f32 %v3757_v27, %v3655_v61  ;;  %v3477_v58 = vadd.f32 %v3476_v42, %v3399_v9  ;;  %v3482_v30 = vpop.f32.mrf.mxu1  ;;  %5911 = vmatpush.msrb.mxu3 %v5792_v23 }
 0x327   : > { %12033 = vmatmul.msk.f32.gmra.mxu0 %vm451_vm0, %v14527_v10  ;;  %12056 = vmatmul.msk.f32.gmra.mxu1 %vm451_vm0, %v14630_v56  ;;  %v3656_v57 = vadd.f32 %v3610_v62, %v3477_v58  ;;  %v12108_v58 = vld [vmem:[%s17766_s1 + $0x88] sm:$0xff] }
 0x328   : > { %12072 = vmatmul.msk.f32.gmra.mxu2 %vm451_vm0, %v14555_v2 }
 0x329   : > { %12091 = vmatmul.msk.f32.gmra.mxu3 %vm451_vm0, %v14664_v5 }
 0x32a   : > { %v5635_v31 = vld [vmem:[#allocation2 + $0x1f0] ss:$2 sm:$0xff]  ;;  %v5639_v36 = vld [vmem:[#allocation2 + $0x1f1] ss:$2 sm:$0xff] }
 0x32b   : > { %v5641_v21 = vmax.f32 %v5635_v31, %v5639_v36  ;;  %v3616_v53 = vpop.f32.mrf.mxu2 }
 0x32c   : > { %v3760_v49 = vpop.f32.mrf.mxu3  ;;  %v3402_v43 = vpop.f32.mrf.mxu0 }
 0x32d   : > { %v14731_v10 = vadd.f32 %v3760_v49, %v3656_v57  ;;  %v3480_v19 = vadd.f32 %v3479_v17, %v3402_v43  ;;  %v3485_v12 = vpop.f32.mrf.mxu1  ;;  %v5643_v60 = vmax.f32 %v5631_v8, %v5641_v21 }
 0x32f   : > { %12034 = vmatmul.msk.f32.gmra.mxu0 %vm451_vm0, %v14541_v26  ;;  %12057 = vmatmul.msk.f32.gmra.mxu1 %vm451_vm0, %v14647_v35  ;;  %v3657_v28 = vadd.f32 %v3613_v51, %v3480_v19  ;;  %5645 = vst.msk [vmem:[#allocation3 + $0x78] sm:$0xff] %vm1130_vm1, %v5643_v60 }
 0x330   : > { %12073 = vmatmul.msk.f32.gmra.mxu2 %vm451_vm0, %v14580_v55 }
 0x331   : > { %12092 = vmatmul.msk.f32.gmra.mxu3 %vm451_vm0, %v14678_v24 }
 0x333   : > { %v3619_v46 = vpop.f32.mrf.mxu2 }
 0x334   : > { %v3763_v59 = vpop.f32.mrf.mxu3  ;;  %v3405_v7 = vpop.f32.mrf.mxu0 }
 0x335   : > { %v14742_v47 = vadd.f32 %v3763_v59, %v3657_v28  ;;  %v3483_v29 = vadd.f32 %v3482_v30, %v3405_v7  ;;  %v3488_v16 = vpop.f32.mrf.mxu1  ;;  %v14806_v30 = vld [vmem:[%s13026_s29 + $0x2f8] sm:$0xff] }
 0x337   : > { %12035 = vmatmul.msk.f32.gmra.mxu0 %vm451_vm0, %v14555_v2  ;;  %12058 = vmatmul.msk.f32.gmra.mxu1 %vm451_vm0, %v14664_v5  ;;  %v3658_v26 = vadd.f32 %v3616_v53, %v3483_v29  ;;  %v12109_v2 = vld [vmem:[%s17766_s1 + $0x90] sm:$0xff]  ;;  %v14819_v53 = vld [vmem:[%s13026_s29 + $0x300] sm:$0xff] }
 0x338   : > { %12074 = vmatmul.msk.f32.gmra.mxu2 %vm451_vm0, %v14595_v13  ;;  %4470 = vmatpush.msra.mxu0 %v12109_v2 }
 0x339   : > { %12093 = vmatmul.msk.f32.gmra.mxu3 %vm451_vm0, %v14692_v44  ;;  %5188 = vmatpush.msra.mxu1 %v12109_v2  ;;  %v14851_v2 = vld [vmem:[%s13026_s29 + $0x310] sm:$0xff] }
 0x33a   : > { %4471 = vmatpush.msra.mxu0 %v12108_v58 }
 0x33b   : > { %v3622_v40 = vpop.f32.mrf.mxu2  ;;  %5189 = vmatpush.msra.mxu1 %v12108_v58 }
 0x33c   : > { %v3766_v52 = vpop.f32.mrf.mxu3  ;;  %v3408_v42 = vpop.f32.mrf.mxu0 }
 0x33d   : > { %v14758_v41 = vadd.f32 %v3766_v52, %v3658_v26  ;;  %v3486_v4 = vadd.f32 %v3485_v12, %v3408_v42  ;;  %v3491_v25 = vpop.f32.mrf.mxu1  ;;  %v12148_v52 = vld [vmem:[%s17766_s1 + $0x28] sm:$0xff] }
 0x33f   : > { %12036 = vmatmul.msk.f32.gmra.mxu0 %vm451_vm0, %v14580_v55  ;;  %12059 = vmatmul.msk.f32.gmra.mxu1 %vm451_vm0, %v14678_v24  ;;  %v3659_v37 = vadd.f32 %v3619_v46, %v3486_v4  ;;  %v14832_v46 = vld [vmem:[%s13026_s29 + $0x308] sm:$0xff] }
 0x340   : > { %12075 = vmatmul.msk.f32.gmra.mxu2 %vm451_vm0, %v14612_v34 }
 0x341   : > { %12094 = vmatmul.msk.f32.gmra.mxu3 %vm451_vm0, %v14761_v6 }
 0x343   : > { %v3625_v54 = vpop.f32.mrf.mxu2 }
 0x344   : > { %v3769_v0 = vpop.f32.mrf.mxu3  ;;  %v3411_v38 = vpop.f32.mrf.mxu0 }
 0x345   : > { %v14771_v18 = vadd.f32 %v3769_v0, %v3659_v37  ;;  %v3489_v32 = vadd.f32 %v3488_v16, %v3411_v38  ;;  %v3494_v62 = vpop.f32.mrf.mxu1  ;;  %v12149_v16 = vld [vmem:[%s17766_s1 + $0x30] sm:$0xff] }
 0x346   : > { %4829 = vmatpush.msrb.mxu2 %v12149_v16 }
 0x347   : > { %12037 = vmatmul.msk.f32.gmra.mxu0 %vm451_vm0, %v14595_v13  ;;  %12060 = vmatmul.msk.f32.gmra.mxu1 %vm451_vm0, %v14692_v44  ;;  %v3660_v55 = vadd.f32 %v3622_v40, %v3489_v32  ;;  %v12107_v40 = vld [vmem:[%s17766_s1 + $0x80] sm:$0xff] }
 0x348   : > { %12076 = vmatmul.msk.f32.gmra.mxu2 %vm451_vm0, %v14630_v56  ;;  %4472 = vmatpush.msra.mxu0 %v12107_v40 }
 0x349   : > { %12095 = vmatmul.msk.f32.gmra.mxu3 %vm451_vm0, %v14774_v22  ;;  %5190 = vmatpush.msra.mxu1 %v12107_v40 }
 0x34a   : > { %4830 = vmatpush.msrb.mxu2 %v12148_v52 }
 0x34b   : > { %v3628_v14 = vpop.f32.mrf.mxu2 }
 0x34c   : > { %v3772_v20 = vpop.f32.mrf.mxu3  ;;  %v3414_v63 = vpop.f32.mrf.mxu0 }
 0x34d   : > { %v14784_v17 = vadd.f32 %v3772_v20, %v3660_v55  ;;  %v3492_v48 = vadd.f32 %v3491_v25, %v3414_v63  ;;  %v3497_v3 = vpop.f32.mrf.mxu1 }
 0x34f   : > { %12038 = vmatmul.msk.f32.gmra.mxu0 %vm451_vm0, %v14612_v34  ;;  %12061 = vmatmul.msk.f32.gmra.mxu1 %vm451_vm0, %v14761_v6  ;;  %v3661_v13 = vadd.f32 %v3625_v54, %v3492_v48 }
 0x350   : > { %12077 = vmatmul.msk.f32.gmra.mxu2 %vm451_vm0, %v14647_v35 }
 0x351   : > { %12096 = vmatmul.msk.f32.gmra.mxu3 %vm451_vm0, %v14787_v50 }
 0x353   : > { %v3631_v61 = vpop.f32.mrf.mxu2 }
 0x354   : > { %v3775_v11 = vpop.f32.mrf.mxu3  ;;  %v3417_v51 = vpop.f32.mrf.mxu0 }
 0x355   : > { %v14800_v27 = vadd.f32 %v3775_v11, %v3661_v13  ;;  %v3495_v34 = vadd.f32 %v3494_v62, %v3417_v51  ;;  %v3500_v9 = vpop.f32.mrf.mxu1 }
 0x357   : > { %12039 = vmatmul.msk.f32.gmra.mxu0 %vm451_vm0, %v14630_v56  ;;  %12062 = vmatmul.msk.f32.gmra.mxu1 %vm451_vm0, %v14774_v22  ;;  %v3662_v57 = vadd.f32 %v3628_v14, %v3495_v34 }
 0x358   : > { %12078 = vmatmul.msk.f32.gmra.mxu2 %vm451_vm0, %v14664_v5 }
 0x359   : > { %12097 = vmatmul.msk.f32.gmra.mxu3 %vm451_vm0, %v14806_v30 }
 0x35b   : > { %v3634_v33 = vpop.f32.mrf.mxu2 }
 0x35c   : > { %v3778_v39 = vpop.f32.mrf.mxu3  ;;  %v3420_v31 = vpop.f32.mrf.mxu0 }
 0x35d   : > { %v14816_v36 = vadd.f32 %v3778_v39, %v3662_v57  ;;  %v3498_v8 = vadd.f32 %v3497_v3, %v3420_v31  ;;  %v3503_v21 = vpop.f32.mrf.mxu1  ;;  %v14880_v3 = vld [vmem:[%s13026_s29 + $0x320] sm:$0xff]  ;;  %v14899_v57 = vld [vmem:[%s13026_s29 + $0x328] sm:$0xff] }
 0x35f   : > { %12040 = vmatmul.msk.f32.gmra.mxu0 %vm451_vm0, %v14647_v35  ;;  %12063 = vmatmul.msk.f32.gmra.mxu1 %vm451_vm0, %v14787_v50  ;;  %v3663_v56 = vadd.f32 %v3631_v61, %v3498_v8 }
 0x360   : > { %12079 = vmatmul.msk.f32.gmra.mxu2 %vm451_vm0, %v14678_v24 }
 0x361   : > { %12098 = vmatmul.msk.f32.gmra.mxu3 %vm451_vm0, %v14819_v53 }
 0x363   : > { %v3637_v49 = vpop.f32.mrf.mxu2 }
 0x364   : > { %v3781_v43 = vpop.f32.mrf.mxu3  ;;  %v3423_v19 = vpop.f32.mrf.mxu0 }
 0x365   : > { %v14829_v12 = vadd.f32 %v3781_v43, %v3663_v56  ;;  %v3501_v60 = vadd.f32 %v3500_v9, %v3423_v19  ;;  %v3506_v28 = vpop.f32.mrf.mxu1  ;;  %v14912_v43 = vld [vmem:[%s13026_s29 + $0x330] sm:$0xff] }
 0x367   : > { %12041 = vmatmul.msk.f32.gmra.mxu0 %vm451_vm0, %v14664_v5  ;;  %12064 = vmatmul.msk.f32.gmra.mxu1 %vm451_vm0, %v14806_v30  ;;  %v3664_v35 = vadd.f32 %v3634_v33, %v3501_v60 }
 0x368   : > { %12080 = vmatmul.msk.f32.gmra.mxu2 %vm451_vm0, %v14692_v44 }
 0x369   : > { %12099 = vmatmul.msk.f32.gmra.mxu3 %vm451_vm0, %v14832_v46 }
 0x36b   : > { %v3640_v59 = vpop.f32.mrf.mxu2 }
 0x36c   : > { %v3784_v7 = vpop.f32.mrf.mxu3  ;;  %v3426_v29 = vpop.f32.mrf.mxu0 }
 0x36d   : > { %v14845_v26 = vadd.f32 %v3784_v7, %v3664_v35  ;;  %v3504_v5 = vadd.f32 %v3503_v21, %v3426_v29  ;;  %v3509_v15 = vpop.f32.mrf.mxu1 }
 0x36f   : > { %12042 = vmatmul.msk.f32.gmra.mxu0 %vm451_vm0, %v14678_v24  ;;  %12065 = vmatmul.msk.f32.gmra.mxu1 %vm451_vm0, %v14819_v53  ;;  %v3665_v42 = vadd.f32 %v3637_v49, %v3504_v5  ;;  %v14867_v24 = vld [vmem:[%s13026_s29 + $0x318] sm:$0xff] }
 0x370   : > { %12081 = vmatmul.msk.f32.gmra.mxu2 %vm451_vm0, %v14761_v6  ;;  %v14925_v5 = vld [vmem:[%s13026_s29 + $0x338] sm:$0xff] }
 0x371   : > { %12100 = vmatmul.msk.f32.gmra.mxu3 %vm451_vm0, %v14851_v2 }
 0x373   : > { %v3643_v4 = vpop.f32.mrf.mxu2 }
 0x374   : > { %v3787_v25 = vpop.f32.mrf.mxu3  ;;  %v3429_v37 = vpop.f32.mrf.mxu0 }
 0x375   : > { %v14864_v54 = vadd.f32 %v3787_v25, %v3665_v42  ;;  %v3507_v0 = vadd.f32 %v3506_v28, %v3429_v37  ;;  %v3512_v38 = vpop.f32.mrf.mxu1 }
 0x377   : > { %12043 = vmatmul.msk.f32.gmra.mxu0 %vm451_vm0, %v14692_v44  ;;  %12066 = vmatmul.msk.f32.gmra.mxu1 %vm451_vm0, %v14832_v46  ;;  %v3666_v32 = vadd.f32 %v3640_v59, %v3507_v0  ;;  %v12106_v44 = vld [vmem:[%s17766_s1 + $0x78] sm:$0xff] }
 0x378   : > { %12082 = vmatmul.msk.f32.gmra.mxu2 %vm451_vm0, %v14774_v22  ;;  %4473 = vmatpush.msra.mxu0 %v12106_v44 }
 0x379   : > { %12101 = vmatmul.msk.f32.gmra.mxu3 %vm451_vm0, %v14867_v24  ;;  %5191 = vmatpush.msra.mxu1 %v12106_v44 }
 0x37b   : > { %v3646_v62 = vpop.f32.mrf.mxu2 }
 0x37c   : > { %v3790_v55 = vpop.f32.mrf.mxu3  ;;  %v3432_v14 = vpop.f32.mrf.mxu0 }
 0x37d   : > { %v14877_v20 = vadd.f32 %v3790_v55, %v3666_v32  ;;  %v3510_v63 = vadd.f32 %v3509_v15, %v3432_v14  ;;  %v3515_v48 = vpop.f32.mrf.mxu1 }
 0x37f   : > { %12044 = vmatmul.msk.f32.gmra.mxu0 %vm451_vm0, %v14761_v6  ;;  %12067 = vmatmul.msk.f32.gmra.mxu1 %vm451_vm0, %v14851_v2  ;;  %v3667_v13 = vadd.f32 %v3643_v4, %v3510_v63 }
 0x380   : > { %12083 = vmatmul.msk.f32.gmra.mxu2 %vm451_vm0, %v14787_v50 }
 0x381   : > { %12102 = vmatmul.msk.f32.gmra.mxu3 %vm451_vm0, %v14880_v3 }
 0x383   : > { %v3649_v61 = vpop.f32.mrf.mxu2 }
 0x384   : > { %v3793_v11 = vpop.f32.mrf.mxu3  ;;  %v3435_v51 = vpop.f32.mrf.mxu0 }
 0x385   : > { %v14896_v34 = vadd.f32 %v3793_v11, %v3667_v13  ;;  %v3513_v9 = vadd.f32 %v3512_v38, %v3435_v51  ;;  %v3518_v58 = vpop.f32.mrf.mxu1 }
 0x387   : > { %12045 = vmatmul.msk.f32.gmra.mxu0 %vm451_vm0, %v14774_v22  ;;  %12068 = vmatmul.msk.f32.gmra.mxu1 %vm451_vm0, %v14867_v24  ;;  %v3668_v33 = vadd.f32 %v3646_v62, %v3513_v9 }
 0x388   : > { %12084 = vmatmul.msk.f32.gmra.mxu2 %vm451_vm0, %v14806_v30 }
 0x389   : > { %12103 = vmatmul.msk.f32.gmra.mxu3 %vm451_vm0, %v14899_v57 }
 0x38b   : > { %v3652_v39 = vpop.f32.mrf.mxu2 }
 0x38c   : > { %v3796_v31 = vpop.f32.mrf.mxu3  ;;  %v3438_v8 = vpop.f32.mrf.mxu0 }
 0x38d   : > { %v14909_v21 = vadd.f32 %v3796_v31, %v3668_v33  ;;  %v3516_v56 = vadd.f32 %v3515_v48, %v3438_v8  ;;  %v4114_v49 = vpop.f32.mrf.mxu1 }
 0x38f   : > { %12046 = vmatmul.msk.f32.gmra.mxu0 %vm451_vm0, %v14787_v50  ;;  %12132 = vmatmul.msk.f32.vlgmr.msrb.gmra.mxu1 %vm451_vm0, %v14819_v53  ;;  %v3669_v19 = vadd.f32 %v3649_v61, %v3516_v56 }
 0x390   : > { %12153 = vmatmul.msk.f32.vlgmr.msrb.gmra.mxu2 %vm451_vm0, %v14880_v3 }
 0x391   : > { %12104 = vmatmul.msk.f32.gmra.mxu3 %vm451_vm0, %v14912_v43 }
 0x393   : > { %v4191_v60 = vpop.f32.mrf.mxu2 }
 0x394   : > { %v4192_v28 = vadd.f32 %v4191_v60, %v4114_v49  ;;  %v3799_v35 = vpop.f32.mrf.mxu3  ;;  %v3441_v59 = vpop.f32.mrf.mxu0 }
 0x395   : > { %v14922_v7 = vadd.f32 %v3799_v35, %v3669_v19  ;;  %v3519_v29 = vadd.f32 %v3518_v58, %v3441_v59  ;;  %v4117_v16 = vpop.f32.mrf.mxu1  ;;  %v14987_v35 = vld [vmem:[%s13026_s29 + $0x348] sm:$0xff] }
 0x397   : > { %12047 = vmatmul.msk.f32.gmra.mxu0 %vm451_vm0, %v14806_v30  ;;  %12133 = vmatmul.msk.f32.gmra.mxu1 %vm451_vm0, %v14832_v46  ;;  %v3670_v15 = vadd.f32 %v3652_v39, %v3519_v29  ;;  %v14971_v39 = vld [vmem:[%s13026_s29 + $0x340] sm:$0xff] }
 0x398   : > { %12154 = vmatmul.msk.f32.gmra.mxu2 %vm451_vm0, %v14899_v57 }
 0x399   : > { %12105 = vmatmul.msk.f32.gmra.mxu3 %vm451_vm0, %v14925_v5 }
 0x39b   : > { %v4194_v40 = vpop.f32.mrf.mxu2 }
 0x39c   : > { %v4195_v52 = vadd.f32 %v4194_v40, %v4117_v16  ;;  %v3802_v42 = vpop.f32.mrf.mxu3  ;;  %v3907_v4 = vpop.f32.mrf.mxu0 }
 0x39d   : > { %v14935_v25 = vadd.f32 %v3802_v42, %v3670_v15  ;;  %v3955_v37 = vadd.f32 %v3907_v4, %v14721_v1  ;;  %v4120_v0 = vpop.f32.mrf.mxu1  ;;  %v12231_v1 = vld [vmem:[%s17766_s1 + $0xc0] sm:$0xff]  ;;  %v15003_v4 = vld [vmem:[%s13026_s29 + $0x350] sm:$0xff] }
 0x39e   : > { %5337 = vmatpush.msra.mxu2 %v12231_v1 }
 0x39f   : > { %v3971_v38 = vadd.f32 %v14560_v45, %v3955_v37  ;;  %12111 = vmatmul.msk.f32.vlgmr.msra.gmra.mxu0 %vm451_vm0, %v14761_v6  ;;  %12134 = vmatmul.msk.f32.gmra.mxu1 %vm451_vm0, %v14851_v2  ;;  %v12189_v6 = vld [vmem:[%s17766_s1 + $0x70] sm:$0xff] }
 0x3a0   : > { %12155 = vmatmul.msk.f32.gmra.mxu2 %vm451_vm0, %v14912_v43  ;;  %5037 = vmatpush.msrb.mxu0 %v12189_v6 }
 0x3a1   : > { %v3987_v32 = vmax.f32 %v3971_v38, 0.0  ;;  %12169 = vmatmul.msk.f32.vlgmr.msra.gmra.mxu3 %vm451_vm0, %v14819_v53  ;;  %v12230_v38 = vld [vmem:[%s17766_s1 + $0xb8] sm:$0xff] }
 0x3a2   : > { %5338 = vmatpush.msra.mxu2 %v12230_v38 }
 0x3a3   : > { %4003 = vst.msk [vmem:[#allocation2 + $0x200] sm:$0xff] %vm1130_vm1, %v3987_v32  ;;  %v4197_v62 = vpop.f32.mrf.mxu2 }
 0x3a4   : > { %v4198_v55 = vadd.f32 %v4197_v62, %v4120_v0  ;;  %v4325_v14 = vpop.f32.mrf.mxu3  ;;  %v3910_v63 = vpop.f32.mrf.mxu0 }
 0x3a5   : > { %v14954_v48 = vadd.f32 %v4325_v14, %v4192_v28  ;;  %v3956_v44 = vadd.f32 %v3910_v63, %v14731_v10  ;;  %v4123_v13 = vpop.f32.mrf.mxu1  ;;  %v15025_v63 = vld [vmem:[%s13026_s29 + $0x358] sm:$0xff] }
 0x3a7   : > { %v3972_v61 = vadd.f32 %v14560_v45, %v3956_v44  ;;  %12112 = vmatmul.msk.f32.gmra.mxu0 %vm451_vm0, %v14774_v22  ;;  %12135 = vmatmul.msk.f32.gmra.mxu1 %vm451_vm0, %v14867_v24 }
 0x3a8   : > { %12156 = vmatmul.msk.f32.gmra.mxu2 %vm451_vm0, %v14925_v5 }
 0x3a9   : > { %v3988_v23 = vmax.f32 %v3972_v61, 0.0  ;;  %12170 = vmatmul.msk.f32.gmra.mxu3 %vm451_vm0, %v14832_v46 }
 0x3ab   : > { %4004 = vst.msk [vmem:[#allocation2 + $0x208] sm:$0xff] %vm1130_vm1, %v3988_v23  ;;  %v4200_v10 = vpop.f32.mrf.mxu2 }
 0x3ac   : > { %v4201_v11 = vadd.f32 %v4200_v10, %v4123_v13  ;;  %v4328_v51 = vpop.f32.mrf.mxu3  ;;  %v3913_v9 = vpop.f32.mrf.mxu0 }
 0x3ad   : > { %v14967_v58 = vadd.f32 %v4328_v51, %v4195_v52  ;;  %v3957_v22 = vadd.f32 %v3913_v9, %v14742_v47  ;;  %v4126_v33 = vpop.f32.mrf.mxu1  ;;  %v15041_v9 = vld [vmem:[%s13026_s29 + $0x360] sm:$0xff] }
 0x3af   : > { %v3973_v31 = vadd.f32 %v14560_v45, %v3957_v22  ;;  %12113 = vmatmul.msk.f32.gmra.mxu0 %vm451_vm0, %v14787_v50  ;;  %12136 = vmatmul.msk.f32.gmra.mxu1 %vm451_vm0, %v14880_v3 }
 0x3b0   : > { %12157 = vmatmul.msk.f32.gmra.mxu2 %vm451_vm0, %v14971_v39 }
 0x3b1   : > { %v3989_v8 = vmax.f32 %v3973_v31, 0.0  ;;  %12171 = vmatmul.msk.f32.gmra.mxu3 %vm451_vm0, %v14851_v2 }
 0x3b2   : > { %v5651_v31 = vld [vmem:[#allocation2 + $0x201] ss:$2 sm:$0xff] }
 0x3b3   : > { %4005 = vst.msk [vmem:[#allocation2 + $0x210] sm:$0xff] %vm1130_vm1, %v3989_v8  ;;  %v4203_v47 = vpop.f32.mrf.mxu2 }
 0x3b4   : > { %v4204_v56 = vadd.f32 %v4203_v47, %v4126_v33  ;;  %v4331_v49 = vpop.f32.mrf.mxu3  ;;  %v3916_v19 = vpop.f32.mrf.mxu0  ;;  %v5647_v33 = vld [vmem:[#allocation2 + $0x200] ss:$2 sm:$0xff] }
 0x3b5   : > { %v14983_v60 = vadd.f32 %v4331_v49, %v4198_v55  ;;  %v3958_v50 = vadd.f32 %v3916_v19, %v14758_v41  ;;  %v4129_v28 = vpop.f32.mrf.mxu1 }
 0x3b7   : > { %v3974_v59 = vadd.f32 %v14560_v45, %v3958_v50  ;;  %12114 = vmatmul.msk.f32.gmra.mxu0 %vm451_vm0, %v14806_v30  ;;  %12137 = vmatmul.msk.f32.gmra.mxu1 %vm451_vm0, %v14899_v57 }
 0x3b8   : > { %12158 = vmatmul.msk.f32.gmra.mxu2 %vm451_vm0, %v14987_v35 }
 0x3b9   : > { %v3990_v29 = vmax.f32 %v3974_v59, 0.0  ;;  %12172 = vmatmul.msk.f32.gmra.mxu3 %vm451_vm0, %v14867_v24 }
 0x3bb   : > { %4006 = vst.msk [vmem:[#allocation2 + $0x218] sm:$0xff] %vm1130_vm1, %v3990_v29  ;;  %v4206_v41 = vpop.f32.mrf.mxu2 }
 0x3bc   : > { %v4207_v16 = vadd.f32 %v4206_v41, %v4129_v28  ;;  %v4334_v15 = vpop.f32.mrf.mxu3  ;;  %v3919_v40 = vpop.f32.mrf.mxu0  ;;  %v12229_v28 = vld [vmem:[%s17766_s1 + $0xb0] sm:$0xff] }
 0x3bd   : > { %v14999_v52 = vadd.f32 %v4334_v15, %v4201_v11  ;;  %v3959_v30 = vadd.f32 %v3919_v40, %v14771_v18  ;;  %v4132_v42 = vpop.f32.mrf.mxu1  ;;  %5339 = vmatpush.msra.mxu2 %v12229_v28  ;;  %v15065_v40 = vld [vmem:[%s17767_s2] ss:$0 sm:$0xff] }
 0x3be   : > { %v15121_v28 = vld [vmem:[%s13026_s29 + $0x380] sm:$0xff] }
 0x3bf   : > { %v3975_v37 = vadd.f32 %v14560_v45, %v3959_v30  ;;  %12115 = vmatmul.msk.f32.gmra.mxu0 %vm451_vm0, %v14819_v53  ;;  %12138 = vmatmul.msk.f32.gmra.mxu1 %vm451_vm0, %v14912_v43  ;;  %v12188_v53 = vld [vmem:[%s17766_s1 + $0x68] sm:$0xff] }
 0x3c0   : > { %12159 = vmatmul.msk.f32.gmra.mxu2 %vm451_vm0, %v15003_v4  ;;  %5038 = vmatpush.msrb.mxu0 %v12188_v53 }
 0x3c1   : > { %v3991_v0 = vmax.f32 %v3975_v37, 0.0  ;;  %12173 = vmatmul.msk.f32.gmra.mxu3 %vm451_vm0, %v14880_v3 }
 0x3c3   : > { %4007 = vst.msk [vmem:[#allocation2 + $0x220] sm:$0xff] %vm1130_vm1, %v3991_v0  ;;  %v4209_v18 = vpop.f32.mrf.mxu2 }
 0x3c4   : > { %v4210_v32 = vadd.f32 %v4209_v18, %v4132_v42  ;;  %v4337_v62 = vpop.f32.mrf.mxu3  ;;  %v3922_v1 = vpop.f32.mrf.mxu0 }
 0x3c5   : > { %v15021_v6 = vadd.f32 %v4337_v62, %v4204_v56  ;;  %v3960_v55 = vadd.f32 %v3922_v1, %v14784_v17  ;;  %v4135_v14 = vpop.f32.mrf.mxu1  ;;  %v5654_v56 = vmax.f32 %v5647_v33, %v5651_v31  ;;  %v5649_v1 = vld [vmem:[#allocation2 + $0x210] ss:$2 sm:$0xff] }
 0x3c6   : > { %v15101_v31 = vld [vmem:[%s13026_s29 + $0x378] sm:$0xff] }
 0x3c7   : > { %v3976_v44 = vadd.f32 %v14560_v45, %v3960_v55  ;;  %12116 = vmatmul.msk.f32.gmra.mxu0 %vm451_vm0, %v14832_v46  ;;  %12139 = vmatmul.msk.f32.gmra.mxu1 %vm451_vm0, %v14925_v5  ;;  %v5653_v55 = vld [vmem:[#allocation2 + $0x211] ss:$2 sm:$0xff] }
 0x3c8   : > { %12160 = vmatmul.msk.f32.gmra.mxu2 %vm451_vm0, %v15025_v63 }
 0x3c9   : > { %v3992_v13 = vmax.f32 %v3976_v44, 0.0  ;;  %12174 = vmatmul.msk.f32.gmra.mxu3 %vm451_vm0, %v14899_v57 }
 0x3cb   : > { %4008 = vst.msk [vmem:[#allocation2 + $0x228] sm:$0xff] %vm1130_vm1, %v3992_v13  ;;  %v4212_v17 = vpop.f32.mrf.mxu2  ;;  %v5655_v13 = vmax.f32 %v5649_v1, %v5653_v55 }
 0x3cc   : > { %v4213_v61 = vadd.f32 %v4212_v17, %v4135_v14  ;;  %v4340_v23 = vpop.f32.mrf.mxu3  ;;  %v3925_v10 = vpop.f32.mrf.mxu0 }
 0x3cd   : > { %v15037_v11 = vadd.f32 %v4340_v23, %v4207_v16  ;;  %v3961_v46 = vadd.f32 %v3925_v10, %v14800_v27  ;;  %v4138_v51 = vpop.f32.mrf.mxu1  ;;  %v15060_v16 = vld [vmem:[%s13026_s29 + $0x368] sm:$0xff] }
 0x3cf   : > { %v3977_v22 = vadd.f32 %v14560_v45, %v3961_v46  ;;  %12117 = vmatmul.msk.f32.gmra.mxu0 %vm451_vm0, %v14851_v2  ;;  %12140 = vmatmul.msk.f32.gmra.mxu1 %vm451_vm0, %v14971_v39 }
 0x3d0   : > { %12161 = vmatmul.msk.f32.gmra.mxu2 %vm451_vm0, %v15041_v9 }
 0x3d1   : > { %v3993_v8 = vmax.f32 %v3977_v22, 0.0  ;;  %12175 = vmatmul.msk.f32.gmra.mxu3 %vm451_vm0, %v14912_v43 }
 0x3d2   : > { %v5657_v27 = vld [vmem:[#allocation2 + $0x220] ss:$2 sm:$0xff]  ;;  %v5661_v47 = vld [vmem:[#allocation2 + $0x221] ss:$2 sm:$0xff] }
 0x3d3   : > { %v5664_v45 = vmax.f32 %v5657_v27, %v5661_v47  ;;  %4009 = vst.msk [vmem:[#allocation2 + $0x230] sm:$0xff] %vm1130_vm1, %v3993_v8  ;;  %v4215_v2 = vpop.f32.mrf.mxu2 }
 0x3d4   : > { %v4216_v49 = vadd.f32 %v4215_v2, %v4138_v51  ;;  %v4343_v19 = vpop.f32.mrf.mxu3  ;;  %v3928_v50 = vpop.f32.mrf.mxu0 }
 0x3d5   : > { %v15056_v59 = vadd.f32 %v4343_v19, %v4210_v32  ;;  %v3962_v29 = vadd.f32 %v3928_v50, %v14816_v36  ;;  %v4141_v41 = vpop.f32.mrf.mxu1  ;;  %v5666_v15 = vmax.f32 %v5654_v56, %v5664_v45  ;;  %v15082_v32 = vld [vmem:[%s13026_s29 + $0x370] sm:$0xff] }
 0x3d7   : > { %v3978_v30 = vadd.f32 %v15065_v40, %v3962_v29  ;;  %12118 = vmatmul.msk.f32.gmra.mxu0 %vm451_vm0, %v14867_v24  ;;  %12141 = vmatmul.msk.f32.gmra.mxu1 %vm451_vm0, %v14987_v35  ;;  %5668 = vst.msk [vmem:[#allocation3 + $0x80] sm:$0xff] %vm1130_vm1, %v5666_v15  ;;  %v12227_v29 = vld [vmem:[%s17766_s1 + $0xa0] sm:$0xff] }
 0x3d8   : > { %12162 = vmatmul.msk.f32.gmra.mxu2 %vm451_vm0, %v15060_v16 }
 0x3d9   : > { %v3994_v36 = vmax.f32 %v3978_v30, 0.0  ;;  %12176 = vmatmul.msk.f32.gmra.mxu3 %vm451_vm0, %v14925_v5  ;;  %v12186_v30 = vld [vmem:[%s17766_s1 + $0x58] sm:$0xff] }
 0x3db   : > { %4010 = vst.msk [vmem:[#allocation2 + $0x238] sm:$0xff] %vm1130_vm1, %v3994_v36  ;;  %v4218_v42 = vpop.f32.mrf.mxu2 }
 0x3dc   : > { %v4219_v37 = vadd.f32 %v4218_v42, %v4141_v41  ;;  %v4346_v0 = vpop.f32.mrf.mxu3  ;;  %v3931_v18 = vpop.f32.mrf.mxu0 }
 0x3dd   : > { %v15078_v38 = vadd.f32 %v4346_v0, %v4213_v61  ;;  %v3963_v24 = vadd.f32 %v3931_v18, %v14829_v12  ;;  %v4144_v53 = vpop.f32.mrf.mxu1  ;;  %v12187_v61 = vld [vmem:[%s17766_s1 + $0x60] sm:$0xff] }
 0x3de   : > { %5039 = vmatpush.msrb.mxu0 %v12187_v61 }
 0x3df   : > { %v3979_v62 = vadd.f32 %v15065_v40, %v3963_v24  ;;  %12119 = vmatmul.msk.f32.gmra.mxu0 %vm451_vm0, %v14880_v3  ;;  %12142 = vmatmul.msk.f32.gmra.mxu1 %vm451_vm0, %v15003_v4  ;;  %v15143_v24 = vld [vmem:[%s13026_s29 + $0x388] sm:$0xff] }
 0x3e0   : > { %12163 = vmatmul.msk.f32.gmra.mxu2 %vm451_vm0, %v15082_v32  ;;  %5040 = vmatpush.msrb.mxu0 %v12186_v30 }
 0x3e1   : > { %v3995_v14 = vmax.f32 %v3979_v62, 0.0  ;;  %12177 = vmatmul.msk.f32.gmra.mxu3 %vm451_vm0, %v14971_v39 }
 0x3e2   : > { %v5659_v12 = vld [vmem:[#allocation2 + $0x230] ss:$2 sm:$0xff]  ;;  %v5663_v44 = vld [vmem:[#allocation2 + $0x231] ss:$2 sm:$0xff] }
 0x3e3   : > { %v5665_v17 = vmax.f32 %v5659_v12, %v5663_v44  ;;  %4011 = vst.msk [vmem:[#allocation2 + $0x240] sm:$0xff] %vm1130_vm1, %v3995_v14  ;;  %v4221_v3 = vpop.f32.mrf.mxu2 }
 0x3e4   : > { %v4222_v23 = vadd.f32 %v4221_v3, %v4144_v53  ;;  %v4349_v10 = vpop.f32.mrf.mxu3  ;;  %v3934_v46 = vpop.f32.mrf.mxu0 }
 0x3e5   : > { %v15097_v51 = vadd.f32 %v4349_v10, %v4216_v49  ;;  %v3964_v22 = vadd.f32 %v3934_v46, %v14845_v26  ;;  %v4147_v33 = vpop.f32.mrf.mxu1  ;;  %v5667_v8 = vmax.f32 %v5655_v13, %v5665_v17  ;;  %v15159_v13 = vld [vmem:[%s13026_s29 + $0x390] sm:$0xff] }
 0x3e6   : > { %v12185_v17 = vld [vmem:[%s17766_s1 + $0x50] sm:$0xff] }
 0x3e7   : > { %v3980_v27 = vadd.f32 %v15065_v40, %v3964_v22  ;;  %12120 = vmatmul.msk.f32.gmra.mxu0 %vm451_vm0, %v14899_v57  ;;  %12143 = vmatmul.msk.f32.gmra.mxu1 %vm451_vm0, %v15025_v63  ;;  %5669 = vst.msk [vmem:[#allocation3 + $0x88] sm:$0xff] %vm1130_vm1, %v5667_v8  ;;  %v12228_v57 = vld [vmem:[%s17766_s1 + $0xa8] sm:$0xff] }
 0x3e8   : > { %12164 = vmatmul.msk.f32.gmra.mxu2 %vm451_vm0, %v15101_v31  ;;  %5041 = vmatpush.msrb.mxu0 %v12185_v17 }
 0x3e9   : > { %v3996_v47 = vmax.f32 %v3980_v27, 0.0  ;;  %12178 = vmatmul.msk.f32.gmra.mxu3 %vm451_vm0, %v14987_v35  ;;  %5340 = vmatpush.msra.mxu2 %v12228_v57  ;;  %v15178_v27 = vld [vmem:[%s13026_s29 + $0x398] sm:$0xff] }
 0x3eb   : > { %4012 = vst.msk [vmem:[#allocation2 + $0x248] sm:$0xff] %vm1130_vm1, %v3996_v47  ;;  %v4224_v26 = vpop.f32.mrf.mxu2  ;;  %5341 = vmatpush.msra.mxu2 %v12227_v29  ;;  %v5795_v47 = vld [vmem:[%s17768_s3 + $0x20] sm:$0xff] }
 0x3ec   : > { %v4225_v56 = vadd.f32 %v4224_v26, %v4147_v33  ;;  %v4352_v45 = vpop.f32.mrf.mxu3  ;;  %v3937_v2 = vpop.f32.mrf.mxu0  ;;  %6559 = vmatpush.msra.mxu3 %v5795_v47 }
 0x3ed   : > { %v15117_v49 = vadd.f32 %v4352_v45, %v4219_v37  ;;  %v3965_v19 = vadd.f32 %v3937_v2, %v14864_v54  ;;  %v4150_v50 = vpop.f32.mrf.mxu1 }
 0x3ef   : > { %v3981_v41 = vadd.f32 %v15065_v40, %v3965_v19  ;;  %12121 = vmatmul.msk.f32.gmra.mxu0 %vm451_vm0, %v14912_v43  ;;  %12144 = vmatmul.msk.f32.gmra.mxu1 %vm451_vm0, %v15041_v9 }
 0x3f0   : > { %12165 = vmatmul.msk.f32.gmra.mxu2 %vm451_vm0, %v15121_v28 }
 0x3f1   : > { %v3997_v54 = vmax.f32 %v3981_v41, 0.0  ;;  %12179 = vmatmul.msk.f32.gmra.mxu3 %vm451_vm0, %v15003_v4 }
 0x3f3   : > { %4013 = vst.msk [vmem:[#allocation2 + $0x250] sm:$0xff] %vm1130_vm1, %v3997_v54  ;;  %v4227_v15 = vpop.f32.mrf.mxu2  ;;  %v5671_v54 = vld [vmem:[#allocation2 + $0x240] ss:$2 sm:$0xff] }
 0x3f4   : > { %v4228_v43 = vadd.f32 %v4227_v15, %v4150_v50  ;;  %v4355_v36 = vpop.f32.mrf.mxu3  ;;  %v3940_v42 = vpop.f32.mrf.mxu0  ;;  %v5675_v15 = vld [vmem:[#allocation2 + $0x241] ss:$2 sm:$0xff] }
 0x3f5   : > { %v15139_v37 = vadd.f32 %v4355_v36, %v4222_v23  ;;  %v3966_v0 = vadd.f32 %v3940_v42, %v14877_v20  ;;  %v4153_v18 = vpop.f32.mrf.mxu1  ;;  %v5678_v36 = vmax.f32 %v5671_v54, %v5675_v15  ;;  %v5791_v54 = vld [vmem:[%s17768_s3] sm:$0xff]  ;;  %v5793_v15 = vld [vmem:[%s17768_s3 + $0x10] sm:$0xff] }
 0x3f6   : > { %6048 = vmatpush.msra.mxu0 %v5791_v54  ;;  %6205 = vmatpush.msrb.mxu1 %v5793_v15 }
 0x3f7   : > { %v3982_v53 = vadd.f32 %v15065_v40, %v3966_v0  ;;  %12122 = vmatmul.msk.f32.gmra.mxu0 %vm451_vm0, %v14925_v5  ;;  %12145 = vmatmul.msk.f32.gmra.mxu1 %vm451_vm0, %v15060_v16 }
 0x3f8   : > { %12166 = vmatmul.msk.f32.gmra.mxu2 %vm451_vm0, %v15143_v24 }
 0x3f9   : > { %v3998_v62 = vmax.f32 %v3982_v53, 0.0  ;;  %12180 = vmatmul.msk.f32.gmra.mxu3 %vm451_vm0, %v15025_v63 }
 0x3fb   : > { %4014 = vst.msk [vmem:[#allocation2 + $0x258] sm:$0xff] %vm1130_vm1, %v3998_v62  ;;  %v4230_v20 = vpop.f32.mrf.mxu2 }
 0x3fc   : > { %v4231_v1 = vadd.f32 %v4230_v20, %v4153_v18  ;;  %v4358_v55 = vpop.f32.mrf.mxu3  ;;  %v3943_v14 = vpop.f32.mrf.mxu0 }
 0x3fd   : > { %v15155_v12 = vadd.f32 %v4358_v55, %v4225_v56  ;;  %v3967_v5 = vadd.f32 %v3943_v14, %v14896_v34  ;;  %v4156_v44 = vpop.f32.mrf.mxu1 }
 0x3ff   : > { %v3983_v3 = vadd.f32 %v15065_v40, %v3967_v5  ;;  %12123 = vmatmul.msk.f32.gmra.mxu0 %vm451_vm0, %v14971_v39  ;;  %12146 = vmatmul.msk.f32.gmra.mxu1 %vm451_vm0, %v15082_v32 }
 0x400   : > { %12167 = vmatmul.msk.f32.gmra.mxu2 %vm451_vm0, %v15159_v13 }
 0x401   : > { %v3999_v34 = vmax.f32 %v3983_v3, 0.0  ;;  %12181 = vmatmul.msk.f32.gmra.mxu3 %vm451_vm0, %v15041_v9 }
 0x403   : > { %4015 = vst.msk [vmem:[#allocation2 + $0x260] sm:$0xff] %vm1130_vm1, %v3999_v34  ;;  %v4233_v61 = vpop.f32.mrf.mxu2 }
 0x404   : > { %v4234_v23 = vadd.f32 %v4233_v61, %v4156_v44  ;;  %v4361_v10 = vpop.f32.mrf.mxu3  ;;  %v3946_v46 = vpop.f32.mrf.mxu0 }
 0x405   : > { %v15174_v22 = vadd.f32 %v4361_v10, %v4228_v43  ;;  %v3968_v33 = vadd.f32 %v3946_v46, %v14909_v21  ;;  %v4159_v8 = vpop.f32.mrf.mxu1  ;;  %v5673_v10 = vld [vmem:[#allocation2 + $0x250] ss:$2 sm:$0xff]  ;;  %v5677_v46 = vld [vmem:[#allocation2 + $0x251] ss:$2 sm:$0xff] }
 0x407   : > { %v3984_v26 = vadd.f32 %v15065_v40, %v3968_v33  ;;  %12124 = vmatmul.msk.f32.gmra.mxu0 %vm451_vm0, %v14987_v35  ;;  %12147 = vmatmul.msk.f32.gmra.mxu1 %vm451_vm0, %v15101_v31  ;;  %v5816_v33 = vld [vmem:[#allocation3 + $0x1] sm:$0xff] }
 0x408   : > { %12168 = vmatmul.msk.f32.gmra.mxu2 %vm451_vm0, %v15178_v27 }
 0x409   : > { %v4000_v21 = vmax.f32 %v3984_v26, 0.0  ;;  %12182 = vmatmul.msk.f32.gmra.mxu3 %vm451_vm0, %v15060_v16  ;;  %v5679_v26 = vmax.f32 %v5673_v10, %v5677_v46  ;;  %v5819_v46 = vld [vmem:[#allocation3 + $0x19] sm:$0xff] }
 0x40b   : > { %4016 = vst.msk [vmem:[#allocation2 + $0x268] sm:$0xff] %vm1130_vm1, %v4000_v21  ;;  %v4236_v56 = vpop.f32.mrf.mxu2 }
 0x40c   : > { %v4237_v45 = vadd.f32 %v4236_v56, %v4159_v8  ;;  %v4364_v2 = vpop.f32.mrf.mxu3  ;;  %v3949_v57 = vpop.f32.mrf.mxu0 }
 0x40d   : > { %v15193_v19 = vadd.f32 %v4364_v2, %v4231_v1  ;;  %v3969_v50 = vadd.f32 %v3949_v57, %v14922_v7  ;;  %v4625_v29 = vpop.f32.mrf.mxu1 }
 0x40f   : > { %v3985_v41 = vadd.f32 %v15065_v40, %v3969_v50  ;;  %12125 = vmatmul.msk.f32.gmra.mxu0 %vm451_vm0, %v15003_v4  ;;  %12211 = vmatmul.msk.f32.vlgmr.msra.gmra.mxu1 %vm451_vm0, %v15041_v9 }
 0x410   : > { %12232 = vmatmul.msk.f32.vlgmr.msra.gmra.mxu2 %vm451_vm0, %v15121_v28 }
 0x411   : > { %v4001_v30 = vmax.f32 %v3985_v41, 0.0  ;;  %12183 = vmatmul.msk.f32.gmra.mxu3 %vm451_vm0, %v15082_v32  ;;  %v5794_v41 = vld [vmem:[%s17768_s3 + $0x18] sm:$0xff] }
 0x412   : > { %v5681_v43 = vld [vmem:[#allocation2 + $0x260] ss:$2 sm:$0xff]  ;;  %v5685_v7 = vld [vmem:[#allocation2 + $0x261] ss:$2 sm:$0xff]  ;;  %6382 = vmatpush.msrb.mxu2 %v5794_v41 }
 0x413   : > { %v5688_v42 = vmax.f32 %v5681_v43, %v5685_v7  ;;  %4017 = vst.msk [vmem:[#allocation2 + $0x270] sm:$0xff] %vm1130_vm1, %v4001_v30  ;;  %v4832_v0 = vpop.f32.mrf.mxu2 }
 0x414   : > { %v4367_v18 = vpop.f32.mrf.mxu3  ;;  %v3952_v53 = vpop.f32.mrf.mxu0 }
 0x415   : > { %v15206_v62 = vadd.f32 %v4367_v18, %v4234_v23  ;;  %v3970_v20 = vadd.f32 %v3952_v53, %v14935_v25  ;;  %v4628_v1 = vpop.f32.mrf.mxu1  ;;  %v5690_v55 = vmax.f32 %v5678_v36, %v5688_v42 }
 0x417   : > { %v3986_v14 = vadd.f32 %v15065_v40, %v3970_v20  ;;  %12126 = vmatmul.msk.f32.gmra.mxu0 %vm451_vm0, %v15025_v63  ;;  %12212 = vmatmul.msk.f32.gmra.mxu1 %vm451_vm0, %v15060_v16  ;;  %5692 = vst.msk [vmem:[#allocation3 + $0x90] sm:$0xff] %vm1130_vm1, %v5690_v55 }
 0x418   : > { %12233 = vmatmul.msk.f32.gmra.mxu2 %vm451_vm0, %v15143_v24 }
 0x419   : > { %v4002_v5 = vmax.f32 %v3986_v14, 0.0  ;;  %12184 = vmatmul.msk.f32.gmra.mxu3 %vm451_vm0, %v15101_v31  ;;  %v5818_v14 = vld [vmem:[#allocation3 + $0x11] sm:$0xff] }
 0x41b   : > { %4018 = vst.msk [vmem:[#allocation2 + $0x278] sm:$0xff] %vm1130_vm1, %v4002_v5  ;;  %v4835_v25 = vpop.f32.mrf.mxu2 }
 0x41c   : > { %v4370_v44 = vpop.f32.mrf.mxu3  ;;  %v4475_v17 = vpop.f32.mrf.mxu0 }
 0x41d   : > { %v15220_v3 = vadd.f32 %v4370_v44, %v4237_v45  ;;  %v4523_v34 = vadd.f32 %v4475_v17, %v14954_v48  ;;  %v4631_v61 = vpop.f32.mrf.mxu1 }
 0x41f   : > { %v4673_v23 = vadd.f32 %v4625_v29, %v4523_v34  ;;  %12190 = vmatmul.msk.f32.vlgmr.msrb.gmra.mxu0 %vm451_vm0, %v14971_v39  ;;  %12213 = vmatmul.msk.f32.gmra.mxu1 %vm451_vm0, %v15082_v32 }
 0x420   : > { %12234 = vmatmul.msk.f32.gmra.mxu2 %vm451_vm0, %v15159_v13 }
 0x421   : > { %v4689_v8 = vadd.f32 %v15065_v40, %v4673_v23  ;;  %12248 = vmatmul.msk.f32.vlgmr.msrb.gmra.mxu3 %vm1130_vm1, %v5816_v33  ;;  %v15273_v23 = vld [vmem:[%s13026_s29 + $0x3a8] sm:$0xff] }
 0x422   : > { %v5683_v47 = vld [vmem:[#allocation2 + $0x270] ss:$2 sm:$0xff]  ;;  %v5687_v48 = vld [vmem:[#allocation2 + $0x271] ss:$2 sm:$0xff] }
 0x423   : > { %v5689_v21 = vmax.f32 %v5683_v47, %v5687_v48  ;;  %v4705_v56 = vmax.f32 %v4689_v8, 0.0  ;;  %v4838_v45 = vpop.f32.mrf.mxu2 }
 0x424   : > { %v4909_v39 = vpop.f32.mrf.mxu3  ;;  %v4478_v2 = vpop.f32.mrf.mxu0 }
 0x425   : > { %4721 = vst.msk [vmem:[#allocation2 + $0x280] sm:$0xff] %vm1130_vm1, %v4705_v56  ;;  %v15232_v57 = vadd.f32 %v4909_v39, %v4832_v0  ;;  %v4524_v50 = vadd.f32 %v4478_v2, %v14967_v58  ;;  %v4634_v29 = vpop.f32.mrf.mxu1  ;;  %v5691_v30 = vmax.f32 %v5679_v26, %v5689_v21  ;;  %v5817_v58 = vld [vmem:[#allocation3 + $0x9] sm:$0xff]  ;;  %v5820_v39 = vld [vmem:[#allocation3 + $0x21] sm:$0xff] }
 0x426   : > { %v15288_v56 = vld [vmem:[%s13026_s29 + $0x3b0] sm:$0xff] }
 0x427   : > { %v4674_v43 = vadd.f32 %v4628_v1, %v4524_v50  ;;  %12191 = vmatmul.msk.f32.gmra.mxu0 %vm451_vm0, %v14987_v35  ;;  %12214 = vmatmul.msk.f32.gmra.mxu1 %vm451_vm0, %v15101_v31  ;;  %5693 = vst.msk [vmem:[#allocation3 + $0x98] sm:$0xff] %vm1130_vm1, %v5691_v30  ;;  %v15258_v1 = vld [vmem:[%s13026_s29 + $0x3a0] sm:$0xff]  ;;  %v15303_v30 = vld [vmem:[%s13026_s29 + $0x3b8] sm:$0xff] }
 0x428   : > { %12235 = vmatmul.msk.f32.gmra.mxu2 %vm451_vm0, %v15178_v27 }
 0x429   : > { %v4690_v7 = vadd.f32 %v15065_v40, %v4674_v43  ;;  %12249 = vmatmul.msk.f32.gmra.mxu3 %vm1130_vm1, %v5817_v58  ;;  %v5821_v58 = vld [vmem:[#allocation3 + $0x29] sm:$0xff] }
 0x42b   : > { %v4706_v36 = vmax.f32 %v4690_v7, 0.0  ;;  %v4841_v42 = vpop.f32.mrf.mxu2 }
 0x42c   : > { %v4912_v0 = vpop.f32.mrf.mxu3  ;;  %v4481_v18 = vpop.f32.mrf.mxu0 }
 0x42d   : > { %4722 = vst.msk [vmem:[#allocation2 + $0x288] sm:$0xff] %vm1130_vm1, %v4706_v36  ;;  %v15254_v35 = vadd.f32 %v4912_v0, %v4835_v25  ;;  %v4525_v53 = vadd.f32 %v4481_v18, %v14983_v60  ;;  %v4637_v20 = vpop.f32.mrf.mxu1 }
 0x42f   : > { %v4675_v55 = vadd.f32 %v4631_v61, %v4525_v53  ;;  %12192 = vmatmul.msk.f32.gmra.mxu0 %vm451_vm0, %v15003_v4  ;;  %12215 = vmatmul.msk.f32.gmra.mxu1 %vm451_vm0, %v15121_v28 }
 0x430   : > { %12236 = vmatmul.msk.f32.gmra.mxu2 %vm451_vm0, %v15258_v1 }
 0x431   : > { %v4691_v5 = vadd.f32 %v15065_v40, %v4675_v55  ;;  %12250 = vmatmul.msk.f32.gmra.mxu3 %vm1130_vm1, %v5818_v14  ;;  %v5822_v14 = vld [vmem:[#allocation3 + $0x31] sm:$0xff] }
 0x433   : > { %v4707_v60 = vmax.f32 %v4691_v5, 0.0  ;;  %v4844_v25 = vpop.f32.mrf.mxu2 }
 0x434   : > { %v4915_v44 = vpop.f32.mrf.mxu3  ;;  %v4484_v17 = vpop.f32.mrf.mxu0 }
 0x435   : > { %4723 = vst.msk [vmem:[#allocation2 + $0x290] sm:$0xff] %vm1130_vm1, %v4707_v60  ;;  %v15269_v34 = vadd.f32 %v4915_v44, %v4838_v45  ;;  %v4526_v4 = vadd.f32 %v4484_v17, %v14999_v52  ;;  %v4640_v61 = vpop.f32.mrf.mxu1  ;;  %v5699_v60 = vld [vmem:[#allocation2 + $0x281] ss:$2 sm:$0xff] }
 0x437   : > { %v4676_v10 = vadd.f32 %v4634_v29, %v4526_v4  ;;  %12193 = vmatmul.msk.f32.gmra.mxu0 %vm451_vm0, %v15025_v63  ;;  %12216 = vmatmul.msk.f32.gmra.mxu1 %vm451_vm0, %v15143_v24 }
 0x438   : > { %12237 = vmatmul.msk.f32.gmra.mxu2 %vm451_vm0, %v15273_v23 }
 0x439   : > { %v4692_v33 = vadd.f32 %v15065_v40, %v4676_v10  ;;  %12251 = vmatmul.msk.f32.gmra.mxu3 %vm1130_vm1, %v5819_v46 }
 0x43b   : > { %v4708_v52 = vmax.f32 %v4692_v33, 0.0  ;;  %v4847_v8 = vpop.f32.mrf.mxu2 }
 0x43c   : > { %v4918_v47 = vpop.f32.mrf.mxu3  ;;  %v4487_v48 = vpop.f32.mrf.mxu0 }
 0x43d   : > { %4724 = vst.msk [vmem:[#allocation2 + $0x298] sm:$0xff] %vm1130_vm1, %v4708_v52  ;;  %v15284_v26 = vadd.f32 %v4918_v47, %v4841_v42  ;;  %v4527_v63 = vadd.f32 %v4487_v48, %v15021_v6  ;;  %v4643_v21 = vpop.f32.mrf.mxu1  ;;  %v15333_v52 = vld [vmem:[%s13026_s29 + $0x3c8] sm:$0xff] }
 0x43f   : > { %v4677_v45 = vadd.f32 %v4637_v20, %v4527_v63  ;;  %12194 = vmatmul.msk.f32.gmra.mxu0 %vm451_vm0, %v15041_v9  ;;  %12217 = vmatmul.msk.f32.gmra.mxu1 %vm451_vm0, %v15159_v13  ;;  %v15318_v20 = vld [vmem:[%s13026_s29 + $0x3c0] sm:$0xff] }
 0x440   : > { %12238 = vmatmul.msk.f32.gmra.mxu2 %vm451_vm0, %v15288_v56 }
 0x441   : > { %v4693_v2 = vadd.f32 %v15065_v40, %v4677_v45  ;;  %12252 = vmatmul.msk.f32.gmra.mxu3 %vm1130_vm1, %v5820_v39 }
 0x443   : > { %v4709_v6 = vmax.f32 %v4693_v2, 0.0  ;;  %v4850_v50 = vpop.f32.mrf.mxu2 }
 0x444   : > { %v4921_v29 = vpop.f32.mrf.mxu3  ;;  %v4490_v41 = vpop.f32.mrf.mxu0 }
 0x445   : > { %4725 = vst.msk [vmem:[#allocation2 + $0x2a0] sm:$0xff] %vm1130_vm1, %v4709_v6  ;;  %v15299_v54 = vadd.f32 %v4921_v29, %v4844_v25  ;;  %v4528_v9 = vadd.f32 %v4490_v41, %v15037_v11  ;;  %v4646_v15 = vpop.f32.mrf.mxu1  ;;  %v15349_v41 = vld [vmem:[%s13026_s29 + $0x3d0] sm:$0xff] }
 0x447   : > { %v4678_v43 = vadd.f32 %v4640_v61, %v4528_v9  ;;  %12195 = vmatmul.msk.f32.gmra.mxu0 %vm451_vm0, %v15060_v16  ;;  %12218 = vmatmul.msk.f32.gmra.mxu1 %vm451_vm0, %v15178_v27 }
 0x448   : > { %12239 = vmatmul.msk.f32.gmra.mxu2 %vm451_vm0, %v15303_v30 }
 0x449   : > { %v4694_v7 = vadd.f32 %v15065_v40, %v4678_v43  ;;  %12253 = vmatmul.msk.f32.gmra.mxu3 %vm1130_vm1, %v5821_v58  ;;  %v5701_v58 = vld [vmem:[#allocation2 + $0x291] ss:$2 sm:$0xff] }
 0x44b   : > { %v4710_v11 = vmax.f32 %v4694_v7, 0.0  ;;  %v4853_v36 = vpop.f32.mrf.mxu2 }
 0x44c   : > { %v4924_v42 = vpop.f32.mrf.mxu3  ;;  %v4493_v0 = vpop.f32.mrf.mxu0 }
 0x44d   : > { %4726 = vst.msk [vmem:[#allocation2 + $0x2a8] sm:$0xff] %vm1130_vm1, %v4710_v11  ;;  %v15314_v18 = vadd.f32 %v4924_v42, %v4847_v8  ;;  %v4529_v16 = vadd.f32 %v4493_v0, %v15056_v59  ;;  %v4649_v53 = vpop.f32.mrf.mxu1  ;;  %v5695_v59 = vld [vmem:[#allocation2 + $0x280] ss:$2 sm:$0xff] }
 0x44e   : > { %v5702_v8 = vmax.f32 %v5695_v59, %v5699_v60 }
 0x44f   : > { %v4679_v55 = vadd.f32 %v4643_v21, %v4529_v16  ;;  %12196 = vmatmul.msk.f32.gmra.mxu0 %vm451_vm0, %v15082_v32  ;;  %12219 = vmatmul.msk.f32.gmra.mxu1 %vm451_vm0, %v15258_v1  ;;  %v5823_v21 = vld [vmem:[#allocation3 + $0x39] sm:$0xff] }
 0x450   : > { %12240 = vmatmul.msk.f32.gmra.mxu2 %vm451_vm0, %v15318_v20 }
 0x451   : > { %v4695_v5 = vadd.f32 %v15065_v40, %v4679_v55  ;;  %12254 = vmatmul.msk.f32.gmra.mxu3 %vm1130_vm1, %v5822_v14  ;;  %v15364_v14 = vld [vmem:[%s13026_s29 + $0x3d8] sm:$0xff] }
 0x453   : > { %v4711_v25 = vmax.f32 %v4695_v5, 0.0  ;;  %v4856_v44 = vpop.f32.mrf.mxu2 }
 0x454   : > { %v5705_v17 = vld [vmem:[#allocation2 + $0x2a0] ss:$2 sm:$0xff]  ;;  %v5709_v4 = vld [vmem:[#allocation2 + $0x2a1] ss:$2 sm:$0xff]  ;;  %v4927_v61 = vpop.f32.mrf.mxu3  ;;  %v4496_v32 = vpop.f32.mrf.mxu0 }
 0x455   : > { %4727 = vst.msk [vmem:[#allocation2 + $0x2b0] sm:$0xff] %vm1130_vm1, %v4711_v25  ;;  %v15329_v10 = vadd.f32 %v4927_v61, %v4850_v50  ;;  %v4530_v46 = vadd.f32 %v4496_v32, %v15078_v38  ;;  %v4652_v33 = vpop.f32.mrf.mxu1  ;;  %v5712_v47 = vmax.f32 %v5705_v17, %v5709_v4 }
 0x457   : > { %v4680_v48 = vadd.f32 %v4646_v15, %v4530_v46  ;;  %12197 = vmatmul.msk.f32.gmra.mxu0 %vm451_vm0, %v15101_v31  ;;  %12220 = vmatmul.msk.f32.gmra.mxu1 %vm451_vm0, %v15273_v23  ;;  %v5714_v63 = vmax.f32 %v5702_v8, %v5712_v47  ;;  %v5824_v15 = vld [vmem:[#allocation3 + $0x41] sm:$0xff] }
 0x458   : > { %12241 = vmatmul.msk.f32.gmra.mxu2 %vm451_vm0, %v15333_v52  ;;  %v5269_v8 = vld [vmem:[%s13026_s29 + $0x3e0] sm:$0xff] }
 0x459   : > { %v4696_v38 = vadd.f32 %v15065_v40, %v4680_v48  ;;  %12255 = vmatmul.msk.f32.gmra.mxu3 %vm1130_vm1, %v5823_v21  ;;  %5716 = vst.msk [vmem:[#allocation3 + $0xa0] sm:$0xff] %vm1130_vm1, %v5714_v63  ;;  %v5826_v48 = vld [vmem:[#allocation3 + $0x51] sm:$0xff] }
 0x45b   : > { %v4712_v45 = vmax.f32 %v4696_v38, 0.0  ;;  %v4859_v39 = vpop.f32.mrf.mxu2 }
 0x45c   : > { %v4930_v2 = vpop.f32.mrf.mxu3  ;;  %v4499_v6 = vpop.f32.mrf.mxu0 }
 0x45d   : > { %4728 = vst.msk [vmem:[#allocation2 + $0x2b8] sm:$0xff] %vm1130_vm1, %v4712_v45  ;;  %v15345_v31 = vadd.f32 %v4930_v2, %v4853_v36  ;;  %v4531_v50 = vadd.f32 %v4499_v6, %v15097_v51  ;;  %v4655_v29 = vpop.f32.mrf.mxu1  ;;  %v5697_v51 = vld [vmem:[#allocation2 + $0x290] ss:$2 sm:$0xff]  ;;  %v5270_v6 = vld [vmem:[%s13026_s29 + $0x3e8] sm:$0xff] }
 0x45e   : > { %v5703_v5 = vmax.f32 %v5697_v51, %v5701_v58 }
 0x45f   : > { %v4681_v9 = vadd.f32 %v4649_v53, %v4531_v50  ;;  %12198 = vmatmul.msk.f32.gmra.mxu0 %vm451_vm0, %v15121_v28  ;;  %12221 = vmatmul.msk.f32.gmra.mxu1 %vm451_vm0, %v15288_v56  ;;  %v5827_v50 = vld [vmem:[#allocation3 + $0x59] sm:$0xff] }
 0x460   : > { %12242 = vmatmul.msk.f32.gmra.mxu2 %vm451_vm0, %v15349_v41 }
 0x461   : > { %v4697_v43 = vadd.f32 %v15065_v40, %v4681_v9  ;;  %12256 = vmatmul.msk.f32.gmra.mxu3 %vm1130_vm1, %v5824_v15 }
 0x463   : > { %v4713_v7 = vmax.f32 %v4697_v43, 0.0  ;;  %v4862_v11 = vpop.f32.mrf.mxu2 }
 0x464   : > { %v5707_v36 = vld [vmem:[#allocation2 + $0x2b0] ss:$2 sm:$0xff]  ;;  %v5711_v42 = vld [vmem:[#allocation2 + $0x2b1] ss:$2 sm:$0xff]  ;;  %v4933_v0 = vpop.f32.mrf.mxu3  ;;  %v4502_v28 = vpop.f32.mrf.mxu0 }
 0x465   : > { %4729 = vst.msk [vmem:[#allocation2 + $0x2c0] sm:$0xff] %vm1130_vm1, %v4713_v7  ;;  %v15360_v16 = vadd.f32 %v4933_v0, %v4856_v44  ;;  %v4532_v53 = vadd.f32 %v4502_v28, %v15117_v49  ;;  %v4658_v55 = vpop.f32.mrf.mxu1  ;;  %v5713_v59 = vmax.f32 %v5707_v36, %v5711_v42  ;;  %v5825_v44 = vld [vmem:[#allocation3 + $0x49] sm:$0xff] }
 0x466   : > { %v5271_v7 = vld [vmem:[%s13026_s29 + $0x3f0] sm:$0xff] }
 0x467   : > { %v4682_v60 = vadd.f32 %v4652_v33, %v4532_v53  ;;  %12199 = vmatmul.msk.f32.gmra.mxu0 %vm451_vm0, %v15143_v24  ;;  %12222 = vmatmul.msk.f32.gmra.mxu1 %vm451_vm0, %v15303_v30  ;;  %v5715_v25 = vmax.f32 %v5703_v5, %v5713_v59  ;;  %v5272_v5 = vld [vmem:[%s13026_s29 + $0x3f8] sm:$0xff]  ;;  %v5829_v59 = vld [vmem:[#allocation3 + $0x69] sm:$0xff] }
 0x468   : > { %12243 = vmatmul.msk.f32.gmra.mxu2 %vm451_vm0, %v15364_v14 }
 0x469   : > { %v4698_v49 = vadd.f32 %v15065_v40, %v4682_v60  ;;  %12257 = vmatmul.msk.f32.gmra.mxu3 %vm1130_vm1, %v5825_v44  ;;  %5717 = vst.msk [vmem:[#allocation3 + $0xa8] sm:$0xff] %vm1130_vm1, %v5715_v25 }
 0x46b   : > { %v4714_v17 = vmax.f32 %v4698_v49, 0.0  ;;  %v4865_v4 = vpop.f32.mrf.mxu2 }
 0x46c   : > { %v4936_v61 = vpop.f32.mrf.mxu3  ;;  %v4505_v32 = vpop.f32.mrf.mxu0 }
 0x46d   : > { %4730 = vst.msk [vmem:[#allocation2 + $0x2c8] sm:$0xff] %vm1130_vm1, %v4714_v17  ;;  %v15376_v24 = vadd.f32 %v4936_v61, %v4859_v39  ;;  %v4533_v46 = vadd.f32 %v4505_v32, %v15139_v37  ;;  %v4661_v33 = vpop.f32.mrf.mxu1  ;;  %v6110_v61 = vld [vmem:[#allocation3 + $0x2] sm:$0xff] }
 0x46e   : > { %v6287_v32 = vld [vmem:[#allocation3 + $0x3] sm:$0xff] }
 0x46f   : > { %v4683_v47 = vadd.f32 %v4655_v29, %v4533_v46  ;;  %12200 = vmatmul.msk.f32.gmra.mxu0 %vm451_vm0, %v15159_v13  ;;  %12223 = vmatmul.msk.f32.gmra.mxu1 %vm451_vm0, %v15318_v20  ;;  %v5830_v46 = vld [vmem:[#allocation3 + $0x71] sm:$0xff] }
 0x470   : > { %12244 = vmatmul.msk.f32.gmra.mxu2 %vm451_vm0, %v5269_v8 }
 0x471   : > { %v4699_v63 = vadd.f32 %v15065_v40, %v4683_v47  ;;  %12258 = vmatmul.msk.f32.gmra.mxu3 %vm1130_vm1, %v5826_v48 }
 0x473   : > { %v4715_v21 = vmax.f32 %v4699_v63, 0.0  ;;  %v4868_v38 = vpop.f32.mrf.mxu2 }
 0x474   : > { %v4939_v37 = vpop.f32.mrf.mxu3  ;;  %v4508_v45 = vpop.f32.mrf.mxu0  ;;  %v5719_v8 = vld [vmem:[#allocation2 + $0x2c0] ss:$2 sm:$0xff]  ;;  %v5723_v47 = vld [vmem:[#allocation2 + $0x2c1] ss:$2 sm:$0xff] }
 0x475   : > { %4731 = vst.msk [vmem:[#allocation2 + $0x2d0] sm:$0xff] %vm1130_vm1, %v4715_v21  ;;  %v15388_v39 = vadd.f32 %v4939_v37, %v4862_v11  ;;  %v4534_v13 = vadd.f32 %v4508_v45, %v15155_v12  ;;  %v4664_v2 = vpop.f32.mrf.mxu1  ;;  %v5828_v11 = vld [vmem:[#allocation3 + $0x61] sm:$0xff] }
 0x477   : > { %v4684_v20 = vadd.f32 %v4658_v55, %v4534_v13  ;;  %12201 = vmatmul.msk.f32.gmra.mxu0 %vm451_vm0, %v15178_v27  ;;  %12224 = vmatmul.msk.f32.gmra.mxu1 %vm451_vm0, %v15333_v52 }
 0x478   : > { %12245 = vmatmul.msk.f32.gmra.mxu2 %vm451_vm0, %v5270_v6 }
 0x479   : > { %v4700_v29 = vadd.f32 %v15065_v40, %v4684_v20  ;;  %12259 = vmatmul.msk.f32.gmra.mxu3 %vm1130_vm1, %v5827_v50  ;;  %v6111_v20 = vld [vmem:[#allocation3 + $0xa] sm:$0xff] }
 0x47b   : > { %v4716_v9 = vmax.f32 %v4700_v29, 0.0  ;;  %v4871_v15 = vpop.f32.mrf.mxu2  ;;  %v6288_v29 = vld [vmem:[#allocation3 + $0xb] sm:$0xff] }
 0x47c   : > { %v4942_v12 = vpop.f32.mrf.mxu3  ;;  %v4511_v43 = vpop.f32.mrf.mxu0 }
 0x47d   : > { %4732 = vst.msk [vmem:[#allocation2 + $0x2d8] sm:$0xff] %vm1130_vm1, %v4716_v9  ;;  %v15400_v51 = vadd.f32 %v4942_v12, %v4865_v4  ;;  %v4535_v27 = vadd.f32 %v4511_v43, %v15174_v22  ;;  %v4667_v58 = vpop.f32.mrf.mxu1 }
 0x47f   : > { %v4685_v52 = vadd.f32 %v4661_v33, %v4535_v27  ;;  %12202 = vmatmul.msk.f32.gmra.mxu0 %vm451_vm0, %v15258_v1  ;;  %12225 = vmatmul.msk.f32.gmra.mxu1 %vm451_vm0, %v15349_v41 }
 0x480   : > { %12246 = vmatmul.msk.f32.gmra.mxu2 %vm451_vm0, %v5271_v7 }
 0x481   : > { %v4701_v36 = vadd.f32 %v15065_v40, %v4685_v52  ;;  %12260 = vmatmul.msk.f32.gmra.mxu3 %vm1130_vm1, %v5828_v11  ;;  %v5796_v11 = vld [vmem:[#allocation3] sm:$0xff] }
 0x483   : > { %v4717_v42 = vmax.f32 %v4701_v36, 0.0  ;;  %v4874_v0 = vpop.f32.mrf.mxu2  ;;  %v15448_v36 = vld [vmem:[#allocation3 + $0x12] sm:$0xff] }
 0x484   : > { %v4945_v22 = vpop.f32.mrf.mxu3  ;;  %v4514_v28 = vpop.f32.mrf.mxu0 }
 0x485   : > { %4733 = vst.msk [vmem:[#allocation2 + $0x2e0] sm:$0xff] %vm1130_vm1, %v4717_v42  ;;  %v15412_v53 = vadd.f32 %v4945_v22, %v4868_v38  ;;  %v4536_v1 = vadd.f32 %v4514_v28, %v15193_v19  ;;  %v4670_v55 = vpop.f32.mrf.mxu1  ;;  %v5832_v22 = vld [vmem:[#allocation3 + $0x81] sm:$0xff] }
 0x487   : > { %v4686_v41 = vadd.f32 %v4664_v2, %v4536_v1  ;;  %12203 = vmatmul.msk.f32.gmra.mxu0 %vm451_vm0, %v15273_v23  ;;  %12226 = vmatmul.msk.f32.gmra.mxu1 %vm451_vm0, %v15364_v14  ;;  %v5726_v2 = vmax.f32 %v5719_v8, %v5723_v47  ;;  %v5725_v1 = vld [vmem:[#allocation2 + $0x2d1] ss:$2 sm:$0xff]  ;;  %v12351_v8 = vld [vmem:[%s17768_s3 + $0x40] sm:$0xff] }
 0x488   : > { %12247 = vmatmul.msk.f32.gmra.mxu2 %vm451_vm0, %v5272_v5  ;;  %7273 = vmatpush.msrb.mxu3 %v12351_v8 }
 0x489   : > { %v4702_v60 = vadd.f32 %v15065_v40, %v4686_v41  ;;  %12261 = vmatmul.msk.f32.gmra.mxu3 %vm1130_vm1, %v5829_v59 }
 0x48b   : > { %v4718_v25 = vmax.f32 %v4702_v60, 0.0  ;;  %v4877_v44 = vpop.f32.mrf.mxu2 }
 0x48c   : > { %v4948_v49 = vpop.f32.mrf.mxu3  ;;  %v4517_v19 = vpop.f32.mrf.mxu0 }
 0x48d   : > { %4734 = vst.msk [vmem:[#allocation2 + $0x2e8] sm:$0xff] %vm1130_vm1, %v4718_v25  ;;  %v15424_v17 = vadd.f32 %v4948_v49, %v4871_v15  ;;  %v4537_v23 = vadd.f32 %v4517_v19, %v15206_v62  ;;  %v5193_v4 = vpop.f32.mrf.mxu1  ;;  %v5831_v15 = vld [vmem:[#allocation3 + $0x79] sm:$0xff] }
 0x48f   : > { %v4687_v14 = vadd.f32 %v4667_v58, %v4537_v23  ;;  %12204 = vmatmul.msk.f32.gmra.mxu0 %vm451_vm0, %v15288_v56  ;;  %12288 = vmatmul.msk.f32.vlgmr.msrb.gmra.mxu1 %vm1130_vm1, %v6110_v61  ;;  %v5797_v61 = vld [vmem:[#allocation3 + $0x8] sm:$0xff] }
 0x490   : > { %12308 = vmatmul.msk.f32.vlgmr.msrb.gmra.mxu2 %vm1130_vm1, %v6287_v32  ;;  %v15464_v32 = vld [vmem:[#allocation3 + $0x1b] sm:$0xff] }
 0x491   : > { %v4703_v33 = vadd.f32 %v15065_v40, %v4687_v14  ;;  %12262 = vmatmul.msk.f32.gmra.mxu3 %vm1130_vm1, %v5830_v46  ;;  %v15462_v14 = vld [vmem:[#allocation3 + $0x1a] sm:$0xff] }
 0x493   : > { %v4719_v48 = vmax.f32 %v4703_v33, 0.0  ;;  %v5343_v62 = vpop.f32.mrf.mxu2  ;;  %v12348_v33 = vld [vmem:[%s17768_s3 + $0x28] sm:$0xff] }
 0x494   : > { %v5729_v63 = vld [vmem:[#allocation2 + $0x2e0] ss:$2 sm:$0xff]  ;;  %v5733_v21 = vld [vmem:[#allocation2 + $0x2e1] ss:$2 sm:$0xff]  ;;  %v4951_v38 = vpop.f32.mrf.mxu3  ;;  %v4520_v37 = vpop.f32.mrf.mxu0  ;;  %6742 = vmatpush.msrb.mxu0 %v12348_v33 }
 0x495   : > { %4735 = vst.msk [vmem:[#allocation2 + $0x2f0] sm:$0xff] %vm1130_vm1, %v4719_v48  ;;  %v15434_v56 = vadd.f32 %v4951_v38, %v4874_v0  ;;  %v4538_v45 = vadd.f32 %v4520_v37, %v15220_v3  ;;  %v5196_v13 = vpop.f32.mrf.mxu1  ;;  %v5736_v6 = vmax.f32 %v5729_v63, %v5733_v21  ;;  %v15453_v0 = vld [vmem:[#allocation3 + $0x13] sm:$0xff]  ;;  %v5833_v48 = vld [vmem:[#allocation3 + $0x89] sm:$0xff] }
 0x497   : > { %v4688_v50 = vadd.f32 %v4670_v55, %v4538_v45  ;;  %12205 = vmatmul.msk.f32.gmra.mxu0 %vm451_vm0, %v15303_v30  ;;  %12289 = vmatmul.msk.f32.gmra.mxu1 %vm1130_vm1, %v6111_v20  ;;  %v5738_v9 = vmax.f32 %v5726_v2, %v5736_v6  ;;  %v15490_v20 = vld [vmem:[#allocation3 + $0x10] sm:$0xff] }
 0x498   : > { %12309 = vmatmul.msk.f32.gmra.mxu2 %vm1130_vm1, %v6288_v29 }
 0x499   : > { %v4704_v12 = vadd.f32 %v15065_v40, %v4688_v50  ;;  %12263 = vmatmul.msk.f32.gmra.mxu3 %vm1130_vm1, %v5831_v15  ;;  %5740 = vst.msk [vmem:[#allocation3 + $0xb0] sm:$0xff] %vm1130_vm1, %v5738_v9  ;;  %v15492_v50 = vld [vmem:[#allocation3 + $0x22] sm:$0xff]  ;;  %v15507_v15 = vld [vmem:[%s17767_s2] ss:$0 sm:$0xff] }
 0x49b   : > { %v4720_v3 = vmax.f32 %v4704_v12, 0.0  ;;  %v5346_v43 = vpop.f32.mrf.mxu2 }
 0x49c   : > { %v4954_v27 = vpop.f32.mrf.mxu3  ;;  %v5043_v58 = vpop.f32.mrf.mxu0 }
 0x49d   : > { %4736 = vst.msk [vmem:[#allocation2 + $0x2f8] sm:$0xff] %vm1130_vm1, %v4720_v3  ;;  %v15445_v30 = vadd.f32 %v4954_v27, %v4877_v44  ;;  %v5091_v7 = vadd.f32 %v5043_v58, %v15232_v57  ;;  %v5199_v52 = vpop.f32.mrf.mxu1  ;;  %v5721_v57 = vld [vmem:[#allocation2 + $0x2d0] ss:$2 sm:$0xff] }
 0x49e   : > { %v5727_v23 = vmax.f32 %v5721_v57, %v5725_v1 }
 0x49f   : > { %v5241_v42 = vadd.f32 %v5193_v4, %v5091_v7  ;;  %12268 = vmatmul.msk.f32.vlgmr.msra.gmra.mxu0 %vm1130_vm1, %v5796_v11  ;;  %12290 = vmatmul.msk.f32.gmra.mxu1 %vm1130_vm1, %v15448_v36  ;;  %v15513_v11 = vld [vmem:[#allocation3 + $0x18] sm:$0xff] }
 0x4a0   : > { %12310 = vmatmul.msk.f32.gmra.mxu2 %vm1130_vm1, %v15453_v0 }
 0x4a1   : > { %v5391_v28 = vadd.f32 %v5343_v62, %v5241_v42  ;;  %12264 = vmatmul.msk.f32.gmra.mxu3 %vm1130_vm1, %v5832_v22  ;;  %v12349_v62 = vld [vmem:[%s17768_s3 + $0x30] sm:$0xff] }
 0x4a2   : > { %6919 = vmatpush.msra.mxu1 %v12349_v62  ;;  %v15515_v42 = vld [vmem:[#allocation3 + $0x2a] sm:$0xff] }
 0x4a3   : > { %v5407_v55 = vadd.f32 %v15065_v40, %v5391_v28  ;;  %v5349_v5 = vpop.f32.mrf.mxu2  ;;  %v15522_v28 = vld [vmem:[#allocation3 + $0x2b] sm:$0xff] }
 0x4a4   : > { %v5731_v41 = vld [vmem:[#allocation2 + $0x2f0] ss:$2 sm:$0xff]  ;;  %v5735_v59 = vld [vmem:[#allocation2 + $0x2f1] ss:$2 sm:$0xff]  ;;  %v15459_v60 = vpop.f32.mrf.mxu3  ;;  %v5046_v25 = vpop.f32.mrf.mxu0 }
 0x4a5   : > { %v5423_v44 = vmax.f32 %v5407_v55, 0.0  ;;  %v5092_v49 = vadd.f32 %v5046_v25, %v15254_v35  ;;  %v5202_v19 = vpop.f32.mrf.mxu1  ;;  %v5737_v4 = vmax.f32 %v5731_v41, %v5735_v59  ;;  %v12350_v35 = vld [vmem:[%s17768_s3 + $0x38] sm:$0xff] }
 0x4a6   : > { %7096 = vmatpush.msra.mxu2 %v12350_v35 }
 0x4a7   : > { %5439 = vst.msk [vmem:[#allocation2 + $0x300] sm:$0xff] %vm1130_vm1, %v5423_v44  ;;  %v5242_v46 = vadd.f32 %v5196_v13, %v5092_v49  ;;  %12269 = vmatmul.msk.f32.gmra.mxu0 %vm1130_vm1, %v5797_v61  ;;  %12291 = vmatmul.msk.f32.gmra.mxu1 %vm1130_vm1, %v15462_v14  ;;  %v5739_v47 = vmax.f32 %v5727_v23, %v5737_v4  ;;  %v15531_v49 = vld [vmem:[#allocation3 + $0x20] sm:$0xff]  ;;  %v15540_v4 = vld [vmem:[#allocation3 + $0x33] sm:$0xff] }
 0x4a8   : > { %12311 = vmatmul.msk.f32.gmra.mxu2 %vm1130_vm1, %v15464_v32 }
 0x4a9   : > { %v5392_v63 = vadd.f32 %v5346_v43, %v5242_v46  ;;  %12265 = vmatmul.msk.f32.gmra.mxu3 %vm1130_vm1, %v5833_v48  ;;  %5741 = vst.msk [vmem:[#allocation3 + $0xb8] sm:$0xff] %vm1130_vm1, %v5739_v47 }
 0x4ab   : > { %v5408_v21 = vadd.f32 %v15065_v40, %v5392_v63  ;;  %v5352_v38 = vpop.f32.mrf.mxu2  ;;  %v15499_v40 = vld [vmem:[#allocation3 + $0x23] sm:$0xff] }
 0x4ac   : > { %v15487_v37 = vpop.f32.mrf.mxu3  ;;  %v5049_v45 = vpop.f32.mrf.mxu0  ;;  %v15549_v63 = vld [vmem:[#allocation3 + $0x28] sm:$0xff] }
 0x4ad   : > { %v5424_v13 = vmax.f32 %v5408_v21, 0.0  ;;  %v5093_v2 = vadd.f32 %v5049_v45, %v15269_v34  ;;  %v5205_v6 = vpop.f32.mrf.mxu1  ;;  %v5834_v34 = vld [vmem:[#allocation3 + $0x91] sm:$0xff]  ;;  %v15551_v21 = vld [vmem:[#allocation3 + $0x3a] sm:$0xff] }
 0x4ae   : > { %v15558_v45 = vld [vmem:[#allocation3 + $0x3b] sm:$0xff] }
 0x4af   : > { %5440 = vst.msk [vmem:[#allocation2 + $0x308] sm:$0xff] %vm1130_vm1, %v5424_v13  ;;  %v5243_v29 = vadd.f32 %v5199_v52, %v5093_v2  ;;  %12270 = vmatmul.msk.f32.gmra.mxu0 %vm1130_vm1, %v15490_v20  ;;  %12292 = vmatmul.msk.f32.gmra.mxu1 %vm1130_vm1, %v15492_v50 }
 0x4b0   : > { %12312 = vmatmul.msk.f32.gmra.mxu2 %vm1130_vm1, %v15499_v40 }
 0x4b1   : > { %v5393_v9 = vadd.f32 %v5349_v5, %v5243_v29  ;;  %12266 = vmatmul.msk.f32.gmra.mxu3 %vm1130_vm1, %v5834_v34 }
 0x4b3   : > { %v5409_v12 = vadd.f32 %v15507_v15, %v5393_v9  ;;  %v5355_v3 = vpop.f32.mrf.mxu2 }
 0x4b4   : > { %v15510_v43 = vpop.f32.mrf.mxu3  ;;  %v5052_v27 = vpop.f32.mrf.mxu0 }
 0x4b5   : > { %v5425_v58 = vmax.f32 %v5409_v12, 0.0  ;;  %v5094_v7 = vadd.f32 %v5052_v27, %v15284_v26  ;;  %v5208_v52 = vpop.f32.mrf.mxu1  ;;  %v5835_v26 = vld [vmem:[#allocation3 + $0x99] sm:$0xff]  ;;  %v15567_v27 = vld [vmem:[#allocation3 + $0x30] sm:$0xff] }
 0x4b7   : > { %5441 = vst.msk [vmem:[#allocation2 + $0x310] sm:$0xff] %vm1130_vm1, %v5425_v58  ;;  %v5244_v22 = vadd.f32 %v5202_v19, %v5094_v7  ;;  %12271 = vmatmul.msk.f32.gmra.mxu0 %vm1130_vm1, %v15513_v11  ;;  %12293 = vmatmul.msk.f32.gmra.mxu1 %vm1130_vm1, %v15515_v42  ;;  %v15533_v19 = vld [vmem:[#allocation3 + $0x32] sm:$0xff]  ;;  %v15569_v58 = vld [vmem:[#allocation3 + $0x42] sm:$0xff] }
 0x4b8   : > { %12313 = vmatmul.msk.f32.gmra.mxu2 %vm1130_vm1, %v15522_v28 }
 0x4b9   : > { %v5394_v57 = vadd.f32 %v5352_v38, %v5244_v22  ;;  %12267 = vmatmul.msk.f32.gmra.mxu3 %vm1130_vm1, %v5835_v26 }
 0x4bb   : > { %v5410_v1 = vadd.f32 %v15507_v15, %v5394_v57  ;;  %v5358_v55 = vpop.f32.mrf.mxu2 }
 0x4bc   : > { %v15528_v5 = vpop.f32.mrf.mxu3  ;;  %v5055_v41 = vpop.f32.mrf.mxu0 }
 0x4bd   : > { %v5426_v59 = vmax.f32 %v5410_v1, 0.0  ;;  %v5095_v25 = vadd.f32 %v5055_v41, %v15299_v54  ;;  %v5211_v44 = vpop.f32.mrf.mxu1  ;;  %v6464_v54 = vld [vmem:[#allocation3 + $0x4] sm:$0xff] }
 0x4be   : > { %v5743_v41 = vld [vmem:[#allocation2 + $0x300] ss:$2 sm:$0xff] }
 0x4bf   : > { %5442 = vst.msk [vmem:[#allocation2 + $0x318] sm:$0xff] %vm1130_vm1, %v5426_v59  ;;  %v5245_v23 = vadd.f32 %v5205_v6, %v5095_v25  ;;  %12272 = vmatmul.msk.f32.gmra.mxu0 %vm1130_vm1, %v15531_v49  ;;  %12294 = vmatmul.msk.f32.gmra.mxu1 %vm1130_vm1, %v15533_v19  ;;  %v5747_v59 = vld [vmem:[#allocation2 + $0x301] ss:$2 sm:$0xff] }
 0x4c0   : > { %12314 = vmatmul.msk.f32.gmra.mxu2 %vm1130_vm1, %v15540_v4 }
 0x4c1   : > { %v5395_v61 = vadd.f32 %v5355_v3, %v5245_v23  ;;  %12328 = vmatmul.msk.f32.vlgmr.msra.gmra.mxu3 %vm1130_vm1, %v6464_v54  ;;  %v15585_v54 = vld [vmem:[#allocation3 + $0x38] sm:$0xff] }
 0x4c3   : > { %v5411_v46 = vadd.f32 %v15507_v15, %v5395_v61  ;;  %v5361_v35 = vpop.f32.mrf.mxu2  ;;  %v15587_v61 = vld [vmem:[#allocation3 + $0x4a] sm:$0xff] }
 0x4c4   : > { %v15546_v33 = vpop.f32.mrf.mxu3  ;;  %v5058_v8 = vpop.f32.mrf.mxu0 }
 0x4c5   : > { %v5427_v47 = vmax.f32 %v5411_v46, 0.0  ;;  %v5096_v48 = vadd.f32 %v5058_v8, %v15314_v18  ;;  %v5214_v62 = vpop.f32.mrf.mxu1  ;;  %v6465_v18 = vld [vmem:[#allocation3 + $0xc] sm:$0xff] }
 0x4c7   : > { %5443 = vst.msk [vmem:[#allocation2 + $0x320] sm:$0xff] %vm1130_vm1, %v5427_v47  ;;  %v5246_v38 = vadd.f32 %v5208_v52, %v5096_v48  ;;  %12273 = vmatmul.msk.f32.gmra.mxu0 %vm1130_vm1, %v15549_v63  ;;  %12295 = vmatmul.msk.f32.gmra.mxu1 %vm1130_vm1, %v15551_v21  ;;  %v15576_v52 = vld [vmem:[#allocation3 + $0x43] sm:$0xff]  ;;  %v15594_v47 = vld [vmem:[#allocation3 + $0x4b] sm:$0xff]  ;;  %v5750_v48 = vmax.f32 %v5743_v41, %v5747_v59 }
 0x4c8   : > { %12315 = vmatmul.msk.f32.gmra.mxu2 %vm1130_vm1, %v15558_v45  ;;  %17814 = vst [vmem:[#allocation6_spill] sm:$0xff] %v15576_v52 }
 0x4c9   : > { %v5396_v13 = vadd.f32 %v5358_v55, %v5246_v38  ;;  %12329 = vmatmul.msk.f32.gmra.mxu3 %vm1130_vm1, %v6465_v18  ;;  %17815 = vst [vmem:[#allocation7_spill] sm:$0xff] %v15594_v47  ;;  %v6467_v38 = vld [vmem:[#allocation3 + $0x1c] sm:$0xff] }
 0x4cb   : > { %v5412_v2 = vadd.f32 %v15507_v15, %v5396_v13  ;;  %v5364_v6 = vpop.f32.mrf.mxu2 }
 0x4cc   : > { %v15564_v29 = vpop.f32.mrf.mxu3  ;;  %v5061_v34 = vpop.f32.mrf.mxu0 }
 0x4cd   : > { %v5428_v9 = vmax.f32 %v5412_v2, 0.0  ;;  %v5097_v12 = vadd.f32 %v5061_v34, %v15329_v10  ;;  %v5217_v3 = vpop.f32.mrf.mxu1  ;;  %v6466_v10 = vld [vmem:[#allocation3 + $0x14] sm:$0xff] }
 0x4cf   : > { %5444 = vst.msk [vmem:[#allocation2 + $0x328] sm:$0xff] %vm1130_vm1, %v5428_v9  ;;  %v5247_v7 = vadd.f32 %v5211_v44, %v5097_v12  ;;  %12274 = vmatmul.msk.f32.gmra.mxu0 %vm1130_vm1, %v15567_v27  ;;  %12296 = vmatmul.msk.f32.gmra.mxu1 %vm1130_vm1, %v15569_v58 }
 0x4d0   : > { %12316 = vmatmul.msk.f32.gmra.mxu2 %vm1130_vm1, %v15576_v52  ;;  %v15733_v52 = vld [vmem:[#allocation3 + $0x78] sm:$0xff] }
 0x4d1   : > { %v5397_v22 = vadd.f32 %v5361_v35, %v5247_v7  ;;  %12330 = vmatmul.msk.f32.gmra.mxu3 %vm1130_vm1, %v6466_v10  ;;  %17829 = vst [vmem:[#allocation21_spill] sm:$0xff] %v15733_v52 }
 0x4d3   : > { %v5413_v26 = vadd.f32 %v15507_v15, %v5397_v22  ;;  %v5367_v57 = vpop.f32.mrf.mxu2  ;;  %v15604_v22 = vld [vmem:[#allocation3 + $0x40] sm:$0xff] }
 0x4d4   : > { %v15582_v1 = vpop.f32.mrf.mxu3  ;;  %v5064_v55 = vpop.f32.mrf.mxu0 }
 0x4d5   : > { %v5429_v25 = vmax.f32 %v5413_v26, 0.0  ;;  %v5098_v44 = vadd.f32 %v5064_v55, %v15345_v31  ;;  %v5220_v23 = vpop.f32.mrf.mxu1  ;;  %v15606_v26 = vld [vmem:[#allocation3 + $0x52] sm:$0xff] }
 0x4d6   : > { %v5753_v46 = vld [vmem:[#allocation2 + $0x320] ss:$2 sm:$0xff]  ;;  %v5757_v35 = vld [vmem:[#allocation2 + $0x321] ss:$2 sm:$0xff]  ;;  %v15613_v55 = vld [vmem:[#allocation3 + $0x53] sm:$0xff] }
 0x4d7   : > { %5445 = vst.msk [vmem:[#allocation2 + $0x330] sm:$0xff] %vm1130_vm1, %v5429_v25  ;;  %v5248_v8 = vadd.f32 %v5214_v62, %v5098_v44  ;;  %12275 = vmatmul.msk.f32.gmra.mxu0 %vm1130_vm1, %v15585_v54  ;;  %12297 = vmatmul.msk.f32.gmra.mxu1 %vm1130_vm1, %v15587_v61  ;;  %v5760_v31 = vmax.f32 %v5753_v46, %v5757_v35  ;;  %v5745_v46 = vld [vmem:[#allocation2 + $0x310] ss:$2 sm:$0xff]  ;;  %v5749_v35 = vld [vmem:[#allocation2 + $0x311] ss:$2 sm:$0xff] }
 0x4d8   : > { %12317 = vmatmul.msk.f32.gmra.mxu2 %vm1130_vm1, %v15594_v47  ;;  %17816 = vst [vmem:[#allocation8_spill] sm:$0xff] %v15613_v55  ;;  %v15697_v47 = vld [vmem:[#allocation3 + $0x7a] sm:$0xff] }
 0x4d9   : > { %v5398_v18 = vadd.f32 %v5364_v6, %v5248_v8  ;;  %12331 = vmatmul.msk.f32.gmra.mxu3 %vm1130_vm1, %v6467_v38  ;;  %v5762_v13 = vmax.f32 %v5750_v48, %v5760_v31  ;;  %v15622_v38 = vld [vmem:[#allocation3 + $0x48] sm:$0xff]  ;;  %17824 = vst [vmem:[#allocation16_spill] sm:$0xff] %v15697_v47 }
 0x4db   : > { %v5414_v62 = vadd.f32 %v15507_v15, %v5398_v18  ;;  %v5370_v2 = vpop.f32.mrf.mxu2  ;;  %5764 = vst.msk [vmem:[#allocation3 + $0xc0] sm:$0xff] %vm1130_vm1, %v5762_v13  ;;  %v15624_v18 = vld [vmem:[#allocation3 + $0x5a] sm:$0xff] }
 0x4dc   : > { %v15601_v34 = vpop.f32.mrf.mxu3  ;;  %v5067_v9 = vpop.f32.mrf.mxu0 }
 0x4dd   : > { %v5430_v12 = vmax.f32 %v5414_v62, 0.0  ;;  %v5099_v7 = vadd.f32 %v5067_v9, %v15360_v16  ;;  %v5223_v10 = vpop.f32.mrf.mxu1  ;;  %v6468_v16 = vld [vmem:[#allocation3 + $0x24] sm:$0xff]  ;;  %v15631_v9 = vld [vmem:[#allocation3 + $0x5b] sm:$0xff] }
 0x4de   : > { %17817 = vst [vmem:[#allocation9_spill] sm:$0xff] %v15631_v9 }
 0x4df   : > { %5446 = vst.msk [vmem:[#allocation2 + $0x338] sm:$0xff] %vm1130_vm1, %v5430_v12  ;;  %v5249_v6 = vadd.f32 %v5217_v3, %v5099_v7  ;;  %12276 = vmatmul.msk.f32.gmra.mxu0 %vm1130_vm1, %v15604_v22  ;;  %12298 = vmatmul.msk.f32.gmra.mxu1 %vm1130_vm1, %v15606_v26  ;;  %v5751_v12 = vmax.f32 %v5745_v46, %v5749_v35  ;;  %v6469_v7 = vld [vmem:[#allocation3 + $0x2c] sm:$0xff] }
 0x4e0   : > { %12318 = vmatmul.msk.f32.gmra.mxu2 %vm1130_vm1, %v15613_v55  ;;  %v15695_v55 = vld [vmem:[#allocation3 + $0x68] sm:$0xff] }
 0x4e1   : > { %v5399_v41 = vadd.f32 %v5367_v57, %v5249_v6  ;;  %12332 = vmatmul.msk.f32.gmra.mxu3 %vm1130_vm1, %v6468_v16  ;;  %17823 = vst [vmem:[#allocation15_spill] sm:$0xff] %v15695_v55 }
 0x4e3   : > { %v5415_v59 = vadd.f32 %v15507_v15, %v5399_v41  ;;  %v5373_v25 = vpop.f32.mrf.mxu2 }
 0x4e4   : > { %v15619_v44 = vpop.f32.mrf.mxu3  ;;  %v5070_v3 = vpop.f32.mrf.mxu0 }
 0x4e5   : > { %v5431_v8 = vmax.f32 %v5415_v59, 0.0  ;;  %v5100_v48 = vadd.f32 %v5070_v3, %v15376_v24  ;;  %v5226_v31 = vpop.f32.mrf.mxu1 }
 0x4e6   : > { %v5755_v13 = vld [vmem:[#allocation2 + $0x330] ss:$2 sm:$0xff]  ;;  %v5759_v57 = vld [vmem:[#allocation2 + $0x331] ss:$2 sm:$0xff] }
 0x4e7   : > { %5447 = vst.msk [vmem:[#allocation2 + $0x340] sm:$0xff] %vm1130_vm1, %v5431_v8  ;;  %v5250_v62 = vadd.f32 %v5220_v23, %v5100_v48  ;;  %12277 = vmatmul.msk.f32.gmra.mxu0 %vm1130_vm1, %v15622_v38  ;;  %12299 = vmatmul.msk.f32.gmra.mxu1 %vm1130_vm1, %v15624_v18  ;;  %v5761_v24 = vmax.f32 %v5755_v13, %v5759_v57  ;;  %v15641_v48 = vld [vmem:[#allocation3 + $0x50] sm:$0xff]  ;;  %v15643_v13 = vld [vmem:[#allocation3 + $0x62] sm:$0xff] }
 0x4e8   : > { %12319 = vmatmul.msk.f32.gmra.mxu2 %vm1130_vm1, %v15631_v9  ;;  %v15650_v57 = vld [vmem:[#allocation3 + $0x63] sm:$0xff]  ;;  %v15679_v9 = vld [vmem:[#allocation3 + $0x72] sm:$0xff] }
 0x4e9   : > { %v5400_v6 = vadd.f32 %v5370_v2, %v5250_v62  ;;  %12333 = vmatmul.msk.f32.gmra.mxu3 %vm1130_vm1, %v6469_v7  ;;  %v5763_v16 = vmax.f32 %v5751_v12, %v5761_v24  ;;  %17818 = vst [vmem:[#allocation10_spill] sm:$0xff] %v15650_v57 }
 0x4ea   : > { %17821 = vst [vmem:[#allocation13_spill] sm:$0xff] %v15679_v9 }
 0x4eb   : > { %v5416_v23 = vadd.f32 %v15507_v15, %v5400_v6  ;;  %v5376_v41 = vpop.f32.mrf.mxu2  ;;  %5765 = vst.msk [vmem:[#allocation3 + $0xc8] sm:$0xff] %vm1130_vm1, %v5763_v16 }
 0x4ec   : > { %v15638_v59 = vpop.f32.mrf.mxu3  ;;  %v5073_v3 = vpop.f32.mrf.mxu0 }
 0x4ed   : > { %v5432_v8 = vmax.f32 %v5416_v23, 0.0  ;;  %v5101_v46 = vadd.f32 %v5073_v3, %v15388_v39  ;;  %v5229_v35 = vpop.f32.mrf.mxu1  ;;  %v6470_v39 = vld [vmem:[#allocation3 + $0x34] sm:$0xff] }
 0x4ee   : > { %v15659_v3 = vld [vmem:[#allocation3 + $0x58] sm:$0xff] }
 0x4ef   : > { %5448 = vst.msk [vmem:[#allocation2 + $0x348] sm:$0xff] %vm1130_vm1, %v5432_v8  ;;  %v5251_v2 = vadd.f32 %v5223_v10, %v5101_v46  ;;  %12278 = vmatmul.msk.f32.gmra.mxu0 %vm1130_vm1, %v15641_v48  ;;  %12300 = vmatmul.msk.f32.gmra.mxu1 %vm1130_vm1, %v15643_v13  ;;  %v15661_v8 = vld [vmem:[#allocation3 + $0x6a] sm:$0xff] }
 0x4f0   : > { %12320 = vmatmul.msk.f32.gmra.mxu2 %vm1130_vm1, %v15650_v57  ;;  %v15677_v57 = vld [vmem:[#allocation3 + $0x60] sm:$0xff] }
 0x4f1   : > { %v5401_v62 = vadd.f32 %v5373_v25, %v5251_v2  ;;  %12334 = vmatmul.msk.f32.gmra.mxu3 %vm1130_vm1, %v6470_v39  ;;  %v15668_v25 = vld [vmem:[#allocation3 + $0x6b] sm:$0xff]  ;;  %17820 = vst [vmem:[#allocation12_spill] sm:$0xff] %v15677_v57 }
 0x4f2   : > { %17819 = vst [vmem:[#allocation11_spill] sm:$0xff] %v15668_v25 }
 0x4f3   : > { %v5417_v12 = vadd.f32 %v15507_v15, %v5401_v62  ;;  %v5379_v24 = vpop.f32.mrf.mxu2 }
 0x4f4   : > { %v15656_v7 = vpop.f32.mrf.mxu3  ;;  %v5076_v10 = vpop.f32.mrf.mxu0 }
 0x4f5   : > { %v5433_v6 = vmax.f32 %v5417_v12, 0.0  ;;  %v5102_v16 = vadd.f32 %v5076_v10, %v15400_v51  ;;  %v5232_v23 = vpop.f32.mrf.mxu1  ;;  %v6471_v51 = vld [vmem:[#allocation3 + $0x3c] sm:$0xff] }
 0x4f7   : > { %5449 = vst.msk [vmem:[#allocation2 + $0x350] sm:$0xff] %vm1130_vm1, %v5433_v6  ;;  %v5252_v46 = vadd.f32 %v5226_v31, %v5102_v16  ;;  %12279 = vmatmul.msk.f32.gmra.mxu0 %vm1130_vm1, %v15659_v3  ;;  %12301 = vmatmul.msk.f32.gmra.mxu1 %vm1130_vm1, %v15661_v8 }
 0x4f8   : > { %12321 = vmatmul.msk.f32.gmra.mxu2 %vm1130_vm1, %v15668_v25 }
 0x4f9   : > { %v5402_v2 = vadd.f32 %v5376_v41, %v5252_v46  ;;  %12335 = vmatmul.msk.f32.gmra.mxu3 %vm1130_vm1, %v6471_v51  ;;  %v15686_v41 = vld [vmem:[#allocation3 + $0x73] sm:$0xff] }
 0x4fa   : > { %17822 = vst [vmem:[#allocation14_spill] sm:$0xff] %v15686_v41 }
 0x4fb   : > { %v5418_v39 = vadd.f32 %v15507_v15, %v5402_v2  ;;  %v5382_v62 = vpop.f32.mrf.mxu2 }
 0x4fc   : > { %v15674_v12 = vpop.f32.mrf.mxu3  ;;  %v5079_v31 = vpop.f32.mrf.mxu0 }
 0x4fd   : > { %v5434_v10 = vmax.f32 %v5418_v39, 0.0  ;;  %v5103_v6 = vadd.f32 %v5079_v31, %v15412_v53  ;;  %v5235_v16 = vpop.f32.mrf.mxu1  ;;  %v6472_v53 = vld [vmem:[#allocation3 + $0x44] sm:$0xff] }
 0x4ff   : > { %5450 = vst.msk [vmem:[#allocation2 + $0x358] sm:$0xff] %vm1130_vm1, %v5434_v10  ;;  %v5253_v25 = vadd.f32 %v5229_v35, %v5103_v6  ;;  %12280 = vmatmul.msk.f32.gmra.mxu0 %vm1130_vm1, %v15677_v57  ;;  %12302 = vmatmul.msk.f32.gmra.mxu1 %vm1130_vm1, %v15679_v9 }
 0x500   : > { %12322 = vmatmul.msk.f32.gmra.mxu2 %vm1130_vm1, %v15686_v41 }
 0x501   : > { %v5403_v46 = vadd.f32 %v5379_v24, %v5253_v25  ;;  %12336 = vmatmul.msk.f32.gmra.mxu3 %vm1130_vm1, %v6472_v53  ;;  %v15704_v24 = vld [vmem:[#allocation3 + $0x7b] sm:$0xff] }
 0x502   : > { %17825 = vst [vmem:[#allocation17_spill] sm:$0xff] %v15704_v24 }
 0x503   : > { %v5419_v51 = vadd.f32 %v15507_v15, %v5403_v46  ;;  %v5385_v2 = vpop.f32.mrf.mxu2 }
 0x504   : > { %v15692_v39 = vpop.f32.mrf.mxu3  ;;  %v5082_v35 = vpop.f32.mrf.mxu0 }
 0x505   : > { %v5435_v31 = vmax.f32 %v5419_v51, 0.0  ;;  %v5104_v10 = vadd.f32 %v5082_v35, %v15424_v17  ;;  %v5238_v6 = vpop.f32.mrf.mxu1  ;;  %v6473_v17 = vld [vmem:[#allocation3 + $0x4c] sm:$0xff] }
 0x507   : > { %5451 = vst.msk [vmem:[#allocation2 + $0x360] sm:$0xff] %vm1130_vm1, %v5435_v31  ;;  %v5254_v41 = vadd.f32 %v5232_v23, %v5104_v10  ;;  %12281 = vmatmul.msk.f32.gmra.mxu0 %vm1130_vm1, %v15695_v55  ;;  %12303 = vmatmul.msk.f32.gmra.mxu1 %vm1130_vm1, %v15697_v47  ;;  %v15713_v47 = vld [vmem:[#allocation3 + $0x70] sm:$0xff]  ;;  %v15715_v55 = vld [vmem:[#allocation3 + $0x82] sm:$0xff] }
 0x508   : > { %12323 = vmatmul.msk.f32.gmra.mxu2 %vm1130_vm1, %v15704_v24  ;;  %17826 = vst [vmem:[#allocation18_spill] sm:$0xff] %v15713_v47 }
 0x509   : > { %v5404_v25 = vadd.f32 %v5382_v62, %v5254_v41  ;;  %12337 = vmatmul.msk.f32.gmra.mxu3 %vm1130_vm1, %v6473_v17  ;;  %17827 = vst [vmem:[#allocation19_spill] sm:$0xff] %v15715_v55  ;;  %v15722_v62 = vld [vmem:[#allocation3 + $0x83] sm:$0xff]  ;;  %v17790_v17 = vmov 0.0  }
 0x50a   : > { %17828 = vst [vmem:[#allocation20_spill] sm:$0xff] %v15722_v62 }
 0x50b   : > { %v5420_v53 = vadd.f32 %v15507_v15, %v5404_v25  ;;  %v5388_v46 = vpop.f32.mrf.mxu2  ;;  %5790 = vst.msk [vmem:[#allocation3 + $0xe0] sm:$0xff] %vm1130_vm1, %v17790_v17 }
 0x50c   : > { %v15710_v51 = vpop.f32.mrf.mxu3  ;;  %v5085_v23 = vpop.f32.mrf.mxu0 }
 0x50d   : > { %v5436_v35 = vmax.f32 %v5420_v53, 0.0  ;;  %v5105_v31 = vadd.f32 %v5085_v23, %v15434_v56  ;;  %v6207_v10 = vpop.f32.mrf.mxu1  ;;  %v6474_v56 = vld [vmem:[#allocation3 + $0x54] sm:$0xff] }
 0x50f   : > { %5452 = vst.msk [vmem:[#allocation2 + $0x368] sm:$0xff] %vm1130_vm1, %v5436_v35  ;;  %v5255_v24 = vadd.f32 %v5235_v16, %v5105_v31  ;;  %12282 = vmatmul.msk.f32.gmra.mxu0 %vm1130_vm1, %v15713_v47  ;;  %12304 = vmatmul.msk.f32.gmra.mxu1 %vm1130_vm1, %v15715_v55  ;;  %v5767_v35 = vld [vmem:[#allocation2 + $0x340] ss:$2 sm:$0xff]  ;;  %v5771_v31 = vld [vmem:[#allocation2 + $0x341] ss:$2 sm:$0xff] }
 0x510   : > { %12324 = vmatmul.msk.f32.gmra.mxu2 %vm1130_vm1, %v15722_v62 }
 0x511   : > { %v5405_v41 = vadd.f32 %v5385_v2, %v5255_v24  ;;  %12338 = vmatmul.msk.f32.gmra.mxu3 %vm1130_vm1, %v6474_v56  ;;  %v15735_v2 = vld [vmem:[#allocation3 + $0x8a] sm:$0xff] }
 0x512   : > { %17830 = vst [vmem:[#allocation22_spill] sm:$0xff] %v15735_v2 }
 0x513   : > { %v5421_v16 = vadd.f32 %v15507_v15, %v5405_v41  ;;  %v6384_v25 = vpop.f32.mrf.mxu2  ;;  %v15742_v41 = vld [vmem:[#allocation3 + $0x8b] sm:$0xff] }
 0x514   : > { %v15730_v53 = vpop.f32.mrf.mxu3  ;;  %v5088_v23 = vpop.f32.mrf.mxu0  ;;  %17831 = vst [vmem:[#allocation23_spill] sm:$0xff] %v15742_v41 }
 0x515   : > { %v5437_v55 = vmax.f32 %v5421_v16, 0.0  ;;  %v5106_v47 = vadd.f32 %v5088_v23, %v15445_v30  ;;  %v6210_v62 = vpop.f32.mrf.mxu1  ;;  %v5774_v16 = vmax.f32 %v5767_v35, %v5771_v31  ;;  %v6475_v23 = vld [vmem:[#allocation3 + $0x5c] sm:$0xff] }
 0x516   : > { %v5777_v24 = vld [vmem:[#allocation2 + $0x360] ss:$2 sm:$0xff]  ;;  %v5781_v56 = vld [vmem:[#allocation2 + $0x361] ss:$2 sm:$0xff] }
 0x517   : > { %5453 = vst.msk [vmem:[#allocation2 + $0x370] sm:$0xff] %vm1130_vm1, %v5437_v55  ;;  %v5256_v17 = vadd.f32 %v5238_v6, %v5106_v47  ;;  %12283 = vmatmul.msk.f32.gmra.mxu0 %vm1130_vm1, %v15733_v52  ;;  %12305 = vmatmul.msk.f32.gmra.mxu1 %vm1130_vm1, %v15735_v2  ;;  %v5784_v30 = vmax.f32 %v5777_v24, %v5781_v56  ;;  %v15752_v24 = vld [vmem:[#allocation3 + $0x80] sm:$0xff]  ;;  %v15754_v56 = vld [vmem:[#allocation3 + $0x92] sm:$0xff] }
 0x518   : > { %12325 = vmatmul.msk.f32.gmra.mxu2 %vm1130_vm1, %v15742_v41  ;;  %17832 = vst [vmem:[#allocation24_spill] sm:$0xff] %v15752_v24 }
 0x519   : > { %v5406_v9 = vadd.f32 %v5388_v46, %v5256_v17  ;;  %12339 = vmatmul.msk.f32.gmra.mxu3 %vm1130_vm1, %v6475_v23  ;;  %v5786_v57 = vmax.f32 %v5774_v16, %v5784_v30  ;;  %17833 = vst [vmem:[#allocation25_spill] sm:$0xff] %v15754_v56  ;;  %v15771_v23 = vld [vmem:[#allocation3 + $0x88] sm:$0xff] }
 0x51a   : > { %17835 = vst [vmem:[#allocation27_spill] sm:$0xff] %v15771_v23 }
 0x51b   : > { %v5422_v47 = vadd.f32 %v15507_v15, %v5406_v9  ;;  %v6387_v55 = vpop.f32.mrf.mxu2  ;;  %5788 = vst.msk [vmem:[#allocation3 + $0xd0] sm:$0xff] %vm1130_vm1, %v5786_v57  ;;  %v15761_v15 = vld [vmem:[#allocation3 + $0x93] sm:$0xff] }
 0x51c   : > { %v15749_v6 = vpop.f32.mrf.mxu3  ;;  %v6050_v2 = vpop.f32.mrf.mxu0  ;;  %17834 = vst [vmem:[#allocation26_spill] sm:$0xff] %v15761_v15 }
 0x51d   : > { %v5438_v52 = vmax.f32 %v5422_v47, 0.0  ;;  %v6051_v35 = vadd.f32 %v6050_v2, %v15459_v60  ;;  %v6213_v31 = vpop.f32.mrf.mxu1  ;;  %v6476_v60 = vld [vmem:[#allocation3 + $0x64] sm:$0xff]  ;;  %v5773_v2 = vld [vmem:[#allocation2 + $0x351] ss:$2 sm:$0xff] }
 0x51e   : > { %v15773_v47 = vld [vmem:[#allocation3 + $0x9a] sm:$0xff] }
 0x51f   : > { %5454 = vst.msk [vmem:[#allocation2 + $0x378] sm:$0xff] %vm1130_vm1, %v5438_v52  ;;  %v6267_v46 = vadd.f32 %v6207_v10, %v6051_v35  ;;  %12284 = vmatmul.msk.f32.gmra.mxu0 %vm1130_vm1, %v15752_v24  ;;  %12306 = vmatmul.msk.f32.gmra.mxu1 %vm1130_vm1, %v15754_v56  ;;  %v5769_v10 = vld [vmem:[#allocation2 + $0x350] ss:$2 sm:$0xff] }
 0x520   : > { %12326 = vmatmul.msk.f32.gmra.mxu2 %vm1130_vm1, %v15761_v15  ;;  %17836 = vst [vmem:[#allocation28_spill] sm:$0xff] %v15773_v47 }
 0x521   : > { %12340 = vmatmul.msk.f32.gmra.mxu3 %vm1130_vm1, %v6476_v60  ;;  %v15766_v9 = vadd.f32 %v6384_v25, %v6267_v46  ;;  %v15779_v25 = vld [vmem:[#allocation3 + $0x9b] sm:$0xff]  ;;  %v5775_v46 = vmax.f32 %v5769_v10, %v5773_v2  ;;  %v15790_v10 = vld [vmem:[#allocation3 + $0x90] sm:$0xff] }
 0x523   : > { %v6390_v57 = vpop.f32.mrf.mxu2 }
 0x524   : > { %v15768_v17 = vpop.f32.mrf.mxu3  ;;  %v6053_v52 = vpop.f32.mrf.mxu0 }
 0x525   : > { %v6054_v16 = vadd.f32 %v6053_v52, %v15487_v37  ;;  %v6216_v30 = vpop.f32.mrf.mxu1  ;;  %v6477_v37 = vld [vmem:[#allocation3 + $0x6c] sm:$0xff] }
 0x526   : > { %v5779_v35 = vld [vmem:[#allocation2 + $0x370] ss:$2 sm:$0xff]  ;;  %v5783_v15 = vld [vmem:[#allocation2 + $0x371] ss:$2 sm:$0xff] }
 0x527   : > { %v6268_v41 = vadd.f32 %v6210_v62, %v6054_v16  ;;  %12285 = vmatmul.msk.f32.gmra.mxu0 %vm1130_vm1, %v15771_v23  ;;  %12307 = vmatmul.msk.f32.gmra.mxu1 %vm1130_vm1, %v15773_v47  ;;  %v5785_v60 = vmax.f32 %v5779_v35, %v5783_v15  ;;  %v6824_v15 = vld [vmem:[#allocation3 + $0x11] sm:$0xff] }
 0x528   : > { %12327 = vmatmul.msk.f32.gmra.mxu2 %vm1130_vm1, %v15779_v25 }
 0x529   : > { %12341 = vmatmul.msk.f32.gmra.mxu3 %vm1130_vm1, %v6477_v37  ;;  %v15784_v52 = vadd.f32 %v6387_v55, %v6268_v41  ;;  %v5787_v56 = vmax.f32 %v5775_v46, %v5785_v60  ;;  %v6478_v41 = vld [vmem:[#allocation3 + $0x74] sm:$0xff] }
 0x52a   : > { %v6825_v46 = vld [vmem:[#allocation3 + $0x19] sm:$0xff] }
 0x52b   : > { %v6393_v62 = vpop.f32.mrf.mxu2  ;;  %5789 = vst.msk [vmem:[#allocation3 + $0xd8] sm:$0xff] %vm1130_vm1, %v5787_v56 }
 0x52c   : > { %v15787_v16 = vpop.f32.mrf.mxu3  ;;  %v6056_v23 = vpop.f32.mrf.mxu0 }
 0x52d   : > { %v6057_v47 = vadd.f32 %v6056_v23, %v15510_v43  ;;  %v6219_v24 = vpop.f32.mrf.mxu1 }
 0x52f   : > { %v6269_v2 = vadd.f32 %v6213_v31, %v6057_v47  ;;  %12286 = vmatmul.msk.f32.gmra.mxu0 %vm1130_vm1, %v15790_v10  ;;  %12373 = vmatmul.msk.f32.vlgmr.msra.gmra.mxu1 %vm1130_vm1, %v6824_v15  ;;  %v15803_v47 = vld [vmem:[#allocation3 + $0x98] sm:$0xff] }
 0x530   : > { %12393 = vmatmul.msk.f32.vlgmr.msra.gmra.mxu2 %vm1130_vm1, %v15448_v36  ;;  %v6479_v36 = vld [vmem:[#allocation3 + $0x7c] sm:$0xff] }
 0x531   : > { %12342 = vmatmul.msk.f32.gmra.mxu3 %vm1130_vm1, %v6478_v41  ;;  %v15798_v55 = vadd.f32 %v6390_v57, %v6269_v2  ;;  %v15816_v41 = vld [vmem:[#allocation3 + $0x21] sm:$0xff] }
 0x533   : > { %v6396_v56 = vpop.f32.mrf.mxu2 }
 0x534   : > { %v15800_v43 = vpop.f32.mrf.mxu3  ;;  %v6059_v23 = vpop.f32.mrf.mxu0 }
 0x535   : > { %v6060_v35 = vadd.f32 %v6059_v23, %v15528_v5  ;;  %v6222_v31 = vpop.f32.mrf.mxu1 }
 0x537   : > { %v6270_v60 = vadd.f32 %v6216_v30, %v6060_v35  ;;  %12287 = vmatmul.msk.f32.gmra.mxu0 %vm1130_vm1, %v15803_v47  ;;  %12374 = vmatmul.msk.f32.gmra.mxu1 %vm1130_vm1, %v6825_v46 }
 0x538   : > { %12394 = vmatmul.msk.f32.gmra.mxu2 %vm1130_vm1, %v15462_v14  ;;  %v12454_v14 = vld [vmem:[%s17768_s3 + $0x58] sm:$0xff] }
 0x539   : > { %12343 = vmatmul.msk.f32.gmra.mxu3 %vm1130_vm1, %v6479_v36  ;;  %v15811_v57 = vadd.f32 %v6393_v62, %v6270_v60  ;;  %v6480_v62 = vld [vmem:[#allocation3 + $0x84] sm:$0xff]  ;;  %7810 = vmatpush.msrb.mxu2 %v12454_v14 }
 0x53a   : > { %v15843_v14 = vld [vmem:[#allocation3 + $0x29] sm:$0xff] }
 0x53b   : > { %v6399_v37 = vpop.f32.mrf.mxu2 }
 0x53c   : > { %v15813_v5 = vpop.f32.mrf.mxu3  ;;  %v6062_v15 = vpop.f32.mrf.mxu0 }
 0x53d   : > { %v6063_v2 = vadd.f32 %v6062_v15, %v15546_v33  ;;  %v6225_v30 = vpop.f32.mrf.mxu1  ;;  %v12352_v33 = vld [vmem:[%s17768_s3 + $0x48] sm:$0xff] }
 0x53e   : > { %7450 = vmatpush.msra.mxu0 %v12352_v33 }
 0x53f   : > { %v6271_v23 = vadd.f32 %v6219_v24, %v6063_v2  ;;  %12353 = vmatmul.msk.f32.vlgmr.msrb.gmra.mxu0 %vm1130_vm1, %v15490_v20  ;;  %12375 = vmatmul.msk.f32.gmra.mxu1 %vm1130_vm1, %v15816_v41  ;;  %v12455_v20 = vld [vmem:[%s17768_s3 + $0x60] sm:$0xff] }
 0x540   : > { %12395 = vmatmul.msk.f32.gmra.mxu2 %vm1130_vm1, %v15492_v50  ;;  %7987 = vmatpush.msra.mxu3 %v12455_v20  ;;  %v12453_v50 = vld [vmem:[%s17768_s3 + $0x50] sm:$0xff] }
 0x541   : > { %12344 = vmatmul.msk.f32.gmra.mxu3 %vm1130_vm1, %v6480_v62  ;;  %v15834_v24 = vadd.f32 %v6396_v56, %v6271_v23  ;;  %7633 = vmatpush.msrb.mxu1 %v12453_v50  ;;  %v6481_v23 = vld [vmem:[#allocation3 + $0x8c] sm:$0xff] }
 0x543   : > { %v6402_v35 = vpop.f32.mrf.mxu2 }
 0x544   : > { %v6561_v46 = vpop.f32.mrf.mxu3  ;;  %v6065_v60 = vpop.f32.mrf.mxu0 }
 0x545   : > { %v15840_v36 = vadd.f32 %v6561_v46, %v15766_v9  ;;  %v6066_v15 = vadd.f32 %v6065_v60, %v15564_v29  ;;  %v6228_v2 = vpop.f32.mrf.mxu1 }
 0x547   : > { %v6272_v56 = vadd.f32 %v6222_v31, %v6066_v15  ;;  %12354 = vmatmul.msk.f32.gmra.mxu0 %vm1130_vm1, %v15513_v11  ;;  %12376 = vmatmul.msk.f32.gmra.mxu1 %vm1130_vm1, %v15843_v14  ;;  %v15856_v11 = vld [vmem:[#allocation3 + $0x31] sm:$0xff] }
 0x548   : > { %12396 = vmatmul.msk.f32.gmra.mxu2 %vm1130_vm1, %v15515_v42  ;;  %v6482_v42 = vld [vmem:[#allocation3 + $0x94] sm:$0xff] }
 0x549   : > { %12345 = vmatmul.msk.f32.gmra.mxu3 %vm1130_vm1, %v6481_v23  ;;  %v6449_v9 = vadd.f32 %v6399_v37, %v6272_v56 }
 0x54b   : > { %v6405_v62 = vpop.f32.mrf.mxu2 }
 0x54c   : > { %v6564_v33 = vpop.f32.mrf.mxu3  ;;  %v6068_v29 = vpop.f32.mrf.mxu0 }
 0x54d   : > { %v15853_v20 = vadd.f32 %v6564_v33, %v15784_v52  ;;  %v6069_v31 = vadd.f32 %v6068_v29, %v15582_v1  ;;  %v6231_v50 = vpop.f32.mrf.mxu1 }
 0x54f   : > { %v6273_v46 = vadd.f32 %v6225_v30, %v6069_v31  ;;  %12355 = vmatmul.msk.f32.gmra.mxu0 %vm1130_vm1, %v15531_v49  ;;  %12377 = vmatmul.msk.f32.gmra.mxu1 %vm1130_vm1, %v15856_v11  ;;  %v15869_v49 = vld [vmem:[#allocation3 + $0x39] sm:$0xff] }
 0x550   : > { %12397 = vmatmul.msk.f32.gmra.mxu2 %vm1130_vm1, %v15533_v19  ;;  %v6483_v19 = vld [vmem:[#allocation3 + $0x9c] sm:$0xff] }
 0x551   : > { %12346 = vmatmul.msk.f32.gmra.mxu3 %vm1130_vm1, %v6482_v42  ;;  %v6450_v52 = vadd.f32 %v6402_v35, %v6273_v46 }
 0x553   : > { %v6408_v37 = vpop.f32.mrf.mxu2 }
 0x554   : > { %v6567_v60 = vpop.f32.mrf.mxu3  ;;  %v6071_v1 = vpop.f32.mrf.mxu0 }
 0x555   : > { %v15866_v15 = vadd.f32 %v6567_v60, %v15798_v55  ;;  %v6072_v30 = vadd.f32 %v6071_v1, %v15601_v34  ;;  %v6234_v56 = vpop.f32.mrf.mxu1 }
 0x557   : > { %v6274_v23 = vadd.f32 %v6228_v2, %v6072_v30  ;;  %12356 = vmatmul.msk.f32.gmra.mxu0 %vm1130_vm1, %v15549_v63  ;;  %12378 = vmatmul.msk.f32.gmra.mxu1 %vm1130_vm1, %v15869_v49  ;;  %v15882_v63 = vld [vmem:[#allocation3 + $0x41] sm:$0xff] }
 0x558   : > { %12398 = vmatmul.msk.f32.gmra.mxu2 %vm1130_vm1, %v15551_v21 }
 0x559   : > { %12347 = vmatmul.msk.f32.gmra.mxu3 %vm1130_vm1, %v6483_v19  ;;  %v6451_v55 = vadd.f32 %v6405_v62, %v6274_v23  ;;  %v15909_v23 = vld [vmem:[#allocation3 + $0x51] sm:$0xff] }
 0x55b   : > { %v6411_v35 = vpop.f32.mrf.mxu2 }
 0x55c   : > { %v6570_v33 = vpop.f32.mrf.mxu3  ;;  %v6074_v34 = vpop.f32.mrf.mxu0 }
 0x55d   : > { %v15879_v29 = vadd.f32 %v6570_v33, %v15811_v57  ;;  %v6075_v2 = vadd.f32 %v6074_v34, %v15619_v44  ;;  %v6237_v31 = vpop.f32.mrf.mxu1  ;;  %v15922_v34 = vld [vmem:[#allocation3 + $0x59] sm:$0xff] }
 0x55f   : > { %v6275_v46 = vadd.f32 %v6231_v50, %v6075_v2  ;;  %12357 = vmatmul.msk.f32.gmra.mxu0 %vm1130_vm1, %v15567_v27  ;;  %12379 = vmatmul.msk.f32.gmra.mxu1 %vm1130_vm1, %v15882_v63  ;;  %v15896_v27 = vld [vmem:[#allocation3 + $0x49] sm:$0xff] }
 0x560   : > { %12399 = vmatmul.msk.f32.gmra.mxu2 %vm1130_vm1, %v15569_v58 }
 0x561   : > { %12413 = vmatmul.msk.f32.vlgmr.msrb.gmra.mxu3 %vm1130_vm1, %v15453_v0  ;;  %v6452_v21 = vadd.f32 %v6408_v37, %v6275_v46 }
 0x563   : > { %v6414_v57 = vpop.f32.mrf.mxu2 }
 0x564   : > { %v6573_v62 = vpop.f32.mrf.mxu3  ;;  %v6077_v44 = vpop.f32.mrf.mxu0 }
 0x565   : > { %v15893_v42 = vadd.f32 %v6573_v62, %v15834_v24  ;;  %v6078_v50 = vadd.f32 %v6077_v44, %v15638_v59  ;;  %v6240_v60 = vpop.f32.mrf.mxu1 }
 0x567   : > { %v6276_v1 = vadd.f32 %v6234_v56, %v6078_v50  ;;  %12358 = vmatmul.msk.f32.gmra.mxu0 %vm1130_vm1, %v15585_v54  ;;  %12380 = vmatmul.msk.f32.gmra.mxu1 %vm1130_vm1, %v15896_v27 }
 0x568   : > { %12400 = vmatmul.msk.f32.gmra.mxu2 %vm1130_vm1, %v15587_v61 }
 0x569   : > { %12414 = vmatmul.msk.f32.gmra.mxu3 %vm1130_vm1, %v15464_v32  ;;  %v6453_v0 = vadd.f32 %v6411_v35, %v6276_v1 }
 0x56b   : > { %v6417_v58 = vpop.f32.mrf.mxu2 }
 0x56c   : > { %v6576_v24 = vpop.f32.mrf.mxu3  ;;  %v6080_v59 = vpop.f32.mrf.mxu0 }
 0x56d   : > { %v15906_v37 = vadd.f32 %v6576_v24, %v6449_v9  ;;  %v6081_v30 = vadd.f32 %v6080_v59, %v15656_v7  ;;  %v6243_v56 = vpop.f32.mrf.mxu1  ;;  %v15961_v59 = vld [vmem:[#allocation3 + $0x71] sm:$0xff] }
 0x56f   : > { %v6277_v54 = vadd.f32 %v6237_v31, %v6081_v30  ;;  %12359 = vmatmul.msk.f32.gmra.mxu0 %vm1130_vm1, %v15604_v22  ;;  %12381 = vmatmul.msk.f32.gmra.mxu1 %vm1130_vm1, %v15909_v23  ;;  %v17837_v30 = vld [vmem:[#allocation12_spill] sm:$0xff] }
 0x570   : > { %12401 = vmatmul.msk.f32.gmra.mxu2 %vm1130_vm1, %v15606_v26 }
 0x571   : > { %12415 = vmatmul.msk.f32.gmra.mxu3 %vm1130_vm1, %v15499_v40  ;;  %v6454_v32 = vadd.f32 %v6414_v57, %v6277_v54  ;;  %v15935_v57 = vld [vmem:[#allocation3 + $0x61] sm:$0xff] }
 0x573   : > { %v6420_v61 = vpop.f32.mrf.mxu2 }
 0x574   : > { %v6579_v9 = vpop.f32.mrf.mxu3  ;;  %v6083_v7 = vpop.f32.mrf.mxu0 }
 0x575   : > { %v15919_v19 = vadd.f32 %v6579_v9, %v6450_v52  ;;  %v6084_v35 = vadd.f32 %v6083_v7, %v15674_v12  ;;  %v6246_v33 = vpop.f32.mrf.mxu1 }
 0x577   : > { %v6278_v22 = vadd.f32 %v6240_v60, %v6084_v35  ;;  %12360 = vmatmul.msk.f32.gmra.mxu0 %vm1130_vm1, %v15622_v38  ;;  %12382 = vmatmul.msk.f32.gmra.mxu1 %vm1130_vm1, %v15922_v34  ;;  %v15948_v60 = vld [vmem:[#allocation3 + $0x69] sm:$0xff]  ;;  %v15974_v35 = vld [vmem:[#allocation3 + $0x79] sm:$0xff] }
 0x578   : > { %12402 = vmatmul.msk.f32.gmra.mxu2 %vm1130_vm1, %v15624_v18 }
 0x579   : > { %12416 = vmatmul.msk.f32.gmra.mxu3 %vm1130_vm1, %v15522_v28  ;;  %v6455_v40 = vadd.f32 %v6417_v58, %v6278_v22  ;;  %v17840_v22 = vld [vmem:[#allocation15_spill] sm:$0xff] }
 0x57b   : > { %v6423_v26 = vpop.f32.mrf.mxu2 }
 0x57c   : > { %v6582_v52 = vpop.f32.mrf.mxu3  ;;  %v6086_v12 = vpop.f32.mrf.mxu0 }
 0x57d   : > { %v15932_v2 = vadd.f32 %v6582_v52, %v6451_v55  ;;  %v6087_v31 = vadd.f32 %v6086_v12, %v15692_v39  ;;  %v6249_v46 = vpop.f32.mrf.mxu1  ;;  %v17842_v52 = vld [vmem:[#allocation7_spill] sm:$0xff] }
 0x57f   : > { %v6279_v38 = vadd.f32 %v6243_v56, %v6087_v31  ;;  %12361 = vmatmul.msk.f32.gmra.mxu0 %vm1130_vm1, %v15641_v48  ;;  %12383 = vmatmul.msk.f32.gmra.mxu1 %vm1130_vm1, %v15935_v57 }
 0x580   : > { %12403 = vmatmul.msk.f32.gmra.mxu2 %vm1130_vm1, %v15643_v13 }
 0x581   : > { %12417 = vmatmul.msk.f32.gmra.mxu3 %vm1130_vm1, %v15540_v4  ;;  %v6456_v28 = vadd.f32 %v6420_v61, %v6279_v38 }
 0x583   : > { %v6426_v18 = vpop.f32.mrf.mxu2 }
 0x584   : > { %v6585_v55 = vpop.f32.mrf.mxu3  ;;  %v6089_v39 = vpop.f32.mrf.mxu0 }
 0x585   : > { %v15945_v62 = vadd.f32 %v6585_v55, %v6452_v21  ;;  %v6090_v44 = vadd.f32 %v6089_v39, %v15710_v51  ;;  %v6252_v50 = vpop.f32.mrf.mxu1  ;;  %v15987_v55 = vld [vmem:[#allocation3 + $0x81] sm:$0xff] }
 0x587   : > { %v6280_v48 = vadd.f32 %v6246_v33, %v6090_v44  ;;  %12362 = vmatmul.msk.f32.gmra.mxu0 %vm1130_vm1, %v15659_v3  ;;  %12384 = vmatmul.msk.f32.gmra.mxu1 %vm1130_vm1, %v15948_v60  ;;  %v17843_v44 = vld [vmem:[#allocation18_spill] sm:$0xff] }
 0x588   : > { %12404 = vmatmul.msk.f32.gmra.mxu2 %vm1130_vm1, %v15661_v8  ;;  %v17838_v8 = vld [vmem:[#allocation13_spill] sm:$0xff] }
 0x589   : > { %12418 = vmatmul.msk.f32.gmra.mxu3 %vm1130_vm1, %v15558_v45  ;;  %v6457_v4 = vadd.f32 %v6423_v26, %v6280_v48  ;;  %v17839_v45 = vld [vmem:[#allocation6_spill] sm:$0xff]  ;;  %v17841_v26 = vld [vmem:[#allocation16_spill] sm:$0xff] }
 0x58a   : > { %v17845_v48 = vld [vmem:[#allocation8_spill] sm:$0xff] }
 0x58b   : > { %v6429_v13 = vpop.f32.mrf.mxu2 }
 0x58c   : > { %v6588_v21 = vpop.f32.mrf.mxu3  ;;  %v6092_v51 = vpop.f32.mrf.mxu0 }
 0x58d   : > { %v15958_v1 = vadd.f32 %v6588_v21, %v6453_v0  ;;  %v6093_v58 = vadd.f32 %v6092_v51, %v15730_v53  ;;  %v6255_v24 = vpop.f32.mrf.mxu1 }
 0x58f   : > { %v6281_v3 = vadd.f32 %v6249_v46, %v6093_v58  ;;  %12363 = vmatmul.msk.f32.gmra.mxu0 %vm1130_vm1, %v17837_v30  ;;  %12385 = vmatmul.msk.f32.gmra.mxu1 %vm1130_vm1, %v15961_v59 }
 0x590   : > { %12405 = vmatmul.msk.f32.gmra.mxu2 %vm1130_vm1, %v17838_v8  ;;  %v17846_v8 = vld [vmem:[#allocation21_spill] sm:$0xff] }
 0x591   : > { %12419 = vmatmul.msk.f32.gmra.mxu3 %vm1130_vm1, %v17839_v45  ;;  %v6458_v0 = vadd.f32 %v6426_v18, %v6281_v3  ;;  %v16000_v3 = vld [vmem:[#allocation3 + $0x89] sm:$0xff] }
 0x592   : > { %v17847_v45 = vld [vmem:[#allocation22_spill] sm:$0xff] }
 0x593   : > { %v6432_v56 = vpop.f32.mrf.mxu2 }
 0x594   : > { %v6591_v54 = vpop.f32.mrf.mxu3  ;;  %v6095_v53 = vpop.f32.mrf.mxu0 }
 0x595   : > { %v15971_v61 = vadd.f32 %v6591_v54, %v6454_v32  ;;  %v6096_v9 = vadd.f32 %v6095_v53, %v15749_v6  ;;  %v6258_v7 = vpop.f32.mrf.mxu1 }
 0x597   : > { %v6282_v33 = vadd.f32 %v6252_v50, %v6096_v9  ;;  %12364 = vmatmul.msk.f32.gmra.mxu0 %vm1130_vm1, %v17840_v22  ;;  %12386 = vmatmul.msk.f32.gmra.mxu1 %vm1130_vm1, %v15974_v35  ;;  %v17844_v50 = vld [vmem:[#allocation19_spill] sm:$0xff] }
 0x598   : > { %12406 = vmatmul.msk.f32.gmra.mxu2 %vm1130_vm1, %v17841_v26  ;;  %v16013_v22 = vld [vmem:[#allocation3 + $0x91] sm:$0xff] }
 0x599   : > { %12420 = vmatmul.msk.f32.gmra.mxu3 %vm1130_vm1, %v17842_v52  ;;  %v6459_v32 = vadd.f32 %v6429_v13, %v6282_v33  ;;  %v17849_v52 = vld [vmem:[#allocation24_spill] sm:$0xff] }
 0x59b   : > { %v6435_v12 = vpop.f32.mrf.mxu2 }
 0x59c   : > { %v6594_v31 = vpop.f32.mrf.mxu3  ;;  %v6098_v6 = vpop.f32.mrf.mxu0 }
 0x59d   : > { %v15984_v46 = vadd.f32 %v6594_v31, %v6455_v40  ;;  %v6099_v38 = vadd.f32 %v6098_v6, %v15768_v17  ;;  %v6261_v18 = vpop.f32.mrf.mxu1  ;;  %v17850_v31 = vld [vmem:[#allocation25_spill] sm:$0xff] }
 0x59f   : > { %v6283_v39 = vadd.f32 %v6255_v24, %v6099_v38  ;;  %12365 = vmatmul.msk.f32.gmra.mxu0 %vm1130_vm1, %v17843_v44  ;;  %12387 = vmatmul.msk.f32.gmra.mxu1 %vm1130_vm1, %v15987_v55 }
 0x5a0   : > { %12407 = vmatmul.msk.f32.gmra.mxu2 %vm1130_vm1, %v17844_v50  ;;  %v16026_v50 = vld [vmem:[#allocation3 + $0x99] sm:$0xff] }
 0x5a1   : > { %12421 = vmatmul.msk.f32.gmra.mxu3 %vm1130_vm1, %v17845_v48  ;;  %v6460_v40 = vadd.f32 %v6432_v56, %v6283_v39  ;;  %v17848_v56 = vld [vmem:[#allocation9_spill] sm:$0xff] }
 0x5a3   : > { %v6438_v13 = vpop.f32.mrf.mxu2 }
 0x5a4   : > { %v6597_v21 = vpop.f32.mrf.mxu3  ;;  %v6101_v17 = vpop.f32.mrf.mxu0 }
 0x5a5   : > { %v15997_v51 = vadd.f32 %v6597_v21, %v6456_v28  ;;  %v6102_v58 = vadd.f32 %v6101_v17, %v15787_v16  ;;  %v6264_v24 = vpop.f32.mrf.mxu1  ;;  %v17852_v21 = vld [vmem:[#allocation27_spill] sm:$0xff]  ;;  %v17853_v17 = vld [vmem:[#allocation28_spill] sm:$0xff] }
 0x5a7   : > { %v6284_v30 = vadd.f32 %v6258_v7, %v6102_v58  ;;  %12366 = vmatmul.msk.f32.gmra.mxu0 %vm1130_vm1, %v17846_v8  ;;  %12388 = vmatmul.msk.f32.gmra.mxu1 %vm1130_vm1, %v16000_v3 }
 0x5a8   : > { %12408 = vmatmul.msk.f32.gmra.mxu2 %vm1130_vm1, %v17847_v45 }
 0x5a9   : > { %12422 = vmatmul.msk.f32.gmra.mxu3 %vm1130_vm1, %v17848_v56  ;;  %v6461_v28 = vadd.f32 %v6435_v12, %v6284_v30  ;;  %v17851_v12 = vld [vmem:[#allocation10_spill] sm:$0xff] }
 0x5aa   : > { %v16039_v56 = vld [vmem:[#allocation3 + $0xa1] sm:$0xff] }
 0x5ab   : > { %v6441_v54 = vpop.f32.mrf.mxu2 }
 0x5ac   : > { %v6600_v53 = vpop.f32.mrf.mxu3  ;;  %v6104_v16 = vpop.f32.mrf.mxu0 }
 0x5ad   : > { %v16010_v9 = vadd.f32 %v6600_v53, %v6457_v4  ;;  %v6105_v7 = vadd.f32 %v6104_v16, %v15800_v43  ;;  %v6921_v33 = vpop.f32.mrf.mxu1  ;;  %v16045_v16 = vld [vmem:[#allocation3 + $0xa2] sm:$0xff] }
 0x5af   : > { %v6285_v26 = vadd.f32 %v6261_v18, %v6105_v7  ;;  %12367 = vmatmul.msk.f32.gmra.mxu0 %vm1130_vm1, %v17849_v52  ;;  %12389 = vmatmul.msk.f32.gmra.mxu1 %vm1130_vm1, %v16013_v22 }
 0x5b0   : > { %12409 = vmatmul.msk.f32.gmra.mxu2 %vm1130_vm1, %v17850_v31  ;;  %v16056_v31 = vld [vmem:[#allocation3 + $0xa9] sm:$0xff] }
 0x5b1   : > { %12423 = vmatmul.msk.f32.gmra.mxu3 %vm1130_vm1, %v17851_v12  ;;  %v6462_v4 = vadd.f32 %v6438_v13, %v6285_v26  ;;  %v17854_v13 = vld [vmem:[#allocation11_spill] sm:$0xff] }
 0x5b3   : > { %v7098_v6 = vpop.f32.mrf.mxu2 }
 0x5b4   : > { %v6603_v38 = vpop.f32.mrf.mxu3  ;;  %v6107_v43 = vpop.f32.mrf.mxu0 }
 0x5b5   : > { %v16023_v39 = vadd.f32 %v6603_v38, %v6458_v0  ;;  %v6108_v18 = vadd.f32 %v6107_v43, %v15813_v5  ;;  %v6924_v44 = vpop.f32.mrf.mxu1  ;;  %v16062_v38 = vld [vmem:[#allocation3 + $0xaa] sm:$0xff] }
 0x5b7   : > { %v6286_v48 = vadd.f32 %v6264_v24, %v6108_v18  ;;  %12368 = vmatmul.msk.f32.gmra.mxu0 %vm1130_vm1, %v17852_v21  ;;  %12390 = vmatmul.msk.f32.gmra.mxu1 %vm1130_vm1, %v16026_v50  ;;  %v16073_v21 = vld [vmem:[#allocation3 + $0xa0] sm:$0xff] }
 0x5b8   : > { %12410 = vmatmul.msk.f32.gmra.mxu2 %vm1130_vm1, %v17853_v17  ;;  %v7538_v17 = vld [vmem:[#allocation3 + $0x20] sm:$0xff] }
 0x5b9   : > { %12424 = vmatmul.msk.f32.gmra.mxu3 %vm1130_vm1, %v17854_v13  ;;  %v6463_v0 = vadd.f32 %v6441_v54, %v6286_v48  ;;  %v17855_v54 = vld [vmem:[#allocation14_spill] sm:$0xff] }
 0x5bb   : > { %v7101_v58 = vpop.f32.mrf.mxu2 }
 0x5bc   : > { %v6606_v30 = vpop.f32.mrf.mxu3  ;;  %v6744_v5 = vpop.f32.mrf.mxu0 }
 0x5bd   : > { %v16036_v8 = vadd.f32 %v6606_v30, %v6459_v32  ;;  %v6804_v24 = vadd.f32 %v6744_v5, %v15840_v36  ;;  %v6927_v45 = vpop.f32.mrf.mxu1 }
 0x5bf   : > { %v6981_v53 = vadd.f32 %v6921_v33, %v6804_v24  ;;  %12369 = vmatmul.msk.f32.gmra.mxu0 %vm1130_vm1, %v15790_v10  ;;  %12391 = vmatmul.msk.f32.gmra.mxu1 %vm1130_vm1, %v16039_v56 }
 0x5c0   : > { %12411 = vmatmul.msk.f32.gmra.mxu2 %vm1130_vm1, %v16045_v16 }
 0x5c1   : > { %12425 = vmatmul.msk.f32.gmra.mxu3 %vm1130_vm1, %v17855_v54  ;;  %v16051_v32 = vadd.f32 %v7098_v6, %v6981_v53  ;;  %v17856_v6 = vld [vmem:[#allocation17_spill] sm:$0xff]  ;;  %v16087_v54 = vld [vmem:[#allocation3 + $0xa8] sm:$0xff] }
 0x5c3   : > { %v7104_v36 = vpop.f32.mrf.mxu2 }
 0x5c4   : > { %v6609_v7 = vpop.f32.mrf.mxu3  ;;  %v6747_v26 = vpop.f32.mrf.mxu0 }
 0x5c5   : > { %v16053_v33 = vadd.f32 %v6609_v7, %v6460_v40  ;;  %v6805_v10 = vadd.f32 %v6747_v26, %v15853_v20  ;;  %v6930_v52 = vpop.f32.mrf.mxu1  ;;  %v7539_v7 = vld [vmem:[#allocation3 + $0x28] sm:$0xff] }
 0x5c7   : > { %v6982_v12 = vadd.f32 %v6924_v44, %v6805_v10  ;;  %12370 = vmatmul.msk.f32.gmra.mxu0 %vm1130_vm1, %v15803_v47  ;;  %12392 = vmatmul.msk.f32.gmra.mxu1 %vm1130_vm1, %v16056_v31 }
 0x5c8   : > { %12412 = vmatmul.msk.f32.gmra.mxu2 %vm1130_vm1, %v16062_v38 }
 0x5c9   : > { %12426 = vmatmul.msk.f32.gmra.mxu3 %vm1130_vm1, %v17856_v6  ;;  %v16068_v40 = vadd.f32 %v7101_v58, %v6982_v12  ;;  %v17857_v58 = vld [vmem:[#allocation20_spill] sm:$0xff] }
 0x5cb   : > { %v7107_v20 = vpop.f32.mrf.mxu2 }
 0x5cc   : > { %v6612_v43 = vpop.f32.mrf.mxu3  ;;  %v6750_v18 = vpop.f32.mrf.mxu0 }
 0x5cd   : > { %v16070_v44 = vadd.f32 %v6612_v43, %v6461_v28  ;;  %v6806_v47 = vadd.f32 %v6750_v18, %v15866_v15  ;;  %v6933_v48 = vpop.f32.mrf.mxu1  ;;  %v7355_v43 = vld [vmem:[#allocation3 + $0x14] sm:$0xff] }
 0x5ce   : > { %v16101_v18 = vld [vmem:[#allocation3 + $0x30] sm:$0xff] }
 0x5cf   : > { %v6983_v13 = vadd.f32 %v6927_v45, %v6806_v47  ;;  %12371 = vmatmul.msk.f32.gmra.mxu0 %vm1130_vm1, %v16073_v21  ;;  %12458 = vmatmul.msk.f32.vlgmr.msrb.gmra.mxu1 %vm1130_vm1, %v7538_v17 }
 0x5d0   : > { %12478 = vmatmul.msk.f32.vlgmr.msrb.gmra.mxu2 %vm1130_vm1, %v15816_v41  ;;  %v17858_v41 = vld [vmem:[#allocation23_spill] sm:$0xff] }
 0x5d1   : > { %12427 = vmatmul.msk.f32.gmra.mxu3 %vm1130_vm1, %v17857_v58  ;;  %v16082_v28 = vadd.f32 %v7104_v36, %v6983_v13 }
 0x5d3   : > { %v7110_v30 = vpop.f32.mrf.mxu2 }
 0x5d4   : > { %v6615_v15 = vpop.f32.mrf.mxu3  ;;  %v6753_v5 = vpop.f32.mrf.mxu0 }
 0x5d5   : > { %v16084_v24 = vadd.f32 %v6615_v15, %v6462_v4  ;;  %v6807_v45 = vadd.f32 %v6753_v5, %v15879_v29  ;;  %v6936_v53 = vpop.f32.mrf.mxu1 }
 0x5d7   : > { %v6984_v26 = vadd.f32 %v6930_v52, %v6807_v45  ;;  %12372 = vmatmul.msk.f32.gmra.mxu0 %vm1130_vm1, %v16087_v54  ;;  %12459 = vmatmul.msk.f32.gmra.mxu1 %vm1130_vm1, %v7539_v7  ;;  %v7356_v7 = vld [vmem:[#allocation3 + $0x1c] sm:$0xff] }
 0x5d8   : > { %12479 = vmatmul.msk.f32.gmra.mxu2 %vm1130_vm1, %v15843_v14  ;;  %v12558_v14 = vld [vmem:[%s17768_s3 + $0x78] sm:$0xff] }
 0x5d9   : > { %12428 = vmatmul.msk.f32.gmra.mxu3 %vm1130_vm1, %v17858_v41  ;;  %v16096_v4 = vadd.f32 %v7107_v20, %v6984_v26  ;;  %8524 = vmatpush.msra.mxu2 %v12558_v14  ;;  %v12559_v20 = vld [vmem:[%s17768_s3 + $0x80] sm:$0xff]  ;;  %v16128_v26 = vld [vmem:[#allocation3 + $0x38] sm:$0xff] }
 0x5da   : > { %8701 = vmatpush.msrb.mxu3 %v12559_v20  ;;  %v16160_v20 = vld [vmem:[#allocation3 + $0x2c] sm:$0xff] }
 0x5db   : > { %v7113_v36 = vpop.f32.mrf.mxu2 }
 0x5dc   : > { %v6618_v29 = vpop.f32.mrf.mxu3  ;;  %v6756_v10 = vpop.f32.mrf.mxu0 }
 0x5dd   : > { %v16098_v12 = vadd.f32 %v6618_v29, %v6463_v0  ;;  %v6808_v52 = vadd.f32 %v6756_v10, %v15893_v42  ;;  %v6939_v6 = vpop.f32.mrf.mxu1  ;;  %v17859_v0 = vld [vmem:[#allocation26_spill] sm:$0xff] }
 0x5de   : > { %v12456_v42 = vld [vmem:[%s17768_s3 + $0x68] sm:$0xff] }
 0x5df   : > { %v6985_v47 = vadd.f32 %v6933_v48, %v6808_v52  ;;  %12433 = vmatmul.msk.f32.vlgmr.msra.gmra.mxu0 %vm1130_vm1, %v7355_v43  ;;  %12460 = vmatmul.msk.f32.gmra.mxu1 %vm1130_vm1, %v16101_v18  ;;  %v16143_v43 = vld [vmem:[#allocation3 + $0x24] sm:$0xff] }
 0x5e0   : > { %12480 = vmatmul.msk.f32.gmra.mxu2 %vm1130_vm1, %v15856_v11  ;;  %8164 = vmatpush.msrb.mxu0 %v12456_v42  ;;  %v12457_v11 = vld [vmem:[%s17768_s3 + $0x70] sm:$0xff] }
 0x5e1   : > { %12429 = vmatmul.msk.f32.gmra.mxu3 %vm1130_vm1, %v17859_v0  ;;  %v16119_v48 = vadd.f32 %v7110_v30, %v6985_v47  ;;  %8341 = vmatpush.msra.mxu1 %v12457_v11  ;;  %v16145_v47 = vld [vmem:[#allocation3 + $0x40] sm:$0xff]  ;;  %v16162_v11 = vld [vmem:[#allocation3 + $0x48] sm:$0xff] }
 0x5e3   : > { %v7116_v17 = vpop.f32.mrf.mxu2 }
 0x5e4   : > { %v7275_v13 = vpop.f32.mrf.mxu3  ;;  %v6759_v58 = vpop.f32.mrf.mxu0 }
 0x5e5   : > { %v16125_v15 = vadd.f32 %v7275_v13, %v16051_v32  ;;  %v6809_v5 = vadd.f32 %v6759_v58, %v15906_v37  ;;  %v6942_v45 = vpop.f32.mrf.mxu1 }
 0x5e7   : > { %v6986_v30 = vadd.f32 %v6936_v53, %v6809_v5  ;;  %12434 = vmatmul.msk.f32.gmra.mxu0 %vm1130_vm1, %v7356_v7  ;;  %12461 = vmatmul.msk.f32.gmra.mxu1 %vm1130_vm1, %v16128_v26 }
 0x5e8   : > { %12481 = vmatmul.msk.f32.gmra.mxu2 %vm1130_vm1, %v15869_v49 }
 0x5e9   : > { %12430 = vmatmul.msk.f32.gmra.mxu3 %vm1130_vm1, %v15779_v25  ;;  %v16137_v32 = vadd.f32 %v7113_v36, %v6986_v30  ;;  %v7196_v25 = vld [vmem:[#allocation3 + $0xa3] sm:$0xff]  ;;  %v16177_v30 = vld [vmem:[#allocation3 + $0x34] sm:$0xff] }
 0x5eb   : > { %v7119_v41 = vpop.f32.mrf.mxu2 }
 0x5ec   : > { %v7278_v37 = vpop.f32.mrf.mxu3  ;;  %v6762_v29 = vpop.f32.mrf.mxu0 }
 0x5ed   : > { %v16140_v10 = vadd.f32 %v7278_v37, %v16068_v40  ;;  %v6810_v53 = vadd.f32 %v6762_v29, %v15919_v19  ;;  %v6945_v52 = vpop.f32.mrf.mxu1  ;;  %v16179_v37 = vld [vmem:[#allocation3 + $0x50] sm:$0xff] }
 0x5ef   : > { %v6987_v14 = vadd.f32 %v6939_v6, %v6810_v53  ;;  %12435 = vmatmul.msk.f32.gmra.mxu0 %vm1130_vm1, %v16143_v43  ;;  %12462 = vmatmul.msk.f32.gmra.mxu1 %vm1130_vm1, %v16145_v47 }
 0x5f0   : > { %12482 = vmatmul.msk.f32.gmra.mxu2 %vm1130_vm1, %v15882_v63  ;;  %v7197_v63 = vld [vmem:[#allocation3 + $0xab] sm:$0xff] }
 0x5f1   : > { %12431 = vmatmul.msk.f32.gmra.mxu3 %vm1130_vm1, %v7196_v25  ;;  %v16154_v49 = vadd.f32 %v7116_v17, %v6987_v14 }
 0x5f3   : > { %v7122_v19 = vpop.f32.mrf.mxu2 }
 0x5f4   : > { %v7281_v40 = vpop.f32.mrf.mxu3  ;;  %v6765_v36 = vpop.f32.mrf.mxu0 }
 0x5f5   : > { %v16157_v0 = vadd.f32 %v7281_v40, %v16082_v28  ;;  %v6811_v6 = vadd.f32 %v6765_v36, %v15932_v2  ;;  %v6948_v42 = vpop.f32.mrf.mxu1  ;;  %v16194_v40 = vld [vmem:[#allocation3 + $0x3c] sm:$0xff] }
 0x5f6   : > { %v16196_v36 = vld [vmem:[#allocation3 + $0x58] sm:$0xff] }
 0x5f7   : > { %v6988_v13 = vadd.f32 %v6942_v45, %v6811_v6  ;;  %12436 = vmatmul.msk.f32.gmra.mxu0 %vm1130_vm1, %v16160_v20  ;;  %12463 = vmatmul.msk.f32.gmra.mxu1 %vm1130_vm1, %v16162_v11 }
 0x5f8   : > { %12483 = vmatmul.msk.f32.gmra.mxu2 %vm1130_vm1, %v15896_v27  ;;  %v7892_v27 = vld [vmem:[#allocation3 + $0x22] sm:$0xff] }
 0x5f9   : > { %12432 = vmatmul.msk.f32.gmra.mxu3 %vm1130_vm1, %v7197_v63  ;;  %v16171_v28 = vadd.f32 %v7119_v41, %v6988_v13 }
 0x5fb   : > { %v7125_v2 = vpop.f32.mrf.mxu2 }
 0x5fc   : > { %v7284_v17 = vpop.f32.mrf.mxu3  ;;  %v6768_v58 = vpop.f32.mrf.mxu0 }
 0x5fd   : > { %v16174_v5 = vadd.f32 %v7284_v17, %v16096_v4  ;;  %v6812_v45 = vadd.f32 %v6768_v58, %v15945_v62  ;;  %v6951_v7 = vpop.f32.mrf.mxu1  ;;  %v16211_v58 = vld [vmem:[#allocation3 + $0x44] sm:$0xff] }
 0x5ff   : > { %v6989_v29 = vadd.f32 %v6945_v52, %v6812_v45  ;;  %12437 = vmatmul.msk.f32.gmra.mxu0 %vm1130_vm1, %v16177_v30  ;;  %12464 = vmatmul.msk.f32.gmra.mxu1 %vm1130_vm1, %v16179_v37  ;;  %v16213_v45 = vld [vmem:[#allocation3 + $0x60] sm:$0xff] }
 0x600   : > { %12484 = vmatmul.msk.f32.gmra.mxu2 %vm1130_vm1, %v15909_v23  ;;  %v7893_v23 = vld [vmem:[#allocation3 + $0x2a] sm:$0xff] }
 0x601   : > { %12498 = vmatmul.msk.f32.vlgmr.msra.gmra.mxu3 %vm1130_vm1, %v7892_v27  ;;  %v16188_v4 = vadd.f32 %v7122_v19, %v6989_v29 }
 0x603   : > { %v7128_v62 = vpop.f32.mrf.mxu2 }
 0x604   : > { %v7287_v41 = vpop.f32.mrf.mxu3  ;;  %v6771_v53 = vpop.f32.mrf.mxu0 }
 0x605   : > { %v16191_v14 = vadd.f32 %v7287_v41, %v16119_v48  ;;  %v6813_v52 = vadd.f32 %v6771_v53, %v15958_v1  ;;  %v6954_v25 = vpop.f32.mrf.mxu1 }
 0x607   : > { %v6990_v6 = vadd.f32 %v6948_v42, %v6813_v52  ;;  %12438 = vmatmul.msk.f32.gmra.mxu0 %vm1130_vm1, %v16194_v40  ;;  %12465 = vmatmul.msk.f32.gmra.mxu1 %vm1130_vm1, %v16196_v36  ;;  %v16228_v52 = vld [vmem:[#allocation3 + $0x4c] sm:$0xff] }
 0x608   : > { %12485 = vmatmul.msk.f32.gmra.mxu2 %vm1130_vm1, %v15922_v34  ;;  %v7894_v34 = vld [vmem:[#allocation3 + $0x32] sm:$0xff] }
 0x609   : > { %12499 = vmatmul.msk.f32.gmra.mxu3 %vm1130_vm1, %v7893_v23  ;;  %v16205_v48 = vadd.f32 %v7125_v2, %v6990_v6  ;;  %v16230_v6 = vld [vmem:[#allocation3 + $0x68] sm:$0xff] }
 0x60b   : > { %v7131_v1 = vpop.f32.mrf.mxu2 }
 0x60c   : > { %v7290_v19 = vpop.f32.mrf.mxu3  ;;  %v6774_v13 = vpop.f32.mrf.mxu0 }
 0x60d   : > { %v16208_v63 = vadd.f32 %v7290_v19, %v16137_v32  ;;  %v6814_v42 = vadd.f32 %v6774_v13, %v15971_v61  ;;  %v6957_v17 = vpop.f32.mrf.mxu1 }
 0x60f   : > { %v6991_v29 = vadd.f32 %v6951_v7, %v6814_v42  ;;  %12439 = vmatmul.msk.f32.gmra.mxu0 %vm1130_vm1, %v16211_v58  ;;  %12466 = vmatmul.msk.f32.gmra.mxu1 %vm1130_vm1, %v16213_v45 }
 0x610   : > { %12486 = vmatmul.msk.f32.gmra.mxu2 %vm1130_vm1, %v15935_v57  ;;  %v7895_v57 = vld [vmem:[#allocation3 + $0x3a] sm:$0xff] }
 0x611   : > { %12500 = vmatmul.msk.f32.gmra.mxu3 %vm1130_vm1, %v7894_v34  ;;  %v16222_v32 = vadd.f32 %v7128_v62, %v6991_v29  ;;  %v16245_v29 = vld [vmem:[#allocation3 + $0x54] sm:$0xff] }
 0x612   : > { %v16247_v34 = vld [vmem:[#allocation3 + $0x70] sm:$0xff] }
 0x613   : > { %v7134_v61 = vpop.f32.mrf.mxu2 }
 0x614   : > { %v7293_v2 = vpop.f32.mrf.mxu3  ;;  %v6777_v27 = vpop.f32.mrf.mxu0 }
 0x615   : > { %v16225_v41 = vadd.f32 %v7293_v2, %v16154_v49  ;;  %v6815_v7 = vadd.f32 %v6777_v27, %v15984_v46  ;;  %v6960_v53 = vpop.f32.mrf.mxu1 }
 0x617   : > { %v6992_v23 = vadd.f32 %v6954_v25, %v6815_v7  ;;  %12440 = vmatmul.msk.f32.gmra.mxu0 %vm1130_vm1, %v16228_v52  ;;  %12467 = vmatmul.msk.f32.gmra.mxu1 %vm1130_vm1, %v16230_v6 }
 0x618   : > { %12487 = vmatmul.msk.f32.gmra.mxu2 %vm1130_vm1, %v15948_v60  ;;  %v7896_v60 = vld [vmem:[#allocation3 + $0x42] sm:$0xff] }
 0x619   : > { %12501 = vmatmul.msk.f32.gmra.mxu3 %vm1130_vm1, %v7895_v57  ;;  %v16239_v49 = vadd.f32 %v7131_v1, %v6992_v23  ;;  %v16262_v57 = vld [vmem:[#allocation3 + $0x5c] sm:$0xff] }
 0x61b   : > { %v7137_v46 = vpop.f32.mrf.mxu2 }
 0x61c   : > { %v7296_v62 = vpop.f32.mrf.mxu3  ;;  %v6780_v19 = vpop.f32.mrf.mxu0 }
 0x61d   : > { %v16242_v13 = vadd.f32 %v7296_v62, %v16171_v28  ;;  %v6816_v25 = vadd.f32 %v6780_v19, %v15997_v51  ;;  %v6963_v42 = vpop.f32.mrf.mxu1  ;;  %v16264_v62 = vld [vmem:[#allocation3 + $0x78] sm:$0xff] }
 0x61f   : > { %v6993_v2 = vadd.f32 %v6957_v17, %v6816_v25  ;;  %12441 = vmatmul.msk.f32.gmra.mxu0 %vm1130_vm1, %v16245_v29  ;;  %12468 = vmatmul.msk.f32.gmra.mxu1 %vm1130_vm1, %v16247_v34 }
 0x620   : > { %12488 = vmatmul.msk.f32.gmra.mxu2 %vm1130_vm1, %v15961_v59  ;;  %v7897_v59 = vld [vmem:[#allocation3 + $0x4a] sm:$0xff] }
 0x621   : > { %12502 = vmatmul.msk.f32.gmra.mxu3 %vm1130_vm1, %v7896_v60  ;;  %v16256_v28 = vadd.f32 %v7134_v61, %v6993_v2 }
 0x623   : > { %v7140_v51 = vpop.f32.mrf.mxu2 }
 0x624   : > { %v7299_v1 = vpop.f32.mrf.mxu3  ;;  %v6783_v27 = vpop.f32.mrf.mxu0 }
 0x625   : > { %v16259_v7 = vadd.f32 %v7299_v1, %v16188_v4  ;;  %v6817_v17 = vadd.f32 %v6783_v27, %v16010_v9  ;;  %v6966_v23 = vpop.f32.mrf.mxu1  ;;  %v16279_v1 = vld [vmem:[#allocation3 + $0x64] sm:$0xff] }
 0x626   : > { %v16281_v27 = vld [vmem:[#allocation3 + $0x80] sm:$0xff] }
 0x627   : > { %v6994_v19 = vadd.f32 %v6960_v53, %v6817_v17  ;;  %12442 = vmatmul.msk.f32.gmra.mxu0 %vm1130_vm1, %v16262_v57  ;;  %12469 = vmatmul.msk.f32.gmra.mxu1 %vm1130_vm1, %v16264_v62  ;;  %17860 = vst [vmem:[#allocation12_spill] sm:$0xff] %v16281_v27 }
 0x628   : > { %12489 = vmatmul.msk.f32.gmra.mxu2 %vm1130_vm1, %v15974_v35  ;;  %v7898_v35 = vld [vmem:[#allocation3 + $0x52] sm:$0xff] }
 0x629   : > { %12503 = vmatmul.msk.f32.gmra.mxu3 %vm1130_vm1, %v7897_v59  ;;  %v16273_v4 = vadd.f32 %v7137_v46, %v6994_v19 }
 0x62b   : > { %v7143_v9 = vpop.f32.mrf.mxu2 }
 0x62c   : > { %v7302_v61 = vpop.f32.mrf.mxu3  ;;  %v6786_v25 = vpop.f32.mrf.mxu0 }
 0x62d   : > { %v16276_v2 = vadd.f32 %v7302_v61, %v16205_v48  ;;  %v6818_v53 = vadd.f32 %v6786_v25, %v16023_v39  ;;  %v6969_v60 = vpop.f32.mrf.mxu1  ;;  %v16296_v25 = vld [vmem:[#allocation3 + $0x6c] sm:$0xff] }
 0x62f   : > { %v6995_v17 = vadd.f32 %v6963_v42, %v6818_v53  ;;  %12443 = vmatmul.msk.f32.gmra.mxu0 %vm1130_vm1, %v16279_v1  ;;  %12470 = vmatmul.msk.f32.gmra.mxu1 %vm1130_vm1, %v16281_v27  ;;  %v16298_v53 = vld [vmem:[#allocation3 + $0x88] sm:$0xff] }
 0x630   : > { %12490 = vmatmul.msk.f32.gmra.mxu2 %vm1130_vm1, %v15987_v55  ;;  %17861 = vst [vmem:[#allocation13_spill] sm:$0xff] %v16298_v53  ;;  %v7899_v55 = vld [vmem:[#allocation3 + $0x5a] sm:$0xff] }
 0x631   : > { %12504 = vmatmul.msk.f32.gmra.mxu3 %vm1130_vm1, %v7898_v35  ;;  %v16290_v48 = vadd.f32 %v7140_v51, %v6995_v17 }
 0x633   : > { %v7146_v39 = vpop.f32.mrf.mxu2 }
 0x634   : > { %v7305_v46 = vpop.f32.mrf.mxu3  ;;  %v6789_v19 = vpop.f32.mrf.mxu0 }
 0x635   : > { %v16293_v59 = vadd.f32 %v7305_v46, %v16222_v32  ;;  %v6819_v42 = vadd.f32 %v6789_v19, %v16036_v8  ;;  %v6972_v61 = vpop.f32.mrf.mxu1  ;;  %v16311_v19 = vld [vmem:[#allocation3 + $0x74] sm:$0xff] }
 0x637   : > { %v6996_v27 = vadd.f32 %v6966_v23, %v6819_v42  ;;  %12444 = vmatmul.msk.f32.gmra.mxu0 %vm1130_vm1, %v16296_v25  ;;  %12471 = vmatmul.msk.f32.gmra.mxu1 %vm1130_vm1, %v16298_v53  ;;  %v16313_v42 = vld [vmem:[#allocation3 + $0x90] sm:$0xff] }
 0x638   : > { %12491 = vmatmul.msk.f32.gmra.mxu2 %vm1130_vm1, %v16000_v3  ;;  %17862 = vst [vmem:[#allocation6_spill] sm:$0xff] %v16313_v42  ;;  %v7900_v3 = vld [vmem:[#allocation3 + $0x62] sm:$0xff] }
 0x639   : > { %12505 = vmatmul.msk.f32.gmra.mxu3 %vm1130_vm1, %v7899_v55  ;;  %v7173_v32 = vadd.f32 %v7143_v9, %v6996_v27 }
 0x63b   : > { %v7149_v8 = vpop.f32.mrf.mxu2 }
 0x63c   : > { %v7308_v51 = vpop.f32.mrf.mxu3  ;;  %v6792_v17 = vpop.f32.mrf.mxu0 }
 0x63d   : > { %v16308_v35 = vadd.f32 %v7308_v51, %v16239_v49  ;;  %v6820_v23 = vadd.f32 %v6792_v17, %v16053_v33  ;;  %v6975_v46 = vpop.f32.mrf.mxu1  ;;  %v16328_v17 = vld [vmem:[#allocation3 + $0x7c] sm:$0xff] }
 0x63f   : > { %v6997_v53 = vadd.f32 %v6969_v60, %v6820_v23  ;;  %12445 = vmatmul.msk.f32.gmra.mxu0 %vm1130_vm1, %v16311_v19  ;;  %12472 = vmatmul.msk.f32.gmra.mxu1 %vm1130_vm1, %v16313_v42  ;;  %v16330_v23 = vld [vmem:[#allocation3 + $0x98] sm:$0xff] }
 0x640   : > { %12492 = vmatmul.msk.f32.gmra.mxu2 %vm1130_vm1, %v16013_v22  ;;  %v7901_v22 = vld [vmem:[#allocation3 + $0x6a] sm:$0xff] }
 0x641   : > { %12506 = vmatmul.msk.f32.gmra.mxu3 %vm1130_vm1, %v7900_v3  ;;  %v16322_v49 = vadd.f32 %v7146_v39, %v6997_v53 }
 0x643   : > { %v7152_v33 = vpop.f32.mrf.mxu2 }
 0x644   : > { %v7311_v9 = vpop.f32.mrf.mxu3  ;;  %v6795_v27 = vpop.f32.mrf.mxu0 }
 0x645   : > { %v16325_v55 = vadd.f32 %v7311_v9, %v16256_v28  ;;  %v6821_v60 = vadd.f32 %v6795_v27, %v16070_v44  ;;  %v6978_v51 = vpop.f32.mrf.mxu1  ;;  %v16345_v27 = vld [vmem:[#allocation3 + $0x84] sm:$0xff] }
 0x647   : > { %v6998_v42 = vadd.f32 %v6972_v61, %v6821_v60  ;;  %12446 = vmatmul.msk.f32.gmra.mxu0 %vm1130_vm1, %v16328_v17  ;;  %12473 = vmatmul.msk.f32.gmra.mxu1 %vm1130_vm1, %v16330_v23 }
 0x648   : > { %12493 = vmatmul.msk.f32.gmra.mxu2 %vm1130_vm1, %v16026_v50  ;;  %v7902_v50 = vld [vmem:[#allocation3 + $0x72] sm:$0xff] }
 0x649   : > { %12507 = vmatmul.msk.f32.gmra.mxu3 %vm1130_vm1, %v7901_v22  ;;  %v16339_v28 = vadd.f32 %v7149_v8, %v6998_v42 }
 0x64b   : > { %v7155_v44 = vpop.f32.mrf.mxu2 }
 0x64c   : > { %v7314_v39 = vpop.f32.mrf.mxu3  ;;  %v6798_v53 = vpop.f32.mrf.mxu0 }
 0x64d   : > { %v16342_v3 = vadd.f32 %v7314_v39, %v16273_v4  ;;  %v6822_v61 = vadd.f32 %v6798_v53, %v16084_v24  ;;  %v7635_v9 = vpop.f32.mrf.mxu1  ;;  %v16360_v53 = vld [vmem:[#allocation3 + $0x8c] sm:$0xff] }
 0x64f   : > { %v6999_v60 = vadd.f32 %v6975_v46, %v6822_v61  ;;  %12447 = vmatmul.msk.f32.gmra.mxu0 %vm1130_vm1, %v16345_v27  ;;  %12474 = vmatmul.msk.f32.gmra.mxu1 %vm1130_vm1, %v16073_v21 }
 0x650   : > { %12494 = vmatmul.msk.f32.gmra.mxu2 %vm1130_vm1, %v16039_v56  ;;  %v7903_v56 = vld [vmem:[#allocation3 + $0x7a] sm:$0xff] }
 0x651   : > { %12508 = vmatmul.msk.f32.gmra.mxu3 %vm1130_vm1, %v7902_v50  ;;  %v16354_v4 = vadd.f32 %v7152_v33, %v6999_v60 }
 0x653   : > { %v7812_v8 = vpop.f32.mrf.mxu2 }
 0x654   : > { %v7317_v24 = vpop.f32.mrf.mxu3  ;;  %v6801_v42 = vpop.f32.mrf.mxu0 }
 0x655   : > { %v16357_v22 = vadd.f32 %v7317_v24, %v16290_v48  ;;  %v6823_v46 = vadd.f32 %v6801_v42, %v16098_v12  ;;  %v7638_v39 = vpop.f32.mrf.mxu1  ;;  %v16374_v24 = vld [vmem:[#allocation3 + $0x94] sm:$0xff] }
 0x656   : > { %v16376_v42 = vld [vmem:[#allocation3 + $0xb0] sm:$0xff] }
 0x657   : > { %v7000_v21 = vadd.f32 %v6978_v51, %v6823_v46  ;;  %12448 = vmatmul.msk.f32.gmra.mxu0 %vm1130_vm1, %v16360_v53  ;;  %12475 = vmatmul.msk.f32.gmra.mxu1 %vm1130_vm1, %v16087_v54  ;;  %17863 = vst [vmem:[#allocation15_spill] sm:$0xff] %v16376_v42 }
 0x658   : > { %12495 = vmatmul.msk.f32.gmra.mxu2 %vm1130_vm1, %v16056_v31  ;;  %v16382_v31 = vld [vmem:[#allocation3 + $0xb1] sm:$0xff] }
 0x659   : > { %12509 = vmatmul.msk.f32.gmra.mxu3 %vm1130_vm1, %v7903_v56  ;;  %v16369_v48 = vadd.f32 %v7155_v44, %v7000_v21  ;;  %17864 = vst [vmem:[#allocation16_spill] sm:$0xff] %v16382_v31 }
 0x65b   : > { %v7815_v33 = vpop.f32.mrf.mxu2 }
 0x65c   : > { %v7320_v12 = vpop.f32.mrf.mxu3  ;;  %v7452_v61 = vpop.f32.mrf.mxu0 }
 0x65d   : > { %v16371_v60 = vadd.f32 %v7320_v12, %v7173_v32  ;;  %v7512_v51 = vadd.f32 %v7452_v61, %v16125_v15  ;;  %v7641_v50 = vpop.f32.mrf.mxu1  ;;  %v7904_v32 = vld [vmem:[#allocation3 + $0x82] sm:$0xff] }
 0x65e   : > { %v16393_v61 = vld [vmem:[#allocation3 + $0x9c] sm:$0xff] }
 0x65f   : > { %v7695_v54 = vadd.f32 %v7635_v9, %v7512_v51  ;;  %12449 = vmatmul.msk.f32.gmra.mxu0 %vm1130_vm1, %v16374_v24  ;;  %12476 = vmatmul.msk.f32.gmra.mxu1 %vm1130_vm1, %v16376_v42  ;;  %v16395_v51 = vld [vmem:[#allocation3 + $0xb8] sm:$0xff] }
 0x660   : > { %12496 = vmatmul.msk.f32.gmra.mxu2 %vm1130_vm1, %v16382_v31  ;;  %17865 = vst [vmem:[#allocation7_spill] sm:$0xff] %v16395_v51  ;;  %v16412_v31 = vld [vmem:[#allocation3 + $0xa4] sm:$0xff] }
 0x661   : > { %12510 = vmatmul.msk.f32.gmra.mxu3 %vm1130_vm1, %v7904_v32  ;;  %v16387_v15 = vadd.f32 %v7812_v8, %v7695_v54  ;;  %v16401_v8 = vld [vmem:[#allocation3 + $0xb9] sm:$0xff] }
 0x663   : > { %v7818_v44 = vpop.f32.mrf.mxu2 }
 0x664   : > { %v7323_v46 = vpop.f32.mrf.mxu3  ;;  %v7455_v21 = vpop.f32.mrf.mxu0 }
 0x665   : > { %v16390_v9 = vadd.f32 %v7323_v46, %v16322_v49  ;;  %v7513_v56 = vadd.f32 %v7455_v21, %v16140_v10  ;;  %v7644_v12 = vpop.f32.mrf.mxu1  ;;  %v7905_v49 = vld [vmem:[#allocation3 + $0x8a] sm:$0xff] }
 0x667   : > { %v7696_v42 = vadd.f32 %v7638_v39, %v7513_v56  ;;  %12450 = vmatmul.msk.f32.gmra.mxu0 %vm1130_vm1, %v16393_v61  ;;  %12477 = vmatmul.msk.f32.gmra.mxu1 %vm1130_vm1, %v16395_v51 }
 0x668   : > { %12497 = vmatmul.msk.f32.gmra.mxu2 %vm1130_vm1, %v16401_v8 }
 0x669   : > { %12511 = vmatmul.msk.f32.gmra.mxu3 %vm1130_vm1, %v7905_v49  ;;  %v16406_v10 = vadd.f32 %v7815_v33, %v7696_v42  ;;  %v7906_v33 = vld [vmem:[#allocation3 + $0x92] sm:$0xff] }
 0x66b   : > { %v7821_v54 = vpop.f32.mrf.mxu2 }
 0x66c   : > { %v7326_v32 = vpop.f32.mrf.mxu3  ;;  %v7458_v46 = vpop.f32.mrf.mxu0 }
 0x66d   : > { %v16409_v39 = vadd.f32 %v7326_v32, %v16339_v28  ;;  %v7514_v21 = vadd.f32 %v7458_v46, %v16157_v0  ;;  %v7647_v56 = vpop.f32.mrf.mxu1 }
 0x66f   : > { %v7697_v51 = vadd.f32 %v7641_v50, %v7514_v21  ;;  %12451 = vmatmul.msk.f32.gmra.mxu0 %vm1130_vm1, %v16412_v31  ;;  %12538 = vmatmul.msk.f32.vlgmr.msra.gmra.mxu1 %vm1130_vm1, %v16143_v43  ;;  %v16427_v21 = vld [vmem:[#allocation3 + $0xac] sm:$0xff] }
 0x670   : > { %12563 = vmatmul.msk.f32.vlgmr.msra.gmra.mxu2 %vm1130_vm1, %v16101_v18  ;;  %v7907_v18 = vld [vmem:[#allocation3 + $0x9a] sm:$0xff] }
 0x671   : > { %12512 = vmatmul.msk.f32.gmra.mxu3 %vm1130_vm1, %v7906_v33  ;;  %v16421_v28 = vadd.f32 %v7818_v44, %v7697_v51 }
 0x673   : > { %v7824_v42 = vpop.f32.mrf.mxu2 }
 0x674   : > { %v7329_v0 = vpop.f32.mrf.mxu3  ;;  %v7461_v49 = vpop.f32.mrf.mxu0 }
 0x675   : > { %v16424_v32 = vadd.f32 %v7329_v0, %v16354_v4  ;;  %v7515_v50 = vadd.f32 %v7461_v49, %v16174_v5  ;;  %v7650_v46 = vpop.f32.mrf.mxu1  ;;  %v8069_v49 = vld [vmem:[#allocation3 + $0x23] sm:$0xff] }
 0x677   : > { %v7698_v43 = vadd.f32 %v7644_v12, %v7515_v50  ;;  %12452 = vmatmul.msk.f32.gmra.mxu0 %vm1130_vm1, %v16427_v21  ;;  %12539 = vmatmul.msk.f32.gmra.mxu1 %vm1130_vm1, %v16160_v20  ;;  %v12560_v20 = vld [vmem:[%s17768_s3 + $0x88] sm:$0xff] }
 0x678   : > { %12564 = vmatmul.msk.f32.gmra.mxu2 %vm1130_vm1, %v16128_v26  ;;  %v12562_v26 = vld [vmem:[%s17768_s3 + $0x98] sm:$0xff]  ;;  %8878 = vmatpush.msra.mxu0 %v12560_v20 }
 0x679   : > { %12513 = vmatmul.msk.f32.gmra.mxu3 %vm1130_vm1, %v7907_v18  ;;  %v16436_v4 = vadd.f32 %v7821_v54, %v7698_v43  ;;  %9232 = vmatpush.msrb.mxu2 %v12562_v26  ;;  %v16478_v26 = vld [vmem:[#allocation3 + $0x33] sm:$0xff] }
 0x67b   : > { %v7827_v44 = vpop.f32.mrf.mxu2 }
 0x67c   : > { %v7332_v5 = vpop.f32.mrf.mxu3  ;;  %v7464_v51 = vpop.f32.mrf.mxu0 }
 0x67d   : > { %v16439_v33 = vadd.f32 %v7332_v5, %v16369_v48  ;;  %v7516_v12 = vadd.f32 %v7464_v51, %v16191_v14  ;;  %v7653_v0 = vpop.f32.mrf.mxu1  ;;  %v12663_v14 = vld [vmem:[%s17768_s3 + $0xa0] sm:$0xff]  ;;  %v8070_v5 = vld [vmem:[#allocation3 + $0x2b] sm:$0xff] }
 0x67e   : > { %9415 = vmatpush.msra.mxu3 %v12663_v14 }
 0x67f   : > { %v7699_v50 = vadd.f32 %v7647_v56, %v7516_v12  ;;  %12518 = vmatmul.msk.f32.vlgmr.msrb.gmra.mxu0 %vm1130_vm1, %v8069_v49  ;;  %12540 = vmatmul.msk.f32.gmra.mxu1 %vm1130_vm1, %v16177_v30 }
 0x680   : > { %12565 = vmatmul.msk.f32.gmra.mxu2 %vm1130_vm1, %v16145_v47  ;;  %v12561_v47 = vld [vmem:[%s17768_s3 + $0x90] sm:$0xff] }
 0x681   : > { %12514 = vmatmul.msk.f32.gmra.mxu3 %vm1130_vm1, %v16045_v16  ;;  %v16458_v30 = vadd.f32 %v7824_v42, %v7699_v50  ;;  %9055 = vmatpush.msrb.mxu1 %v12561_v47  ;;  %v16491_v47 = vld [vmem:[#allocation3 + $0x3b] sm:$0xff] }
 0x683   : > { %v7830_v48 = vpop.f32.mrf.mxu2 }
 0x684   : > { %v7989_v54 = vpop.f32.mrf.mxu3  ;;  %v7467_v16 = vpop.f32.mrf.mxu0 }
 0x685   : > { %v16464_v56 = vadd.f32 %v7989_v54, %v16387_v15  ;;  %v7517_v43 = vadd.f32 %v7467_v16, %v16208_v63  ;;  %v7656_v18 = vpop.f32.mrf.mxu1 }
 0x687   : > { %v7700_v51 = vadd.f32 %v7650_v46, %v7517_v43  ;;  %12519 = vmatmul.msk.f32.gmra.mxu0 %vm1130_vm1, %v8070_v5  ;;  %12541 = vmatmul.msk.f32.gmra.mxu1 %vm1130_vm1, %v16194_v40  ;;  %v16504_v5 = vld [vmem:[#allocation3 + $0x43] sm:$0xff] }
 0x688   : > { %12566 = vmatmul.msk.f32.gmra.mxu2 %vm1130_vm1, %v16162_v11 }
 0x689   : > { %12515 = vmatmul.msk.f32.gmra.mxu3 %vm1130_vm1, %v16062_v38  ;;  %v7877_v42 = vadd.f32 %v7827_v44, %v7700_v51  ;;  %v7910_v38 = vld [vmem:[#allocation3 + $0xb2] sm:$0xff] }
 0x68b   : > { %v7833_v12 = vpop.f32.mrf.mxu2 }
 0x68c   : > { %v7992_v15 = vpop.f32.mrf.mxu3  ;;  %v7470_v49 = vpop.f32.mrf.mxu0 }
 0x68d   : > { %v16475_v63 = vadd.f32 %v7992_v15, %v16406_v10  ;;  %v7518_v46 = vadd.f32 %v7470_v49, %v16225_v41  ;;  %v7659_v50 = vpop.f32.mrf.mxu1 }
 0x68f   : > { %v7701_v20 = vadd.f32 %v7653_v0, %v7518_v46  ;;  %12520 = vmatmul.msk.f32.gmra.mxu0 %vm1130_vm1, %v16478_v26  ;;  %12542 = vmatmul.msk.f32.gmra.mxu1 %vm1130_vm1, %v16211_v58 }
 0x690   : > { %12567 = vmatmul.msk.f32.gmra.mxu2 %vm1130_vm1, %v16179_v37  ;;  %v7911_v37 = vld [vmem:[#allocation3 + $0xba] sm:$0xff] }
 0x691   : > { %12516 = vmatmul.msk.f32.gmra.mxu3 %vm1130_vm1, %v7910_v38  ;;  %v7878_v11 = vadd.f32 %v7830_v48, %v7701_v20 }
 0x693   : > { %v7836_v40 = vpop.f32.mrf.mxu2 }
 0x694   : > { %v7995_v10 = vpop.f32.mrf.mxu3  ;;  %v7473_v41 = vpop.f32.mrf.mxu0 }
 0x695   : > { %v16488_v44 = vadd.f32 %v7995_v10, %v16421_v28  ;;  %v7519_v0 = vadd.f32 %v7473_v41, %v16242_v13  ;;  %v7662_v14 = vpop.f32.mrf.mxu1 }
 0x697   : > { %v7702_v54 = vadd.f32 %v7656_v18, %v7519_v0  ;;  %12521 = vmatmul.msk.f32.gmra.mxu0 %vm1130_vm1, %v16491_v47  ;;  %12543 = vmatmul.msk.f32.gmra.mxu1 %vm1130_vm1, %v16228_v52  ;;  %v16529_v0 = vld [vmem:[#allocation3 + $0x53] sm:$0xff] }
 0x698   : > { %12568 = vmatmul.msk.f32.gmra.mxu2 %vm1130_vm1, %v16196_v36  ;;  %v8606_v36 = vld [vmem:[#allocation3 + $0x31] sm:$0xff] }
 0x699   : > { %12517 = vmatmul.msk.f32.gmra.mxu3 %vm1130_vm1, %v7911_v37  ;;  %v7879_v58 = vadd.f32 %v7833_v12, %v7702_v54 }
 0x69b   : > { %v7839_v28 = vpop.f32.mrf.mxu2 }
 0x69c   : > { %v7998_v48 = vpop.f32.mrf.mxu3  ;;  %v7476_v13 = vpop.f32.mrf.mxu0 }
 0x69d   : > { %v16501_v16 = vadd.f32 %v7998_v48, %v16436_v4  ;;  %v7520_v43 = vadd.f32 %v7476_v13, %v16259_v7  ;;  %v7665_v18 = vpop.f32.mrf.mxu1  ;;  %v16541_v13 = vld [vmem:[#allocation3 + $0x5b] sm:$0xff] }
 0x69f   : > { %v7703_v51 = vadd.f32 %v7659_v50, %v7520_v43  ;;  %12522 = vmatmul.msk.f32.gmra.mxu0 %vm1130_vm1, %v16504_v5  ;;  %12544 = vmatmul.msk.f32.gmra.mxu1 %vm1130_vm1, %v16245_v29  ;;  %v16517_v50 = vld [vmem:[#allocation3 + $0x4b] sm:$0xff] }
 0x6a0   : > { %12569 = vmatmul.msk.f32.gmra.mxu2 %vm1130_vm1, %v16213_v45  ;;  %v8607_v45 = vld [vmem:[#allocation3 + $0x39] sm:$0xff] }
 0x6a1   : > { %12583 = vmatmul.msk.f32.vlgmr.msrb.gmra.mxu3 %vm1130_vm1, %v8606_v36  ;;  %v7880_v52 = vadd.f32 %v7836_v40, %v7703_v51 }
 0x6a3   : > { %v7842_v4 = vpop.f32.mrf.mxu2 }
 0x6a4   : > { %v8001_v12 = vpop.f32.mrf.mxu3  ;;  %v7479_v7 = vpop.f32.mrf.mxu0 }
 0x6a5   : > { %v16514_v15 = vadd.f32 %v8001_v12, %v16458_v30  ;;  %v7521_v49 = vadd.f32 %v7479_v7, %v16276_v2  ;;  %v7668_v46 = vpop.f32.mrf.mxu1  ;;  %v16553_v12 = vld [vmem:[#allocation3 + $0x63] sm:$0xff] }
 0x6a7   : > { %v7704_v20 = vadd.f32 %v7662_v14, %v7521_v49  ;;  %12523 = vmatmul.msk.f32.gmra.mxu0 %vm1130_vm1, %v16517_v50  ;;  %12545 = vmatmul.msk.f32.gmra.mxu1 %vm1130_vm1, %v16262_v57 }
 0x6a8   : > { %12570 = vmatmul.msk.f32.gmra.mxu2 %vm1130_vm1, %v16230_v6  ;;  %v8608_v6 = vld [vmem:[#allocation3 + $0x41] sm:$0xff] }
 0x6a9   : > { %12584 = vmatmul.msk.f32.gmra.mxu3 %vm1130_vm1, %v8607_v45  ;;  %v7881_v29 = vadd.f32 %v7839_v28, %v7704_v20 }
 0x6ab   : > { %v7845_v30 = vpop.f32.mrf.mxu2 }
 0x6ac   : > { %v8004_v38 = vpop.f32.mrf.mxu3  ;;  %v7482_v2 = vpop.f32.mrf.mxu0 }
 0x6ad   : > { %v16526_v40 = vadd.f32 %v8004_v38, %v7877_v42  ;;  %v7522_v10 = vadd.f32 %v7482_v2, %v16293_v59  ;;  %v7671_v41 = vpop.f32.mrf.mxu1  ;;  %v16565_v38 = vld [vmem:[#allocation3 + $0x6b] sm:$0xff] }
 0x6af   : > { %v7705_v14 = vadd.f32 %v7665_v18, %v7522_v10  ;;  %12524 = vmatmul.msk.f32.gmra.mxu0 %vm1130_vm1, %v16529_v0  ;;  %12546 = vmatmul.msk.f32.gmra.mxu1 %vm1130_vm1, %v16279_v1  ;;  %v8611_v10 = vld [vmem:[#allocation3 + $0x59] sm:$0xff] }
 0x6b0   : > { %12571 = vmatmul.msk.f32.gmra.mxu2 %vm1130_vm1, %v16247_v34  ;;  %v8609_v34 = vld [vmem:[#allocation3 + $0x49] sm:$0xff] }
 0x6b1   : > { %12585 = vmatmul.msk.f32.gmra.mxu3 %vm1130_vm1, %v8608_v6  ;;  %v7882_v57 = vadd.f32 %v7842_v4, %v7705_v14 }
 0x6b3   : > { %v7848_v42 = vpop.f32.mrf.mxu2 }
 0x6b4   : > { %v8007_v54 = vpop.f32.mrf.mxu3  ;;  %v7485_v59 = vpop.f32.mrf.mxu0 }
 0x6b5   : > { %v16538_v37 = vadd.f32 %v8007_v54, %v7878_v11  ;;  %v7523_v28 = vadd.f32 %v7485_v59, %v16308_v35  ;;  %v7674_v48 = vpop.f32.mrf.mxu1  ;;  %v16577_v59 = vld [vmem:[#allocation3 + $0x73] sm:$0xff] }
 0x6b7   : > { %v7706_v43 = vadd.f32 %v7668_v46, %v7523_v28  ;;  %12525 = vmatmul.msk.f32.gmra.mxu0 %vm1130_vm1, %v16541_v13  ;;  %12547 = vmatmul.msk.f32.gmra.mxu1 %vm1130_vm1, %v16296_v25  ;;  %v8610_v25 = vld [vmem:[#allocation3 + $0x51] sm:$0xff] }
 0x6b8   : > { %12572 = vmatmul.msk.f32.gmra.mxu2 %vm1130_vm1, %v16264_v62  ;;  %v17866_v62 = vld [vmem:[#allocation12_spill] sm:$0xff] }
 0x6b9   : > { %12586 = vmatmul.msk.f32.gmra.mxu3 %vm1130_vm1, %v8609_v34  ;;  %v7883_v1 = vadd.f32 %v7845_v30, %v7706_v43 }
 0x6bb   : > { %v7851_v11 = vpop.f32.mrf.mxu2 }
 0x6bc   : > { %v8010_v18 = vpop.f32.mrf.mxu3  ;;  %v7488_v35 = vpop.f32.mrf.mxu0 }
 0x6bd   : > { %v16550_v51 = vadd.f32 %v8010_v18, %v7879_v58  ;;  %v7524_v36 = vadd.f32 %v7488_v35, %v16325_v55  ;;  %v7677_v4 = vpop.f32.mrf.mxu1 }
 0x6bf   : > { %v7707_v7 = vadd.f32 %v7671_v41, %v7524_v36  ;;  %12526 = vmatmul.msk.f32.gmra.mxu0 %vm1130_vm1, %v16553_v12  ;;  %12548 = vmatmul.msk.f32.gmra.mxu1 %vm1130_vm1, %v16311_v19  ;;  %v17867_v19 = vld [vmem:[#allocation13_spill] sm:$0xff] }
 0x6c0   : > { %12573 = vmatmul.msk.f32.gmra.mxu2 %vm1130_vm1, %v17866_v62  ;;  %v16589_v36 = vld [vmem:[#allocation3 + $0x7b] sm:$0xff] }
 0x6c1   : > { %12587 = vmatmul.msk.f32.gmra.mxu3 %vm1130_vm1, %v8610_v25  ;;  %v7884_v58 = vadd.f32 %v7848_v42, %v7707_v7 }
 0x6c3   : > { %v7854_v49 = vpop.f32.mrf.mxu2 }
 0x6c4   : > { %v8013_v46 = vpop.f32.mrf.mxu3  ;;  %v7491_v55 = vpop.f32.mrf.mxu0 }
 0x6c5   : > { %v16562_v20 = vadd.f32 %v8013_v46, %v7880_v52  ;;  %v7525_v45 = vadd.f32 %v7491_v55, %v16342_v3  ;;  %v7680_v30 = vpop.f32.mrf.mxu1  ;;  %v16601_v55 = vld [vmem:[#allocation3 + $0x83] sm:$0xff] }
 0x6c7   : > { %v7708_v2 = vadd.f32 %v7674_v48, %v7525_v45  ;;  %12527 = vmatmul.msk.f32.gmra.mxu0 %vm1130_vm1, %v16565_v38  ;;  %12549 = vmatmul.msk.f32.gmra.mxu1 %vm1130_vm1, %v16328_v17  ;;  %v17868_v17 = vld [vmem:[#allocation6_spill] sm:$0xff] }
 0x6c8   : > { %12574 = vmatmul.msk.f32.gmra.mxu2 %vm1130_vm1, %v17867_v19  ;;  %v8612_v48 = vld [vmem:[#allocation3 + $0x61] sm:$0xff] }
 0x6c9   : > { %12588 = vmatmul.msk.f32.gmra.mxu3 %vm1130_vm1, %v8611_v10  ;;  %v7885_v52 = vadd.f32 %v7851_v11, %v7708_v2 }
 0x6cb   : > { %v7857_v41 = vpop.f32.mrf.mxu2 }
 0x6cc   : > { %v8016_v14 = vpop.f32.mrf.mxu3  ;;  %v7494_v3 = vpop.f32.mrf.mxu0 }
 0x6cd   : > { %v16574_v6 = vadd.f32 %v8016_v14, %v7881_v29  ;;  %v7526_v42 = vadd.f32 %v7494_v3, %v16357_v22  ;;  %v7683_v54 = vpop.f32.mrf.mxu1  ;;  %v16617_v14 = vld [vmem:[#allocation3 + $0x8b] sm:$0xff] }
 0x6ce   : > { %v16623_v3 = vld [vmem:[#allocation3 + $0xa8] sm:$0xff] }
 0x6cf   : > { %v7709_v28 = vadd.f32 %v7677_v4, %v7526_v42  ;;  %12528 = vmatmul.msk.f32.gmra.mxu0 %vm1130_vm1, %v16577_v59  ;;  %12550 = vmatmul.msk.f32.gmra.mxu1 %vm1130_vm1, %v16345_v27  ;;  %v8613_v27 = vld [vmem:[#allocation3 + $0x69] sm:$0xff]  ;;  %v8615_v42 = vld [vmem:[#allocation3 + $0x79] sm:$0xff] }
 0x6d0   : > { %12575 = vmatmul.msk.f32.gmra.mxu2 %vm1130_vm1, %v17868_v17 }
 0x6d1   : > { %12589 = vmatmul.msk.f32.gmra.mxu3 %vm1130_vm1, %v8612_v48  ;;  %v7886_v29 = vadd.f32 %v7854_v49, %v7709_v28 }
 0x6d3   : > { %v7860_v43 = vpop.f32.mrf.mxu2 }
 0x6d4   : > { %v8019_v34 = vpop.f32.mrf.mxu3  ;;  %v7497_v22 = vpop.f32.mrf.mxu0 }
 0x6d5   : > { %v16586_v11 = vadd.f32 %v8019_v34, %v7882_v57  ;;  %v7527_v18 = vadd.f32 %v7497_v22, %v16371_v60  ;;  %v7686_v35 = vpop.f32.mrf.mxu1  ;;  %v16633_v34 = vld [vmem:[#allocation3 + $0x93] sm:$0xff] }
 0x6d6   : > { %v17869_v22 = vld [vmem:[#allocation15_spill] sm:$0xff] }
 0x6d7   : > { %v7710_v4 = vadd.f32 %v7680_v30, %v7527_v18  ;;  %12529 = vmatmul.msk.f32.gmra.mxu0 %vm1130_vm1, %v16589_v36  ;;  %12551 = vmatmul.msk.f32.gmra.mxu1 %vm1130_vm1, %v16360_v53  ;;  %v8614_v53 = vld [vmem:[#allocation3 + $0x71] sm:$0xff]  ;;  %v8616_v18 = vld [vmem:[#allocation3 + $0x81] sm:$0xff] }
 0x6d8   : > { %12576 = vmatmul.msk.f32.gmra.mxu2 %vm1130_vm1, %v16330_v23  ;;  %v16607_v23 = vld [vmem:[#allocation3 + $0xa0] sm:$0xff] }
 0x6d9   : > { %12590 = vmatmul.msk.f32.gmra.mxu3 %vm1130_vm1, %v8613_v27  ;;  %v7887_v57 = vadd.f32 %v7857_v41, %v7710_v4 }
 0x6db   : > { %v7863_v7 = vpop.f32.mrf.mxu2 }
 0x6dc   : > { %v8022_v62 = vpop.f32.mrf.mxu3  ;;  %v7500_v60 = vpop.f32.mrf.mxu0 }
 0x6dd   : > { %v16598_v25 = vadd.f32 %v8022_v62, %v7883_v1  ;;  %v7528_v49 = vadd.f32 %v7500_v60, %v16390_v9  ;;  %v7689_v46 = vpop.f32.mrf.mxu1  ;;  %v16647_v60 = vld [vmem:[#allocation3 + $0x9b] sm:$0xff] }
 0x6df   : > { %v7711_v45 = vadd.f32 %v7683_v54, %v7528_v49  ;;  %12530 = vmatmul.msk.f32.gmra.mxu0 %vm1130_vm1, %v16601_v55  ;;  %12552 = vmatmul.msk.f32.gmra.mxu1 %vm1130_vm1, %v16374_v24 }
 0x6e0   : > { %12577 = vmatmul.msk.f32.gmra.mxu2 %vm1130_vm1, %v16607_v23 }
 0x6e1   : > { %12591 = vmatmul.msk.f32.gmra.mxu3 %vm1130_vm1, %v8614_v53  ;;  %v16612_v1 = vadd.f32 %v7860_v43, %v7711_v45 }
 0x6e3   : > { %v7866_v9 = vpop.f32.mrf.mxu2 }
 0x6e4   : > { %v8025_v30 = vpop.f32.mrf.mxu3  ;;  %v7503_v2 = vpop.f32.mrf.mxu0 }
 0x6e5   : > { %v16614_v19 = vadd.f32 %v8025_v30, %v7884_v58  ;;  %v7529_v10 = vadd.f32 %v7503_v2, %v16409_v39  ;;  %v7692_v41 = vpop.f32.mrf.mxu1 }
 0x6e7   : > { %v7712_v24 = vadd.f32 %v7686_v35, %v7529_v10  ;;  %12531 = vmatmul.msk.f32.gmra.mxu0 %vm1130_vm1, %v16617_v14  ;;  %12553 = vmatmul.msk.f32.gmra.mxu1 %vm1130_vm1, %v16393_v61  ;;  %v16661_v10 = vld [vmem:[#allocation3 + $0xa3] sm:$0xff] }
 0x6e8   : > { %12578 = vmatmul.msk.f32.gmra.mxu2 %vm1130_vm1, %v16623_v3 }
 0x6e9   : > { %12592 = vmatmul.msk.f32.gmra.mxu3 %vm1130_vm1, %v8615_v42  ;;  %v16628_v58 = vadd.f32 %v7863_v7, %v7712_v24  ;;  %v16669_v24 = vld [vmem:[#allocation3 + $0xc0] sm:$0xff] }
 0x6eb   : > { %v7869_v39 = vpop.f32.mrf.mxu2 }
 0x6ec   : > { %v8028_v54 = vpop.f32.mrf.mxu3  ;;  %v7506_v28 = vpop.f32.mrf.mxu0 }
 0x6ed   : > { %v16630_v17 = vadd.f32 %v8028_v54, %v7885_v52  ;;  %v7530_v48 = vadd.f32 %v7506_v28, %v16424_v32  ;;  %v8343_v43 = vpop.f32.mrf.mxu1 }
 0x6ef   : > { %v7713_v61 = vadd.f32 %v7689_v46, %v7530_v48  ;;  %12532 = vmatmul.msk.f32.gmra.mxu0 %vm1130_vm1, %v16633_v34  ;;  %12554 = vmatmul.msk.f32.gmra.mxu1 %vm1130_vm1, %v16412_v31  ;;  %v17870_v31 = vld [vmem:[#allocation7_spill] sm:$0xff] }
 0x6f0   : > { %12579 = vmatmul.msk.f32.gmra.mxu2 %vm1130_vm1, %v17869_v22  ;;  %v8617_v46 = vld [vmem:[#allocation3 + $0x89] sm:$0xff]  ;;  %v16682_v22 = vld [vmem:[#allocation3 + $0xbc] sm:$0xff] }
 0x6f1   : > { %12593 = vmatmul.msk.f32.gmra.mxu3 %vm1130_vm1, %v8616_v18  ;;  %v16642_v52 = vadd.f32 %v7866_v9, %v7713_v61  ;;  %v16680_v61 = vld [vmem:[#allocation3 + $0xab] sm:$0xff] }
 0x6f3   : > { %v8526_v35 = vpop.f32.mrf.mxu2 }
 0x6f4   : > { %v8031_v32 = vpop.f32.mrf.mxu3  ;;  %v7509_v4 = vpop.f32.mrf.mxu0 }
 0x6f5   : > { %v16644_v27 = vadd.f32 %v8031_v32, %v7886_v29  ;;  %v7531_v7 = vadd.f32 %v7509_v4, %v16439_v33  ;;  %v8346_v62 = vpop.f32.mrf.mxu1 }
 0x6f7   : > { %v7714_v49 = vadd.f32 %v7692_v41, %v7531_v7  ;;  %12533 = vmatmul.msk.f32.gmra.mxu0 %vm1130_vm1, %v16647_v60  ;;  %12555 = vmatmul.msk.f32.gmra.mxu1 %vm1130_vm1, %v16427_v21  ;;  %v16663_v41 = vld [vmem:[#allocation3 + $0xb4] sm:$0xff] }
 0x6f8   : > { %12580 = vmatmul.msk.f32.gmra.mxu2 %vm1130_vm1, %v17870_v31 }
 0x6f9   : > { %12594 = vmatmul.msk.f32.gmra.mxu3 %vm1130_vm1, %v8617_v46  ;;  %v16656_v29 = vadd.f32 %v7869_v39, %v7714_v49  ;;  %v16699_v46 = vld [vmem:[#allocation3 + $0xb3] sm:$0xff] }
 0x6fb   : > { %v8529_v45 = vpop.f32.mrf.mxu2 }
 0x6fc   : > { %v8034_v33 = vpop.f32.mrf.mxu3  ;;  %v8166_v53 = vpop.f32.mrf.mxu0 }
 0x6fd   : > { %v16658_v9 = vadd.f32 %v8034_v33, %v7887_v57  ;;  %v8226_v30 = vadd.f32 %v8166_v53, %v16464_v56  ;;  %v8349_v2 = vpop.f32.mrf.mxu1  ;;  %v8618_v57 = vld [vmem:[#allocation3 + $0x91] sm:$0xff]  ;;  %v8620_v53 = vld [vmem:[#allocation3 + $0xa1] sm:$0xff] }
 0x6ff   : > { %v8403_v21 = vadd.f32 %v8343_v43, %v8226_v30  ;;  %12534 = vmatmul.msk.f32.gmra.mxu0 %vm1130_vm1, %v16661_v10  ;;  %12556 = vmatmul.msk.f32.gmra.mxu1 %vm1130_vm1, %v16663_v41 }
 0x700   : > { %12581 = vmatmul.msk.f32.gmra.mxu2 %vm1130_vm1, %v16669_v24 }
 0x701   : > { %12595 = vmatmul.msk.f32.gmra.mxu3 %vm1130_vm1, %v8618_v57  ;;  %v16674_v56 = vadd.f32 %v8526_v35, %v8403_v21  ;;  %v16688_v35 = vld [vmem:[#allocation3 + $0xc8] sm:$0xff] }
 0x703   : > { %v8532_v42 = vpop.f32.mrf.mxu2 }
 0x704   : > { %v8037_v39 = vpop.f32.mrf.mxu3  ;;  %v8169_v54 = vpop.f32.mrf.mxu0 }
 0x705   : > { %v16677_v28 = vadd.f32 %v8037_v39, %v16612_v1  ;;  %v8227_v48 = vadd.f32 %v8169_v54, %v16475_v63  ;;  %v8352_v43 = vpop.f32.mrf.mxu1  ;;  %v8619_v1 = vld [vmem:[#allocation3 + $0x99] sm:$0xff] }
 0x706   : > { %v16713_v54 = vld [vmem:[#allocation3 + $0xbb] sm:$0xff] }
 0x707   : > { %v8404_v18 = vadd.f32 %v8346_v62, %v8227_v48  ;;  %12535 = vmatmul.msk.f32.gmra.mxu0 %vm1130_vm1, %v16680_v61  ;;  %12557 = vmatmul.msk.f32.gmra.mxu1 %vm1130_vm1, %v16682_v22  ;;  %v8621_v48 = vld [vmem:[#allocation3 + $0xa9] sm:$0xff] }
 0x708   : > { %12582 = vmatmul.msk.f32.gmra.mxu2 %vm1130_vm1, %v16688_v35 }
 0x709   : > { %12596 = vmatmul.msk.f32.gmra.mxu3 %vm1130_vm1, %v8619_v1  ;;  %v16693_v63 = vadd.f32 %v8529_v45, %v8404_v18  ;;  %v9137_v45 = vld [vmem:[#allocation3 + $0x34] sm:$0xff] }
 0x70b   : > { %v8535_v32 = vpop.f32.mrf.mxu2 }
 0x70c   : > { %v8040_v4 = vpop.f32.mrf.mxu3  ;;  %v8172_v7 = vpop.f32.mrf.mxu0 }
 0x70d   : > { %v16696_v62 = vadd.f32 %v8040_v4, %v16628_v58  ;;  %v8228_v49 = vadd.f32 %v8172_v7, %v16488_v44  ;;  %v8355_v31 = vpop.f32.mrf.mxu1 }
 0x70f   : > { %v8405_v33 = vadd.f32 %v8349_v2, %v8228_v49  ;;  %12536 = vmatmul.msk.f32.gmra.mxu0 %vm1130_vm1, %v16699_v46  ;;  %12623 = vmatmul.msk.f32.vlgmr.msrb.gmra.mxu1 %vm1130_vm1, %v16478_v26  ;;  %v8783_v49 = vld [vmem:[#allocation3 + $0x32] sm:$0xff] }
 0x710   : > { %12643 = vmatmul.msk.f32.vlgmr.msrb.gmra.mxu2 %vm1130_vm1, %v9137_v45 }
 0x711   : > { %12597 = vmatmul.msk.f32.gmra.mxu3 %vm1130_vm1, %v8620_v53  ;;  %v16707_v58 = vadd.f32 %v8532_v42, %v8405_v33  ;;  %v9138_v42 = vld [vmem:[#allocation3 + $0x3c] sm:$0xff]  ;;  %v12665_v53 = vld [vmem:[%s17768_s3 + $0xb0] sm:$0xff] }
 0x712   : > { %9769 = vmatpush.msra.mxu1 %v12665_v53 }
 0x713   : > { %v8538_v30 = vpop.f32.mrf.mxu2 }
 0x714   : > { %v8043_v44 = vpop.f32.mrf.mxu3  ;;  %v8175_v21 = vpop.f32.mrf.mxu0 }
 0x715   : > { %v16710_v57 = vadd.f32 %v8043_v44, %v16642_v52  ;;  %v8229_v2 = vadd.f32 %v8175_v21, %v16501_v16  ;;  %v8358_v39 = vpop.f32.mrf.mxu1 }
 0x717   : > { %v8406_v26 = vadd.f32 %v8352_v43, %v8229_v2  ;;  %12537 = vmatmul.msk.f32.gmra.mxu0 %vm1130_vm1, %v16713_v54  ;;  %12624 = vmatmul.msk.f32.gmra.mxu1 %vm1130_vm1, %v16491_v47  ;;  %v16730_v47 = vld [vmem:[#allocation3 + $0x44] sm:$0xff] }
 0x718   : > { %12644 = vmatmul.msk.f32.gmra.mxu2 %vm1130_vm1, %v9138_v42 }
 0x719   : > { %12598 = vmatmul.msk.f32.gmra.mxu3 %vm1130_vm1, %v8621_v48  ;;  %v16721_v52 = vadd.f32 %v8535_v32, %v8406_v26  ;;  %v12666_v32 = vld [vmem:[%s17768_s3 + $0xb8] sm:$0xff] }
 0x71a   : > { %9946 = vmatpush.msra.mxu2 %v12666_v32  ;;  %v8784_v48 = vld [vmem:[#allocation3 + $0x3a] sm:$0xff] }
 0x71b   : > { %v8541_v18 = vpop.f32.mrf.mxu2 }
 0x71c   : > { %v8046_v16 = vpop.f32.mrf.mxu3  ;;  %v8178_v1 = vpop.f32.mrf.mxu0 }
 0x71d   : > { %v16724_v4 = vadd.f32 %v8046_v16, %v16656_v29  ;;  %v8230_v43 = vadd.f32 %v8178_v1, %v16514_v15  ;;  %v8361_v7 = vpop.f32.mrf.mxu1  ;;  %v17871_v29 = vld [vmem:[#allocation16_spill] sm:$0xff]  ;;  %v12664_v15 = vld [vmem:[%s17768_s3 + $0xa8] sm:$0xff] }
 0x71e   : > { %9592 = vmatpush.msrb.mxu0 %v12664_v15 }
 0x71f   : > { %v8407_v33 = vadd.f32 %v8355_v31, %v8230_v43  ;;  %12603 = vmatmul.msk.f32.vlgmr.msra.gmra.mxu0 %vm1130_vm1, %v8783_v49  ;;  %12625 = vmatmul.msk.f32.gmra.mxu1 %vm1130_vm1, %v16504_v5  ;;  %v12667_v5 = vld [vmem:[%s17768_s3 + $0xc0] sm:$0xff] }
 0x720   : > { %12645 = vmatmul.msk.f32.gmra.mxu2 %vm1130_vm1, %v16730_v47  ;;  %10123 = vmatpush.msrb.mxu3 %v12667_v5 }
 0x721   : > { %12599 = vmatmul.msk.f32.gmra.mxu3 %vm1130_vm1, %v17871_v29  ;;  %v16745_v31 = vadd.f32 %v8538_v30, %v8407_v33  ;;  %v16757_v30 = vld [vmem:[#allocation3 + $0x4c] sm:$0xff] }
 0x723   : > { %v8544_v45 = vpop.f32.mrf.mxu2 }
 0x724   : > { %v8703_v44 = vpop.f32.mrf.mxu3  ;;  %v8181_v21 = vpop.f32.mrf.mxu0 }
 0x725   : > { %v16751_v2 = vadd.f32 %v8703_v44, %v16674_v56  ;;  %v8231_v26 = vadd.f32 %v8181_v21, %v16526_v40  ;;  %v8364_v42 = vpop.f32.mrf.mxu1  ;;  %v8625_v21 = vld [vmem:[#allocation3 + $0xc9] sm:$0xff] }
 0x727   : > { %v8408_v16 = vadd.f32 %v8358_v39, %v8231_v26  ;;  %12604 = vmatmul.msk.f32.gmra.mxu0 %vm1130_vm1, %v8784_v48  ;;  %12626 = vmatmul.msk.f32.gmra.mxu1 %vm1130_vm1, %v16517_v50  ;;  %v16769_v50 = vld [vmem:[#allocation3 + $0x42] sm:$0xff] }
 0x728   : > { %12646 = vmatmul.msk.f32.gmra.mxu2 %vm1130_vm1, %v16757_v30 }
 0x729   : > { %12600 = vmatmul.msk.f32.gmra.mxu3 %vm1130_vm1, %v16401_v8  ;;  %v16763_v56 = vadd.f32 %v8541_v18, %v8408_v16  ;;  %v16775_v8 = vld [vmem:[#allocation3 + $0x54] sm:$0xff]  ;;  %v8624_v18 = vld [vmem:[#allocation3 + $0xc1] sm:$0xff] }
 0x72b   : > { %v8547_v1 = vpop.f32.mrf.mxu2 }
 0x72c   : > { %v8706_v40 = vpop.f32.mrf.mxu3  ;;  %v8184_v43 = vpop.f32.mrf.mxu0 }
 0x72d   : > { %v16766_v39 = vadd.f32 %v8706_v40, %v16693_v63  ;;  %v8232_v49 = vadd.f32 %v8184_v43, %v16538_v37  ;;  %v8367_v33 = vpop.f32.mrf.mxu1 }
 0x72f   : > { %v8409_v32 = vadd.f32 %v8361_v7, %v8232_v49  ;;  %12605 = vmatmul.msk.f32.gmra.mxu0 %vm1130_vm1, %v16769_v50  ;;  %12627 = vmatmul.msk.f32.gmra.mxu1 %vm1130_vm1, %v16529_v0  ;;  %v16786_v0 = vld [vmem:[#allocation3 + $0x4a] sm:$0xff]  ;;  %v9320_v49 = vld [vmem:[#allocation3 + $0x40] sm:$0xff] }
 0x730   : > { %12647 = vmatmul.msk.f32.gmra.mxu2 %vm1130_vm1, %v16775_v8 }
 0x731   : > { %12601 = vmatmul.msk.f32.gmra.mxu3 %vm1130_vm1, %v8624_v18  ;;  %v16780_v63 = vadd.f32 %v8544_v45, %v8409_v32  ;;  %v16792_v45 = vld [vmem:[#allocation3 + $0x5c] sm:$0xff] }
 0x733   : > { %v8550_v37 = vpop.f32.mrf.mxu2 }
 0x734   : > { %v8709_v29 = vpop.f32.mrf.mxu3  ;;  %v8187_v15 = vpop.f32.mrf.mxu0 }
 0x735   : > { %v16783_v7 = vadd.f32 %v8709_v29, %v16707_v58  ;;  %v8233_v5 = vadd.f32 %v8187_v15, %v16550_v51  ;;  %v8370_v53 = vpop.f32.mrf.mxu1 }
 0x737   : > { %v8410_v44 = vadd.f32 %v8364_v42, %v8233_v5  ;;  %12606 = vmatmul.msk.f32.gmra.mxu0 %vm1130_vm1, %v16786_v0  ;;  %12628 = vmatmul.msk.f32.gmra.mxu1 %vm1130_vm1, %v16541_v13  ;;  %v16803_v13 = vld [vmem:[#allocation3 + $0x52] sm:$0xff] }
 0x738   : > { %12648 = vmatmul.msk.f32.gmra.mxu2 %vm1130_vm1, %v16792_v45 }
 0x739   : > { %12602 = vmatmul.msk.f32.gmra.mxu3 %vm1130_vm1, %v8625_v21  ;;  %v16797_v58 = vadd.f32 %v8547_v1, %v8410_v44  ;;  %v16809_v1 = vld [vmem:[#allocation3 + $0x64] sm:$0xff] }
 0x73a   : > { %v9321_v44 = vld [vmem:[#allocation3 + $0x48] sm:$0xff] }
 0x73b   : > { %v8553_v51 = vpop.f32.mrf.mxu2 }
 0x73c   : > { %v8712_v26 = vpop.f32.mrf.mxu3  ;;  %v8190_v48 = vpop.f32.mrf.mxu0 }
 0x73d   : > { %v16800_v42 = vadd.f32 %v8712_v26, %v16721_v52  ;;  %v8234_v16 = vadd.f32 %v8190_v48, %v16562_v20  ;;  %v8373_v40 = vpop.f32.mrf.mxu1 }
 0x73f   : > { %v8411_v43 = vadd.f32 %v8367_v33, %v8234_v16  ;;  %12607 = vmatmul.msk.f32.gmra.mxu0 %vm1130_vm1, %v16803_v13  ;;  %12629 = vmatmul.msk.f32.gmra.mxu1 %vm1130_vm1, %v16553_v12  ;;  %v16820_v12 = vld [vmem:[#allocation3 + $0x5a] sm:$0xff] }
 0x740   : > { %12649 = vmatmul.msk.f32.gmra.mxu2 %vm1130_vm1, %v16809_v1 }
 0x741   : > { %12668 = vmatmul.msk.f32.vlgmr.msra.gmra.mxu3 %vm1130_vm1, %v9320_v49  ;;  %v16814_v52 = vadd.f32 %v8550_v37, %v8411_v43  ;;  %v16826_v37 = vld [vmem:[#allocation3 + $0x6c] sm:$0xff] }
 0x742   : > { %v9322_v49 = vld [vmem:[#allocation3 + $0x50] sm:$0xff] }
 0x743   : > { %v8556_v20 = vpop.f32.mrf.mxu2 }
 0x744   : > { %v8715_v32 = vpop.f32.mrf.mxu3  ;;  %v8193_v18 = vpop.f32.mrf.mxu0 }
 0x745   : > { %v16817_v33 = vadd.f32 %v8715_v32, %v16745_v31  ;;  %v8235_v29 = vadd.f32 %v8193_v18, %v16574_v6  ;;  %v8376_v15 = vpop.f32.mrf.mxu1 }
 0x747   : > { %v8412_v5 = vadd.f32 %v8370_v53, %v8235_v29  ;;  %12608 = vmatmul.msk.f32.gmra.mxu0 %vm1130_vm1, %v16820_v12  ;;  %12630 = vmatmul.msk.f32.gmra.mxu1 %vm1130_vm1, %v16565_v38  ;;  %v16837_v38 = vld [vmem:[#allocation3 + $0x62] sm:$0xff] }
 0x748   : > { %12650 = vmatmul.msk.f32.gmra.mxu2 %vm1130_vm1, %v16826_v37 }
 0x749   : > { %12669 = vmatmul.msk.f32.gmra.mxu3 %vm1130_vm1, %v9321_v44  ;;  %v16831_v31 = vadd.f32 %v8553_v51, %v8412_v5  ;;  %v16843_v51 = vld [vmem:[#allocation3 + $0x74] sm:$0xff] }
 0x74b   : > { %v8559_v6 = vpop.f32.mrf.mxu2 }
 0x74c   : > { %v8718_v21 = vpop.f32.mrf.mxu3  ;;  %v8196_v26 = vpop.f32.mrf.mxu0 }
 0x74d   : > { %v16834_v53 = vadd.f32 %v8718_v21, %v16763_v56  ;;  %v8236_v48 = vadd.f32 %v8196_v26, %v16586_v11  ;;  %v8379_v16 = vpop.f32.mrf.mxu1  ;;  %v9323_v21 = vld [vmem:[#allocation3 + $0x58] sm:$0xff] }
 0x74f   : > { %v8413_v43 = vadd.f32 %v8373_v40, %v8236_v48  ;;  %12609 = vmatmul.msk.f32.gmra.mxu0 %vm1130_vm1, %v16837_v38  ;;  %12631 = vmatmul.msk.f32.gmra.mxu1 %vm1130_vm1, %v16577_v59  ;;  %v16854_v59 = vld [vmem:[#allocation3 + $0x6a] sm:$0xff] }
 0x750   : > { %12651 = vmatmul.msk.f32.gmra.mxu2 %vm1130_vm1, %v16843_v51 }
 0x751   : > { %12670 = vmatmul.msk.f32.gmra.mxu3 %vm1130_vm1, %v9322_v49  ;;  %v16848_v56 = vadd.f32 %v8556_v20, %v8413_v43  ;;  %v16860_v20 = vld [vmem:[#allocation3 + $0x7c] sm:$0xff] }
 0x753   : > { %v8562_v11 = vpop.f32.mrf.mxu2 }
 0x754   : > { %v8721_v32 = vpop.f32.mrf.mxu3  ;;  %v8199_v18 = vpop.f32.mrf.mxu0 }
 0x755   : > { %v16851_v40 = vadd.f32 %v8721_v32, %v16780_v63  ;;  %v8237_v29 = vadd.f32 %v8199_v18, %v16598_v25  ;;  %v8382_v5 = vpop.f32.mrf.mxu1  ;;  %v9324_v18 = vld [vmem:[#allocation3 + $0x60] sm:$0xff] }
 0x757   : > { %v8414_v44 = vadd.f32 %v8376_v15, %v8237_v29  ;;  %12610 = vmatmul.msk.f32.gmra.mxu0 %vm1130_vm1, %v16854_v59  ;;  %12632 = vmatmul.msk.f32.gmra.mxu1 %vm1130_vm1, %v16589_v36  ;;  %v16871_v36 = vld [vmem:[#allocation3 + $0x72] sm:$0xff] }
 0x758   : > { %12652 = vmatmul.msk.f32.gmra.mxu2 %vm1130_vm1, %v16860_v20 }
 0x759   : > { %12671 = vmatmul.msk.f32.gmra.mxu3 %vm1130_vm1, %v9323_v21  ;;  %v16865_v63 = vadd.f32 %v8559_v6, %v8414_v44  ;;  %v16877_v6 = vld [vmem:[#allocation3 + $0x84] sm:$0xff] }
 0x75b   : > { %v8565_v25 = vpop.f32.mrf.mxu2 }
 0x75c   : > { %v8724_v26 = vpop.f32.mrf.mxu3  ;;  %v8202_v48 = vpop.f32.mrf.mxu0 }
 0x75d   : > { %v16868_v15 = vadd.f32 %v8724_v26, %v16797_v58  ;;  %v8238_v43 = vadd.f32 %v8202_v48, %v16614_v19  ;;  %v8385_v49 = vpop.f32.mrf.mxu1 }
 0x75f   : > { %v8415_v32 = vadd.f32 %v8379_v16, %v8238_v43  ;;  %12611 = vmatmul.msk.f32.gmra.mxu0 %vm1130_vm1, %v16871_v36  ;;  %12633 = vmatmul.msk.f32.gmra.mxu1 %vm1130_vm1, %v16601_v55  ;;  %v16888_v55 = vld [vmem:[#allocation3 + $0x7a] sm:$0xff]  ;;  %v9325_v43 = vld [vmem:[#allocation3 + $0x68] sm:$0xff] }
 0x760   : > { %12653 = vmatmul.msk.f32.gmra.mxu2 %vm1130_vm1, %v16877_v6 }
 0x761   : > { %12672 = vmatmul.msk.f32.gmra.mxu3 %vm1130_vm1, %v9324_v18  ;;  %v16882_v58 = vadd.f32 %v8562_v11, %v8415_v32  ;;  %v16894_v11 = vld [vmem:[#allocation3 + $0x8c] sm:$0xff] }
 0x762   : > { %17872 = vst [vmem:[#allocation18_spill] sm:$0xff] %v16894_v11 }
 0x763   : > { %v8568_v19 = vpop.f32.mrf.mxu2 }
 0x764   : > { %v8727_v29 = vpop.f32.mrf.mxu3  ;;  %v8205_v44 = vpop.f32.mrf.mxu0 }
 0x765   : > { %v16885_v16 = vadd.f32 %v8727_v29, %v16814_v52  ;;  %v8239_v21 = vadd.f32 %v8205_v44, %v16630_v17  ;;  %v8388_v26 = vpop.f32.mrf.mxu1 }
 0x767   : > { %v8416_v48 = vadd.f32 %v8382_v5, %v8239_v21  ;;  %12612 = vmatmul.msk.f32.gmra.mxu0 %vm1130_vm1, %v16888_v55  ;;  %12634 = vmatmul.msk.f32.gmra.mxu1 %vm1130_vm1, %v16617_v14  ;;  %v16905_v14 = vld [vmem:[#allocation3 + $0x82] sm:$0xff] }
 0x768   : > { %12654 = vmatmul.msk.f32.gmra.mxu2 %vm1130_vm1, %v16894_v11 }
 0x769   : > { %12673 = vmatmul.msk.f32.gmra.mxu3 %vm1130_vm1, %v9325_v43  ;;  %v16899_v52 = vadd.f32 %v8565_v25, %v8416_v48  ;;  %v16911_v25 = vld [vmem:[#allocation3 + $0x94] sm:$0xff] }
 0x76a   : > { %17873 = vst [vmem:[#allocation19_spill] sm:$0xff] %v16911_v25  ;;  %v9326_v48 = vld [vmem:[#allocation3 + $0x70] sm:$0xff] }
 0x76b   : > { %v8571_v17 = vpop.f32.mrf.mxu2 }
 0x76c   : > { %v8730_v32 = vpop.f32.mrf.mxu3  ;;  %v8208_v18 = vpop.f32.mrf.mxu0 }
 0x76d   : > { %v16902_v5 = vadd.f32 %v8730_v32, %v16831_v31  ;;  %v8240_v29 = vadd.f32 %v8208_v18, %v16644_v27  ;;  %v8391_v44 = vpop.f32.mrf.mxu1 }
 0x76f   : > { %v8417_v21 = vadd.f32 %v8385_v49, %v8240_v29  ;;  %12613 = vmatmul.msk.f32.gmra.mxu0 %vm1130_vm1, %v16905_v14  ;;  %12635 = vmatmul.msk.f32.gmra.mxu1 %vm1130_vm1, %v16633_v34  ;;  %v16922_v34 = vld [vmem:[#allocation3 + $0x8a] sm:$0xff] }
 0x770   : > { %12655 = vmatmul.msk.f32.gmra.mxu2 %vm1130_vm1, %v16911_v25  ;;  %v16937_v25 = vld [vmem:[#allocation3 + $0x92] sm:$0xff] }
 0x771   : > { %12674 = vmatmul.msk.f32.gmra.mxu3 %vm1130_vm1, %v9326_v48  ;;  %v16916_v31 = vadd.f32 %v8568_v19, %v8417_v21  ;;  %v16928_v19 = vld [vmem:[#allocation3 + $0x9c] sm:$0xff] }
 0x772   : > { %17874 = vst [vmem:[#allocation8_spill] sm:$0xff] %v16928_v19  ;;  %v9327_v21 = vld [vmem:[#allocation3 + $0x78] sm:$0xff] }
 0x773   : > { %v8574_v27 = vpop.f32.mrf.mxu2 }
 0x774   : > { %v8733_v43 = vpop.f32.mrf.mxu3  ;;  %v8211_v32 = vpop.f32.mrf.mxu0 }
 0x775   : > { %v16919_v49 = vadd.f32 %v8733_v43, %v16848_v56  ;;  %v8241_v18 = vadd.f32 %v8211_v32, %v16658_v9  ;;  %v8394_v29 = vpop.f32.mrf.mxu1 }
 0x777   : > { %v8418_v11 = vadd.f32 %v8388_v26, %v8241_v18  ;;  %12614 = vmatmul.msk.f32.gmra.mxu0 %vm1130_vm1, %v16922_v34  ;;  %12636 = vmatmul.msk.f32.gmra.mxu1 %vm1130_vm1, %v16647_v60 }
 0x778   : > { %12656 = vmatmul.msk.f32.gmra.mxu2 %vm1130_vm1, %v16928_v19  ;;  %v16952_v19 = vld [vmem:[#allocation3 + $0x9a] sm:$0xff] }
 0x779   : > { %12675 = vmatmul.msk.f32.gmra.mxu3 %vm1130_vm1, %v9327_v21  ;;  %v8601_v56 = vadd.f32 %v8571_v17, %v8418_v11  ;;  %v16943_v21 = vld [vmem:[#allocation3 + $0xa4] sm:$0xff] }
 0x77a   : > { %17875 = vst [vmem:[#allocation21_spill] sm:$0xff] %v16943_v21  ;;  %v9328_v11 = vld [vmem:[#allocation3 + $0x80] sm:$0xff] }
 0x77b   : > { %v8577_v9 = vpop.f32.mrf.mxu2 }
 0x77c   : > { %v8736_v48 = vpop.f32.mrf.mxu3  ;;  %v8214_v43 = vpop.f32.mrf.mxu0 }
 0x77d   : > { %v16934_v26 = vadd.f32 %v8736_v48, %v16865_v63  ;;  %v8242_v32 = vadd.f32 %v8214_v43, %v16677_v28  ;;  %v8397_v18 = vpop.f32.mrf.mxu1 }
 0x77f   : > { %v8419_v60 = vadd.f32 %v8391_v44, %v8242_v32  ;;  %12615 = vmatmul.msk.f32.gmra.mxu0 %vm1130_vm1, %v16937_v25  ;;  %12637 = vmatmul.msk.f32.gmra.mxu1 %vm1130_vm1, %v16661_v10 }
 0x780   : > { %12657 = vmatmul.msk.f32.gmra.mxu2 %vm1130_vm1, %v16943_v21  ;;  %v16967_v21 = vld [vmem:[#allocation3 + $0xa2] sm:$0xff] }
 0x781   : > { %12676 = vmatmul.msk.f32.gmra.mxu3 %vm1130_vm1, %v9328_v11  ;;  %v8602_v63 = vadd.f32 %v8574_v27, %v8419_v60  ;;  %v16958_v11 = vld [vmem:[#allocation3 + $0xac] sm:$0xff] }
 0x782   : > { %17876 = vst [vmem:[#allocation22_spill] sm:$0xff] %v16958_v11  ;;  %v9329_v27 = vld [vmem:[#allocation3 + $0x88] sm:$0xff] }
 0x783   : > { %v8580_v28 = vpop.f32.mrf.mxu2 }
 0x784   : > { %v8739_v17 = vpop.f32.mrf.mxu3  ;;  %v8217_v48 = vpop.f32.mrf.mxu0 }
 0x785   : > { %v16949_v44 = vadd.f32 %v8739_v17, %v16882_v58  ;;  %v8243_v43 = vadd.f32 %v8217_v48, %v16696_v62  ;;  %v8400_v32 = vpop.f32.mrf.mxu1 }
 0x787   : > { %v8420_v10 = vadd.f32 %v8394_v29, %v8243_v43  ;;  %12616 = vmatmul.msk.f32.gmra.mxu0 %vm1130_vm1, %v16952_v19  ;;  %12638 = vmatmul.msk.f32.gmra.mxu1 %vm1130_vm1, %v16680_v61 }
 0x788   : > { %12658 = vmatmul.msk.f32.gmra.mxu2 %vm1130_vm1, %v16958_v11 }
 0x789   : > { %12677 = vmatmul.msk.f32.gmra.mxu3 %vm1130_vm1, %v9329_v27  ;;  %v8603_v58 = vadd.f32 %v8577_v9, %v8420_v10  ;;  %v9330_v9 = vld [vmem:[#allocation3 + $0x90] sm:$0xff] }
 0x78b   : > { %v8583_v62 = vpop.f32.mrf.mxu2 }
 0x78c   : > { %v8742_v60 = vpop.f32.mrf.mxu3  ;;  %v8220_v17 = vpop.f32.mrf.mxu0 }
 0x78d   : > { %v16964_v29 = vadd.f32 %v8742_v60, %v16899_v52  ;;  %v8244_v48 = vadd.f32 %v8220_v17, %v16710_v57  ;;  %v9057_v43 = vpop.f32.mrf.mxu1 }
 0x78f   : > { %v8421_v61 = vadd.f32 %v8397_v18, %v8244_v48  ;;  %12617 = vmatmul.msk.f32.gmra.mxu0 %vm1130_vm1, %v16967_v21  ;;  %12639 = vmatmul.msk.f32.gmra.mxu1 %vm1130_vm1, %v16699_v46  ;;  %v16982_v48 = vld [vmem:[#allocation3 + $0xaa] sm:$0xff] }
 0x790   : > { %12659 = vmatmul.msk.f32.gmra.mxu2 %vm1130_vm1, %v16663_v41  ;;  %v9331_v41 = vld [vmem:[#allocation3 + $0x98] sm:$0xff] }
 0x791   : > { %12678 = vmatmul.msk.f32.gmra.mxu3 %vm1130_vm1, %v9330_v9  ;;  %v16976_v52 = vadd.f32 %v8580_v28, %v8421_v61 }
 0x793   : > { %v9234_v10 = vpop.f32.mrf.mxu2 }
 0x794   : > { %v8745_v57 = vpop.f32.mrf.mxu3  ;;  %v8223_v27 = vpop.f32.mrf.mxu0 }
 0x795   : > { %v16979_v60 = vadd.f32 %v8745_v57, %v16916_v31  ;;  %v8245_v18 = vadd.f32 %v8223_v27, %v16724_v4  ;;  %v9060_v17 = vpop.f32.mrf.mxu1  ;;  %v16996_v27 = vld [vmem:[#allocation3 + $0xb2] sm:$0xff] }
 0x797   : > { %v8422_v46 = vadd.f32 %v8400_v32, %v8245_v18  ;;  %12618 = vmatmul.msk.f32.gmra.mxu0 %vm1130_vm1, %v16982_v48  ;;  %12640 = vmatmul.msk.f32.gmra.mxu1 %vm1130_vm1, %v16713_v54  ;;  %v16998_v18 = vld [vmem:[#allocation3 + $0xc3] sm:$0xff] }
 0x798   : > { %12660 = vmatmul.msk.f32.gmra.mxu2 %vm1130_vm1, %v16682_v22  ;;  %v17004_v22 = vld [vmem:[#allocation3 + $0xc4] sm:$0xff] }
 0x799   : > { %12679 = vmatmul.msk.f32.gmra.mxu3 %vm1130_vm1, %v9331_v41  ;;  %v16991_v31 = vadd.f32 %v8583_v62, %v8422_v46 }
 0x79b   : > { %v9237_v28 = vpop.f32.mrf.mxu2 }
 0x79c   : > { %v8748_v4 = vpop.f32.mrf.mxu3  ;;  %v8880_v61 = vpop.f32.mrf.mxu0 }
 0x79d   : > { %v16993_v9 = vadd.f32 %v8748_v4, %v8601_v56  ;;  %v8940_v32 = vadd.f32 %v8880_v61, %v16751_v2  ;;  %v9063_v57 = vpop.f32.mrf.mxu1  ;;  %v17015_v61 = vld [vmem:[#allocation3 + $0xba] sm:$0xff] }
 0x79f   : > { %v9117_v54 = vadd.f32 %v9057_v43, %v8940_v32  ;;  %12619 = vmatmul.msk.f32.gmra.mxu0 %vm1130_vm1, %v16996_v27  ;;  %12641 = vmatmul.msk.f32.gmra.mxu1 %vm1130_vm1, %v16998_v18  ;;  %v17017_v32 = vld [vmem:[#allocation3 + $0xcb] sm:$0xff] }
 0x7a0   : > { %12661 = vmatmul.msk.f32.gmra.mxu2 %vm1130_vm1, %v17004_v22 }
 0x7a1   : > { %12680 = vmatmul.msk.f32.gmra.mxu3 %vm1130_vm1, %v16607_v23  ;;  %v17010_v2 = vadd.f32 %v9234_v10, %v9117_v54  ;;  %v17023_v23 = vld [vmem:[#allocation3 + $0xcc] sm:$0xff] }
 0x7a2   : > { %17878 = vst [vmem:[#allocation24_spill] sm:$0xff] %v17023_v23 }
 0x7a3   : > { %v9240_v56 = vpop.f32.mrf.mxu2 }
 0x7a4   : > { %v8751_v62 = vpop.f32.mrf.mxu3  ;;  %v8883_v46 = vpop.f32.mrf.mxu0 }
 0x7a5   : > { %v17012_v43 = vadd.f32 %v8751_v62, %v8602_v63  ;;  %v8941_v41 = vadd.f32 %v8883_v46, %v16766_v39  ;;  %v9066_v4 = vpop.f32.mrf.mxu1 }
 0x7a7   : > { %17877 = vst [vmem:[#allocation9_spill] sm:$0xff] %v17012_v43  ;;  %v9118_v11 = vadd.f32 %v9060_v17, %v8941_v41  ;;  %12620 = vmatmul.msk.f32.gmra.mxu0 %vm1130_vm1, %v17015_v61  ;;  %12642 = vmatmul.msk.f32.gmra.mxu1 %vm1130_vm1, %v17017_v32  ;;  %v17032_v41 = vld [vmem:[#allocation3 + $0xc2] sm:$0xff] }
 0x7a8   : > { %12662 = vmatmul.msk.f32.gmra.mxu2 %vm1130_vm1, %v17023_v23  ;;  %v9851_v23 = vld [vmem:[#allocation3 + $0x43] sm:$0xff] }
 0x7a9   : > { %12681 = vmatmul.msk.f32.gmra.mxu3 %vm1130_vm1, %v16623_v3  ;;  %v9295_v39 = vadd.f32 %v9237_v28, %v9118_v11  ;;  %v9334_v3 = vld [vmem:[#allocation3 + $0xb0] sm:$0xff] }
 0x7ab   : > { %v9243_v63 = vpop.f32.mrf.mxu2 }
 0x7ac   : > { %v8754_v10 = vpop.f32.mrf.mxu3  ;;  %v8886_v54 = vpop.f32.mrf.mxu0 }
 0x7ad   : > { %v17029_v62 = vadd.f32 %v8754_v10, %v8603_v58  ;;  %v8942_v17 = vadd.f32 %v8886_v54, %v16783_v7  ;;  %v9069_v46 = vpop.f32.mrf.mxu1 }
 0x7af   : > { %17879 = vst [vmem:[#allocation25_spill] sm:$0xff] %v17029_v62  ;;  %v9119_v43 = vadd.f32 %v9063_v57, %v8942_v17  ;;  %12621 = vmatmul.msk.f32.gmra.mxu0 %vm1130_vm1, %v17032_v41  ;;  %12708 = vmatmul.msk.f32.vlgmr.msra.gmra.mxu1 %vm1130_vm1, %v16769_v50  ;;  %v17044_v17 = vld [vmem:[#allocation3 + $0xca] sm:$0xff] }
 0x7b0   : > { %12728 = vmatmul.msk.f32.vlgmr.msra.gmra.mxu2 %vm1130_vm1, %v9851_v23  ;;  %v9852_v50 = vld [vmem:[#allocation3 + $0x4b] sm:$0xff] }
 0x7b1   : > { %12682 = vmatmul.msk.f32.gmra.mxu3 %vm1130_vm1, %v9334_v3  ;;  %v9296_v11 = vadd.f32 %v9240_v56, %v9119_v43  ;;  %v9335_v56 = vld [vmem:[#allocation3 + $0xb8] sm:$0xff] }
 0x7b3   : > { %v9246_v58 = vpop.f32.mrf.mxu2 }
 0x7b4   : > { %v8757_v28 = vpop.f32.mrf.mxu3  ;;  %v8889_v7 = vpop.f32.mrf.mxu0 }
 0x7b5   : > { %v17041_v10 = vadd.f32 %v8757_v28, %v16976_v52  ;;  %v8943_v57 = vadd.f32 %v8889_v7, %v16800_v42  ;;  %v9072_v54 = vpop.f32.mrf.mxu1  ;;  %v9497_v7 = vld [vmem:[#allocation3 + $0x41] sm:$0xff] }
 0x7b7   : > { %v9120_v62 = vadd.f32 %v9066_v4, %v8943_v57  ;;  %12622 = vmatmul.msk.f32.gmra.mxu0 %vm1130_vm1, %v17044_v17  ;;  %12709 = vmatmul.msk.f32.gmra.mxu1 %vm1130_vm1, %v16786_v0  ;;  %v9853_v0 = vld [vmem:[#allocation3 + $0x53] sm:$0xff] }
 0x7b8   : > { %12729 = vmatmul.msk.f32.gmra.mxu2 %vm1130_vm1, %v9852_v50 }
 0x7b9   : > { %12683 = vmatmul.msk.f32.gmra.mxu3 %vm1130_vm1, %v9335_v56  ;;  %v9297_v52 = vadd.f32 %v9243_v63, %v9120_v62 }
 0x7bb   : > { %v9249_v43 = vpop.f32.mrf.mxu2 }
 0x7bc   : > { %v8760_v23 = vpop.f32.mrf.mxu3  ;;  %v8892_v42 = vpop.f32.mrf.mxu0 }
 0x7bd   : > { %v17053_v3 = vadd.f32 %v8760_v23, %v16991_v31  ;;  %v8944_v4 = vadd.f32 %v8892_v42, %v16817_v33  ;;  %v9075_v28 = vpop.f32.mrf.mxu1  ;;  %v9498_v23 = vld [vmem:[#allocation3 + $0x49] sm:$0xff] }
 0x7bf   : > { %v9121_v57 = vadd.f32 %v9069_v46, %v8944_v4  ;;  %12688 = vmatmul.msk.f32.vlgmr.msrb.gmra.mxu0 %vm1130_vm1, %v9497_v7  ;;  %12710 = vmatmul.msk.f32.gmra.mxu1 %vm1130_vm1, %v16803_v13  ;;  %v9854_v13 = vld [vmem:[#allocation3 + $0x5b] sm:$0xff] }
 0x7c0   : > { %12730 = vmatmul.msk.f32.gmra.mxu2 %vm1130_vm1, %v9853_v0 }
 0x7c1   : > { %12684 = vmatmul.msk.f32.gmra.mxu3 %vm1130_vm1, %v16669_v24  ;;  %v9298_v63 = vadd.f32 %v9246_v58, %v9121_v57  ;;  %v9499_v57 = vld [vmem:[#allocation3 + $0x51] sm:$0xff] }
 0x7c3   : > { %v9252_v62 = vpop.f32.mrf.mxu2 }
 0x7c4   : > { %v9417_v31 = vpop.f32.mrf.mxu3  ;;  %v8895_v50 = vpop.f32.mrf.mxu0 }
 0x7c5   : > { %v17063_v33 = vadd.f32 %v9417_v31, %v17010_v2  ;;  %v8945_v46 = vadd.f32 %v8895_v50, %v16834_v53  ;;  %v9078_v56 = vpop.f32.mrf.mxu1 }
 0x7c7   : > { %v9122_v42 = vadd.f32 %v9072_v54, %v8945_v46  ;;  %12689 = vmatmul.msk.f32.gmra.mxu0 %vm1130_vm1, %v9498_v23  ;;  %12711 = vmatmul.msk.f32.gmra.mxu1 %vm1130_vm1, %v16820_v12  ;;  %v9855_v12 = vld [vmem:[#allocation3 + $0x63] sm:$0xff]  ;;  %v9500_v23 = vld [vmem:[#allocation3 + $0x59] sm:$0xff] }
 0x7c8   : > { %12731 = vmatmul.msk.f32.gmra.mxu2 %vm1130_vm1, %v9854_v13  ;;  %v9339_v13 = vld [vmem:[#allocation3 + $0xd8] sm:$0xff] }
 0x7c9   : > { %12685 = vmatmul.msk.f32.gmra.mxu3 %vm1130_vm1, %v16688_v35  ;;  %v9299_v24 = vadd.f32 %v9249_v43, %v9122_v42  ;;  %v9338_v35 = vld [vmem:[#allocation3 + $0xd0] sm:$0xff] }
 0x7cb   : > { %v9255_v58 = vpop.f32.mrf.mxu2 }
 0x7cc   : > { %v9420_v2 = vpop.f32.mrf.mxu3  ;;  %v8898_v4 = vpop.f32.mrf.mxu0 }
 0x7cd   : > { %v17072_v7 = vadd.f32 %v9420_v2, %v9295_v39  ;;  %v8946_v53 = vadd.f32 %v8898_v4, %v16851_v40  ;;  %v9081_v54 = vpop.f32.mrf.mxu1 }
 0x7cf   : > { %v9123_v0 = vadd.f32 %v9075_v28, %v8946_v53  ;;  %12690 = vmatmul.msk.f32.gmra.mxu0 %vm1130_vm1, %v9499_v57  ;;  %12712 = vmatmul.msk.f32.gmra.mxu1 %vm1130_vm1, %v16837_v38  ;;  %v9856_v38 = vld [vmem:[#allocation3 + $0x6b] sm:$0xff]  ;;  %v9501_v57 = vld [vmem:[#allocation3 + $0x61] sm:$0xff] }
 0x7d0   : > { %12732 = vmatmul.msk.f32.gmra.mxu2 %vm1130_vm1, %v9855_v12 }
 0x7d1   : > { %12686 = vmatmul.msk.f32.gmra.mxu3 %vm1130_vm1, %v9338_v35  ;;  %v9300_v43 = vadd.f32 %v9252_v62, %v9123_v0 }
 0x7d3   : > { %v9258_v31 = vpop.f32.mrf.mxu2 }
 0x7d4   : > { %v9423_v39 = vpop.f32.mrf.mxu3  ;;  %v8901_v50 = vpop.f32.mrf.mxu0 }
 0x7d5   : > { %v17080_v46 = vadd.f32 %v9423_v39, %v9296_v11  ;;  %v8947_v40 = vadd.f32 %v8901_v50, %v16868_v15  ;;  %v9084_v28 = vpop.f32.mrf.mxu1  ;;  %v9502_v50 = vld [vmem:[#allocation3 + $0x69] sm:$0xff] }
 0x7d7   : > { %v9124_v42 = vadd.f32 %v9078_v56, %v8947_v40  ;;  %12691 = vmatmul.msk.f32.gmra.mxu0 %vm1130_vm1, %v9500_v23  ;;  %12713 = vmatmul.msk.f32.gmra.mxu1 %vm1130_vm1, %v16854_v59  ;;  %v9857_v59 = vld [vmem:[#allocation3 + $0x73] sm:$0xff] }
 0x7d8   : > { %12733 = vmatmul.msk.f32.gmra.mxu2 %vm1130_vm1, %v9856_v38  ;;  %v9503_v38 = vld [vmem:[#allocation3 + $0x71] sm:$0xff] }
 0x7d9   : > { %12687 = vmatmul.msk.f32.gmra.mxu3 %vm1130_vm1, %v9339_v13  ;;  %v9301_v62 = vadd.f32 %v9255_v58, %v9124_v42 }
 0x7db   : > { %v9261_v2 = vpop.f32.mrf.mxu2 }
 0x7dc   : > { %v9426_v11 = vpop.f32.mrf.mxu3  ;;  %v8904_v4 = vpop.f32.mrf.mxu0 }
 0x7dd   : > { %v17088_v53 = vadd.f32 %v9426_v11, %v9297_v52  ;;  %v8948_v15 = vadd.f32 %v8904_v4, %v16885_v16  ;;  %v9087_v56 = vpop.f32.mrf.mxu1 }
 0x7df   : > { %v9125_v0 = vadd.f32 %v9081_v54, %v8948_v15  ;;  %12692 = vmatmul.msk.f32.gmra.mxu0 %vm1130_vm1, %v9501_v57  ;;  %12714 = vmatmul.msk.f32.gmra.mxu1 %vm1130_vm1, %v16871_v36  ;;  %v9858_v36 = vld [vmem:[#allocation3 + $0x7b] sm:$0xff] }
 0x7e0   : > { %12734 = vmatmul.msk.f32.gmra.mxu2 %vm1130_vm1, %v9857_v59 }
 0x7e1   : > { %12748 = vmatmul.msk.f32.vlgmr.msrb.gmra.mxu3 %vm1130_vm1, %v16730_v47  ;;  %v9302_v58 = vadd.f32 %v9258_v31, %v9125_v0 }
 0x7e3   : > { %v9264_v12 = vpop.f32.mrf.mxu2 }
 0x7e4   : > { %v9429_v52 = vpop.f32.mrf.mxu3  ;;  %v8907_v35 = vpop.f32.mrf.mxu0 }
 0x7e5   : > { %v17097_v39 = vadd.f32 %v9429_v52, %v9298_v63  ;;  %v8949_v16 = vadd.f32 %v8907_v35, %v16902_v5  ;;  %v9090_v54 = vpop.f32.mrf.mxu1  ;;  %v9505_v35 = vld [vmem:[#allocation3 + $0x81] sm:$0xff] }
 0x7e7   : > { %v9126_v40 = vadd.f32 %v9084_v28, %v8949_v16  ;;  %12693 = vmatmul.msk.f32.gmra.mxu0 %vm1130_vm1, %v9502_v50  ;;  %12715 = vmatmul.msk.f32.gmra.mxu1 %vm1130_vm1, %v16888_v55  ;;  %v9859_v55 = vld [vmem:[#allocation3 + $0x83] sm:$0xff] }
 0x7e8   : > { %12735 = vmatmul.msk.f32.gmra.mxu2 %vm1130_vm1, %v9858_v36 }
 0x7e9   : > { %12749 = vmatmul.msk.f32.gmra.mxu3 %vm1130_vm1, %v16757_v30  ;;  %v9303_v47 = vadd.f32 %v9261_v2, %v9126_v40 }
 0x7eb   : > { %v9267_v31 = vpop.f32.mrf.mxu2 }
 0x7ec   : > { %v9432_v63 = vpop.f32.mrf.mxu3  ;;  %v8910_v23 = vpop.f32.mrf.mxu0 }
 0x7ed   : > { %v17106_v42 = vadd.f32 %v9432_v63, %v9299_v24  ;;  %v8950_v5 = vadd.f32 %v8910_v23, %v16919_v49  ;;  %v9093_v28 = vpop.f32.mrf.mxu1 }
 0x7ef   : > { %v9127_v13 = vadd.f32 %v9087_v56, %v8950_v5  ;;  %12694 = vmatmul.msk.f32.gmra.mxu0 %vm1130_vm1, %v9503_v38  ;;  %12716 = vmatmul.msk.f32.gmra.mxu1 %vm1130_vm1, %v16905_v14  ;;  %v9504_v56 = vld [vmem:[#allocation3 + $0x79] sm:$0xff]  ;;  %v9860_v14 = vld [vmem:[#allocation3 + $0x8b] sm:$0xff] }
 0x7f0   : > { %12736 = vmatmul.msk.f32.gmra.mxu2 %vm1130_vm1, %v9859_v55  ;;  %v9507_v38 = vld [vmem:[#allocation3 + $0x91] sm:$0xff] }
 0x7f1   : > { %12750 = vmatmul.msk.f32.gmra.mxu3 %vm1130_vm1, %v16775_v8  ;;  %v9304_v30 = vadd.f32 %v9264_v12, %v9127_v13 }
 0x7f3   : > { %v9270_v2 = vpop.f32.mrf.mxu2 }
 0x7f4   : > { %v9435_v24 = vpop.f32.mrf.mxu3  ;;  %v8913_v11 = vpop.f32.mrf.mxu0 }
 0x7f5   : > { %v17115_v4 = vadd.f32 %v9435_v24, %v9300_v43  ;;  %v8951_v49 = vadd.f32 %v8913_v11, %v16934_v26  ;;  %v9096_v15 = vpop.f32.mrf.mxu1 }
 0x7f7   : > { %v9128_v57 = vadd.f32 %v9090_v54, %v8951_v49  ;;  %12695 = vmatmul.msk.f32.gmra.mxu0 %vm1130_vm1, %v9504_v56  ;;  %12717 = vmatmul.msk.f32.gmra.mxu1 %vm1130_vm1, %v16922_v34  ;;  %v9861_v34 = vld [vmem:[#allocation3 + $0x93] sm:$0xff] }
 0x7f8   : > { %12737 = vmatmul.msk.f32.gmra.mxu2 %vm1130_vm1, %v9860_v14  ;;  %v9508_v49 = vld [vmem:[#allocation3 + $0x99] sm:$0xff] }
 0x7f9   : > { %12751 = vmatmul.msk.f32.gmra.mxu3 %vm1130_vm1, %v16792_v45  ;;  %v9305_v8 = vadd.f32 %v9267_v31, %v9128_v57  ;;  %v9506_v31 = vld [vmem:[#allocation3 + $0x89] sm:$0xff] }
 0x7fb   : > { %v9273_v0 = vpop.f32.mrf.mxu2 }
 0x7fc   : > { %v9438_v43 = vpop.f32.mrf.mxu3  ;;  %v8916_v59 = vpop.f32.mrf.mxu0 }
 0x7fd   : > { %v17124_v12 = vadd.f32 %v9438_v43, %v9301_v62  ;;  %v8952_v26 = vadd.f32 %v8916_v59, %v16949_v44  ;;  %v9099_v52 = vpop.f32.mrf.mxu1 }
 0x7ff   : > { %v9129_v16 = vadd.f32 %v9093_v28, %v8952_v26  ;;  %12696 = vmatmul.msk.f32.gmra.mxu0 %vm1130_vm1, %v9505_v35  ;;  %12718 = vmatmul.msk.f32.gmra.mxu1 %vm1130_vm1, %v16937_v25  ;;  %v9862_v25 = vld [vmem:[#allocation3 + $0x9b] sm:$0xff]  ;;  %v17881_v35 = vld [vmem:[#allocation18_spill] sm:$0xff] }
 0x800   : > { %12738 = vmatmul.msk.f32.gmra.mxu2 %vm1130_vm1, %v9861_v34 }
 0x801   : > { %12752 = vmatmul.msk.f32.gmra.mxu3 %vm1130_vm1, %v16809_v1  ;;  %v9306_v45 = vadd.f32 %v9270_v2, %v9129_v16 }
 0x803   : > { %v9276_v54 = vpop.f32.mrf.mxu2 }
 0x804   : > { %v9441_v62 = vpop.f32.mrf.mxu3  ;;  %v8919_v50 = vpop.f32.mrf.mxu0 }
 0x805   : > { %v17133_v40 = vadd.f32 %v9441_v62, %v9302_v58  ;;  %v8953_v44 = vadd.f32 %v8919_v50, %v16964_v29  ;;  %v9102_v36 = vpop.f32.mrf.mxu1  ;;  %v17884_v62 = vld [vmem:[#allocation19_spill] sm:$0xff] }
 0x807   : > { %v9130_v63 = vadd.f32 %v9096_v15, %v8953_v44  ;;  %12697 = vmatmul.msk.f32.gmra.mxu0 %vm1130_vm1, %v9506_v31  ;;  %12719 = vmatmul.msk.f32.gmra.mxu1 %vm1130_vm1, %v16952_v19  ;;  %v9863_v19 = vld [vmem:[#allocation3 + $0xa3] sm:$0xff]  ;;  %v9512_v31 = vld [vmem:[#allocation3 + $0xb9] sm:$0xff] }
 0x808   : > { %12739 = vmatmul.msk.f32.gmra.mxu2 %vm1130_vm1, %v9862_v25  ;;  %v17886_v25 = vld [vmem:[#allocation8_spill] sm:$0xff] }
 0x809   : > { %12753 = vmatmul.msk.f32.gmra.mxu3 %vm1130_vm1, %v16826_v37  ;;  %v9307_v1 = vadd.f32 %v9273_v0, %v9130_v63  ;;  %v9509_v0 = vld [vmem:[#allocation3 + $0xa1] sm:$0xff] }
 0x80b   : > { %v9279_v23 = vpop.f32.mrf.mxu2 }
 0x80c   : > { %v9444_v58 = vpop.f32.mrf.mxu3  ;;  %v8922_v5 = vpop.f32.mrf.mxu0 }
 0x80d   : > { %v17142_v28 = vadd.f32 %v9444_v58, %v9303_v47  ;;  %v8954_v29 = vadd.f32 %v8922_v5, %v16979_v60  ;;  %v17145_v55 = vpop.f32.mrf.mxu1 }
 0x80f   : > { %v9131_v13 = vadd.f32 %v9099_v52, %v8954_v29  ;;  %12698 = vmatmul.msk.f32.gmra.mxu0 %vm1130_vm1, %v9507_v38  ;;  %12720 = vmatmul.msk.f32.gmra.mxu1 %vm1130_vm1, %v16967_v21  ;;  %v9864_v21 = vld [vmem:[#allocation3 + $0xab] sm:$0xff]  ;;  %v9513_v29 = vld [vmem:[#allocation3 + $0xc1] sm:$0xff] }
 0x810   : > { %12740 = vmatmul.msk.f32.gmra.mxu2 %vm1130_vm1, %v9863_v19  ;;  %v9692_v38 = vld [vmem:[#allocation3 + $0xd2] sm:$0xff]  ;;  %v17887_v19 = vld [vmem:[#allocation21_spill] sm:$0xff] }
 0x811   : > { %12754 = vmatmul.msk.f32.gmra.mxu3 %vm1130_vm1, %v16843_v51  ;;  %v9308_v37 = vadd.f32 %v9276_v54, %v9131_v13  ;;  %v9511_v54 = vld [vmem:[#allocation3 + $0xb1] sm:$0xff] }
 0x813   : > { %v17153_v47 = vpop.f32.mrf.mxu2 }
 0x814   : > { %v9447_v2 = vpop.f32.mrf.mxu3  ;;  %v8925_v60 = vpop.f32.mrf.mxu0 }
 0x815   : > { %v17155_v24 = vadd.f32 %v9447_v2, %v9304_v30  ;;  %v8955_v11 = vadd.f32 %v8925_v60, %v16993_v9  ;;  %v17162_v51 = vpop.f32.mrf.mxu1 }
 0x817   : > { %v9132_v15 = vadd.f32 %v9102_v36, %v8955_v11  ;;  %12699 = vmatmul.msk.f32.gmra.mxu0 %vm1130_vm1, %v9508_v49  ;;  %12721 = vmatmul.msk.f32.gmra.mxu1 %vm1130_vm1, %v16982_v48  ;;  %v9865_v48 = vld [vmem:[#allocation3 + $0xb3] sm:$0xff]  ;;  %v17888_v11 = vmov 0.0  }
 0x818   : > { %12741 = vmatmul.msk.f32.gmra.mxu2 %vm1130_vm1, %v9864_v21  ;;  %388 = vst.msk [vmem:[#allocation5] sm:$0xff] %vm387_vm2, %v17888_v11  ;;  %v9693_v21 = vld [vmem:[#allocation3 + $0xda] sm:$0xff] }
 0x819   : > { %12755 = vmatmul.msk.f32.gmra.mxu3 %vm1130_vm1, %v16860_v20  ;;  %v9309_v56 = vadd.f32 %v9279_v23, %v9132_v15  ;;  %389 = vst.msk [vmem:[#allocation5 + $0x8] sm:$0xff] %vm387_vm2, %v17888_v11  ;;  %v9514_v15 = vld [vmem:[#allocation3 + $0xc9] sm:$0xff] }
 0x81a   : > { %390 = vst.msk [vmem:[#allocation5 + $0x10] sm:$0xff] %vm387_vm2, %v17888_v11 }
 0x81b   : > { %v17168_v9 = vpop.f32.mrf.mxu2  ;;  %391 = vst.msk [vmem:[#allocation5 + $0x18] sm:$0xff] %vm387_vm2, %v17888_v11 }
 0x81c   : > { %v9450_v30 = vpop.f32.mrf.mxu3  ;;  %v17166_v57 = vpop.f32.mrf.mxu0  ;;  %392 = vst.msk [vmem:[#allocation5 + $0x20] sm:$0xff] %vm387_vm2, %v17888_v11 }
 0x81d   : > { %v17170_v14 = vadd.f32 %v9450_v30, %v9305_v8  ;;  %v17178_v20 = vpop.f32.mrf.mxu1  ;;  %v9510_v8 = vld [vmem:[#allocation3 + $0xa9] sm:$0xff]  ;;  %393 = vst.msk [vmem:[#allocation5 + $0x28] sm:$0xff] %vm387_vm2, %v17888_v11 }
 0x81e   : > { %v17889_v30 = vld [vmem:[#allocation22_spill] sm:$0xff]  ;;  %394 = vst.msk [vmem:[#allocation5 + $0x30] sm:$0xff] %vm387_vm2, %v17888_v11 }
 0x81f   : > { %12700 = vmatmul.msk.f32.gmra.mxu0 %vm1130_vm1, %v9509_v0  ;;  %12722 = vmatmul.msk.f32.gmra.mxu1 %vm1130_vm1, %v16996_v27  ;;  %v9866_v27 = vld [vmem:[#allocation3 + $0xbb] sm:$0xff]  ;;  %395 = vst.msk [vmem:[#allocation5 + $0x38] sm:$0xff] %vm387_vm2, %v17888_v11 }
 0x820   : > { %12742 = vmatmul.msk.f32.gmra.mxu2 %vm1130_vm1, %v9865_v48  ;;  %396 = vst.msk [vmem:[#allocation5 + $0x40] sm:$0xff] %vm387_vm2, %v17888_v11 }
 0x821   : > { %12756 = vmatmul.msk.f32.gmra.mxu3 %vm1130_vm1, %v16877_v6  ;;  %397 = vst.msk [vmem:[#allocation5 + $0x48] sm:$0xff] %vm387_vm2, %v17888_v11 }
 0x822   : > { %398 = vst.msk [vmem:[#allocation5 + $0x50] sm:$0xff] %vm387_vm2, %v17888_v11 }
 0x823   : > { %v17184_v52 = vpop.f32.mrf.mxu2  ;;  %399 = vst.msk [vmem:[#allocation5 + $0x58] sm:$0xff] %vm387_vm2, %v17888_v11 }
 0x824   : > { %v9453_v43 = vpop.f32.mrf.mxu3  ;;  %v17180_v59 = vpop.f32.mrf.mxu0  ;;  %17880 = vst [vmem:[#allocation10_spill] sm:$0xff] %v17184_v52 }
 0x825   : > { %v17182_v26 = vadd.f32 %v9453_v43, %v9306_v45  ;;  %v17194_v34 = vpop.f32.mrf.mxu1  ;;  %400 = vst.msk [vmem:[#allocation5 + $0x60] sm:$0xff] %vm387_vm2, %v17888_v11 }
 0x826   : > { %17882 = vst [vmem:[#allocation27_spill] sm:$0xff] %v17194_v34 }
 0x827   : > { %12701 = vmatmul.msk.f32.gmra.mxu0 %vm1130_vm1, %v9510_v8  ;;  %12723 = vmatmul.msk.f32.gmra.mxu1 %vm1130_vm1, %v17015_v61  ;;  %v9515_v8 = vld [vmem:[#allocation3 + $0xd1] sm:$0xff]  ;;  %401 = vst.msk [vmem:[#allocation5 + $0x68] sm:$0xff] %vm387_vm2, %v17888_v11 }
 0x828   : > { %12743 = vmatmul.msk.f32.gmra.mxu2 %vm1130_vm1, %v9866_v27  ;;  %402 = vst.msk [vmem:[#allocation5 + $0x70] sm:$0xff] %vm387_vm2, %v17888_v11 }
 0x829   : > { %12757 = vmatmul.msk.f32.gmra.mxu3 %vm1130_vm1, %v17881_v35  ;;  %v10042_v35 = vld [vmem:[#allocation3 + $0xb4] sm:$0xff]  ;;  %403 = vst.msk [vmem:[#allocation5 + $0x78] sm:$0xff] %vm387_vm2, %v17888_v11 }
 0x82a   : > { %404 = vst.msk [vmem:[#allocation5 + $0x80] sm:$0xff] %vm387_vm2, %v17888_v11 }
 0x82b   : > { %v17203_v61 = vpop.f32.mrf.mxu2  ;;  %405 = vst.msk [vmem:[#allocation5 + $0x88] sm:$0xff] %vm387_vm2, %v17888_v11 }
 0x82c   : > { %v9456_v6 = vpop.f32.mrf.mxu3  ;;  %v17192_v16 = vpop.f32.mrf.mxu0  ;;  %17883 = vst [vmem:[#allocation28_spill] sm:$0xff] %v17203_v61  ;;  %v10502_v34 = vld [vmem:[#allocation5 + $0x4] ss:$32 sm:$0x8] }
 0x82d   : > { %v17196_v45 = vadd.f32 %v9456_v6, %v9307_v1  ;;  %v17211_v63 = vpop.f32.mrf.mxu1  ;;  %406 = vst.msk [vmem:[#allocation5 + $0x90] sm:$0xff] %vm387_vm2, %v17888_v11 }
 0x82e   : > { %407 = vst.msk [vmem:[#allocation5 + $0x98] sm:$0xff] %vm387_vm2, %v17888_v11 }
 0x82f   : > { %12702 = vmatmul.msk.f32.gmra.mxu0 %vm1130_vm1, %v9511_v54  ;;  %12724 = vmatmul.msk.f32.gmra.mxu1 %vm1130_vm1, %v17032_v41  ;;  %v12769_v41 = vld [vmem:[%s17770_s5 + $0x18] sm:$0xff]  ;;  %408 = vst.msk [vmem:[#allocation5 + $0xa0] sm:$0xff] %vm387_vm2, %v17888_v11 }
 0x830   : > { %12744 = vmatmul.msk.f32.gmra.mxu2 %vm1130_vm1, %v16998_v18  ;;  %v12773_v18 = vld [vmem:[%s17770_s5 + $0x28] sm:$0xff]  ;;  %10381 = vmatpush.msra.mxu0 %v12769_v41  ;;  %409 = vst.msk [vmem:[#allocation5 + $0xa8] sm:$0xff] %vm387_vm2, %v17888_v11 }
 0x831   : > { %12758 = vmatmul.msk.f32.gmra.mxu3 %vm1130_vm1, %v17884_v62  ;;  %10446 = vmatpush.msrb.mxu2 %v12773_v18  ;;  %410 = vst.msk [vmem:[#allocation5 + $0xb0] sm:$0xff] %vm387_vm2, %v17888_v11  ;;  %v10418_v61 = vld [vmem:[#allocation5 + $0x2] ss:$32 sm:$0x10] }
 0x832   : > { %411 = vst.msk [vmem:[#allocation5 + $0xb8] sm:$0xff] %vm387_vm2, %v17888_v11 }
 0x833   : > { %v17226_v1 = vpop.f32.mrf.mxu2  ;;  %412 = vst.msk [vmem:[#allocation5 + $0xc0] sm:$0xff] %vm387_vm2, %v17888_v11 }
 0x834   : > { %v9459_v50 = vpop.f32.mrf.mxu3  ;;  %v17207_v44 = vpop.f32.mrf.mxu0  ;;  %413 = vst.msk [vmem:[#allocation5 + $0xc8] sm:$0xff] %vm387_vm2, %v17888_v11 }
 0x835   : > { %17885 = vst [vmem:[#allocation11_spill] sm:$0xff] %v17207_v44  ;;  %v17209_v36 = vadd.f32 %v9459_v50, %v9308_v37  ;;  %v17238_v13 = vpop.f32.mrf.mxu1  ;;  %v12779_v37 = vld [vmem:[%s17770_s5 + $0x48] sm:$0xff]  ;;  %v9516_v50 = vld [vmem:[#allocation3 + $0xd9] sm:$0xff] }
 0x836   : > { %10532 = vmatpush.msrb.mxu1 %v12779_v37  ;;  %414 = vst.msk [vmem:[#allocation5 + $0xd0] sm:$0xff] %vm387_vm2, %v17888_v11 }
 0x837   : > { %12703 = vmatmul.msk.f32.gmra.mxu0 %vm1130_vm1, %v9512_v31  ;;  %12725 = vmatmul.msk.f32.gmra.mxu1 %vm1130_vm1, %v17044_v17  ;;  %v10344_v17 = vld [vmem:[%s17770_s5 + $0x8] sm:$0xff]  ;;  %v10043_v31 = vld [vmem:[#allocation3 + $0xbc] sm:$0xff]  ;;  %415 = vst.msk [vmem:[#allocation5 + $0xd8] sm:$0xff] %vm387_vm2, %v17888_v11 }
 0x838   : > { %12745 = vmatmul.msk.f32.gmra.mxu2 %vm1130_vm1, %v17017_v32  ;;  %10404 = vmatpush.msra.mxu3 %v10344_v17  ;;  %v9869_v32 = vld [vmem:[#allocation3 + $0xd3] sm:$0xff]  ;;  %416 = vst.msk [vmem:[#allocation5 + $0xe0] sm:$0xff] %vm387_vm2, %v17888_v11 }
 0x839   : > { %12759 = vmatmul.msk.f32.gmra.mxu3 %vm1130_vm1, %v17886_v25  ;;  %417 = vst.msk [vmem:[#allocation5 + $0xe8] sm:$0xff] %vm387_vm2, %v17888_v11 }
 0x83a   : > { %418 = vst.msk [vmem:[#allocation5 + $0xf0] sm:$0xff] %vm387_vm2, %v17888_v11 }
 0x83b   : > { %v17249_v49 = vpop.f32.mrf.mxu2  ;;  %419 = vst.msk [vmem:[#allocation5 + $0xf8] sm:$0xff] %vm387_vm2, %v17888_v11 }
 0x83c   : > { %v9462_v23 = vpop.f32.mrf.mxu3  ;;  %v17231_v58 = vpop.f32.mrf.mxu0 }
 0x83d   : > { %v17233_v5 = vadd.f32 %v9462_v23, %v9309_v56  ;;  %v9870_v56 = vld [vmem:[#allocation3 + $0xdb] sm:$0xff]  ;;  %v17268_v0 = vpop.f32.mrf.mxu1  ;;  %v9654_v41 = vadd.f32 %v17231_v58, %v17063_v33 }
 0x83f   : > { %12704 = vmatmul.msk.f32.gmra.mxu0 %vm1130_vm1, %v9513_v29  ;;  %12726 = vmatmul.msk.f32.gmra.mxu1 %vm1130_vm1, %v9692_v38  ;;  %v9831_v23 = vadd.f32 %v17211_v63, %v9654_v41  ;;  %v17340_v38 = vld [vmem:[%s17769_s4] ss:$0 sm:$0xff] }
 0x840   : > { %12746 = vmatmul.msk.f32.gmra.mxu2 %vm1130_vm1, %v9869_v32 }
 0x841   : > { %12760 = vmatmul.msk.f32.gmra.mxu3 %vm1130_vm1, %v17887_v19  ;;  %v10008_v63 = vadd.f32 %v17226_v1, %v9831_v23 }
 0x843   : > { %v17280_v27 = vpop.f32.mrf.mxu2 }
 0x844   : > { %v17245_v2 = vpop.f32.mrf.mxu3  ;;  %v9597_v60 = vpop.f32.mrf.mxu0 }
 0x845   : > { %v9780_v62 = vpop.f32.mrf.mxu1  ;;  %v9655_v58 = vadd.f32 %v9597_v60, %v17072_v7  ;;  %v17892_v7 = vld [vmem:[#allocation24_spill] sm:$0xff] }
 0x847   : > { %12705 = vmatmul.msk.f32.gmra.mxu0 %vm1130_vm1, %v9514_v15  ;;  %12727 = vmatmul.msk.f32.gmra.mxu1 %vm1130_vm1, %v9693_v21  ;;  %v9832_v37 = vadd.f32 %v17238_v13, %v9655_v58 }
 0x848   : > { %12747 = vmatmul.msk.f32.gmra.mxu2 %vm1130_vm1, %v9870_v56 }
 0x849   : > { %12761 = vmatmul.msk.f32.gmra.mxu3 %vm1130_vm1, %v17889_v30  ;;  %v10009_v56 = vadd.f32 %v17249_v49, %v9832_v37  ;;  %v10047_v37 = vld [vmem:[#allocation3 + $0xdc] sm:$0xff] }
 0x84b   : > { %v9957_v18 = vpop.f32.mrf.mxu2 }
 0x84c   : > { %v17272_v48 = vpop.f32.mrf.mxu3  ;;  %v9600_v43 = vpop.f32.mrf.mxu0 }
 0x84d   : > { %v9783_v33 = vpop.f32.mrf.mxu1  ;;  %v9656_v60 = vadd.f32 %v9600_v43, %v17080_v46 }
 0x84f   : > { %12706 = vmatmul.msk.f32.gmra.mxu0 %vm1130_vm1, %v9515_v8 }
 0x851   : > { %12762 = vmatmul.msk.f32.gmra.mxu3 %vm1130_vm1, %v10042_v35 }
 0x853   : > { %v9960_v29 = vpop.f32.mrf.mxu2 }
 0x854   : > { %v17294_v6 = vpop.f32.mrf.mxu3  ;;  %v9603_v54 = vpop.f32.mrf.mxu0 }
 0x855   : > { %17890 = vst [vmem:[#allocation14_spill] sm:$0xff] %v17294_v6  ;;  %v9786_v1 = vpop.f32.mrf.mxu1  ;;  %v9657_v23 = vadd.f32 %v9603_v54, %v17088_v53 }
 0x857   : > { %12707 = vmatmul.msk.f32.gmra.mxu0 %vm1130_vm1, %v9516_v50  ;;  %v9833_v50 = vadd.f32 %v17268_v0, %v9656_v60 }
 0x859   : > { %12763 = vmatmul.msk.f32.gmra.mxu3 %vm1130_vm1, %v10043_v31  ;;  %v10046_v31 = vld [vmem:[#allocation3 + $0xd4] sm:$0xff]  ;;  %v10010_v46 = vadd.f32 %v17280_v27, %v9833_v50 }
 0x85b   : > { %v9963_v11 = vpop.f32.mrf.mxu2 }
 0x85c   : > { %v17316_v25 = vpop.f32.mrf.mxu3  ;;  %v9606_v17 = vpop.f32.mrf.mxu0 }
 0x85d   : > { %17891 = vst [vmem:[#allocation17_spill] sm:$0xff] %v17316_v25  ;;  %v9789_v43 = vpop.f32.mrf.mxu1 }
 0x861   : > { %12764 = vmatmul.msk.f32.gmra.mxu3 %vm1130_vm1, %v17004_v22 }
 0x864   : > { %v10125_v22 = vpop.f32.mrf.mxu3  ;;  %v9609_v32 = vpop.f32.mrf.mxu0 }
 0x865   : > { %v10185_v19 = vadd.f32 %v10125_v22, %v10008_v63  ;;  %v9834_v63 = vadd.f32 %v9780_v62, %v9657_v23  ;;  %v9966_v22 = vpop.f32.mrf.mxu2  ;;  %v9792_v27 = vpop.f32.mrf.mxu1 }
 0x867   : > { %v10208_v15 = vadd.f32 %v17340_v38, %v10185_v19  ;;  %v10011_v53 = vadd.f32 %v9957_v18, %v9834_v63 }
 0x869   : > { %v10228_v21 = vmax.f32 %v10208_v15, 0.0  ;;  %12765 = vmatmul.msk.f32.gmra.mxu3 %vm1130_vm1, %v17892_v7 }
 0x86b   : > { %10248 = vst.msk [vmem:[#allocation4] sm:$0xff] %vm387_vm2, %v10228_v21  ;;  %v9658_v21 = vadd.f32 %v9606_v17, %v17097_v39 }
 0x86c   : > { %v10128_v30 = vpop.f32.mrf.mxu3  ;;  %v9612_v35 = vpop.f32.mrf.mxu0 }
 0x86d   : > { %v10186_v8 = vadd.f32 %v10128_v30, %v10009_v56  ;;  %v9835_v60 = vadd.f32 %v9783_v33, %v9658_v21  ;;  %v17362_v62 = vpop.f32.mrf.mxu2  ;;  %v17369_v33 = vpop.f32.mrf.mxu1  ;;  %v12778_v21 = vld [vmem:[%s17770_s5 + $0x40] sm:$0xff] }
 0x86e   : > { %10533 = vmatpush.msrb.mxu1 %v12778_v21 }
 0x86f   : > { %v10209_v13 = vadd.f32 %v17340_v38, %v10186_v8  ;;  %v9659_v8 = vadd.f32 %v9609_v32, %v17106_v42  ;;  %v10343_v42 = vld [vmem:[%s17770_s5] sm:$0xff] }
 0x870   : > { %10405 = vmatpush.msra.mxu3 %v10343_v42 }
 0x871   : > { %v10229_v41 = vmax.f32 %v10209_v13, 0.0  ;;  %12766 = vmatmul.msk.f32.gmra.mxu3 %vm1130_vm1, %v10046_v31  ;;  %v10012_v13 = vadd.f32 %v9960_v29, %v9835_v60  ;;  %v9836_v31 = vadd.f32 %v9786_v1, %v9659_v8  ;;  %v12772_v29 = vld [vmem:[%s17770_s5 + $0x20] sm:$0xff] }
 0x872   : > { %10447 = vmatpush.msrb.mxu2 %v12772_v29  ;;  %v10414_v29 = vld [vmem:[#allocation5 + $0x2] ss:$32 sm:$0x4] }
 0x873   : > { %10249 = vst.msk [vmem:[#allocation4 + $0x8] sm:$0xff] %vm387_vm2, %v10229_v41 }
 0x874   : > { %v10131_v49 = vpop.f32.mrf.mxu3  ;;  %v9615_v0 = vpop.f32.mrf.mxu0 }
 0x875   : > { %v10187_v58 = vadd.f32 %v10131_v49, %v10010_v46  ;;  %v12768_v49 = vld [vmem:[%s17770_s5 + $0x10] sm:$0xff]  ;;  %v9661_v8 = vadd.f32 %v9615_v0, %v17124_v12 }
 0x876   : > { %10382 = vmatpush.msra.mxu0 %v12768_v49 }
 0x877   : > { %v10210_v19 = vadd.f32 %v17340_v38, %v10187_v58  ;;  %v10013_v58 = vadd.f32 %v9963_v11, %v9836_v31  ;;  %v10412_v31 = vld [vmem:[#allocation5 + $0x2] ss:$32 sm:$0x2]  ;;  %v9838_v12 = vadd.f32 %v9792_v27, %v9661_v8 }
 0x879   : > { %v10230_v15 = vmax.f32 %v10210_v19, 0.0  ;;  %12767 = vmatmul.msk.f32.gmra.mxu3 %vm1130_vm1, %v10047_v37  ;;  %v9660_v19 = vadd.f32 %v9612_v35, %v17115_v4  ;;  %v17381_v37 = vpop.f32.mrf.mxu2  ;;  %v12776_v35 = vld [vmem:[%s17770_s5 + $0x38] sm:$0xff]  ;;  %v10015_v52 = vadd.f32 %v17362_v62, %v9838_v12  ;;  %v10339_v62 = vld [vmem:[#allocation5] ss:$32 sm:$0x40] }
 0x87a   : > { %v10268_v41 = vld [vmem:[#allocation4] ss:$2 sm:$0x1f]  ;;  %v10270_v23 = vld [vmem:[#allocation4 + $0x1] ss:$2 sm:$0x1f]  ;;  %10489 = vmatpush.msrb.mxu0 %v12776_v35 }
 0x87b   : > { %10250 = vst.msk [vmem:[#allocation4 + $0x10] sm:$0xff] %vm387_vm2, %v10230_v15  ;;  %v10271_v63 = vmax.f32 %v10268_v41, %v10270_v23  ;;  %v9837_v60 = vadd.f32 %v9789_v43, %v9660_v19  ;;  %v10329_v43 = vld [vmem:[#allocation5] ss:$32 sm:$0x2] }
 0x87c   : > { %v10134_v54 = vpop.f32.mrf.mxu3  ;;  %v17365_v50 = vpop.f32.mrf.mxu0  ;;  %v10349_v23 = vld [vmem:[#allocation5 + $0x1] ss:$32 sm:$0x4]  ;;  %v10335_v35 = vld [vmem:[#allocation5] ss:$32 sm:$0x10] }
 0x87d   : > { %v10188_v7 = vadd.f32 %v10134_v54, %v10011_v53  ;;  %v9662_v44 = vadd.f32 %v17365_v50, %v17133_v40  ;;  %v10359_v40 = vld [vmem:[#allocation5 + $0x1] ss:$32 sm:$0x80] }
 0x87f   : > { %v10211_v56 = vadd.f32 %v17340_v38, %v10188_v7 }
 0x881   : > { %v10231_v30 = vmax.f32 %v10211_v56, 0.0  ;;  %v17401_v49 = vpop.f32.mrf.mxu2 }
 0x883   : > { %10251 = vst.msk [vmem:[#allocation4 + $0x18] sm:$0xff] %vm387_vm2, %v10231_v30  ;;  %v12775_v30 = vld [vmem:[%s17770_s5 + $0x30] sm:$0xff] }
 0x884   : > { %v10137_v39 = vpop.f32.mrf.mxu3  ;;  %v17387_v53 = vpop.f32.mrf.mxu0  ;;  %10490 = vmatpush.msrb.mxu0 %v12775_v30 }
 0x885   : > { %v10189_v17 = vadd.f32 %v10137_v39, %v10012_v13  ;;  %v17398_v13 = vpop.f32.mrf.mxu1  ;;  %v10347_v39 = vld [vmem:[#allocation5 + $0x1] ss:$32 sm:$0x2] }
 0x887   : > { %v10212_v18 = vadd.f32 %v17340_v38, %v10189_v17  ;;  %v10014_v17 = vadd.f32 %v9966_v22, %v9837_v60 }
 0x889   : > { %v10232_v46 = vmax.f32 %v10212_v18, 0.0  ;;  %v10498_v18 = vld [vmem:[#allocation5 + $0x4] ss:$32 sm:$0x2] }
 0x88a   : > { %v10273_v32 = vld [vmem:[#allocation4 + $0x10] ss:$2 sm:$0x1f]  ;;  %v10275_v1 = vld [vmem:[#allocation4 + $0x11] ss:$2 sm:$0x1f] }
 0x88b   : > { %v10276_v15 = vmax.f32 %v10273_v32, %v10275_v1  ;;  %10252 = vst.msk [vmem:[#allocation4 + $0x20] sm:$0xff] %vm387_vm2, %v10232_v46  ;;  %v10331_v46 = vld [vmem:[#allocation5] ss:$32 sm:$0x4] }
 0x88c   : > { %v10140_v54 = vpop.f32.mrf.mxu3  ;;  %v10500_v32 = vld [vmem:[#allocation5 + $0x4] ss:$32 sm:$0x4]  ;;  %v10455_v1 = vld [vmem:[#allocation5 + $0x3] ss:$32 sm:$0x2]  ;;  %v17403_v0 = vpop.f32.mrf.mxu0 }
 0x88d   : > { %v10277_v11 = vmax.f32 %v10271_v63, %v10276_v15  ;;  %v10190_v7 = vadd.f32 %v10140_v54, %v10013_v58  ;;  %v10351_v63 = vld [vmem:[#allocation5 + $0x1] ss:$32 sm:$0x8]  ;;  %v10333_v15 = vld [vmem:[#allocation5] ss:$32 sm:$0x8] }
 0x88f   : > { %10279 = vst.msk [vmem:[#allocation5] sm:$0x1f] %vm10278_vm3, %v10277_v11  ;;  %v10213_v4 = vadd.f32 %v17340_v38, %v10190_v7  ;;  %v10416_v7 = vld [vmem:[#allocation5 + $0x2] ss:$32 sm:$0x8] }
 0x891   : > { %v10233_v56 = vmax.f32 %v10213_v4, 0.0  ;;  %v10353_v4 = vld [vmem:[#allocation5 + $0x1] ss:$32 sm:$0x10] }
 0x893   : > { %10253 = vst.msk [vmem:[#allocation4 + $0x28] sm:$0xff] %vm387_vm2, %v10233_v56 }
 0x894   : > { %v10143_v41 = vpop.f32.mrf.mxu3 }
 0x895   : > { %v10191_v42 = vadd.f32 %v10143_v41, %v10014_v17  ;;  %v10457_v41 = vld [vmem:[#allocation5 + $0x3] ss:$32 sm:$0x4] }
 0x896   : > { %v10346_v58 = vld [vmem:[#allocation5 + $0x1] ss:$32 sm:$0x1]  ;;  %v10328_v19 = vld [vmem:[#allocation5] ss:$32 sm:$0x1] }
 0x897   : > { %v10214_v22 = vadd.f32 %v17340_v38, %v10191_v42  ;;  %v10348_v21 = vor.u32 %v10347_v39, %v10346_v58  ;;  %v10330_v54 = vor.u32 %v10329_v43, %v10328_v19  ;;  %v10411_v11 = vld [vmem:[#allocation5 + $0x2] ss:$32 sm:$0x1]  ;;  %v10497_v60 = vld [vmem:[#allocation5 + $0x4] ss:$32 sm:$0x1] }
 0x898   : > { %v10413_v56 = vor.u32 %v10412_v31, %v10411_v11  ;;  %v10499_v30 = vor.u32 %v10498_v18, %v10497_v60  ;;  %v10454_v17 = vld [vmem:[#allocation5 + $0x3] ss:$32 sm:$0x1]  ;;  %v10355_v42 = vld [vmem:[#allocation5 + $0x1] ss:$32 sm:$0x20] }
 0x899   : > { %v10234_v27 = vmax.f32 %v10214_v22, 0.0  ;;  %v10350_v8 = vor.u32 %v10349_v23, %v10348_v21  ;;  %v10332_v25 = vor.u32 %v10331_v46, %v10330_v54  ;;  %v10456_v6 = vor.u32 %v10455_v1, %v10454_v17  ;;  %v10337_v39 = vld [vmem:[#allocation5] ss:$32 sm:$0x20]  ;;  %v17410_v21 = vpop.f32.mrf.mxu1 }
 0x89a   : > { %v10415_v43 = vor.u32 %v10414_v29, %v10413_v56  ;;  %v10501_v58 = vor.u32 %v10500_v32, %v10499_v30  ;;  %v10504_v19 = vld [vmem:[#allocation5 + $0x4] ss:$32 sm:$0x10]  ;;  %v10420_v22 = vld [vmem:[#allocation5 + $0x2] ss:$32 sm:$0x20] }
 0x89b   : > { %10254 = vst.msk [vmem:[#allocation4 + $0x30] sm:$0xff] %vm387_vm2, %v10234_v27  ;;  %v10352_v31 = vor.u32 %v10351_v63, %v10350_v8  ;;  %v10334_v18 = vor.u32 %v10333_v15, %v10332_v25  ;;  %v10458_v23 = vor.u32 %v10457_v41, %v10456_v6  ;;  %v10459_v46 = vld [vmem:[#allocation5 + $0x3] ss:$32 sm:$0x8]  ;;  %v9839_v6 = vadd.f32 %v17369_v33, %v9662_v44  ;;  %v17413_v15 = vpop.f32.mrf.mxu2 }
 0x89c   : > { %v10146_v1 = vpop.f32.mrf.mxu3  ;;  %v10357_v54 = vld [vmem:[#allocation5 + $0x1] ss:$32 sm:$0x40]  ;;  %v10417_v12 = vor.u32 %v10416_v7, %v10415_v43  ;;  %v10503_v11 = vor.u32 %v10502_v34, %v10501_v58  ;;  %v10506_v56 = vld [vmem:[#allocation5 + $0x4] ss:$32 sm:$0x20]  ;;  %v9663_v44 = vadd.f32 %v17387_v53, %v17142_v28 }
 0x89d   : > { %v10192_v29 = vadd.f32 %v10146_v1, %v10015_v52  ;;  %v10354_v32 = vor.u32 %v10353_v4, %v10352_v31  ;;  %v10336_v60 = vor.u32 %v10335_v35, %v10334_v18  ;;  %v10461_v30 = vld [vmem:[#allocation5 + $0x3] ss:$32 sm:$0x10]  ;;  %v10422_v17 = vld [vmem:[#allocation5 + $0x2] ss:$32 sm:$0x40]  ;;  %v10460_v25 = vor.u32 %v10459_v46, %v10458_v23  ;;  %v17416_v52 = vpop.f32.mrf.mxu0 }
 0x89e   : > { %v10419_v50 = vor.u32 %v10418_v61, %v10417_v12  ;;  %v10505_v63 = vor.u32 %v10504_v19, %v10503_v11  ;;  %v10341_v7 = vld [vmem:[#allocation5] ss:$32 sm:$0x80]  ;;  %v10508_v34 = vld [vmem:[#allocation5 + $0x4] ss:$32 sm:$0x40]  ;;  %v9840_v28 = vadd.f32 %v17398_v13, %v9663_v44 }
 0x89f   : > { %v10215_v41 = vadd.f32 %v17340_v38, %v10192_v29  ;;  %v10356_v27 = vor.u32 %v10355_v42, %v10354_v32  ;;  %v10338_v8 = vor.u32 %v10337_v39, %v10336_v60  ;;  %v10424_v35 = vld [vmem:[#allocation5 + $0x2] ss:$32 sm:$0x80]  ;;  %v10462_v58 = vor.u32 %v10461_v30, %v10460_v25  ;;  %v10463_v61 = vld [vmem:[#allocation5 + $0x3] ss:$32 sm:$0x20] }
 0x8a0   : > { %v10421_v4 = vor.u32 %v10420_v22, %v10419_v50  ;;  %v10507_v43 = vor.u32 %v10506_v56, %v10505_v63  ;;  %v10510_v23 = vld [vmem:[#allocation5 + $0x4] ss:$32 sm:$0x80]  ;;  %v10016_v42 = vadd.f32 %v17381_v37, %v9839_v6  ;;  %v10465_v32 = vld [vmem:[#allocation5 + $0x3] ss:$32 sm:$0x40] }
 0x8a1   : > { %v10235_v31 = vmax.f32 %v10215_v41, 0.0  ;;  %v10358_v19 = vor.u32 %v10357_v54, %v10356_v27  ;;  %v10340_v18 = vor.u32 %v10339_v62, %v10338_v8  ;;  %v10464_v22 = vor.u32 %v10463_v61, %v10462_v58  ;;  %v17425_v53 = vpop.f32.mrf.mxu1  ;;  %v10467_v37 = vld [vmem:[#allocation5 + $0x3] ss:$32 sm:$0x80]  ;;  %v12782_v56 = vld [vmem:[%s17770_s5 + $0x58] sm:$0xff]  ;;  %v12781_v25 = vld [vmem:[%s17770_s5 + $0x50] sm:$0xff] }
 0x8a2   : > { %v10423_v33 = vor.u32 %v10422_v17, %v10421_v4  ;;  %v10509_v46 = vor.u32 %v10508_v34, %v10507_v43  ;;  %v12785_v30 = vld [vmem:[%s17770_s5 + $0x68] sm:$0xff]  ;;  %v12788_v13 = vld [vmem:[%s17770_s5 + $0x78] sm:$0xff]  ;;  %10575 = vmatpush.msra.mxu2 %v12782_v56  ;;  %v12784_v6 = vld [vmem:[%s17770_s5 + $0x60] sm:$0xff]  ;;  %v9664_v27 = vadd.f32 %v17403_v0, %v17155_v24  ;;  %v10017_v4 = vadd.f32 %v17401_v49, %v9840_v28 }
 0x8a3   : > { %10255 = vst.msk [vmem:[#allocation4 + $0x38] sm:$0xff] %vm387_vm2, %v10235_v31  ;;  %v10360_v39 = vor.u32 %v10359_v40, %v10358_v19  ;;  %v10342_v1 = vor.u32 %v10341_v7, %v10340_v18  ;;  %v10466_v62 = vor.u32 %v10465_v32, %v10464_v22  ;;  %v10281_v40 = vld [vmem:[#allocation4 + $0x20] ss:$2 sm:$0x1f]  ;;  %v17439_v17 = vpop.f32.mrf.mxu2  ;;  %10661 = vmatpush.msra.mxu1 %v12788_v13  ;;  %v12794_v18 = vld [vmem:[%s17770_s5 + $0x98] sm:$0xff] }
 0x8a4   : > { %v10149_v12 = vpop.f32.mrf.mxu3  ;;  %v10425_v11 = vor.u32 %v10424_v35, %v10423_v33  ;;  %v10511_v29 = vor.u32 %v10510_v23, %v10509_v46  ;;  %v10283_v50 = vld [vmem:[#allocation4 + $0x21] ss:$2 sm:$0x1f]  ;;  %10576 = vmatpush.msra.mxu2 %v12781_v25  ;;  %v9841_v24 = vadd.f32 %v17410_v21, %v9664_v27  ;;  %v12790_v21 = vld [vmem:[%s17770_s5 + $0x80] sm:$0xff] }
 0x8a5   : > { %v10193_v60 = vadd.f32 %v10149_v12, %v10016_v42  ;;  %12770 = vmatmul.msk.f32.vlgmr.msra.gmra.mxu0 %vm387_vm2, %v10360_v39  ;;  %12771 = vmatmul.msk.f32.vlgmr.msra.gmra.mxu3 %vm387_vm2, %v10342_v1  ;;  %v12787_v41 = vld [vmem:[%s17770_s5 + $0x70] sm:$0xff]  ;;  %v17452_v34 = vpop.f32.mrf.mxu0  ;;  %v10284_v35 = vmax.f32 %v10281_v40, %v10283_v50  ;;  %v10468_v58 = vor.u32 %v10467_v37, %v10466_v62  ;;  %v12791_v49 = vld [vmem:[%s17770_s5 + $0x88] sm:$0xff] }
 0x8a6   : > { %12774 = vmatmul.msk.f32.vlgmr.msrb.gmra.mxu2 %vm387_vm2, %v10425_v11  ;;  %12780 = vmatmul.msk.f32.vlgmr.msrb.gmra.mxu1 %vm387_vm2, %v10511_v29  ;;  %v12793_v33 = vld [vmem:[%s17770_s5 + $0x90] sm:$0xff]  ;;  %v10541_v46 = vld [vmem:[#allocation5 + $0x5] ss:$32 sm:$0x2]  ;;  %v9665_v1 = vadd.f32 %v17416_v52, %v17170_v14  ;;  %v10018_v22 = vadd.f32 %v17413_v15, %v9841_v24 }
 0x8a7   : > { %v10216_v54 = vadd.f32 %v17340_v38, %v10193_v60  ;;  %10618 = vmatpush.msra.mxu0 %v12785_v30  ;;  %10662 = vmatpush.msra.mxu1 %v12787_v41  ;;  %v10584_v42 = vld [vmem:[#allocation5 + $0x6] ss:$32 sm:$0x2]  ;;  %v10627_v12 = vld [vmem:[#allocation5 + $0x7] ss:$32 sm:$0x2] }
 0x8a8   : > { %10704 = vmatpush.msrb.mxu2 %v12791_v49  ;;  %v10670_v11 = vld [vmem:[#allocation5 + $0x8] ss:$32 sm:$0x2]  ;;  %v10543_v60 = vld [vmem:[#allocation5 + $0x5] ss:$32 sm:$0x4]  ;;  %v9842_v14 = vadd.f32 %v17425_v53, %v9665_v1  ;;  %v9666_v49 = vadd.f32 %v17452_v34, %v17182_v26 }
 0x8a9   : > { %v10236_v63 = vmax.f32 %v10216_v54, 0.0  ;;  %10619 = vmatpush.msra.mxu0 %v12784_v6  ;;  %v17466_v23 = vpop.f32.mrf.mxu1  ;;  %v10586_v28 = vld [vmem:[#allocation5 + $0x6] ss:$32 sm:$0x4] }
 0x8aa   : > { %v10286_v8 = vld [vmem:[#allocation4 + $0x30] ss:$2 sm:$0x1f]  ;;  %v10288_v7 = vld [vmem:[#allocation4 + $0x31] ss:$2 sm:$0x1f]  ;;  %10705 = vmatpush.msrb.mxu2 %v12790_v21 }
 0x8ab   : > { %v10289_v43 = vmax.f32 %v10286_v8, %v10288_v7  ;;  %10256 = vst.msk [vmem:[#allocation4 + $0x40] sm:$0xff] %vm387_vm2, %v10236_v63  ;;  %v17474_v39 = vpop.f32.mrf.mxu2  ;;  %v10629_v54 = vld [vmem:[#allocation5 + $0x7] ss:$32 sm:$0x4] }
 0x8ac   : > { %v10152_v61 = vpop.f32.mrf.mxu3  ;;  %v10672_v62 = vld [vmem:[#allocation5 + $0x8] ss:$32 sm:$0x4]  ;;  %v10713_v56 = vld [vmem:[#allocation5 + $0x9] ss:$32 sm:$0x2] }
 0x8ad   : > { %v10290_v31 = vmax.f32 %v10284_v35, %v10289_v43  ;;  %v10194_v19 = vadd.f32 %v10152_v61, %v10017_v4  ;;  %12777 = vmatmul.msk.f32.vlgmr.msrb.gmra.mxu0 %vm387_vm2, %v10468_v58  ;;  %v17480_v29 = vpop.f32.mrf.mxu0  ;;  %v10545_v13 = vld [vmem:[#allocation5 + $0x5] ss:$32 sm:$0x8]  ;;  %v10588_v50 = vld [vmem:[#allocation5 + $0x6] ss:$32 sm:$0x8] }
 0x8ae   : > { %10747 = vmatpush.msrb.mxu0 %v12794_v18  ;;  %v10631_v6 = vld [vmem:[#allocation5 + $0x7] ss:$32 sm:$0x8]  ;;  %v10547_v27 = vld [vmem:[#allocation5 + $0x5] ss:$32 sm:$0x10] }
 0x8af   : > { %10291 = vst.msk [vmem:[#allocation5 + $0x5] sm:$0x1f] %vm10278_vm3, %v10290_v31  ;;  %v10217_v0 = vadd.f32 %v17340_v38, %v10194_v19  ;;  %v10590_v8 = vld [vmem:[#allocation5 + $0x6] ss:$32 sm:$0x10] }
 0x8b0   : > { %10748 = vmatpush.msrb.mxu0 %v12793_v33  ;;  %v10715_v43 = vld [vmem:[#allocation5 + $0x9] ss:$32 sm:$0x4]  ;;  %v10633_v19 = vld [vmem:[#allocation5 + $0x7] ss:$32 sm:$0x10] }
 0x8b1   : > { %v10237_v44 = vmax.f32 %v10217_v0, 0.0  ;;  %v10674_v24 = vld [vmem:[#allocation5 + $0x8] ss:$32 sm:$0x8]  ;;  %v9810_v53 = vpop.f32.mrf.mxu1 }
 0x8b2   : > { %v10549_v18 = vld [vmem:[#allocation5 + $0x5] ss:$32 sm:$0x20] }
 0x8b3   : > { %10257 = vst.msk [vmem:[#allocation4 + $0x48] sm:$0xff] %vm387_vm2, %v10237_v44  ;;  %v10592_v44 = vld [vmem:[#allocation5 + $0x6] ss:$32 sm:$0x20] }
 0x8b4   : > { %v10155_v32 = vpop.f32.mrf.mxu3 }
 0x8b5   : > { %v10195_v37 = vadd.f32 %v10155_v32, %v10018_v22 }
 0x8b6   : > { %v10540_v30 = vld [vmem:[#allocation5 + $0x5] ss:$32 sm:$0x1]  ;;  %v10583_v40 = vld [vmem:[#allocation5 + $0x6] ss:$32 sm:$0x1] }
 0x8b7   : > { %v10218_v52 = vadd.f32 %v17340_v38, %v10195_v37  ;;  %v10542_v15 = vor.u32 %v10541_v46, %v10540_v30  ;;  %v10585_v63 = vor.u32 %v10584_v42, %v10583_v40  ;;  %v10626_v25 = vld [vmem:[#allocation5 + $0x7] ss:$32 sm:$0x1]  ;;  %v10669_v41 = vld [vmem:[#allocation5 + $0x8] ss:$32 sm:$0x1]  ;;  %v10019_v46 = vadd.f32 %v17439_v17, %v9842_v14 }
 0x8b8   : > { %v10628_v7 = vor.u32 %v10627_v12, %v10626_v25  ;;  %v10671_v4 = vor.u32 %v10670_v11, %v10669_v41  ;;  %v10712_v35 = vld [vmem:[#allocation5 + $0x9] ss:$32 sm:$0x1]  ;;  %v10676_v37 = vld [vmem:[#allocation5 + $0x8] ss:$32 sm:$0x10]  ;;  %v9843_v40 = vadd.f32 %v17466_v23, %v9666_v49 }
 0x8b9   : > { %v10238_v58 = vmax.f32 %v10218_v52, 0.0  ;;  %v10544_v61 = vor.u32 %v10543_v60, %v10542_v15  ;;  %v10587_v31 = vor.u32 %v10586_v28, %v10585_v63  ;;  %v10714_v0 = vor.u32 %v10713_v56, %v10712_v35  ;;  %v10717_v12 = vld [vmem:[#allocation5 + $0x9] ss:$32 sm:$0x8]  ;;  %v17488_v56 = vpop.f32.mrf.mxu2  ;;  %v9636_v52 = vpop.f32.mrf.mxu0 }
 0x8ba   : > { %v10630_v21 = vor.u32 %v10629_v54, %v10628_v7  ;;  %v10673_v33 = vor.u32 %v10672_v62, %v10671_v4  ;;  %v10635_v60 = vld [vmem:[#allocation5 + $0x7] ss:$32 sm:$0x20]  ;;  %v10551_v30 = vld [vmem:[#allocation5 + $0x5] ss:$32 sm:$0x40] }
 0x8bb   : > { %10258 = vst.msk [vmem:[#allocation4 + $0x50] sm:$0xff] %vm387_vm2, %v10238_v58  ;;  %v10546_v42 = vor.u32 %v10545_v13, %v10544_v61  ;;  %v10589_v1 = vor.u32 %v10588_v50, %v10587_v31  ;;  %v10716_v22 = vor.u32 %v10715_v43, %v10714_v0  ;;  %v10719_v62 = vld [vmem:[#allocation5 + $0x9] ss:$32 sm:$0x10]  ;;  %v9667_v31 = vadd.f32 %v17480_v29, %v17196_v45 }
 0x8bc   : > { %v10158_v11 = vpop.f32.mrf.mxu3  ;;  %v10632_v32 = vor.u32 %v10631_v6, %v10630_v21  ;;  %v10675_v28 = vor.u32 %v10674_v24, %v10673_v33  ;;  %v10553_v17 = vld [vmem:[#allocation5 + $0x5] ss:$32 sm:$0x80]  ;;  %v10594_v13 = vld [vmem:[#allocation5 + $0x6] ss:$32 sm:$0x40]  ;;  %v9813_v21 = vpop.f32.mrf.mxu1 }
 0x8bd   : > { %v10196_v26 = vadd.f32 %v10158_v11, %v10019_v46  ;;  %v10548_v34 = vor.u32 %v10547_v27, %v10546_v42  ;;  %v10591_v54 = vor.u32 %v10590_v8, %v10589_v1  ;;  %v10718_v14 = vor.u32 %v10717_v12, %v10716_v22  ;;  %v10596_v6 = vld [vmem:[#allocation5 + $0x6] ss:$32 sm:$0x80]  ;;  %v10637_v41 = vld [vmem:[#allocation5 + $0x7] ss:$32 sm:$0x40] }
 0x8be   : > { %v10634_v50 = vor.u32 %v10633_v19, %v10632_v32  ;;  %v10677_v7 = vor.u32 %v10676_v37, %v10675_v28  ;;  %v10678_v35 = vld [vmem:[#allocation5 + $0x8] ss:$32 sm:$0x20]  ;;  %v10721_v43 = vld [vmem:[#allocation5 + $0x9] ss:$32 sm:$0x20]  ;;  %v10020_v19 = vadd.f32 %v17474_v39, %v9843_v40  ;;  %v9844_v45 = vadd.f32 %v9810_v53, %v9667_v31 }
 0x8bf   : > { %v10219_v15 = vadd.f32 %v17340_v38, %v10196_v26  ;;  %v10550_v63 = vor.u32 %v10549_v18, %v10548_v34  ;;  %v10593_v25 = vor.u32 %v10592_v44, %v10591_v54  ;;  %v10720_v27 = vor.u32 %v10719_v62, %v10718_v14  ;;  %v10639_v23 = vld [vmem:[#allocation5 + $0x7] ss:$32 sm:$0x80]  ;;  %v10680_v42 = vld [vmem:[#allocation5 + $0x8] ss:$32 sm:$0x40] }
 0x8c0   : > { %v10636_v4 = vor.u32 %v10635_v60, %v10634_v50  ;;  %v10679_v18 = vor.u32 %v10678_v35, %v10677_v7  ;;  %v10723_v1 = vld [vmem:[#allocation5 + $0x9] ss:$32 sm:$0x40]  ;;  %v10293_v29 = vld [vmem:[#allocation4 + $0x40] ss:$2 sm:$0x1f]  ;;  %v9668_v50 = vadd.f32 %v9636_v52, %v17209_v36 }
 0x8c1   : > { %v10239_v8 = vmax.f32 %v10219_v15, 0.0  ;;  %v10552_v58 = vor.u32 %v10551_v30, %v10550_v63  ;;  %v10595_v61 = vor.u32 %v10594_v13, %v10593_v25  ;;  %v10722_v44 = vor.u32 %v10721_v43, %v10720_v27  ;;  %v10295_v39 = vld [vmem:[#allocation4 + $0x41] ss:$2 sm:$0x1f]  ;;  %v9990_v12 = vpop.f32.mrf.mxu2  ;;  %v12800_v37 = vld [vmem:[%s17770_s5 + $0xb8] sm:$0xff]  ;;  %v9639_v26 = vpop.f32.mrf.mxu0  ;;  %v12796_v62 = vld [vmem:[%s17770_s5 + $0xa0] sm:$0xff] }
 0x8c2   : > { %v10638_v24 = vor.u32 %v10637_v41, %v10636_v4  ;;  %v10681_v32 = vor.u32 %v10680_v42, %v10679_v18  ;;  %v12797_v28 = vld [vmem:[%s17770_s5 + $0xa8] sm:$0xff]  ;;  %v10682_v34 = vld [vmem:[#allocation5 + $0x8] ss:$32 sm:$0x80]  ;;  %v10296_v13 = vmax.f32 %v10293_v29, %v10295_v39  ;;  %v10021_v63 = vadd.f32 %v17488_v56, %v9844_v45  ;;  %v17893_v36 = vld [vmem:[#allocation9_spill] sm:$0xff] }
 0x8c3   : > { %10259 = vst.msk [vmem:[#allocation4 + $0x58] sm:$0xff] %vm387_vm2, %v10239_v8  ;;  %v10554_v0 = vor.u32 %v10553_v17, %v10552_v58  ;;  %v10597_v49 = vor.u32 %v10596_v6, %v10595_v61  ;;  %v10724_v60 = vor.u32 %v10723_v1, %v10722_v44  ;;  %v12803_v53 = vld [vmem:[%s17770_s5 + $0xc8] sm:$0xff]  ;;  %v10725_v30 = vld [vmem:[#allocation5 + $0x9] ss:$32 sm:$0x80]  ;;  %10790 = vmatpush.msrb.mxu1 %v12797_v28  ;;  %v12802_v17 = vld [vmem:[%s17770_s5 + $0xc0] sm:$0xff] }
 0x8c4   : > { %v10161_v33 = vpop.f32.mrf.mxu3  ;;  %v10640_v46 = vor.u32 %v10639_v23, %v10638_v24  ;;  %v12799_v40 = vld [vmem:[%s17770_s5 + $0xb0] sm:$0xff]  ;;  %v10683_v6 = vor.u32 %v10682_v34, %v10681_v32  ;;  %v8956_v52 = vadd.f32 %v17166_v57, %v17893_v36  ;;  %v9816_v27 = vpop.f32.mrf.mxu1  ;;  %v9845_v56 = vadd.f32 %v9813_v21, %v9668_v50  ;;  %v12806_v8 = vld [vmem:[%s17770_s5 + $0xd8] sm:$0xff]  ;;  %v12809_v58 = vld [vmem:[%s17770_s5 + $0xe8] sm:$0xff] }
 0x8c5   : > { %v10197_v22 = vadd.f32 %v10161_v33, %v10020_v19  ;;  %12783 = vmatmul.msk.f32.vlgmr.msra.gmra.mxu2 %vm387_vm2, %v10554_v0  ;;  %12786 = vmatmul.msk.f32.vlgmr.msra.gmra.mxu0 %vm387_vm2, %v10597_v49  ;;  %v10726_v41 = vor.u32 %v10725_v30, %v10724_v60  ;;  %v12805_v57 = vld [vmem:[%s17770_s5 + $0xd0] sm:$0xff]  ;;  %v12808_v31 = vld [vmem:[%s17770_s5 + $0xe0] sm:$0xff]  ;;  %v9669_v18 = vadd.f32 %v9639_v26, %v17233_v5 }
 0x8c6   : > { %12789 = vmatmul.msk.f32.vlgmr.msra.gmra.mxu1 %vm387_vm2, %v10640_v46  ;;  %10833 = vmatpush.msra.mxu2 %v12800_v37  ;;  %v9133_v19 = vadd.f32 %v17145_v55, %v8956_v52  ;;  %v10756_v0 = vld [vmem:[#allocation5 + $0xa] ss:$32 sm:$0x2]  ;;  %v10799_v49 = vld [vmem:[#allocation5 + $0xb] ss:$32 sm:$0x2]  ;;  %v10022_v44 = vadd.f32 %v9990_v12, %v9845_v56 }
 0x8c7   : > { %v10220_v11 = vadd.f32 %v17340_v38, %v10197_v22  ;;  %10876 = vmatpush.msra.mxu0 %v12803_v53  ;;  %10791 = vmatpush.msrb.mxu1 %v12796_v62  ;;  %v10842_v21 = vld [vmem:[#allocation5 + $0xc] ss:$32 sm:$0x2]  ;;  %v10885_v33 = vld [vmem:[#allocation5 + $0xd] ss:$32 sm:$0x2]  ;;  %v9846_v53 = vadd.f32 %v9816_v27, %v9669_v18 }
 0x8c8   : > { %10834 = vmatpush.msra.mxu2 %v12799_v40  ;;  %v17894_v46 = vld [vmem:[#allocation25_spill] sm:$0xff]  ;;  %v10758_v22 = vld [vmem:[#allocation5 + $0xa] ss:$32 sm:$0x4]  ;;  %v9310_v32 = vadd.f32 %v17153_v47, %v9133_v19 }
 0x8c9   : > { %v10240_v54 = vmax.f32 %v10220_v11, 0.0  ;;  %10877 = vmatpush.msra.mxu0 %v12802_v17  ;;  %10919 = vmatpush.msra.mxu1 %v12806_v8  ;;  %v9993_v61 = vpop.f32.mrf.mxu2  ;;  %v9642_v24 = vpop.f32.mrf.mxu0  ;;  %v8957_v42 = vadd.f32 %v17180_v59, %v17894_v46  ;;  %v10801_v45 = vld [vmem:[#allocation5 + $0xb] ss:$32 sm:$0x4] }
 0x8ca   : > { %v10298_v14 = vld [vmem:[#allocation4 + $0x50] ss:$2 sm:$0x1f]  ;;  %v10300_v15 = vld [vmem:[#allocation4 + $0x51] ss:$2 sm:$0x1f]  ;;  %v9493_v40 = vadd.f32 %v17245_v2, %v9310_v32  ;;  %v10023_v2 = vadd.f32 %v9993_v61, %v9846_v53  ;;  %v8958_v61 = vadd.f32 %v17192_v16, %v17041_v10 }
 0x8cb   : > { %v10301_v25 = vmax.f32 %v10298_v14, %v10300_v15  ;;  %10260 = vst.msk [vmem:[#allocation4 + $0x60] sm:$0xff] %vm387_vm2, %v10240_v54  ;;  %10920 = vmatpush.msra.mxu1 %v12805_v57  ;;  %v10844_v55 = vld [vmem:[#allocation5 + $0xc] ss:$32 sm:$0x4]  ;;  %v9134_v62 = vadd.f32 %v17162_v51, %v8957_v42 }
 0x8cc   : > { %v10164_v7 = vpop.f32.mrf.mxu3  ;;  %v10887_v39 = vld [vmem:[#allocation5 + $0xd] ss:$32 sm:$0x4]  ;;  %v10928_v11 = vld [vmem:[#allocation5 + $0xe] ss:$32 sm:$0x2]  ;;  %v9819_v17 = vpop.f32.mrf.mxu1  ;;  %v9670_v36 = vadd.f32 %v9642_v24, %v9493_v40 }
 0x8cd   : > { %v10302_v4 = vmax.f32 %v10296_v13, %v10301_v25  ;;  %v10198_v35 = vadd.f32 %v10164_v7, %v10021_v63  ;;  %12792 = vmatmul.msk.f32.vlgmr.msrb.gmra.mxu2 %vm387_vm2, %v10683_v6  ;;  %12795 = vmatmul.msk.f32.vlgmr.msrb.gmra.mxu0 %vm387_vm2, %v10726_v41  ;;  %v10760_v28 = vld [vmem:[#allocation5 + $0xa] ss:$32 sm:$0x8]  ;;  %v10803_v37 = vld [vmem:[#allocation5 + $0xb] ss:$32 sm:$0x8] }
 0x8ce   : > { %10962 = vmatpush.msrb.mxu2 %v12809_v58  ;;  %v10846_v59 = vld [vmem:[#allocation5 + $0xc] ss:$32 sm:$0x8]  ;;  %v10762_v13 = vld [vmem:[#allocation5 + $0xa] ss:$32 sm:$0x10] }
 0x8cf   : > { %10303 = vst.msk [vmem:[#allocation5 + $0xa] sm:$0x1f] %vm10278_vm3, %v10302_v4  ;;  %v10221_v43 = vadd.f32 %v17340_v38, %v10198_v35  ;;  %v10805_v50 = vld [vmem:[#allocation5 + $0xb] ss:$32 sm:$0x10] }
 0x8d0   : > { %10963 = vmatpush.msrb.mxu2 %v12808_v31  ;;  %v10930_v63 = vld [vmem:[#allocation5 + $0xe] ss:$32 sm:$0x4]  ;;  %v10848_v7 = vld [vmem:[#allocation5 + $0xc] ss:$32 sm:$0x10]  ;;  %v9311_v31 = vadd.f32 %v17168_v9, %v9134_v62 }
 0x8d1   : > { %v10241_v23 = vmax.f32 %v10221_v43, 0.0  ;;  %v10889_v4 = vld [vmem:[#allocation5 + $0xd] ss:$32 sm:$0x8]  ;;  %v9996_v43 = vpop.f32.mrf.mxu2  ;;  %v9645_v19 = vpop.f32.mrf.mxu0 }
 0x8d2   : > { %v10764_v52 = vld [vmem:[#allocation5 + $0xa] ss:$32 sm:$0x20]  ;;  %v10932_v51 = vld [vmem:[#allocation5 + $0xe] ss:$32 sm:$0x8]  ;;  %v9494_v53 = vadd.f32 %v17272_v48, %v9311_v31 }
 0x8d3   : > { %10261 = vst.msk [vmem:[#allocation4 + $0x68] sm:$0xff] %vm387_vm2, %v10241_v23  ;;  %v10891_v23 = vld [vmem:[#allocation5 + $0xd] ss:$32 sm:$0x10]  ;;  %v17897_v31 = vld [vmem:[#allocation14_spill] sm:$0xff] }
 0x8d4   : > { %v10167_v1 = vpop.f32.mrf.mxu3  ;;  %v10934_v24 = vld [vmem:[#allocation5 + $0xe] ss:$32 sm:$0x10]  ;;  %v10766_v46 = vld [vmem:[#allocation5 + $0xa] ss:$32 sm:$0x40]  ;;  %v9822_v62 = vpop.f32.mrf.mxu1  ;;  %v9671_v40 = vadd.f32 %v9645_v19, %v9494_v53 }
 0x8d5   : > { %v10199_v29 = vadd.f32 %v10167_v1, %v10022_v44  ;;  %v10850_v1 = vld [vmem:[#allocation5 + $0xc] ss:$32 sm:$0x20]  ;;  %v17597_v53 = vld [vmem:[%s17769_s4] ss:$0 sm:$0xff] }
 0x8d6   : > { %v10755_v60 = vld [vmem:[#allocation5 + $0xa] ss:$32 sm:$0x1]  ;;  %v10798_v5 = vld [vmem:[#allocation5 + $0xb] ss:$32 sm:$0x1] }
 0x8d7   : > { %v10222_v12 = vadd.f32 %v17340_v38, %v10199_v29  ;;  %v10757_v26 = vor.u32 %v10756_v0, %v10755_v60  ;;  %v10800_v34 = vor.u32 %v10799_v49, %v10798_v5  ;;  %v10841_v30 = vld [vmem:[#allocation5 + $0xc] ss:$32 sm:$0x1]  ;;  %v10884_v54 = vld [vmem:[#allocation5 + $0xd] ss:$32 sm:$0x1] }
 0x8d8   : > { %v10843_v47 = vor.u32 %v10842_v21, %v10841_v30  ;;  %v10886_v14 = vor.u32 %v10885_v33, %v10884_v54  ;;  %v10927_v15 = vld [vmem:[#allocation5 + $0xe] ss:$32 sm:$0x1]  ;;  %v10807_v49 = vld [vmem:[#allocation5 + $0xb] ss:$32 sm:$0x20]  ;;  %v9135_v54 = vadd.f32 %v17178_v20, %v8958_v61 }
 0x8d9   : > { %v10242_v25 = vmax.f32 %v10222_v12, 0.0  ;;  %v10759_v6 = vor.u32 %v10758_v22, %v10757_v26  ;;  %v10802_v41 = vor.u32 %v10801_v45, %v10800_v34  ;;  %v10929_v35 = vor.u32 %v10928_v11, %v10927_v15  ;;  %v10768_v29 = vld [vmem:[#allocation5 + $0xa] ss:$32 sm:$0x80]  ;;  %v17896_v20 = vld [vmem:[#allocation10_spill] sm:$0xff] }
 0x8da   : > { %v10845_v27 = vor.u32 %v10844_v55, %v10843_v47  ;;  %v10888_v56 = vor.u32 %v10887_v39, %v10886_v14  ;;  %v9847_v45 = vadd.f32 %v9819_v17, %v9670_v36  ;;  %v10809_v55 = vld [vmem:[#allocation5 + $0xb] ss:$32 sm:$0x40]  ;;  %v10852_v5 = vld [vmem:[#allocation5 + $0xc] ss:$32 sm:$0x40]  ;;  %v9999_v36 = vpop.f32.mrf.mxu2 }
 0x8db   : > { %10262 = vst.msk [vmem:[#allocation4 + $0x70] sm:$0xff] %vm387_vm2, %v10242_v25  ;;  %v10761_v8 = vor.u32 %v10760_v28, %v10759_v6  ;;  %v10804_v58 = vor.u32 %v10803_v37, %v10802_v41  ;;  %v10931_v57 = vor.u32 %v10930_v63, %v10929_v35  ;;  %v10811_v28 = vld [vmem:[#allocation5 + $0xb] ss:$32 sm:$0x80]  ;;  %v9312_v35 = vadd.f32 %v17896_v20, %v9135_v54 }
 0x8dc   : > { %v10170_v0 = vpop.f32.mrf.mxu3  ;;  %v10847_v18 = vor.u32 %v10846_v59, %v10845_v27  ;;  %v10890_v44 = vor.u32 %v10889_v4, %v10888_v56  ;;  %v10893_v26 = vld [vmem:[#allocation5 + $0xd] ss:$32 sm:$0x20]  ;;  %v10936_v34 = vld [vmem:[#allocation5 + $0xe] ss:$32 sm:$0x20]  ;;  %v10024_v17 = vadd.f32 %v9996_v43, %v9847_v45 }
 0x8dd   : > { %v10200_v21 = vadd.f32 %v10170_v0, %v10023_v2  ;;  %v10763_v33 = vor.u32 %v10762_v13, %v10761_v8  ;;  %v10806_v42 = vor.u32 %v10805_v50, %v10804_v58  ;;  %v10933_v22 = vor.u32 %v10932_v51, %v10931_v57  ;;  %v10854_v16 = vld [vmem:[#allocation5 + $0xc] ss:$32 sm:$0x80]  ;;  %v10895_v25 = vld [vmem:[#allocation5 + $0xd] ss:$32 sm:$0x40]  ;;  %v9648_v51 = vpop.f32.mrf.mxu0 }
 0x8de   : > { %v10849_v39 = vor.u32 %v10848_v7, %v10847_v18  ;;  %v10892_v9 = vor.u32 %v10891_v23, %v10890_v44  ;;  %v10938_v6 = vld [vmem:[#allocation5 + $0xe] ss:$32 sm:$0x40]  ;;  %v10305_v27 = vld [vmem:[#allocation4 + $0x60] ss:$2 sm:$0x1f]  ;;  %v9495_v19 = vadd.f32 %v17897_v31, %v9312_v35 }
 0x8df   : > { %v10223_v11 = vadd.f32 %v17340_v38, %v10200_v21  ;;  %v10765_v32 = vor.u32 %v10764_v52, %v10763_v33  ;;  %v10808_v60 = vor.u32 %v10807_v49, %v10806_v42  ;;  %v10935_v37 = vor.u32 %v10934_v24, %v10933_v22  ;;  %v17895_v41 = vld [vmem:[#allocation11_spill] sm:$0xff]  ;;  %v12815_v23 = vld [vmem:[%s17770_s5 + $0x108] sm:$0xff]  ;;  %v12818_v57 = vld [vmem:[%s17770_s5 + $0x118] sm:$0xff] }
 0x8e0   : > { %v10851_v12 = vor.u32 %v10850_v1, %v10849_v39  ;;  %v10894_v14 = vor.u32 %v10893_v26, %v10892_v9  ;;  %v8959_v7 = vadd.f32 %v17895_v41, %v17053_v3  ;;  %v9848_v52 = vadd.f32 %v9822_v62, %v9671_v40  ;;  %v10307_v56 = vld [vmem:[#allocation4 + $0x61] ss:$2 sm:$0x1f]  ;;  %v10897_v43 = vld [vmem:[#allocation5 + $0xd] ss:$32 sm:$0x80]  ;;  %11048 = vmatpush.msrb.mxu0 %v12815_v23  ;;  %v9825_v9 = vpop.f32.mrf.mxu1 }
 0x8e1   : > { %v10243_v30 = vmax.f32 %v10223_v11, 0.0  ;;  %v10767_v59 = vor.u32 %v10766_v46, %v10765_v32  ;;  %v10810_v10 = vor.u32 %v10809_v55, %v10808_v60  ;;  %v10937_v15 = vor.u32 %v10936_v34, %v10935_v37  ;;  %v12812_v3 = vld [vmem:[%s17770_s5 + $0xf8] sm:$0xff]  ;;  %v10940_v0 = vld [vmem:[#allocation5 + $0xe] ss:$32 sm:$0x80]  ;;  %v12814_v21 = vld [vmem:[%s17770_s5 + $0x100] sm:$0xff] }
 0x8e2   : > { %v10853_v13 = vor.u32 %v10852_v5, %v10851_v12  ;;  %v10896_v8 = vor.u32 %v10895_v25, %v10894_v14  ;;  %11005 = vmatpush.msrb.mxu3 %v12812_v3  ;;  %v17898_v49 = vld [vmem:[#allocation27_spill] sm:$0xff]  ;;  %v10308_v46 = vmax.f32 %v10305_v27, %v10307_v56  ;;  %v9672_v42 = vadd.f32 %v9648_v51, %v9495_v19  ;;  %v12820_v39 = vld [vmem:[%s17770_s5 + $0x120] sm:$0xff]  ;;  %v12824_v26 = vld [vmem:[%s17770_s5 + $0x138] sm:$0xff] }
 0x8e3   : > { %10263 = vst.msk [vmem:[#allocation4 + $0x78] sm:$0xff] %vm387_vm2, %v10243_v30  ;;  %v10769_v50 = vor.u32 %v10768_v29, %v10767_v59  ;;  %v10812_v47 = vor.u32 %v10811_v28, %v10810_v10  ;;  %v10939_v58 = vor.u32 %v10938_v6, %v10937_v15  ;;  %v9136_v18 = vadd.f32 %v17898_v49, %v8959_v7  ;;  %v12811_v24 = vld [vmem:[%s17770_s5 + $0xf0] sm:$0xff]  ;;  %v17899_v28 = vld [vmem:[#allocation28_spill] sm:$0xff]  ;;  %v12833_v30 = vld [vmem:[%s17770_s5 + $0x168] sm:$0xff]  ;;  %v10002_v59 = vpop.f32.mrf.mxu2 }
 0x8e4   : > { %v10173_v48 = vpop.f32.mrf.mxu3  ;;  %v10855_v63 = vor.u32 %v10854_v16, %v10853_v13  ;;  %v12817_v33 = vld [vmem:[%s17770_s5 + $0x110] sm:$0xff]  ;;  %v10025_v61 = vadd.f32 %v9999_v36, %v9848_v52  ;;  %11006 = vmatpush.msrb.mxu3 %v12811_v24  ;;  %11049 = vmatpush.msrb.mxu0 %v12814_v21  ;;  %v10898_v29 = vor.u32 %v10897_v43, %v10896_v8  ;;  %v17900_v16 = vld [vmem:[#allocation17_spill] sm:$0xff]  ;;  %v12827_v40 = vld [vmem:[%s17770_s5 + $0x148] sm:$0xff] }
 0x8e5   : > { %v10201_v4 = vadd.f32 %v10173_v48, %v10024_v17  ;;  %12798 = vmatmul.msk.f32.vlgmr.msrb.gmra.mxu1 %vm387_vm2, %v10769_v50  ;;  %12801 = vmatmul.msk.f32.vlgmr.msra.gmra.mxu2 %vm387_vm2, %v10812_v47  ;;  %v10941_v55 = vor.u32 %v10940_v0, %v10939_v58  ;;  %v9313_v5 = vadd.f32 %v17899_v28, %v9136_v18  ;;  %v12823_v34 = vld [vmem:[%s17770_s5 + $0x130] sm:$0xff]  ;;  %v9651_v10 = vpop.f32.mrf.mxu0  ;;  %v11014_v13 = vld [vmem:[#allocation5 + $0x10] ss:$32 sm:$0x2] }
 0x8e6   : > { %12804 = vmatmul.msk.f32.vlgmr.msra.gmra.mxu0 %vm387_vm2, %v10855_v63  ;;  %11091 = vmatpush.msrb.mxu1 %v12818_v57  ;;  %v9849_v37 = vadd.f32 %v9825_v9, %v9672_v42  ;;  %v10971_v17 = vld [vmem:[#allocation5 + $0xf] ss:$32 sm:$0x2]  ;;  %v11057_v14 = vld [vmem:[#allocation5 + $0x11] ss:$32 sm:$0x2] }
 0x8e7   : > { %v10224_v2 = vadd.f32 %v17340_v38, %v10201_v4  ;;  %v12821_v38 = vld [vmem:[%s17770_s5 + $0x128] sm:$0xff]  ;;  %11177 = vmatpush.msra.mxu3 %v12824_v26  ;;  %v9496_v54 = vadd.f32 %v17900_v16, %v9313_v5  ;;  %11220 = vmatpush.msra.mxu0 %v12827_v40  ;;  %v11100_v15 = vld [vmem:[#allocation5 + $0x12] ss:$32 sm:$0x2]  ;;  %v12832_v63 = vld [vmem:[%s17770_s5 + $0x160] sm:$0xff] }
 0x8e8   : > { %11134 = vmatpush.msra.mxu2 %v12821_v38  ;;  %11092 = vmatpush.msrb.mxu1 %v12817_v33  ;;  %v10026_v47 = vadd.f32 %v10002_v59, %v9849_v37  ;;  %v12830_v48 = vld [vmem:[%s17770_s5 + $0x158] sm:$0xff]  ;;  %v10973_v6 = vld [vmem:[#allocation5 + $0xf] ss:$32 sm:$0x4]  ;;  %v9828_v36 = vpop.f32.mrf.mxu1 }
 0x8e9   : > { %v10244_v44 = vmax.f32 %v10224_v2, 0.0  ;;  %11178 = vmatpush.msra.mxu3 %v12823_v34  ;;  %v9673_v50 = vadd.f32 %v9651_v10, %v9496_v54  ;;  %v11016_v41 = vld [vmem:[#allocation5 + $0x10] ss:$32 sm:$0x4] }
 0x8ea   : > { %v10310_v1 = vld [vmem:[#allocation4 + $0x70] ss:$2 sm:$0x1f]  ;;  %v10312_v22 = vld [vmem:[#allocation4 + $0x71] ss:$2 sm:$0x1f]  ;;  %11135 = vmatpush.msra.mxu2 %v12820_v39 }
 0x8eb   : > { %v10313_v45 = vmax.f32 %v10310_v1, %v10312_v22  ;;  %10264 = vst.msk [vmem:[#allocation4 + $0x80] sm:$0xff] %vm387_vm2, %v10244_v44  ;;  %v11059_v4 = vld [vmem:[#allocation5 + $0x11] ss:$32 sm:$0x4]  ;;  %v9850_v43 = vadd.f32 %v9828_v36, %v9673_v50  ;;  %v10005_v1 = vpop.f32.mrf.mxu2 }
 0x8ec   : > { %v10176_v11 = vpop.f32.mrf.mxu3  ;;  %v11102_v20 = vld [vmem:[#allocation5 + $0x12] ss:$32 sm:$0x4]  ;;  %v11143_v35 = vld [vmem:[#allocation5 + $0x13] ss:$32 sm:$0x2] }
 0x8ed   : > { %v10314_v32 = vmax.f32 %v10308_v46, %v10313_v45  ;;  %v10202_v60 = vadd.f32 %v10176_v11, %v10025_v61  ;;  %12807 = vmatmul.msk.f32.vlgmr.msra.gmra.mxu1 %vm387_vm2, %v10898_v29  ;;  %12810 = vmatmul.msk.f32.vlgmr.msrb.gmra.mxu2 %vm387_vm2, %v10941_v55  ;;  %v10975_v27 = vld [vmem:[#allocation5 + $0xf] ss:$32 sm:$0x8]  ;;  %v11018_v51 = vld [vmem:[#allocation5 + $0x10] ss:$32 sm:$0x8]  ;;  %v10027_v39 = vadd.f32 %v10005_v1, %v9850_v43 }
 0x8ee   : > { %11306 = vmatpush.msrb.mxu2 %v12833_v30  ;;  %11263 = vmatpush.msra.mxu1 %v12830_v48  ;;  %v11061_v23 = vld [vmem:[#allocation5 + $0x11] ss:$32 sm:$0x8]  ;;  %v10977_v31 = vld [vmem:[#allocation5 + $0xf] ss:$32 sm:$0x10] }
 0x8ef   : > { %10315 = vst.msk [vmem:[#allocation5 + $0xf] sm:$0x1f] %vm10278_vm3, %v10314_v32  ;;  %v10225_v12 = vadd.f32 %v17597_v53, %v10202_v60  ;;  %v11020_v19 = vld [vmem:[#allocation5 + $0x10] ss:$32 sm:$0x10]  ;;  %v12838_v1 = vld [vmem:[%s17770_s5 + $0x180] sm:$0xff] }
 0x8f0   : > { %11307 = vmatpush.msrb.mxu2 %v12832_v63  ;;  %v11145_v18 = vld [vmem:[#allocation5 + $0x13] ss:$32 sm:$0x4]  ;;  %v11063_v33 = vld [vmem:[#allocation5 + $0x11] ss:$32 sm:$0x10] }
 0x8f1   : > { %v10245_v62 = vmax.f32 %v10225_v12, 0.0  ;;  %v11104_v46 = vld [vmem:[#allocation5 + $0x12] ss:$32 sm:$0x8] }
 0x8f2   : > { %v10979_v22 = vld [vmem:[#allocation5 + $0xf] ss:$32 sm:$0x20]  ;;  %v11022_v61 = vld [vmem:[#allocation5 + $0x10] ss:$32 sm:$0x20] }
 0x8f3   : > { %10265 = vst.msk [vmem:[#allocation4 + $0x88] sm:$0xff] %vm387_vm2, %v10245_v62  ;;  %v11147_v55 = vld [vmem:[#allocation5 + $0x13] ss:$32 sm:$0x8] }
 0x8f4   : > { %v10179_v25 = vpop.f32.mrf.mxu3  ;;  %v11065_v32 = vld [vmem:[#allocation5 + $0x11] ss:$32 sm:$0x20]  ;;  %v11106_v60 = vld [vmem:[#allocation5 + $0x12] ss:$32 sm:$0x10] }
 0x8f5   : > { %v10203_v7 = vadd.f32 %v10179_v25, %v10026_v47  ;;  %v10981_v37 = vld [vmem:[#allocation5 + $0xf] ss:$32 sm:$0x40]  ;;  %v11149_v34 = vld [vmem:[#allocation5 + $0x13] ss:$32 sm:$0x10] }
 0x8f6   : > { %v10970_v52 = vld [vmem:[#allocation5 + $0xf] ss:$32 sm:$0x1]  ;;  %v11013_v56 = vld [vmem:[#allocation5 + $0x10] ss:$32 sm:$0x1] }
 0x8f7   : > { %v10226_v2 = vadd.f32 %v17597_v53, %v10203_v7  ;;  %v10972_v8 = vor.u32 %v10971_v17, %v10970_v52  ;;  %v11015_v58 = vor.u32 %v11014_v13, %v11013_v56  ;;  %v11056_v3 = vld [vmem:[#allocation5 + $0x11] ss:$32 sm:$0x1]  ;;  %v11099_v57 = vld [vmem:[#allocation5 + $0x12] ss:$32 sm:$0x1] }
 0x8f8   : > { %v11058_v0 = vor.u32 %v11057_v14, %v11056_v3  ;;  %v11101_v38 = vor.u32 %v11100_v15, %v11099_v57  ;;  %v11142_v49 = vld [vmem:[#allocation5 + $0x13] ss:$32 sm:$0x1]  ;;  %v11024_v16 = vld [vmem:[#allocation5 + $0x10] ss:$32 sm:$0x40] }
 0x8f9   : > { %v10246_v44 = vmax.f32 %v10226_v2, 0.0  ;;  %v10974_v24 = vor.u32 %v10973_v6, %v10972_v8  ;;  %v11017_v21 = vor.u32 %v11016_v41, %v11015_v58  ;;  %v11144_v42 = vor.u32 %v11143_v35, %v11142_v49  ;;  %v11108_v54 = vld [vmem:[#allocation5 + $0x12] ss:$32 sm:$0x20]  ;;  %v12826_v2 = vld [vmem:[%s17770_s5 + $0x140] sm:$0xff]  ;;  %v12829_v8 = vld [vmem:[%s17770_s5 + $0x150] sm:$0xff] }
 0x8fa   : > { %v11060_v45 = vor.u32 %v11059_v4, %v11058_v0  ;;  %v11103_v29 = vor.u32 %v11102_v20, %v11101_v38  ;;  %v10983_v40 = vld [vmem:[#allocation5 + $0xf] ss:$32 sm:$0x80]  ;;  %v11026_v17 = vld [vmem:[#allocation5 + $0x10] ss:$32 sm:$0x80]  ;;  %11221 = vmatpush.msra.mxu0 %v12826_v2  ;;  %11264 = vmatpush.msra.mxu1 %v12829_v8 }
 0x8fb   : > { %10266 = vst.msk [vmem:[#allocation4 + $0x90] sm:$0xff] %vm387_vm2, %v10246_v44  ;;  %v10976_v9 = vor.u32 %v10975_v27, %v10974_v24  ;;  %v11019_v11 = vor.u32 %v11018_v51, %v11017_v21  ;;  %v11146_v28 = vor.u32 %v11145_v18, %v11144_v42  ;;  %v11067_v48 = vld [vmem:[#allocation5 + $0x11] ss:$32 sm:$0x40] }
 0x8fc   : > { %v10182_v5 = vpop.f32.mrf.mxu3  ;;  %v11062_v12 = vor.u32 %v11061_v23, %v11060_v45  ;;  %v11105_v26 = vor.u32 %v11104_v46, %v11103_v29  ;;  %v11110_v63 = vld [vmem:[#allocation5 + $0x12] ss:$32 sm:$0x40]  ;;  %v11069_v41 = vld [vmem:[#allocation5 + $0x11] ss:$32 sm:$0x80] }
 0x8fd   : > { %v10204_v30 = vadd.f32 %v10182_v5, %v10027_v39  ;;  %v10978_v59 = vor.u32 %v10977_v31, %v10976_v9  ;;  %v11021_v10 = vor.u32 %v11020_v19, %v11019_v11  ;;  %v11148_v62 = vor.u32 %v11147_v55, %v11146_v28  ;;  %v11151_v4 = vld [vmem:[#allocation5 + $0x13] ss:$32 sm:$0x20]  ;;  %v11112_v52 = vld [vmem:[#allocation5 + $0x12] ss:$32 sm:$0x80] }
 0x8fe   : > { %v11064_v13 = vor.u32 %v11063_v33, %v11062_v12  ;;  %v11107_v50 = vor.u32 %v11106_v60, %v11105_v26  ;;  %v11153_v23 = vld [vmem:[#allocation5 + $0x13] ss:$32 sm:$0x40]  ;;  %v12835_v31 = vld [vmem:[%s17770_s5 + $0x170] sm:$0xff]  ;;  %v12839_v46 = vld [vmem:[%s17770_s5 + $0x188] sm:$0xff] }
 0x8ff   : > { %v10227_v47 = vadd.f32 %v17597_v53, %v10204_v30  ;;  %v10980_v14 = vor.u32 %v10979_v22, %v10978_v59  ;;  %v11023_v15 = vor.u32 %v11022_v61, %v11021_v10  ;;  %v11150_v25 = vor.u32 %v11149_v34, %v11148_v62  ;;  %v12836_v57 = vld [vmem:[%s17770_s5 + $0x178] sm:$0xff]  ;;  %v10317_v38 = vld [vmem:[#allocation4 + $0x80] ss:$2 sm:$0x1f] }
 0x900   : > { %v11066_v6 = vor.u32 %v11065_v32, %v11064_v13  ;;  %v11109_v7 = vor.u32 %v11108_v54, %v11107_v50  ;;  %v11155_v0 = vld [vmem:[#allocation5 + $0x13] ss:$32 sm:$0x80]  ;;  %v10319_v49 = vld [vmem:[#allocation4 + $0x81] ss:$2 sm:$0x1f] }
 0x901   : > { %v10247_v20 = vmax.f32 %v10227_v47, 0.0  ;;  %v10982_v35 = vor.u32 %v10981_v37, %v10980_v14  ;;  %v11025_v36 = vor.u32 %v11024_v16, %v11023_v15  ;;  %v11152_v53 = vor.u32 %v11151_v4, %v11150_v25  ;;  %v11186_v22 = vld [vmem:[#allocation5 + $0x14] ss:$32 sm:$0x2] }
 0x902   : > { %v11068_v27 = vor.u32 %v11067_v48, %v11066_v6  ;;  %v11111_v56 = vor.u32 %v11110_v63, %v11109_v7  ;;  %v10320_v24 = vmax.f32 %v10317_v38, %v10319_v49  ;;  %v11229_v61 = vld [vmem:[#allocation5 + $0x15] ss:$32 sm:$0x2]  ;;  %v11272_v45 = vld [vmem:[#allocation5 + $0x16] ss:$32 sm:$0x2] }
 0x903   : > { %10267 = vst.msk [vmem:[#allocation4 + $0x98] sm:$0xff] %vm387_vm2, %v10247_v20  ;;  %v10984_v51 = vor.u32 %v10983_v40, %v10982_v35  ;;  %v11027_v43 = vor.u32 %v11026_v17, %v11025_v36  ;;  %v11154_v19 = vor.u32 %v11153_v23, %v11152_v53  ;;  %v11315_v29 = vld [vmem:[#allocation5 + $0x17] ss:$32 sm:$0x2] }
 0x904   : > { %v11070_v58 = vor.u32 %v11069_v41, %v11068_v27  ;;  %v11113_v3 = vor.u32 %v11112_v52, %v11111_v56  ;;  %v11188_v55 = vld [vmem:[#allocation5 + $0x14] ss:$32 sm:$0x4]  ;;  %v11231_v39 = vld [vmem:[#allocation5 + $0x15] ss:$32 sm:$0x4] }
 0x905   : > { %12813 = vmatmul.msk.f32.vlgmr.msrb.gmra.mxu3 %vm387_vm2, %v10984_v51  ;;  %12816 = vmatmul.msk.f32.vlgmr.msrb.gmra.mxu0 %vm387_vm2, %v11027_v43  ;;  %v11156_v33 = vor.u32 %v11155_v0, %v11154_v19  ;;  %v11274_v9 = vld [vmem:[#allocation5 + $0x16] ss:$32 sm:$0x4]  ;;  %v11317_v11 = vld [vmem:[#allocation5 + $0x17] ss:$32 sm:$0x4] }
 0x906   : > { %12819 = vmatmul.msk.f32.vlgmr.msrb.gmra.mxu1 %vm387_vm2, %v11070_v58  ;;  %12822 = vmatmul.msk.f32.vlgmr.msra.gmra.mxu2 %vm387_vm2, %v11113_v3  ;;  %v11358_v32 = vld [vmem:[#allocation5 + $0x18] ss:$32 sm:$0x2]  ;;  %v11190_v28 = vld [vmem:[#allocation5 + $0x14] ss:$32 sm:$0x8] }
 0x907   : > { %11349 = vmatpush.msrb.mxu3 %v12836_v57  ;;  %11392 = vmatpush.msrb.mxu0 %v12839_v46  ;;  %v11233_v37 = vld [vmem:[#allocation5 + $0x15] ss:$32 sm:$0x8]  ;;  %v11276_v30 = vld [vmem:[#allocation5 + $0x16] ss:$32 sm:$0x8] }
 0x908   : > { %v11192_v10 = vld [vmem:[#allocation5 + $0x14] ss:$32 sm:$0x10]  ;;  %v11360_v40 = vld [vmem:[#allocation5 + $0x18] ss:$32 sm:$0x4] }
 0x909   : > { %11350 = vmatpush.msrb.mxu3 %v12835_v31  ;;  %11393 = vmatpush.msrb.mxu0 %v12838_v1  ;;  %v11235_v50 = vld [vmem:[#allocation5 + $0x15] ss:$32 sm:$0x10]  ;;  %v11319_v47 = vld [vmem:[#allocation5 + $0x17] ss:$32 sm:$0x8] }
 0x90a   : > { %v10322_v18 = vld [vmem:[#allocation4 + $0x90] ss:$2 sm:$0x1f]  ;;  %v10324_v44 = vld [vmem:[#allocation4 + $0x91] ss:$2 sm:$0x1f] }
 0x90b   : > { %v10325_v21 = vmax.f32 %v10322_v18, %v10324_v44  ;;  %v11194_v15 = vld [vmem:[#allocation5 + $0x14] ss:$32 sm:$0x20]  ;;  %v11362_v25 = vld [vmem:[#allocation5 + $0x18] ss:$32 sm:$0x8] }
 0x90c   : > { %v11278_v7 = vld [vmem:[#allocation5 + $0x16] ss:$32 sm:$0x10]  ;;  %v11321_v4 = vld [vmem:[#allocation5 + $0x17] ss:$32 sm:$0x10] }
 0x90d   : > { %v10326_v42 = vmax.f32 %v10320_v24, %v10325_v21  ;;  %12825 = vmatmul.msk.f32.vlgmr.msra.gmra.mxu3 %vm387_vm2, %v11156_v33  ;;  %v11196_v35 = vld [vmem:[#allocation5 + $0x14] ss:$32 sm:$0x40]  ;;  %v11237_v36 = vld [vmem:[#allocation5 + $0x15] ss:$32 sm:$0x20] }
 0x90e   : > { %v11364_v56 = vld [vmem:[#allocation5 + $0x18] ss:$32 sm:$0x10]  ;;  %v11280_v53 = vld [vmem:[#allocation5 + $0x16] ss:$32 sm:$0x20] }
 0x90f   : > { %10327 = vst.msk [vmem:[#allocation5 + $0x14] sm:$0x1f] %vm10278_vm3, %v10326_v42  ;;  %v11323_v2 = vld [vmem:[#allocation5 + $0x17] ss:$32 sm:$0x20] }
 0x910   : > { %v11198_v58 = vld [vmem:[#allocation5 + $0x14] ss:$32 sm:$0x80]  ;;  %v11239_v3 = vld [vmem:[#allocation5 + $0x15] ss:$32 sm:$0x40] }
 0x911   : > { %v11282_v0 = vld [vmem:[#allocation5 + $0x16] ss:$32 sm:$0x40]  ;;  %v11325_v38 = vld [vmem:[#allocation5 + $0x17] ss:$32 sm:$0x40] }
 0x912   : > { %v11241_v18 = vld [vmem:[#allocation5 + $0x15] ss:$32 sm:$0x80]  ;;  %v11366_v21 = vld [vmem:[#allocation5 + $0x18] ss:$32 sm:$0x20] }
 0x913   : > { %v11284_v42 = vld [vmem:[#allocation5 + $0x16] ss:$32 sm:$0x80]  ;;  %v11327_v1 = vld [vmem:[#allocation5 + $0x17] ss:$32 sm:$0x80] }
 0x916   : > { %v11185_v60 = vld [vmem:[#allocation5 + $0x14] ss:$32 sm:$0x1]  ;;  %v11228_v5 = vld [vmem:[#allocation5 + $0x15] ss:$32 sm:$0x1] }
 0x917   : > { %v11187_v12 = vor.u32 %v11186_v22, %v11185_v60  ;;  %v11230_v26 = vor.u32 %v11229_v61, %v11228_v5  ;;  %v11271_v34 = vld [vmem:[#allocation5 + $0x16] ss:$32 sm:$0x1]  ;;  %v11314_v59 = vld [vmem:[#allocation5 + $0x17] ss:$32 sm:$0x1] }
 0x918   : > { %v11273_v16 = vor.u32 %v11272_v45, %v11271_v34  ;;  %v11316_v54 = vor.u32 %v11315_v29, %v11314_v59  ;;  %v11357_v62 = vld [vmem:[#allocation5 + $0x18] ss:$32 sm:$0x1] }
 0x919   : > { %v11189_v17 = vor.u32 %v11188_v55, %v11187_v12  ;;  %v11232_v13 = vor.u32 %v11231_v39, %v11230_v26  ;;  %v11359_v14 = vor.u32 %v11358_v32, %v11357_v62  ;;  %v11370_v60 = vld [vmem:[#allocation5 + $0x18] ss:$32 sm:$0x80]  ;;  %v11419_v62 = vld [vmem:[%s17772_s7 + $0x70] sm:$0xff] }
 0x91a   : > { %v11275_v48 = vor.u32 %v11274_v9, %v11273_v16  ;;  %v11318_v63 = vor.u32 %v11317_v11, %v11316_v54  ;;  %v11368_v11 = vld [vmem:[#allocation5 + $0x18] ss:$32 sm:$0x40]  ;;  %v11420_v54 = vld [vmem:[%s17772_s7 + $0x78] sm:$0xff] }
 0x91b   : > { %v11191_v6 = vor.u32 %v11190_v28, %v11189_v17  ;;  %v11234_v41 = vor.u32 %v11233_v37, %v11232_v13  ;;  %v11361_v20 = vor.u32 %v11360_v40, %v11359_v14  ;;  %11425 = vmatpush.msrb.mxu1 %v11420_v54  ;;  %v11418_v17 = vld [vmem:[%s17772_s7 + $0x68] sm:$0xff]  ;;  %v11416_v14 = vld [vmem:[%s17772_s7 + $0x58] sm:$0xff] }
 0x91c   : > { %v11277_v52 = vor.u32 %v11276_v30, %v11275_v48  ;;  %v11320_v27 = vor.u32 %v11319_v47, %v11318_v63  ;;  %v11415_v63 = vld [vmem:[%s17772_s7 + $0x50] sm:$0xff]  ;;  %v11449_v54 = vld [vmem:[%s17774_s9 + $0x18] sm:$0xff] }
 0x91d   : > { %v11193_v51 = vor.u32 %v11192_v10, %v11191_v6  ;;  %v11236_v43 = vor.u32 %v11235_v50, %v11234_v41  ;;  %v11363_v8 = vor.u32 %v11362_v25, %v11361_v20  ;;  %11426 = vmatpush.msrb.mxu1 %v11419_v62  ;;  %v11417_v50 = vld [vmem:[%s17772_s7 + $0x60] sm:$0xff]  ;;  %v11414_v6 = vld [vmem:[%s17772_s7 + $0x48] sm:$0xff] }
 0x91e   : > { %v11279_v23 = vor.u32 %v11278_v7, %v11277_v52  ;;  %v11322_v57 = vor.u32 %v11321_v4, %v11320_v27  ;;  %v11413_v27 = vld [vmem:[%s17772_s7 + $0x40] sm:$0xff] }
 0x91f   : > { %v11195_v31 = vor.u32 %v11194_v15, %v11193_v51  ;;  %v11238_v19 = vor.u32 %v11237_v36, %v11236_v43  ;;  %v11365_v49 = vor.u32 %v11364_v56, %v11363_v8  ;;  %11427 = vmatpush.msrb.mxu1 %v11418_v17  ;;  %v11412_v56 = vld [vmem:[%s17772_s7 + $0x38] sm:$0xff]  ;;  %v11411_v43 = vld [vmem:[%s17772_s7 + $0x30] sm:$0xff]  ;;  %v11410_v8 = vld [vmem:[%s17772_s7 + $0x28] sm:$0xff] }
 0x920   : > { %v11281_v44 = vor.u32 %v11280_v53, %v11279_v23  ;;  %v11324_v24 = vor.u32 %v11323_v2, %v11322_v57  ;;  %v12865_v17 = vld [vmem:[%s17771_s6] ss:$0 sm:$0xff] }
 0x921   : > { %v11197_v33 = vor.u32 %v11196_v35, %v11195_v31  ;;  %v11240_v46 = vor.u32 %v11239_v3, %v11238_v19  ;;  %v11367_v55 = vor.u32 %v11366_v21, %v11365_v49  ;;  %11428 = vmatpush.msrb.mxu1 %v11417_v50  ;;  %v11409_v31 = vld [vmem:[%s17772_s7 + $0x20] sm:$0xff]  ;;  %v11407_v49 = vld [vmem:[%s17772_s7 + $0x10] sm:$0xff] }
 0x922   : > { %v11283_v22 = vor.u32 %v11282_v0, %v11281_v44  ;;  %v11326_v61 = vor.u32 %v11325_v38, %v11324_v24  ;;  %v10384_v5 = vpop.f32.mrf.mxu0  ;;  %v11408_v0 = vld [vmem:[%s17772_s7 + $0x18] sm:$0xff]  ;;  %v11460_v24 = vld [vmem:[%s17774_s9 + $0x70] sm:$0xff] }
 0x923   : > { %v11199_v45 = vor.u32 %v11198_v58, %v11197_v33  ;;  %v11242_v29 = vor.u32 %v11241_v18, %v11240_v46  ;;  %v11369_v32 = vor.u32 %v11368_v11, %v11367_v55  ;;  %v10535_v10 = vpop.f32.mrf.mxu1  ;;  %11429 = vmatpush.msrb.mxu1 %v11416_v14  ;;  %v11406_v18 = vld [vmem:[%s17772_s7 + $0x8] sm:$0xff]  ;;  %v11461_v44 = vld [vmem:[%s17774_s9 + $0x78] sm:$0xff]  ;;  %v11405_v33 = vld [vmem:[%s17772_s7] sm:$0xff] }
 0x924   : > { %v11285_v39 = vor.u32 %v11284_v42, %v11283_v22  ;;  %v11328_v9 = vor.u32 %v11327_v1, %v11326_v61  ;;  %11466 = vmatpush.msra.mxu2 %v11461_v44  ;;  %v11459_v42 = vld [vmem:[%s17774_s9 + $0x68] sm:$0xff]  ;;  %v11458_v1 = vld [vmem:[%s17774_s9 + $0x60] sm:$0xff] }
 0x925   : > { %12828 = vmatmul.msk.f32.vlgmr.msra.gmra.mxu0 %vm387_vm2, %v11199_v45  ;;  %12831 = vmatmul.msk.f32.vlgmr.msra.gmra.mxu1 %vm387_vm2, %v11242_v29  ;;  %v11371_v28 = vor.u32 %v11370_v60, %v11369_v32  ;;  %v11457_v45 = vld [vmem:[%s17774_s9 + $0x58] sm:$0xff]  ;;  %v11456_v29 = vld [vmem:[%s17774_s9 + $0x50] sm:$0xff]  ;;  %v11454_v32 = vld [vmem:[%s17774_s9 + $0x40] sm:$0xff] }
 0x926   : > { %12834 = vmatmul.msk.f32.vlgmr.msrb.gmra.mxu2 %vm387_vm2, %v11285_v39  ;;  %12837 = vmatmul.msk.f32.vlgmr.msrb.gmra.mxu3 %vm387_vm2, %v11328_v9  ;;  %v11455_v9 = vld [vmem:[%s17774_s9 + $0x48] sm:$0xff] }
 0x927   : > { %11430 = vmatpush.msrb.mxu1 %v11415_v63  ;;  %11467 = vmatpush.msra.mxu2 %v11460_v24  ;;  %v11446_v63 = vld [vmem:[%s17774_s9] sm:$0xff] }
 0x928   : > { %v10407_v37 = vpop.f32.mrf.mxu3 }
 0x929   : > { %v10408_v12 = vadd.f32 %v10407_v37, %v10384_v5  ;;  %v10449_v26 = vpop.f32.mrf.mxu2  ;;  %11431 = vmatpush.msrb.mxu1 %v11414_v6  ;;  %11468 = vmatpush.msra.mxu2 %v11459_v42  ;;  %v11453_v5 = vld [vmem:[%s17774_s9 + $0x38] sm:$0xff] }
 0x92a   : > { %v10492_v30 = vpop.f32.mrf.mxu0 }
 0x92b   : > { %v10452_v34 = vadd.f32 %v10449_v26, %v10408_v12  ;;  %11432 = vmatpush.msrb.mxu1 %v11413_v27  ;;  %11469 = vmatpush.msra.mxu2 %v11458_v1  ;;  %v11452_v12 = vld [vmem:[%s17774_s9 + $0x30] sm:$0xff]  ;;  %v11451_v26 = vld [vmem:[%s17774_s9 + $0x28] sm:$0xff] }
 0x92d   : > { %12840 = vmatmul.msk.f32.vlgmr.msrb.gmra.mxu0 %vm387_vm2, %v11371_v28  ;;  %v10495_v59 = vadd.f32 %v10492_v30, %v10452_v34  ;;  %11433 = vmatpush.msrb.mxu1 %v11412_v56 }
 0x92e   : > { %11470 = vmatpush.msra.mxu2 %v11457_v45 }
 0x92f   : > { %v10538_v40 = vadd.f32 %v10535_v10, %v10495_v59  ;;  %11434 = vmatpush.msrb.mxu1 %v11411_v43  ;;  %v11450_v59 = vld [vmem:[%s17774_s9 + $0x20] sm:$0xff] }
 0x930   : > { %11471 = vmatpush.msra.mxu2 %v11456_v29 }
 0x931   : > { %11435 = vmatpush.msrb.mxu1 %v11410_v8 }
 0x932   : > { %11472 = vmatpush.msra.mxu2 %v11455_v9 }
 0x933   : > { %11436 = vmatpush.msrb.mxu1 %v11409_v31 }
 0x934   : > { %11473 = vmatpush.msra.mxu2 %v11454_v32 }
 0x935   : > { %11437 = vmatpush.msrb.mxu1 %v11408_v0 }
 0x936   : > { %11474 = vmatpush.msra.mxu2 %v11453_v5 }
 0x937   : > { %11438 = vmatpush.msrb.mxu1 %v11407_v49 }
 0x938   : > { %11475 = vmatpush.msra.mxu2 %v11452_v12 }
 0x939   : > { %11439 = vmatpush.msrb.mxu1 %v11406_v18 }
 0x93a   : > { %11476 = vmatpush.msra.mxu2 %v11451_v26 }
 0x93b   : > { %11440 = vmatpush.msrb.mxu1 %v11405_v33 }
 0x93c   : > { %11477 = vmatpush.msra.mxu2 %v11450_v59 }
 0x93e   : > { %11478 = vmatpush.msra.mxu2 %v11449_v54 }
 0x942   : > { %v10621_v47 = vpop.f32.mrf.mxu0 }
 0x943   : > { %v10664_v48 = vpop.f32.mrf.mxu1 }
 0x948   : > { %v10578_v16 = vpop.f32.mrf.mxu2 }
 0x949   : > { %v10581_v13 = vadd.f32 %v10578_v16, %v10538_v40 }
 0x94a   : > { %v10750_v4 = vpop.f32.mrf.mxu0 }
 0x94b   : > { %v10624_v15 = vadd.f32 %v10621_v47, %v10581_v13 }
 0x94d   : > { %v10667_v41 = vadd.f32 %v10664_v48, %v10624_v15  ;;  %v11448_v15 = vld [vmem:[%s17774_s9 + $0x10] sm:$0xff]  ;;  %v11447_v48 = vld [vmem:[%s17774_s9 + $0x8] sm:$0xff] }
 0x94e   : > { %11479 = vmatpush.msra.mxu2 %v11448_v15 }
 0x950   : > { %v10707_v25 = vpop.f32.mrf.mxu2  ;;  %11480 = vmatpush.msra.mxu2 %v11447_v48 }
 0x951   : > { %v10710_v7 = vadd.f32 %v10707_v25, %v10667_v41  ;;  %v12866_v25 = vld [vmem:[%s17773_s8] ss:$0 sm:$0xff] }
 0x952   : > { %11481 = vmatpush.msra.mxu2 %v11446_v63 }
 0x953   : > { %v10753_v35 = vadd.f32 %v10750_v4, %v10710_v7  ;;  %v12867_v4 = vld [vmem:[%s17775_s10] ss:$0 sm:$0xff] }
 0x962   : > { %v10793_v20 = vpop.f32.mrf.mxu1 }
 0x963   : > { %v10796_v52 = vadd.f32 %v10793_v20, %v10753_v35  ;;  %v10879_v53 = vpop.f32.mrf.mxu0 }
 0x968   : > { %v10836_v36 = vpop.f32.mrf.mxu2 }
 0x969   : > { %v10839_v51 = vadd.f32 %v10836_v36, %v10796_v52 }
 0x96a   : > { %v10922_v58 = vpop.f32.mrf.mxu1 }
 0x96b   : > { %v10882_v2 = vadd.f32 %v10879_v53, %v10839_v51 }
 0x96d   : > { %v10925_v23 = vadd.f32 %v10922_v58, %v10882_v2 }
 0x970   : > { %v10965_v3 = vpop.f32.mrf.mxu2 }
 0x971   : > { %v10968_v19 = vadd.f32 %v10965_v3, %v10925_v23 }
 0x982   : > { %v11051_v21 = vpop.f32.mrf.mxu0 }
 0x983   : > { %v11094_v22 = vpop.f32.mrf.mxu1 }
 0x988   : > { %v11008_v57 = vpop.f32.mrf.mxu3 }
 0x989   : > { %v11011_v38 = vadd.f32 %v11008_v57, %v10968_v19  ;;  %v11137_v55 = vpop.f32.mrf.mxu2 }
 0x98b   : > { %v11054_v46 = vadd.f32 %v11051_v21, %v11011_v38 }
 0x98d   : > { %v11097_v61 = vadd.f32 %v11094_v22, %v11054_v46 }
 0x98f   : > { %v11140_v39 = vadd.f32 %v11137_v55, %v11097_v61 }
 0x990   : > { %v11180_v11 = vpop.f32.mrf.mxu3 }
 0x991   : > { %v11183_v60 = vadd.f32 %v11180_v11, %v11140_v39 }
 0x9a2   : > { %v11223_v28 = vpop.f32.mrf.mxu0  ;;  %v11266_v34 = vpop.f32.mrf.mxu1 }
 0x9a3   : > { %v11226_v37 = vadd.f32 %v11223_v28, %v11183_v60 }
 0x9a5   : > { %v11269_v30 = vadd.f32 %v11266_v34, %v11226_v37 }
 0x9a9   : > { %v11309_v10 = vpop.f32.mrf.mxu2  ;;  %v11352_v62 = vpop.f32.mrf.mxu3 }
 0x9aa   : > { %v11312_v16 = vadd.f32 %v11309_v10, %v11269_v30  ;;  %v11395_v13 = vpop.f32.mrf.mxu0 }
 0x9ac   : > { %v11355_v40 = vadd.f32 %v11352_v62, %v11312_v16 }
 0x9ae   : > { %v11398_v50 = vadd.f32 %v11395_v13, %v11355_v40 }
 0x9b0   : > { %v11403_v47 = vadd.f32 %v12865_v17, %v11398_v50 }
 0x9b2   : > { %v11404_v14 = vmax.f32 %v11403_v47, 0.0 }
 0x9b4   : > { %11441 = vmatmul.f32.vlgmr.msrb.gmra.mxu1 %v11404_v14 }
 0xa31   : > { %v11442_v6 = vpop.f32.mrf.mxu1 }
 0xa32   : > { %v11443_v41 = vadd.f32 %v12866_v25, %v11442_v6 }
 0xa34   : > { %v11445_v7 = vmax.f32 %v11443_v41, 0.0 }
 0xa36   : > { %11482 = vmatmul.f32.vlgmr.msra.gmra.mxu2 %v11445_v7 }
 0xab9   : > { %v11483_v20 = vpop.f32.mrf.mxu2 }
 0xaba   : > { %v11484_v35 = vadd.f32 %v12867_v4, %v11483_v20 }
 0xabc   : > { %11486 = vst [vmem:[%s384_s15] sm:$0xff] %v11484_v35 }
 0xabd PF: > { %s21_s17 = sadd.s32 1, %s12879_s17  }
 0xabe   : > { %p18_p4 = scmp.ge.s32.totalorder %s21_s17, 4  }
 0xac0   :  { %20 = sbr.rel (!%p18_p4) target bundleno = 1 (0x1), region = 280 }

</bundles_post_ra>
